<compile_context>
chip_gen: v6e
topology: v6e:2x2x1
jax: 0.10.0
libtpu: 0.0.40
codegen_flags: <defaults>
</compile_context>

<pallas_src>
import functools

import jax
import jax.numpy as jnp
from jax import lax
from jax.experimental import pallas as pl
from jax.experimental.pallas import tpu as pltpu

INPUT_DIM = 512          # d_model
FEATURE_DIM = 256
NHEAD = 8
FF_DIM = INPUT_DIM * 4   # dim_feedforward
T_LAYERS = 3             # t_num_layers
LN_EPS = 1e-5


# --------------------------------------------------------------------------
# Fused Pallas kernel (entire forward, grid over transformer layers)
# --------------------------------------------------------------------------

def _layernorm(z, gamma, beta, eps):
    mean = jnp.mean(z, axis=-1, keepdims=True)
    zc = z - mean
    var = jnp.mean(zc * zc, axis=-1, keepdims=True)
    return zc * lax.rsqrt(var + eps) * gamma + beta


def _snn_fused_kernel(
        # siamese input projections (resident across the grid)
        x1_ref, x2_ref, w1_ref, b1_ref, w2_ref, b2_ref,
        # per-layer transformer weights (streamed: one layer per grid step)
        wqkv_ref, bqkv_ref, wo_ref, bo_ref, g1_ref, be1_ref,
        wf1_ref, bf1_ref, wf2_ref, bf2_ref, g2_ref, be2_ref,
        # encoder head + similarity head (resident)
        wtfc_ref, btfc_ref, ws1_ref, bs1_ref, ws2_ref, bs2_ref,
        # output + carried activation scratch
        o_ref, x_scr,
        *, seq, nhead, eps):
    l = pl.program_id(0)
    n_layers = pl.num_programs(0)
    M, E = x_scr.shape                 # M = 2 * seq (both branches batched)
    Dh = E // nhead
    scale = 1.0 / (Dh ** 0.5)

    # ---- grid step 0: linear1(x1) / linear2(x2) -> batched token scratch ----
    @pl.when(l == 0)
    def _init():
        h1 = jnp.dot(x1_ref[...], w1_ref[...],
                     preferred_element_type=jnp.float32) + b1_ref[...]
        h2 = jnp.dot(x2_ref[...], w2_ref[...],
                     preferred_element_type=jnp.float32) + b2_ref[...]
        x_scr[0:seq, :] = h1
        x_scr[seq:2 * seq, :] = h2

    x = x_scr[...]                      # (M, E) float32
    xb = x.astype(jnp.bfloat16)

    # ---- fused QKV projection: one lane-dense (M, E) @ (E, 3E) matmul ----
    qkv = jnp.dot(xb, wqkv_ref[0],
                  preferred_element_type=jnp.float32) + bqkv_ref[0]
    q = qkv[:, 0:E]
    k = qkv[:, E:2 * E]
    v = qkv[:, 2 * E:3 * E]

    # ---- per-branch, per-head attention (tiny S x S scores) ----
    head_outs = []
    for h in range(nhead):
        lo, hi = h * Dh, (h + 1) * Dh
        qh, kh, vh = q[:, lo:hi], k[:, lo:hi], v[:, lo:hi]
        branch_outs = []
        for b in range(2):
            r0, r1 = b * seq, (b + 1) * seq
            qs, ks, vs = qh[r0:r1], kh[r0:r1], vh[r0:r1]
            s = lax.dot_general(qs, ks, (((1,), (1,)), ((), ())),
                                preferred_element_type=jnp.float32) * scale
            m = jnp.max(s, axis=-1, keepdims=True)
            p = jnp.exp(s - m)
            p = p * pl.reciprocal(jnp.sum(p, axis=-1, keepdims=True), approx=True)
            branch_outs.append(jnp.dot(p, vs, preferred_element_type=jnp.float32))
        head_outs.append(jnp.concatenate(branch_outs, axis=0))    # (M, Dh)
    attn = jnp.concatenate(head_outs, axis=-1)                    # (M, E)

    # ---- fused out_proj: one full-K (M, E) @ (E, E) matmul ----
    proj = jnp.dot(attn.astype(jnp.bfloat16), wo_ref[0],
                   preferred_element_type=jnp.float32) + bo_ref[0]

    x = _layernorm(x + proj, g1_ref[0], be1_ref[0], eps)          # post-LN block 1

    # ---- feed-forward ----
    hmid = jnp.dot(x.astype(jnp.bfloat16), wf1_ref[0],
                   preferred_element_type=jnp.float32) + bf1_ref[0]
    hmid = jnp.maximum(hmid, 0.0)
    ff = jnp.dot(hmid.astype(jnp.bfloat16), wf2_ref[0],
                 preferred_element_type=jnp.float32) + bf2_ref[0]
    x = _layernorm(x + ff, g2_ref[0], be2_ref[0], eps)            # post-LN block 2

    x_scr[...] = x

    # ---- final grid step: t_fc projection + |f1 - f2| similarity head ----
    @pl.when(l == n_layers - 1)
    def _finalize():
        f = jnp.dot(x.astype(jnp.bfloat16), wtfc_ref[...],
                    preferred_element_type=jnp.float32) + btfc_ref[...]
        d = jnp.abs(f[0:seq, :] - f[seq:2 * seq, :])               # (S, feature_dim)
        g = jnp.dot(d, ws1_ref[...],
                    preferred_element_type=jnp.float32) + bs1_ref[...]
        g = jnp.maximum(g, 0.0)                                    # (S, 16)
        logit = jnp.sum(g * ws2_ref[...], axis=-1, keepdims=True) + bs2_ref[...]
        o_ref[...] = jax.nn.sigmoid(logit).astype(o_ref.dtype)


def snn_forward(packed, x1, x2):
    """x1: (S, input1_dim), x2: (S, input2_dim) -> (S,) similarity scores."""
    seq = x1.shape[0]
    if seq % 8 != 0:
        # TODO(synk): pad rows + mask padded keys to support unaligned seq.
        raise ValueError("seq must be a multiple of 8 for sublane-aligned branch "
                         "row splits (got %d)" % seq)
    M = 2 * seq
    E = packed["wf1"].shape[1]
    L = packed["wqkv"].shape[0]

    order = ["w1", "b1", "w2", "b2",
             "wqkv", "bqkv", "wo", "bo", "g1", "be1",
             "wf1", "bf1", "wf2", "bf2", "g2", "be2",
             "wtfc", "btfc", "ws1", "bs1", "ws2", "bs2"]
    layer_keys = {"wqkv", "bqkv", "wo", "bo", "g1", "be1",
                  "wf1", "bf1", "wf2", "bf2", "g2", "be2"}

    inputs = [x1, x2] + [packed[k] for k in order]

    def const_spec(a):            # resident: same full block every grid step
        nd = a.ndim
        return pl.BlockSpec(a.shape, lambda l, nd=nd: (0,) * nd)

    def layer_spec(a):            # streamed: leading axis indexed by the layer id
        nd = a.ndim
        return pl.BlockSpec((1,) + a.shape[1:],
                            lambda l, nd=nd: (l,) + (0,) * (nd - 1))

    in_specs = [const_spec(x1), const_spec(x2)]
    for k in order:
        a = packed[k]
        in_specs.append(layer_spec(a) if k in layer_keys else const_spec(a))

    kern = functools.partial(_snn_fused_kernel, seq=seq, nhead=NHEAD, eps=LN_EPS)

    sim = pl.pallas_call(
        kern,
        out_shape=jax.ShapeDtypeStruct((seq, 1), jnp.float32),
        grid_spec=pltpu.PrefetchScalarGridSpec(
            num_scalar_prefetch=0,
            grid=(L,),
            in_specs=in_specs,
            out_specs=pl.BlockSpec((seq, 1), lambda l: (0, 0)),
            scratch_shapes=[pltpu.VMEM((M, E), jnp.float32)]),
        compiler_params=pltpu.CompilerParams(
            dimension_semantics=("arbitrary",),        # layers are sequential
            vmem_limit_bytes=32 * 1024 * 1024),
    )(*inputs)
    return sim.reshape(-1)


# --------------------------------------------------------------------------
# Parameter init (PyTorch-style uniform bounds) and kernel-layout packing
# --------------------------------------------------------------------------

def init_linear(key, fan_in, fan_out):
    kw, kb = jax.random.split(key)
    bound = 1.0 / (fan_in ** 0.5)
    return {
        "w": jax.random.uniform(kw, (fan_in, fan_out), jnp.float32, -bound, bound),
        "b": jax.random.uniform(kb, (fan_out,), jnp.float32, -bound, bound),
    }


def init_transformer_layer(key, d_model, ff_dim):
    ks = jax.random.split(key, 4)
    return {
        "in_proj": init_linear(ks[0], d_model, 3 * d_model),
        "out_proj": init_linear(ks[1], d_model, d_model),
        "ff1": init_linear(ks[2], d_model, ff_dim),
        "ff2": init_linear(ks[3], ff_dim, d_model),
        "norm1_g": jnp.ones((d_model,), jnp.float32),
        "norm1_b": jnp.zeros((d_model,), jnp.float32),
        "norm2_g": jnp.ones((d_model,), jnp.float32),
        "norm2_b": jnp.zeros((d_model,), jnp.float32),
    }


def init_snn_params(key, input1_dim, input2_dim):
    ks = jax.random.split(key, 5 + T_LAYERS)
    return {
        "linear1": init_linear(ks[0], input1_dim, INPUT_DIM),
        "linear2": init_linear(ks[1], input2_dim, INPUT_DIM),
        "t_fc": init_linear(ks[2], INPUT_DIM, FEATURE_DIM),
        "sim1": init_linear(ks[3], FEATURE_DIM, 16),
        "sim2": init_linear(ks[4], 16, 1),
        "t_layers": [init_transformer_layer(ks[5 + i], INPUT_DIM, FF_DIM)
                     for i in range(T_LAYERS)],
    }


def pack_params(params, weight_dtype=jnp.bfloat16):
    """Stack per-layer params with lane-dense layouts: fused (E,3E) QKV weight,
    single-row biases, and bf16 storage for the large streamed matrices."""
    E = INPUT_DIM
    layers = params["t_layers"]

    def stack(fn):
        return jnp.stack([fn(p) for p in layers], axis=0)

    return {
        "w1": params["linear1"]["w"],
        "b1": params["linear1"]["b"].reshape(1, -1),
        "w2": params["linear2"]["w"],
        "b2": params["linear2"]["b"].reshape(1, -1),
        # fused QKV: (L, E, 3E) weight + (L, 1, 3E) bias (q | k | v column blocks)
        "wqkv": stack(lambda p: p["in_proj"]["w"]).astype(weight_dtype),
        "bqkv": stack(lambda p: p["in_proj"]["b"].reshape(1, 3 * E)),
        "wo": stack(lambda p: p["out_proj"]["w"]).astype(weight_dtype),   # (L,E,E)
        "bo": stack(lambda p: p["out_proj"]["b"].reshape(1, E)),
        "g1": stack(lambda p: p["norm1_g"].reshape(1, E)),
        "be1": stack(lambda p: p["norm1_b"].reshape(1, E)),
        "wf1": stack(lambda p: p["ff1"]["w"]).astype(weight_dtype),
        "bf1": stack(lambda p: p["ff1"]["b"].reshape(1, -1)),
        "wf2": stack(lambda p: p["ff2"]["w"]).astype(weight_dtype),
        "bf2": stack(lambda p: p["ff2"]["b"].reshape(1, E)),
        "g2": stack(lambda p: p["norm2_g"].reshape(1, E)),
        "be2": stack(lambda p: p["norm2_b"].reshape(1, E)),
        "wtfc": params["t_fc"]["w"].astype(weight_dtype),
        "btfc": params["t_fc"]["b"].reshape(1, -1),
        "ws1": params["sim1"]["w"],
        "bs1": params["sim1"]["b"].reshape(1, -1),
        "ws2": params["sim2"]["w"].reshape(1, -1),   # (16,1) -> (1,16)
        "bs2": params["sim2"]["b"].reshape(1, 1),
    }


# --------------------------------------------------------------------------
# Pure-JAX reference (same packed weights, f32 math) for validation
# --------------------------------------------------------------------------

def snn_reference(packed, x1, x2):
    f32 = lambda a: a.astype(jnp.float32)
    S = x1.shape[0]
    E = INPUT_DIM
    H = NHEAD
    Dh = E // H
    L = packed["wqkv"].shape[0]

    def ln(z, g, b):
        mu = jnp.mean(z, axis=-1, keepdims=True)
        zc = z - mu
        var = jnp.mean(zc * zc, axis=-1, keepdims=True)
        return zc * lax.rsqrt(var + LN_EPS) * g + b

    h1 = x1 @ packed["w1"] + packed["b1"]
    h2 = x2 @ packed["w2"] + packed["b2"]
    x = jnp.concatenate([h1, h2], axis=0)            # (2S, E)

    for l in range(L):
        qkv = x @ f32(packed["wqkv"][l]) + packed["bqkv"][l]
        q = qkv[:, 0:E].reshape(2, S, H, Dh)
        k = qkv[:, E:2 * E].reshape(2, S, H, Dh)
        v = qkv[:, 2 * E:].reshape(2, S, H, Dh)
        s = jnp.einsum('bqhd,bkhd->bhqk', q, k) / (Dh ** 0.5)
        p = jax.nn.softmax(s, axis=-1)
        o = jnp.einsum('bhqk,bkhd->bqhd', p, v).reshape(2 * S, E)
        proj = o @ f32(packed["wo"][l]) + packed["bo"][l]
        x = ln(x + proj, packed["g1"][l], packed["be1"][l])
        ff = jnp.maximum(x @ f32(packed["wf1"][l]) + packed["bf1"][l], 0.0)
        ff = ff @ f32(packed["wf2"][l]) + packed["bf2"][l]
        x = ln(x + ff, packed["g2"][l], packed["be2"][l])

    f = x @ f32(packed["wtfc"]) + packed["btfc"]
    d = jnp.abs(f[:S] - f[S:])
    g = jnp.maximum(d @ packed["ws1"] + packed["bs1"], 0.0)
    logit = jnp.sum(g * packed["ws2"], axis=-1, keepdims=True) + packed["bs2"]
    return jax.nn.sigmoid(logit).reshape(-1)


# --------------------------------------------------------------------------

if __name__ == "__main__":
    key = jax.random.PRNGKey(0)
    kp, k1, k2 = jax.random.split(key, 3)

    SEQ, INPUT1_DIM, INPUT2_DIM = 8, 32, 48
    params = init_snn_params(kp, INPUT1_DIM, INPUT2_DIM)
    packed = pack_params(params)
    x1 = jax.random.normal(k1, (SEQ, INPUT1_DIM), jnp.float32)
    x2 = jax.random.normal(k2, (SEQ, INPUT2_DIM), jnp.float32)

    out = jax.jit(snn_forward)(packed, x1, x2)
    out = jax.block_until_ready(out)

    assert out.shape == (SEQ,), out.shape
    assert bool(jnp.all(jnp.isfinite(out)))
    assert bool(jnp.all((out >= 0.0) & (out <= 1.0)))     # sigmoid output

    ref = jax.block_until_ready(jax.jit(snn_reference)(packed, x1, x2))
    assert bool(jnp.max(jnp.abs(out - ref)) < 5e-2), (out, ref)

    print("KERNEL_OK")
</pallas_src>

<mosaic_0001>
module attributes {stable_mosaic.version = 11 : i64} {
  func.func @_snn_fused_kernel(%arg0: i32, %arg1: memref<8x32xf32, #tpu.memory_space<vmem>>, %arg2: memref<8x48xf32, #tpu.memory_space<vmem>>, %arg3: memref<32x512xf32, #tpu.memory_space<vmem>>, %arg4: memref<1x512xf32, #tpu.memory_space<vmem>>, %arg5: memref<48x512xf32, #tpu.memory_space<vmem>>, %arg6: memref<1x512xf32, #tpu.memory_space<vmem>>, %arg7: memref<1x512x1536xbf16, #tpu.memory_space<vmem>>, %arg8: memref<1x1x1536xf32, #tpu.memory_space<vmem>>, %arg9: memref<1x512x512xbf16, #tpu.memory_space<vmem>>, %arg10: memref<1x1x512xf32, #tpu.memory_space<vmem>>, %arg11: memref<1x1x512xf32, #tpu.memory_space<vmem>>, %arg12: memref<1x1x512xf32, #tpu.memory_space<vmem>>, %arg13: memref<1x512x2048xbf16, #tpu.memory_space<vmem>>, %arg14: memref<1x1x2048xf32, #tpu.memory_space<vmem>>, %arg15: memref<1x2048x512xbf16, #tpu.memory_space<vmem>>, %arg16: memref<1x1x512xf32, #tpu.memory_space<vmem>>, %arg17: memref<1x1x512xf32, #tpu.memory_space<vmem>>, %arg18: memref<1x1x512xf32, #tpu.memory_space<vmem>>, %arg19: memref<512x256xbf16, #tpu.memory_space<vmem>>, %arg20: memref<1x256xf32, #tpu.memory_space<vmem>>, %arg21: memref<256x16xf32, #tpu.memory_space<vmem>>, %arg22: memref<1x16xf32, #tpu.memory_space<vmem>>, %arg23: memref<1x16xf32, #tpu.memory_space<vmem>>, %arg24: memref<1x1xf32, #tpu.memory_space<vmem>>, %arg25: memref<8x1xf32, #tpu.memory_space<vmem>>, %arg26: memref<16x512xf32, #tpu.memory_space<vmem>>) attributes {dimension_semantics = [#tpu.dimension_semantics<arbitrary>], iteration_bounds = array<i64: 3>, scalar_prefetch = 0 : i64, scratch_operands = 1 : i64, tpu.core_type = #tpu.core_type<tc>, window_params = [{pipeline_mode = #tpu.pipeline_mode<synchronous>, transform_indices = @transform_0, window_bounds = array<i64: 8, 32>}, {pipeline_mode = #tpu.pipeline_mode<synchronous>, transform_indices = @transform_1, window_bounds = array<i64: 8, 48>}, {pipeline_mode = #tpu.pipeline_mode<synchronous>, transform_indices = @transform_2, window_bounds = array<i64: 32, 512>}, {pipeline_mode = #tpu.pipeline_mode<synchronous>, transform_indices = @transform_3, window_bounds = array<i64: 1, 512>}, {pipeline_mode = #tpu.pipeline_mode<synchronous>, transform_indices = @transform_4, window_bounds = array<i64: 48, 512>}, {pipeline_mode = #tpu.pipeline_mode<synchronous>, transform_indices = @transform_5, window_bounds = array<i64: 1, 512>}, {transform_indices = @transform_6, window_bounds = array<i64: 1, 512, 1536>}, {transform_indices = @transform_7, window_bounds = array<i64: 1, 1, 1536>}, {transform_indices = @transform_8, window_bounds = array<i64: 1, 512, 512>}, {transform_indices = @transform_9, window_bounds = array<i64: 1, 1, 512>}, {transform_indices = @transform_10, window_bounds = array<i64: 1, 1, 512>}, {transform_indices = @transform_11, window_bounds = array<i64: 1, 1, 512>}, {transform_indices = @transform_12, window_bounds = array<i64: 1, 512, 2048>}, {transform_indices = @transform_13, window_bounds = array<i64: 1, 1, 2048>}, {transform_indices = @transform_14, window_bounds = array<i64: 1, 2048, 512>}, {transform_indices = @transform_15, window_bounds = array<i64: 1, 1, 512>}, {transform_indices = @transform_16, window_bounds = array<i64: 1, 1, 512>}, {transform_indices = @transform_17, window_bounds = array<i64: 1, 1, 512>}, {pipeline_mode = #tpu.pipeline_mode<synchronous>, transform_indices = @transform_18, window_bounds = array<i64: 512, 256>}, {pipeline_mode = #tpu.pipeline_mode<synchronous>, transform_indices = @transform_19, window_bounds = array<i64: 1, 256>}, {pipeline_mode = #tpu.pipeline_mode<synchronous>, transform_indices = @transform_20, window_bounds = array<i64: 256, 16>}, {pipeline_mode = #tpu.pipeline_mode<synchronous>, transform_indices = @transform_21, window_bounds = array<i64: 1, 16>}, {pipeline_mode = #tpu.pipeline_mode<synchronous>, transform_indices = @transform_22, window_bounds = array<i64: 1, 16>}, {pipeline_mode = #tpu.pipeline_mode<synchronous>, transform_indices = @transform_23, window_bounds = array<i64: 1, 1>}, {pipeline_mode = #tpu.pipeline_mode<synchronous>, transform_indices = @transform_24, window_bounds = array<i64: 8, 1>}]} {
    %c0_i32 = arith.constant 0 : i32
    %0 = arith.cmpi eq, %arg0, %c0_i32 : i32
    %1 = arith.extui %0 : i1 to i32
    %c0_i32_0 = arith.constant 0 : i32
    %2 = arith.cmpi ne, %1, %c0_i32_0 : i32
    scf.if %2 {
      %c0_135 = arith.constant 0 : index
      %c0_136 = arith.constant 0 : index
      %400 = vector.load %arg1[%c0_135, %c0_136] : memref<8x32xf32, #tpu.memory_space<vmem>>, vector<8x32xf32>
      %c0_137 = arith.constant 0 : index
      %c0_138 = arith.constant 0 : index
      %401 = vector.load %arg3[%c0_137, %c0_138] : memref<32x512xf32, #tpu.memory_space<vmem>>, vector<32x512xf32>
      %cst_139 = arith.constant dense<0.000000e+00> : vector<8x512xf32>
      %402 = tpu.matmul %400, %401, %cst_139 {dimension_numbers = #tpu.dot_dimension_numbers<[1], [0], [0], [1], [0, 0, 1, 1], [], []>} : vector<8x32xf32>, vector<32x512xf32>, vector<8x512xf32> -> vector<8x512xf32>
      %c0_140 = arith.constant 0 : index
      %c0_141 = arith.constant 0 : index
      %403 = vector.load %arg4[%c0_140, %c0_141] : memref<1x512xf32, #tpu.memory_space<vmem>>, vector<1x512xf32>
      %404 = vector.broadcast %403 : vector<1x512xf32> to vector<8x512xf32>
      %405 = arith.addf %402, %404 : vector<8x512xf32>
      %c0_142 = arith.constant 0 : index
      %c0_143 = arith.constant 0 : index
      %406 = vector.load %arg2[%c0_142, %c0_143] : memref<8x48xf32, #tpu.memory_space<vmem>>, vector<8x48xf32>
      %c0_144 = arith.constant 0 : index
      %c0_145 = arith.constant 0 : index
      %407 = vector.load %arg5[%c0_144, %c0_145] : memref<48x512xf32, #tpu.memory_space<vmem>>, vector<48x512xf32>
      %cst_146 = arith.constant dense<0.000000e+00> : vector<8x512xf32>
      %408 = tpu.matmul %406, %407, %cst_146 {dimension_numbers = #tpu.dot_dimension_numbers<[1], [0], [0], [1], [0, 0, 1, 1], [], []>} : vector<8x48xf32>, vector<48x512xf32>, vector<8x512xf32> -> vector<8x512xf32>
      %c0_147 = arith.constant 0 : index
      %c0_148 = arith.constant 0 : index
      %409 = vector.load %arg6[%c0_147, %c0_148] : memref<1x512xf32, #tpu.memory_space<vmem>>, vector<1x512xf32>
      %410 = vector.broadcast %409 : vector<1x512xf32> to vector<8x512xf32>
      %411 = arith.addf %408, %410 : vector<8x512xf32>
      %c0_149 = arith.constant 0 : index
      %c0_150 = arith.constant 0 : index
      %412 = vector.load %arg26[%c0_149, %c0_150] : memref<16x512xf32, #tpu.memory_space<vmem>>, vector<8x512xf32>
      tpu.vector_store %arg26[%c0_149, %c0_150], %405 {strides = array<i32>} : memref<16x512xf32, #tpu.memory_space<vmem>>, vector<8x512xf32>,
      %c8 = arith.constant 8 : index
      %c0_151 = arith.constant 0 : index
      %413 = vector.load %arg26[%c8, %c0_151] : memref<16x512xf32, #tpu.memory_space<vmem>>, vector<8x512xf32>
      tpu.vector_store %arg26[%c8, %c0_151], %411 {strides = array<i32>} : memref<16x512xf32, #tpu.memory_space<vmem>>, vector<8x512xf32>,
    } else {
    }
    %c0 = arith.constant 0 : index
    %c0_1 = arith.constant 0 : index
    %3 = vector.load %arg26[%c0, %c0_1] : memref<16x512xf32, #tpu.memory_space<vmem>>, vector<16x512xf32>
    %4 = arith.truncf %3 : vector<16x512xf32> to vector<16x512xbf16>
    %c0_2 = arith.constant 0 : index
    %c0_3 = arith.constant 0 : index
    %c0_4 = arith.constant 0 : index
    %5 = vector.load %arg7[%c0_2, %c0_3, %c0_4] : memref<1x512x1536xbf16, #tpu.memory_space<vmem>>, vector<1x512x1536xbf16>
    %6 = vector.shape_cast %5 : vector<1x512x1536xbf16> to vector<512x1536xbf16>
    %cst = arith.constant dense<0.000000e+00> : vector<16x1536xf32>
    %7 = tpu.matmul %4, %6, %cst {dimension_numbers = #tpu.dot_dimension_numbers<[1], [0], [0], [1], [0, 0, 1, 1], [], []>} : vector<16x512xbf16>, vector<512x1536xbf16>, vector<16x1536xf32> -> vector<16x1536xf32>
    %c0_5 = arith.constant 0 : index
    %c0_6 = arith.constant 0 : index
    %c0_7 = arith.constant 0 : index
    %8 = vector.load %arg8[%c0_5, %c0_6, %c0_7] : memref<1x1x1536xf32, #tpu.memory_space<vmem>>, vector<1x1x1536xf32>
    %9 = vector.shape_cast %8 : vector<1x1x1536xf32> to vector<1x1536xf32>
    %10 = vector.broadcast %9 : vector<1x1536xf32> to vector<16x1536xf32>
    %11 = arith.addf %7, %10 : vector<16x1536xf32>
    %12 = vector.extract_strided_slice %11 {offsets = [0, 0], sizes = [16, 512], strides = [1, 1]} : vector<16x1536xf32> to vector<16x512xf32>
    %13 = vector.extract_strided_slice %11 {offsets = [0, 512], sizes = [16, 512], strides = [1, 1]} : vector<16x1536xf32> to vector<16x512xf32>
    %14 = vector.extract_strided_slice %11 {offsets = [0, 1024], sizes = [16, 512], strides = [1, 1]} : vector<16x1536xf32> to vector<16x512xf32>
    %15 = vector.extract_strided_slice %12 {offsets = [0, 0], sizes = [16, 64], strides = [1, 1]} : vector<16x512xf32> to vector<16x64xf32>
    %16 = vector.extract_strided_slice %13 {offsets = [0, 0], sizes = [16, 64], strides = [1, 1]} : vector<16x512xf32> to vector<16x64xf32>
    %17 = vector.extract_strided_slice %14 {offsets = [0, 0], sizes = [16, 64], strides = [1, 1]} : vector<16x512xf32> to vector<16x64xf32>
    %18 = vector.extract_strided_slice %15 {offsets = [0, 0], sizes = [8, 64], strides = [1, 1]} : vector<16x64xf32> to vector<8x64xf32>
    %19 = vector.extract_strided_slice %16 {offsets = [0, 0], sizes = [8, 64], strides = [1, 1]} : vector<16x64xf32> to vector<8x64xf32>
    %20 = vector.extract_strided_slice %17 {offsets = [0, 0], sizes = [8, 64], strides = [1, 1]} : vector<16x64xf32> to vector<8x64xf32>
    %cst_8 = arith.constant dense<0.000000e+00> : vector<8x8xf32>
    %21 = tpu.matmul %18, %19, %cst_8 {dimension_numbers = #tpu.dot_dimension_numbers<[1], [1], [0], [0], [0, 0, 1, 0], [], []>} : vector<8x64xf32>, vector<8x64xf32>, vector<8x8xf32> -> vector<8x8xf32>
    %cst_9 = arith.constant 1.250000e-01 : f32
    %22 = vector.broadcast %cst_9 : f32 to vector<8x8xf32>
    %23 = arith.mulf %21, %22 : vector<8x8xf32>
    %cst_10 = arith.constant dense<0xFF800000> : vector<8xf32>
    %24 = vector.multi_reduction <maximumf>, %23, %cst_10 [1] : vector<8x8xf32> to vector<8xf32>
    %25 = vector.shape_cast %24 : vector<8xf32> to vector<8x1xf32>
    %26 = vector.broadcast %25 : vector<8x1xf32> to vector<8x8xf32>
    %27 = arith.subf %23, %26 : vector<8x8xf32>
    %28 = math.exp %27 : vector<8x8xf32>
    %cst_11 = arith.constant dense<0.000000e+00> : vector<8xf32>
    %29 = vector.multi_reduction <add>, %28, %cst_11 [1] : vector<8x8xf32> to vector<8xf32>
    %30 = vector.shape_cast %29 : vector<8xf32> to vector<8x1xf32>
    %31 = tpu.reciprocal %30 {approx = true} : vector<8x1xf32> -> vector<8x1xf32>
    %32 = vector.broadcast %31 : vector<8x1xf32> to vector<8x8xf32>
    %33 = arith.mulf %28, %32 : vector<8x8xf32>
    %cst_12 = arith.constant dense<0.000000e+00> : vector<8x64xf32>
    %34 = tpu.matmul %33, %20, %cst_12 {dimension_numbers = #tpu.dot_dimension_numbers<[1], [0], [0], [1], [0, 0, 1, 1], [], []>} : vector<8x8xf32>, vector<8x64xf32>, vector<8x64xf32> -> vector<8x64xf32>
    %35 = vector.extract_strided_slice %15 {offsets = [8, 0], sizes = [8, 64], strides = [1, 1]} : vector<16x64xf32> to vector<8x64xf32>
    %36 = vector.extract_strided_slice %16 {offsets = [8, 0], sizes = [8, 64], strides = [1, 1]} : vector<16x64xf32> to vector<8x64xf32>
    %37 = vector.extract_strided_slice %17 {offsets = [8, 0], sizes = [8, 64], strides = [1, 1]} : vector<16x64xf32> to vector<8x64xf32>
    %cst_13 = arith.constant dense<0.000000e+00> : vector<8x8xf32>
    %38 = tpu.matmul %35, %36, %cst_13 {dimension_numbers = #tpu.dot_dimension_numbers<[1], [1], [0], [0], [0, 0, 1, 0], [], []>} : vector<8x64xf32>, vector<8x64xf32>, vector<8x8xf32> -> vector<8x8xf32>
    %cst_14 = arith.constant 1.250000e-01 : f32
    %39 = vector.broadcast %cst_14 : f32 to vector<8x8xf32>
    %40 = arith.mulf %38, %39 : vector<8x8xf32>
    %cst_15 = arith.constant dense<0xFF800000> : vector<8xf32>
    %41 = vector.multi_reduction <maximumf>, %40, %cst_15 [1] : vector<8x8xf32> to vector<8xf32>
    %42 = vector.shape_cast %41 : vector<8xf32> to vector<8x1xf32>
    %43 = vector.broadcast %42 : vector<8x1xf32> to vector<8x8xf32>
    %44 = arith.subf %40, %43 : vector<8x8xf32>
    %45 = math.exp %44 : vector<8x8xf32>
    %cst_16 = arith.constant dense<0.000000e+00> : vector<8xf32>
    %46 = vector.multi_reduction <add>, %45, %cst_16 [1] : vector<8x8xf32> to vector<8xf32>
    %47 = vector.shape_cast %46 : vector<8xf32> to vector<8x1xf32>
    %48 = tpu.reciprocal %47 {approx = true} : vector<8x1xf32> -> vector<8x1xf32>
    %49 = vector.broadcast %48 : vector<8x1xf32> to vector<8x8xf32>
    %50 = arith.mulf %45, %49 : vector<8x8xf32>
    %cst_17 = arith.constant dense<0.000000e+00> : vector<8x64xf32>
    %51 = tpu.matmul %50, %37, %cst_17 {dimension_numbers = #tpu.dot_dimension_numbers<[1], [0], [0], [1], [0, 0, 1, 1], [], []>} : vector<8x8xf32>, vector<8x64xf32>, vector<8x64xf32> -> vector<8x64xf32>
    %52 = tpu.concatenate %34, %51 in 0 : vector<8x64xf32>, vector<8x64xf32> -> vector<16x64xf32>
    %53 = vector.extract_strided_slice %12 {offsets = [0, 64], sizes = [16, 64], strides = [1, 1]} : vector<16x512xf32> to vector<16x64xf32>
    %54 = vector.extract_strided_slice %13 {offsets = [0, 64], sizes = [16, 64], strides = [1, 1]} : vector<16x512xf32> to vector<16x64xf32>
    %55 = vector.extract_strided_slice %14 {offsets = [0, 64], sizes = [16, 64], strides = [1, 1]} : vector<16x512xf32> to vector<16x64xf32>
    %56 = vector.extract_strided_slice %53 {offsets = [0, 0], sizes = [8, 64], strides = [1, 1]} : vector<16x64xf32> to vector<8x64xf32>
    %57 = vector.extract_strided_slice %54 {offsets = [0, 0], sizes = [8, 64], strides = [1, 1]} : vector<16x64xf32> to vector<8x64xf32>
    %58 = vector.extract_strided_slice %55 {offsets = [0, 0], sizes = [8, 64], strides = [1, 1]} : vector<16x64xf32> to vector<8x64xf32>
    %cst_18 = arith.constant dense<0.000000e+00> : vector<8x8xf32>
    %59 = tpu.matmul %56, %57, %cst_18 {dimension_numbers = #tpu.dot_dimension_numbers<[1], [1], [0], [0], [0, 0, 1, 0], [], []>} : vector<8x64xf32>, vector<8x64xf32>, vector<8x8xf32> -> vector<8x8xf32>
    %cst_19 = arith.constant 1.250000e-01 : f32
    %60 = vector.broadcast %cst_19 : f32 to vector<8x8xf32>
    %61 = arith.mulf %59, %60 : vector<8x8xf32>
    %cst_20 = arith.constant dense<0xFF800000> : vector<8xf32>
    %62 = vector.multi_reduction <maximumf>, %61, %cst_20 [1] : vector<8x8xf32> to vector<8xf32>
    %63 = vector.shape_cast %62 : vector<8xf32> to vector<8x1xf32>
    %64 = vector.broadcast %63 : vector<8x1xf32> to vector<8x8xf32>
    %65 = arith.subf %61, %64 : vector<8x8xf32>
    %66 = math.exp %65 : vector<8x8xf32>
    %cst_21 = arith.constant dense<0.000000e+00> : vector<8xf32>
    %67 = vector.multi_reduction <add>, %66, %cst_21 [1] : vector<8x8xf32> to vector<8xf32>
    %68 = vector.shape_cast %67 : vector<8xf32> to vector<8x1xf32>
    %69 = tpu.reciprocal %68 {approx = true} : vector<8x1xf32> -> vector<8x1xf32>
    %70 = vector.broadcast %69 : vector<8x1xf32> to vector<8x8xf32>
    %71 = arith.mulf %66, %70 : vector<8x8xf32>
    %cst_22 = arith.constant dense<0.000000e+00> : vector<8x64xf32>
    %72 = tpu.matmul %71, %58, %cst_22 {dimension_numbers = #tpu.dot_dimension_numbers<[1], [0], [0], [1], [0, 0, 1, 1], [], []>} : vector<8x8xf32>, vector<8x64xf32>, vector<8x64xf32> -> vector<8x64xf32>
    %73 = vector.extract_strided_slice %53 {offsets = [8, 0], sizes = [8, 64], strides = [1, 1]} : vector<16x64xf32> to vector<8x64xf32>
    %74 = vector.extract_strided_slice %54 {offsets = [8, 0], sizes = [8, 64], strides = [1, 1]} : vector<16x64xf32> to vector<8x64xf32>
    %75 = vector.extract_strided_slice %55 {offsets = [8, 0], sizes = [8, 64], strides = [1, 1]} : vector<16x64xf32> to vector<8x64xf32>
    %cst_23 = arith.constant dense<0.000000e+00> : vector<8x8xf32>
    %76 = tpu.matmul %73, %74, %cst_23 {dimension_numbers = #tpu.dot_dimension_numbers<[1], [1], [0], [0], [0, 0, 1, 0], [], []>} : vector<8x64xf32>, vector<8x64xf32>, vector<8x8xf32> -> vector<8x8xf32>
    %cst_24 = arith.constant 1.250000e-01 : f32
    %77 = vector.broadcast %cst_24 : f32 to vector<8x8xf32>
    %78 = arith.mulf %76, %77 : vector<8x8xf32>
    %cst_25 = arith.constant dense<0xFF800000> : vector<8xf32>
    %79 = vector.multi_reduction <maximumf>, %78, %cst_25 [1] : vector<8x8xf32> to vector<8xf32>
    %80 = vector.shape_cast %79 : vector<8xf32> to vector<8x1xf32>
    %81 = vector.broadcast %80 : vector<8x1xf32> to vector<8x8xf32>
    %82 = arith.subf %78, %81 : vector<8x8xf32>
    %83 = math.exp %82 : vector<8x8xf32>
    %cst_26 = arith.constant dense<0.000000e+00> : vector<8xf32>
    %84 = vector.multi_reduction <add>, %83, %cst_26 [1] : vector<8x8xf32> to vector<8xf32>
    %85 = vector.shape_cast %84 : vector<8xf32> to vector<8x1xf32>
    %86 = tpu.reciprocal %85 {approx = true} : vector<8x1xf32> -> vector<8x1xf32>
    %87 = vector.broadcast %86 : vector<8x1xf32> to vector<8x8xf32>
    %88 = arith.mulf %83, %87 : vector<8x8xf32>
    %cst_27 = arith.constant dense<0.000000e+00> : vector<8x64xf32>
    %89 = tpu.matmul %88, %75, %cst_27 {dimension_numbers = #tpu.dot_dimension_numbers<[1], [0], [0], [1], [0, 0, 1, 1], [], []>} : vector<8x8xf32>, vector<8x64xf32>, vector<8x64xf32> -> vector<8x64xf32>
    %90 = tpu.concatenate %72, %89 in 0 : vector<8x64xf32>, vector<8x64xf32> -> vector<16x64xf32>
    %91 = vector.extract_strided_slice %12 {offsets = [0, 128], sizes = [16, 64], strides = [1, 1]} : vector<16x512xf32> to vector<16x64xf32>
    %92 = vector.extract_strided_slice %13 {offsets = [0, 128], sizes = [16, 64], strides = [1, 1]} : vector<16x512xf32> to vector<16x64xf32>
    %93 = vector.extract_strided_slice %14 {offsets = [0, 128], sizes = [16, 64], strides = [1, 1]} : vector<16x512xf32> to vector<16x64xf32>
    %94 = vector.extract_strided_slice %91 {offsets = [0, 0], sizes = [8, 64], strides = [1, 1]} : vector<16x64xf32> to vector<8x64xf32>
    %95 = vector.extract_strided_slice %92 {offsets = [0, 0], sizes = [8, 64], strides = [1, 1]} : vector<16x64xf32> to vector<8x64xf32>
    %96 = vector.extract_strided_slice %93 {offsets = [0, 0], sizes = [8, 64], strides = [1, 1]} : vector<16x64xf32> to vector<8x64xf32>
    %cst_28 = arith.constant dense<0.000000e+00> : vector<8x8xf32>
    %97 = tpu.matmul %94, %95, %cst_28 {dimension_numbers = #tpu.dot_dimension_numbers<[1], [1], [0], [0], [0, 0, 1, 0], [], []>} : vector<8x64xf32>, vector<8x64xf32>, vector<8x8xf32> -> vector<8x8xf32>
    %cst_29 = arith.constant 1.250000e-01 : f32
    %98 = vector.broadcast %cst_29 : f32 to vector<8x8xf32>
    %99 = arith.mulf %97, %98 : vector<8x8xf32>
    %cst_30 = arith.constant dense<0xFF800000> : vector<8xf32>
    %100 = vector.multi_reduction <maximumf>, %99, %cst_30 [1] : vector<8x8xf32> to vector<8xf32>
    %101 = vector.shape_cast %100 : vector<8xf32> to vector<8x1xf32>
    %102 = vector.broadcast %101 : vector<8x1xf32> to vector<8x8xf32>
    %103 = arith.subf %99, %102 : vector<8x8xf32>
    %104 = math.exp %103 : vector<8x8xf32>
    %cst_31 = arith.constant dense<0.000000e+00> : vector<8xf32>
    %105 = vector.multi_reduction <add>, %104, %cst_31 [1] : vector<8x8xf32> to vector<8xf32>
    %106 = vector.shape_cast %105 : vector<8xf32> to vector<8x1xf32>
    %107 = tpu.reciprocal %106 {approx = true} : vector<8x1xf32> -> vector<8x1xf32>
    %108 = vector.broadcast %107 : vector<8x1xf32> to vector<8x8xf32>
    %109 = arith.mulf %104, %108 : vector<8x8xf32>
    %cst_32 = arith.constant dense<0.000000e+00> : vector<8x64xf32>
    %110 = tpu.matmul %109, %96, %cst_32 {dimension_numbers = #tpu.dot_dimension_numbers<[1], [0], [0], [1], [0, 0, 1, 1], [], []>} : vector<8x8xf32>, vector<8x64xf32>, vector<8x64xf32> -> vector<8x64xf32>
    %111 = vector.extract_strided_slice %91 {offsets = [8, 0], sizes = [8, 64], strides = [1, 1]} : vector<16x64xf32> to vector<8x64xf32>
    %112 = vector.extract_strided_slice %92 {offsets = [8, 0], sizes = [8, 64], strides = [1, 1]} : vector<16x64xf32> to vector<8x64xf32>
    %113 = vector.extract_strided_slice %93 {offsets = [8, 0], sizes = [8, 64], strides = [1, 1]} : vector<16x64xf32> to vector<8x64xf32>
    %cst_33 = arith.constant dense<0.000000e+00> : vector<8x8xf32>
    %114 = tpu.matmul %111, %112, %cst_33 {dimension_numbers = #tpu.dot_dimension_numbers<[1], [1], [0], [0], [0, 0, 1, 0], [], []>} : vector<8x64xf32>, vector<8x64xf32>, vector<8x8xf32> -> vector<8x8xf32>
    %cst_34 = arith.constant 1.250000e-01 : f32
    %115 = vector.broadcast %cst_34 : f32 to vector<8x8xf32>
    %116 = arith.mulf %114, %115 : vector<8x8xf32>
    %cst_35 = arith.constant dense<0xFF800000> : vector<8xf32>
    %117 = vector.multi_reduction <maximumf>, %116, %cst_35 [1] : vector<8x8xf32> to vector<8xf32>
    %118 = vector.shape_cast %117 : vector<8xf32> to vector<8x1xf32>
    %119 = vector.broadcast %118 : vector<8x1xf32> to vector<8x8xf32>
    %120 = arith.subf %116, %119 : vector<8x8xf32>
    %121 = math.exp %120 : vector<8x8xf32>
    %cst_36 = arith.constant dense<0.000000e+00> : vector<8xf32>
    %122 = vector.multi_reduction <add>, %121, %cst_36 [1] : vector<8x8xf32> to vector<8xf32>
    %123 = vector.shape_cast %122 : vector<8xf32> to vector<8x1xf32>
    %124 = tpu.reciprocal %123 {approx = true} : vector<8x1xf32> -> vector<8x1xf32>
    %125 = vector.broadcast %124 : vector<8x1xf32> to vector<8x8xf32>
    %126 = arith.mulf %121, %125 : vector<8x8xf32>
    %cst_37 = arith.constant dense<0.000000e+00> : vector<8x64xf32>
    %127 = tpu.matmul %126, %113, %cst_37 {dimension_numbers = #tpu.dot_dimension_numbers<[1], [0], [0], [1], [0, 0, 1, 1], [], []>} : vector<8x8xf32>, vector<8x64xf32>, vector<8x64xf32> -> vector<8x64xf32>
    %128 = tpu.concatenate %110, %127 in 0 : vector<8x64xf32>, vector<8x64xf32> -> vector<16x64xf32>
    %129 = vector.extract_strided_slice %12 {offsets = [0, 192], sizes = [16, 64], strides = [1, 1]} : vector<16x512xf32> to vector<16x64xf32>
    %130 = vector.extract_strided_slice %13 {offsets = [0, 192], sizes = [16, 64], strides = [1, 1]} : vector<16x512xf32> to vector<16x64xf32>
    %131 = vector.extract_strided_slice %14 {offsets = [0, 192], sizes = [16, 64], strides = [1, 1]} : vector<16x512xf32> to vector<16x64xf32>
    %132 = vector.extract_strided_slice %129 {offsets = [0, 0], sizes = [8, 64], strides = [1, 1]} : vector<16x64xf32> to vector<8x64xf32>
    %133 = vector.extract_strided_slice %130 {offsets = [0, 0], sizes = [8, 64], strides = [1, 1]} : vector<16x64xf32> to vector<8x64xf32>
    %134 = vector.extract_strided_slice %131 {offsets = [0, 0], sizes = [8, 64], strides = [1, 1]} : vector<16x64xf32> to vector<8x64xf32>
    %cst_38 = arith.constant dense<0.000000e+00> : vector<8x8xf32>
    %135 = tpu.matmul %132, %133, %cst_38 {dimension_numbers = #tpu.dot_dimension_numbers<[1], [1], [0], [0], [0, 0, 1, 0], [], []>} : vector<8x64xf32>, vector<8x64xf32>, vector<8x8xf32> -> vector<8x8xf32>
    %cst_39 = arith.constant 1.250000e-01 : f32
    %136 = vector.broadcast %cst_39 : f32 to vector<8x8xf32>
    %137 = arith.mulf %135, %136 : vector<8x8xf32>
    %cst_40 = arith.constant dense<0xFF800000> : vector<8xf32>
    %138 = vector.multi_reduction <maximumf>, %137, %cst_40 [1] : vector<8x8xf32> to vector<8xf32>
    %139 = vector.shape_cast %138 : vector<8xf32> to vector<8x1xf32>
    %140 = vector.broadcast %139 : vector<8x1xf32> to vector<8x8xf32>
    %141 = arith.subf %137, %140 : vector<8x8xf32>
    %142 = math.exp %141 : vector<8x8xf32>
    %cst_41 = arith.constant dense<0.000000e+00> : vector<8xf32>
    %143 = vector.multi_reduction <add>, %142, %cst_41 [1] : vector<8x8xf32> to vector<8xf32>
    %144 = vector.shape_cast %143 : vector<8xf32> to vector<8x1xf32>
    %145 = tpu.reciprocal %144 {approx = true} : vector<8x1xf32> -> vector<8x1xf32>
    %146 = vector.broadcast %145 : vector<8x1xf32> to vector<8x8xf32>
    %147 = arith.mulf %142, %146 : vector<8x8xf32>
    %cst_42 = arith.constant dense<0.000000e+00> : vector<8x64xf32>
    %148 = tpu.matmul %147, %134, %cst_42 {dimension_numbers = #tpu.dot_dimension_numbers<[1], [0], [0], [1], [0, 0, 1, 1], [], []>} : vector<8x8xf32>, vector<8x64xf32>, vector<8x64xf32> -> vector<8x64xf32>
    %149 = vector.extract_strided_slice %129 {offsets = [8, 0], sizes = [8, 64], strides = [1, 1]} : vector<16x64xf32> to vector<8x64xf32>
    %150 = vector.extract_strided_slice %130 {offsets = [8, 0], sizes = [8, 64], strides = [1, 1]} : vector<16x64xf32> to vector<8x64xf32>
    %151 = vector.extract_strided_slice %131 {offsets = [8, 0], sizes = [8, 64], strides = [1, 1]} : vector<16x64xf32> to vector<8x64xf32>
    %cst_43 = arith.constant dense<0.000000e+00> : vector<8x8xf32>
    %152 = tpu.matmul %149, %150, %cst_43 {dimension_numbers = #tpu.dot_dimension_numbers<[1], [1], [0], [0], [0, 0, 1, 0], [], []>} : vector<8x64xf32>, vector<8x64xf32>, vector<8x8xf32> -> vector<8x8xf32>
    %cst_44 = arith.constant 1.250000e-01 : f32
    %153 = vector.broadcast %cst_44 : f32 to vector<8x8xf32>
    %154 = arith.mulf %152, %153 : vector<8x8xf32>
    %cst_45 = arith.constant dense<0xFF800000> : vector<8xf32>
    %155 = vector.multi_reduction <maximumf>, %154, %cst_45 [1] : vector<8x8xf32> to vector<8xf32>
    %156 = vector.shape_cast %155 : vector<8xf32> to vector<8x1xf32>
    %157 = vector.broadcast %156 : vector<8x1xf32> to vector<8x8xf32>
    %158 = arith.subf %154, %157 : vector<8x8xf32>
    %159 = math.exp %158 : vector<8x8xf32>
    %cst_46 = arith.constant dense<0.000000e+00> : vector<8xf32>
    %160 = vector.multi_reduction <add>, %159, %cst_46 [1] : vector<8x8xf32> to vector<8xf32>
    %161 = vector.shape_cast %160 : vector<8xf32> to vector<8x1xf32>
    %162 = tpu.reciprocal %161 {approx = true} : vector<8x1xf32> -> vector<8x1xf32>
    %163 = vector.broadcast %162 : vector<8x1xf32> to vector<8x8xf32>
    %164 = arith.mulf %159, %163 : vector<8x8xf32>
    %cst_47 = arith.constant dense<0.000000e+00> : vector<8x64xf32>
    %165 = tpu.matmul %164, %151, %cst_47 {dimension_numbers = #tpu.dot_dimension_numbers<[1], [0], [0], [1], [0, 0, 1, 1], [], []>} : vector<8x8xf32>, vector<8x64xf32>, vector<8x64xf32> -> vector<8x64xf32>
    %166 = tpu.concatenate %148, %165 in 0 : vector<8x64xf32>, vector<8x64xf32> -> vector<16x64xf32>
    %167 = vector.extract_strided_slice %12 {offsets = [0, 256], sizes = [16, 64], strides = [1, 1]} : vector<16x512xf32> to vector<16x64xf32>
    %168 = vector.extract_strided_slice %13 {offsets = [0, 256], sizes = [16, 64], strides = [1, 1]} : vector<16x512xf32> to vector<16x64xf32>
    %169 = vector.extract_strided_slice %14 {offsets = [0, 256], sizes = [16, 64], strides = [1, 1]} : vector<16x512xf32> to vector<16x64xf32>
    %170 = vector.extract_strided_slice %167 {offsets = [0, 0], sizes = [8, 64], strides = [1, 1]} : vector<16x64xf32> to vector<8x64xf32>
    %171 = vector.extract_strided_slice %168 {offsets = [0, 0], sizes = [8, 64], strides = [1, 1]} : vector<16x64xf32> to vector<8x64xf32>
    %172 = vector.extract_strided_slice %169 {offsets = [0, 0], sizes = [8, 64], strides = [1, 1]} : vector<16x64xf32> to vector<8x64xf32>
    %cst_48 = arith.constant dense<0.000000e+00> : vector<8x8xf32>
    %173 = tpu.matmul %170, %171, %cst_48 {dimension_numbers = #tpu.dot_dimension_numbers<[1], [1], [0], [0], [0, 0, 1, 0], [], []>} : vector<8x64xf32>, vector<8x64xf32>, vector<8x8xf32> -> vector<8x8xf32>
    %cst_49 = arith.constant 1.250000e-01 : f32
    %174 = vector.broadcast %cst_49 : f32 to vector<8x8xf32>
    %175 = arith.mulf %173, %174 : vector<8x8xf32>
    %cst_50 = arith.constant dense<0xFF800000> : vector<8xf32>
    %176 = vector.multi_reduction <maximumf>, %175, %cst_50 [1] : vector<8x8xf32> to vector<8xf32>
    %177 = vector.shape_cast %176 : vector<8xf32> to vector<8x1xf32>
    %178 = vector.broadcast %177 : vector<8x1xf32> to vector<8x8xf32>
    %179 = arith.subf %175, %178 : vector<8x8xf32>
    %180 = math.exp %179 : vector<8x8xf32>
    %cst_51 = arith.constant dense<0.000000e+00> : vector<8xf32>
    %181 = vector.multi_reduction <add>, %180, %cst_51 [1] : vector<8x8xf32> to vector<8xf32>
    %182 = vector.shape_cast %181 : vector<8xf32> to vector<8x1xf32>
    %183 = tpu.reciprocal %182 {approx = true} : vector<8x1xf32> -> vector<8x1xf32>
    %184 = vector.broadcast %183 : vector<8x1xf32> to vector<8x8xf32>
    %185 = arith.mulf %180, %184 : vector<8x8xf32>
    %cst_52 = arith.constant dense<0.000000e+00> : vector<8x64xf32>
    %186 = tpu.matmul %185, %172, %cst_52 {dimension_numbers = #tpu.dot_dimension_numbers<[1], [0], [0], [1], [0, 0, 1, 1], [], []>} : vector<8x8xf32>, vector<8x64xf32>, vector<8x64xf32> -> vector<8x64xf32>
    %187 = vector.extract_strided_slice %167 {offsets = [8, 0], sizes = [8, 64], strides = [1, 1]} : vector<16x64xf32> to vector<8x64xf32>
    %188 = vector.extract_strided_slice %168 {offsets = [8, 0], sizes = [8, 64], strides = [1, 1]} : vector<16x64xf32> to vector<8x64xf32>
    %189 = vector.extract_strided_slice %169 {offsets = [8, 0], sizes = [8, 64], strides = [1, 1]} : vector<16x64xf32> to vector<8x64xf32>
    %cst_53 = arith.constant dense<0.000000e+00> : vector<8x8xf32>
    %190 = tpu.matmul %187, %188, %cst_53 {dimension_numbers = #tpu.dot_dimension_numbers<[1], [1], [0], [0], [0, 0, 1, 0], [], []>} : vector<8x64xf32>, vector<8x64xf32>, vector<8x8xf32> -> vector<8x8xf32>
    %cst_54 = arith.constant 1.250000e-01 : f32
    %191 = vector.broadcast %cst_54 : f32 to vector<8x8xf32>
    %192 = arith.mulf %190, %191 : vector<8x8xf32>
    %cst_55 = arith.constant dense<0xFF800000> : vector<8xf32>
    %193 = vector.multi_reduction <maximumf>, %192, %cst_55 [1] : vector<8x8xf32> to vector<8xf32>
    %194 = vector.shape_cast %193 : vector<8xf32> to vector<8x1xf32>
    %195 = vector.broadcast %194 : vector<8x1xf32> to vector<8x8xf32>
    %196 = arith.subf %192, %195 : vector<8x8xf32>
    %197 = math.exp %196 : vector<8x8xf32>
    %cst_56 = arith.constant dense<0.000000e+00> : vector<8xf32>
    %198 = vector.multi_reduction <add>, %197, %cst_56 [1] : vector<8x8xf32> to vector<8xf32>
    %199 = vector.shape_cast %198 : vector<8xf32> to vector<8x1xf32>
    %200 = tpu.reciprocal %199 {approx = true} : vector<8x1xf32> -> vector<8x1xf32>
    %201 = vector.broadcast %200 : vector<8x1xf32> to vector<8x8xf32>
    %202 = arith.mulf %197, %201 : vector<8x8xf32>
    %cst_57 = arith.constant dense<0.000000e+00> : vector<8x64xf32>
    %203 = tpu.matmul %202, %189, %cst_57 {dimension_numbers = #tpu.dot_dimension_numbers<[1], [0], [0], [1], [0, 0, 1, 1], [], []>} : vector<8x8xf32>, vector<8x64xf32>, vector<8x64xf32> -> vector<8x64xf32>
    %204 = tpu.concatenate %186, %203 in 0 : vector<8x64xf32>, vector<8x64xf32> -> vector<16x64xf32>
    %205 = vector.extract_strided_slice %12 {offsets = [0, 320], sizes = [16, 64], strides = [1, 1]} : vector<16x512xf32> to vector<16x64xf32>
    %206 = vector.extract_strided_slice %13 {offsets = [0, 320], sizes = [16, 64], strides = [1, 1]} : vector<16x512xf32> to vector<16x64xf32>
    %207 = vector.extract_strided_slice %14 {offsets = [0, 320], sizes = [16, 64], strides = [1, 1]} : vector<16x512xf32> to vector<16x64xf32>
    %208 = vector.extract_strided_slice %205 {offsets = [0, 0], sizes = [8, 64], strides = [1, 1]} : vector<16x64xf32> to vector<8x64xf32>
    %209 = vector.extract_strided_slice %206 {offsets = [0, 0], sizes = [8, 64], strides = [1, 1]} : vector<16x64xf32> to vector<8x64xf32>
    %210 = vector.extract_strided_slice %207 {offsets = [0, 0], sizes = [8, 64], strides = [1, 1]} : vector<16x64xf32> to vector<8x64xf32>
    %cst_58 = arith.constant dense<0.000000e+00> : vector<8x8xf32>
    %211 = tpu.matmul %208, %209, %cst_58 {dimension_numbers = #tpu.dot_dimension_numbers<[1], [1], [0], [0], [0, 0, 1, 0], [], []>} : vector<8x64xf32>, vector<8x64xf32>, vector<8x8xf32> -> vector<8x8xf32>
    %cst_59 = arith.constant 1.250000e-01 : f32
    %212 = vector.broadcast %cst_59 : f32 to vector<8x8xf32>
    %213 = arith.mulf %211, %212 : vector<8x8xf32>
    %cst_60 = arith.constant dense<0xFF800000> : vector<8xf32>
    %214 = vector.multi_reduction <maximumf>, %213, %cst_60 [1] : vector<8x8xf32> to vector<8xf32>
    %215 = vector.shape_cast %214 : vector<8xf32> to vector<8x1xf32>
    %216 = vector.broadcast %215 : vector<8x1xf32> to vector<8x8xf32>
    %217 = arith.subf %213, %216 : vector<8x8xf32>
    %218 = math.exp %217 : vector<8x8xf32>
    %cst_61 = arith.constant dense<0.000000e+00> : vector<8xf32>
    %219 = vector.multi_reduction <add>, %218, %cst_61 [1] : vector<8x8xf32> to vector<8xf32>
    %220 = vector.shape_cast %219 : vector<8xf32> to vector<8x1xf32>
    %221 = tpu.reciprocal %220 {approx = true} : vector<8x1xf32> -> vector<8x1xf32>
    %222 = vector.broadcast %221 : vector<8x1xf32> to vector<8x8xf32>
    %223 = arith.mulf %218, %222 : vector<8x8xf32>
    %cst_62 = arith.constant dense<0.000000e+00> : vector<8x64xf32>
    %224 = tpu.matmul %223, %210, %cst_62 {dimension_numbers = #tpu.dot_dimension_numbers<[1], [0], [0], [1], [0, 0, 1, 1], [], []>} : vector<8x8xf32>, vector<8x64xf32>, vector<8x64xf32> -> vector<8x64xf32>
    %225 = vector.extract_strided_slice %205 {offsets = [8, 0], sizes = [8, 64], strides = [1, 1]} : vector<16x64xf32> to vector<8x64xf32>
    %226 = vector.extract_strided_slice %206 {offsets = [8, 0], sizes = [8, 64], strides = [1, 1]} : vector<16x64xf32> to vector<8x64xf32>
    %227 = vector.extract_strided_slice %207 {offsets = [8, 0], sizes = [8, 64], strides = [1, 1]} : vector<16x64xf32> to vector<8x64xf32>
    %cst_63 = arith.constant dense<0.000000e+00> : vector<8x8xf32>
    %228 = tpu.matmul %225, %226, %cst_63 {dimension_numbers = #tpu.dot_dimension_numbers<[1], [1], [0], [0], [0, 0, 1, 0], [], []>} : vector<8x64xf32>, vector<8x64xf32>, vector<8x8xf32> -> vector<8x8xf32>
    %cst_64 = arith.constant 1.250000e-01 : f32
    %229 = vector.broadcast %cst_64 : f32 to vector<8x8xf32>
    %230 = arith.mulf %228, %229 : vector<8x8xf32>
    %cst_65 = arith.constant dense<0xFF800000> : vector<8xf32>
    %231 = vector.multi_reduction <maximumf>, %230, %cst_65 [1] : vector<8x8xf32> to vector<8xf32>
    %232 = vector.shape_cast %231 : vector<8xf32> to vector<8x1xf32>
    %233 = vector.broadcast %232 : vector<8x1xf32> to vector<8x8xf32>
    %234 = arith.subf %230, %233 : vector<8x8xf32>
    %235 = math.exp %234 : vector<8x8xf32>
    %cst_66 = arith.constant dense<0.000000e+00> : vector<8xf32>
    %236 = vector.multi_reduction <add>, %235, %cst_66 [1] : vector<8x8xf32> to vector<8xf32>
    %237 = vector.shape_cast %236 : vector<8xf32> to vector<8x1xf32>
    %238 = tpu.reciprocal %237 {approx = true} : vector<8x1xf32> -> vector<8x1xf32>
    %239 = vector.broadcast %238 : vector<8x1xf32> to vector<8x8xf32>
    %240 = arith.mulf %235, %239 : vector<8x8xf32>
    %cst_67 = arith.constant dense<0.000000e+00> : vector<8x64xf32>
    %241 = tpu.matmul %240, %227, %cst_67 {dimension_numbers = #tpu.dot_dimension_numbers<[1], [0], [0], [1], [0, 0, 1, 1], [], []>} : vector<8x8xf32>, vector<8x64xf32>, vector<8x64xf32> -> vector<8x64xf32>
    %242 = tpu.concatenate %224, %241 in 0 : vector<8x64xf32>, vector<8x64xf32> -> vector<16x64xf32>
    %243 = vector.extract_strided_slice %12 {offsets = [0, 384], sizes = [16, 64], strides = [1, 1]} : vector<16x512xf32> to vector<16x64xf32>
    %244 = vector.extract_strided_slice %13 {offsets = [0, 384], sizes = [16, 64], strides = [1, 1]} : vector<16x512xf32> to vector<16x64xf32>
    %245 = vector.extract_strided_slice %14 {offsets = [0, 384], sizes = [16, 64], strides = [1, 1]} : vector<16x512xf32> to vector<16x64xf32>
    %246 = vector.extract_strided_slice %243 {offsets = [0, 0], sizes = [8, 64], strides = [1, 1]} : vector<16x64xf32> to vector<8x64xf32>
    %247 = vector.extract_strided_slice %244 {offsets = [0, 0], sizes = [8, 64], strides = [1, 1]} : vector<16x64xf32> to vector<8x64xf32>
    %248 = vector.extract_strided_slice %245 {offsets = [0, 0], sizes = [8, 64], strides = [1, 1]} : vector<16x64xf32> to vector<8x64xf32>
    %cst_68 = arith.constant dense<0.000000e+00> : vector<8x8xf32>
    %249 = tpu.matmul %246, %247, %cst_68 {dimension_numbers = #tpu.dot_dimension_numbers<[1], [1], [0], [0], [0, 0, 1, 0], [], []>} : vector<8x64xf32>, vector<8x64xf32>, vector<8x8xf32> -> vector<8x8xf32>
    %cst_69 = arith.constant 1.250000e-01 : f32
    %250 = vector.broadcast %cst_69 : f32 to vector<8x8xf32>
    %251 = arith.mulf %249, %250 : vector<8x8xf32>
    %cst_70 = arith.constant dense<0xFF800000> : vector<8xf32>
    %252 = vector.multi_reduction <maximumf>, %251, %cst_70 [1] : vector<8x8xf32> to vector<8xf32>
    %253 = vector.shape_cast %252 : vector<8xf32> to vector<8x1xf32>
    %254 = vector.broadcast %253 : vector<8x1xf32> to vector<8x8xf32>
    %255 = arith.subf %251, %254 : vector<8x8xf32>
    %256 = math.exp %255 : vector<8x8xf32>
    %cst_71 = arith.constant dense<0.000000e+00> : vector<8xf32>
    %257 = vector.multi_reduction <add>, %256, %cst_71 [1] : vector<8x8xf32> to vector<8xf32>
    %258 = vector.shape_cast %257 : vector<8xf32> to vector<8x1xf32>
    %259 = tpu.reciprocal %258 {approx = true} : vector<8x1xf32> -> vector<8x1xf32>
    %260 = vector.broadcast %259 : vector<8x1xf32> to vector<8x8xf32>
    %261 = arith.mulf %256, %260 : vector<8x8xf32>
    %cst_72 = arith.constant dense<0.000000e+00> : vector<8x64xf32>
    %262 = tpu.matmul %261, %248, %cst_72 {dimension_numbers = #tpu.dot_dimension_numbers<[1], [0], [0], [1], [0, 0, 1, 1], [], []>} : vector<8x8xf32>, vector<8x64xf32>, vector<8x64xf32> -> vector<8x64xf32>
    %263 = vector.extract_strided_slice %243 {offsets = [8, 0], sizes = [8, 64], strides = [1, 1]} : vector<16x64xf32> to vector<8x64xf32>
    %264 = vector.extract_strided_slice %244 {offsets = [8, 0], sizes = [8, 64], strides = [1, 1]} : vector<16x64xf32> to vector<8x64xf32>
    %265 = vector.extract_strided_slice %245 {offsets = [8, 0], sizes = [8, 64], strides = [1, 1]} : vector<16x64xf32> to vector<8x64xf32>
    %cst_73 = arith.constant dense<0.000000e+00> : vector<8x8xf32>
    %266 = tpu.matmul %263, %264, %cst_73 {dimension_numbers = #tpu.dot_dimension_numbers<[1], [1], [0], [0], [0, 0, 1, 0], [], []>} : vector<8x64xf32>, vector<8x64xf32>, vector<8x8xf32> -> vector<8x8xf32>
    %cst_74 = arith.constant 1.250000e-01 : f32
    %267 = vector.broadcast %cst_74 : f32 to vector<8x8xf32>
    %268 = arith.mulf %266, %267 : vector<8x8xf32>
    %cst_75 = arith.constant dense<0xFF800000> : vector<8xf32>
    %269 = vector.multi_reduction <maximumf>, %268, %cst_75 [1] : vector<8x8xf32> to vector<8xf32>
    %270 = vector.shape_cast %269 : vector<8xf32> to vector<8x1xf32>
    %271 = vector.broadcast %270 : vector<8x1xf32> to vector<8x8xf32>
    %272 = arith.subf %268, %271 : vector<8x8xf32>
    %273 = math.exp %272 : vector<8x8xf32>
    %cst_76 = arith.constant dense<0.000000e+00> : vector<8xf32>
    %274 = vector.multi_reduction <add>, %273, %cst_76 [1] : vector<8x8xf32> to vector<8xf32>
    %275 = vector.shape_cast %274 : vector<8xf32> to vector<8x1xf32>
    %276 = tpu.reciprocal %275 {approx = true} : vector<8x1xf32> -> vector<8x1xf32>
    %277 = vector.broadcast %276 : vector<8x1xf32> to vector<8x8xf32>
    %278 = arith.mulf %273, %277 : vector<8x8xf32>
    %cst_77 = arith.constant dense<0.000000e+00> : vector<8x64xf32>
    %279 = tpu.matmul %278, %265, %cst_77 {dimension_numbers = #tpu.dot_dimension_numbers<[1], [0], [0], [1], [0, 0, 1, 1], [], []>} : vector<8x8xf32>, vector<8x64xf32>, vector<8x64xf32> -> vector<8x64xf32>
    %280 = tpu.concatenate %262, %279 in 0 : vector<8x64xf32>, vector<8x64xf32> -> vector<16x64xf32>
    %281 = vector.extract_strided_slice %12 {offsets = [0, 448], sizes = [16, 64], strides = [1, 1]} : vector<16x512xf32> to vector<16x64xf32>
    %282 = vector.extract_strided_slice %13 {offsets = [0, 448], sizes = [16, 64], strides = [1, 1]} : vector<16x512xf32> to vector<16x64xf32>
    %283 = vector.extract_strided_slice %14 {offsets = [0, 448], sizes = [16, 64], strides = [1, 1]} : vector<16x512xf32> to vector<16x64xf32>
    %284 = vector.extract_strided_slice %281 {offsets = [0, 0], sizes = [8, 64], strides = [1, 1]} : vector<16x64xf32> to vector<8x64xf32>
    %285 = vector.extract_strided_slice %282 {offsets = [0, 0], sizes = [8, 64], strides = [1, 1]} : vector<16x64xf32> to vector<8x64xf32>
    %286 = vector.extract_strided_slice %283 {offsets = [0, 0], sizes = [8, 64], strides = [1, 1]} : vector<16x64xf32> to vector<8x64xf32>
    %cst_78 = arith.constant dense<0.000000e+00> : vector<8x8xf32>
    %287 = tpu.matmul %284, %285, %cst_78 {dimension_numbers = #tpu.dot_dimension_numbers<[1], [1], [0], [0], [0, 0, 1, 0], [], []>} : vector<8x64xf32>, vector<8x64xf32>, vector<8x8xf32> -> vector<8x8xf32>
    %cst_79 = arith.constant 1.250000e-01 : f32
    %288 = vector.broadcast %cst_79 : f32 to vector<8x8xf32>
    %289 = arith.mulf %287, %288 : vector<8x8xf32>
    %cst_80 = arith.constant dense<0xFF800000> : vector<8xf32>
    %290 = vector.multi_reduction <maximumf>, %289, %cst_80 [1] : vector<8x8xf32> to vector<8xf32>
    %291 = vector.shape_cast %290 : vector<8xf32> to vector<8x1xf32>
    %292 = vector.broadcast %291 : vector<8x1xf32> to vector<8x8xf32>
    %293 = arith.subf %289, %292 : vector<8x8xf32>
    %294 = math.exp %293 : vector<8x8xf32>
    %cst_81 = arith.constant dense<0.000000e+00> : vector<8xf32>
    %295 = vector.multi_reduction <add>, %294, %cst_81 [1] : vector<8x8xf32> to vector<8xf32>
    %296 = vector.shape_cast %295 : vector<8xf32> to vector<8x1xf32>
    %297 = tpu.reciprocal %296 {approx = true} : vector<8x1xf32> -> vector<8x1xf32>
    %298 = vector.broadcast %297 : vector<8x1xf32> to vector<8x8xf32>
    %299 = arith.mulf %294, %298 : vector<8x8xf32>
    %cst_82 = arith.constant dense<0.000000e+00> : vector<8x64xf32>
    %300 = tpu.matmul %299, %286, %cst_82 {dimension_numbers = #tpu.dot_dimension_numbers<[1], [0], [0], [1], [0, 0, 1, 1], [], []>} : vector<8x8xf32>, vector<8x64xf32>, vector<8x64xf32> -> vector<8x64xf32>
    %301 = vector.extract_strided_slice %281 {offsets = [8, 0], sizes = [8, 64], strides = [1, 1]} : vector<16x64xf32> to vector<8x64xf32>
    %302 = vector.extract_strided_slice %282 {offsets = [8, 0], sizes = [8, 64], strides = [1, 1]} : vector<16x64xf32> to vector<8x64xf32>
    %303 = vector.extract_strided_slice %283 {offsets = [8, 0], sizes = [8, 64], strides = [1, 1]} : vector<16x64xf32> to vector<8x64xf32>
    %cst_83 = arith.constant dense<0.000000e+00> : vector<8x8xf32>
    %304 = tpu.matmul %301, %302, %cst_83 {dimension_numbers = #tpu.dot_dimension_numbers<[1], [1], [0], [0], [0, 0, 1, 0], [], []>} : vector<8x64xf32>, vector<8x64xf32>, vector<8x8xf32> -> vector<8x8xf32>
    %cst_84 = arith.constant 1.250000e-01 : f32
    %305 = vector.broadcast %cst_84 : f32 to vector<8x8xf32>
    %306 = arith.mulf %304, %305 : vector<8x8xf32>
    %cst_85 = arith.constant dense<0xFF800000> : vector<8xf32>
    %307 = vector.multi_reduction <maximumf>, %306, %cst_85 [1] : vector<8x8xf32> to vector<8xf32>
    %308 = vector.shape_cast %307 : vector<8xf32> to vector<8x1xf32>
    %309 = vector.broadcast %308 : vector<8x1xf32> to vector<8x8xf32>
    %310 = arith.subf %306, %309 : vector<8x8xf32>
    %311 = math.exp %310 : vector<8x8xf32>
    %cst_86 = arith.constant dense<0.000000e+00> : vector<8xf32>
    %312 = vector.multi_reduction <add>, %311, %cst_86 [1] : vector<8x8xf32> to vector<8xf32>
    %313 = vector.shape_cast %312 : vector<8xf32> to vector<8x1xf32>
    %314 = tpu.reciprocal %313 {approx = true} : vector<8x1xf32> -> vector<8x1xf32>
    %315 = vector.broadcast %314 : vector<8x1xf32> to vector<8x8xf32>
    %316 = arith.mulf %311, %315 : vector<8x8xf32>
    %cst_87 = arith.constant dense<0.000000e+00> : vector<8x64xf32>
    %317 = tpu.matmul %316, %303, %cst_87 {dimension_numbers = #tpu.dot_dimension_numbers<[1], [0], [0], [1], [0, 0, 1, 1], [], []>} : vector<8x8xf32>, vector<8x64xf32>, vector<8x64xf32> -> vector<8x64xf32>
    %318 = tpu.concatenate %300, %317 in 0 : vector<8x64xf32>, vector<8x64xf32> -> vector<16x64xf32>
    %319 = tpu.concatenate %52, %90, %128, %166, %204, %242, %280, %318 in 1 : vector<16x64xf32>, vector<16x64xf32>, vector<16x64xf32>, vector<16x64xf32>, vector<16x64xf32>, vector<16x64xf32>, vector<16x64xf32>, vector<16x64xf32> -> vector<16x512xf32>
    %320 = arith.truncf %319 : vector<16x512xf32> to vector<16x512xbf16>
    %c0_88 = arith.constant 0 : index
    %c0_89 = arith.constant 0 : index
    %c0_90 = arith.constant 0 : index
    %321 = vector.load %arg9[%c0_88, %c0_89, %c0_90] : memref<1x512x512xbf16, #tpu.memory_space<vmem>>, vector<1x512x512xbf16>
    %322 = vector.shape_cast %321 : vector<1x512x512xbf16> to vector<512x512xbf16>
    %cst_91 = arith.constant dense<0.000000e+00> : vector<16x512xf32>
    %323 = tpu.matmul %320, %322, %cst_91 {dimension_numbers = #tpu.dot_dimension_numbers<[1], [0], [0], [1], [0, 0, 1, 1], [], []>} : vector<16x512xbf16>, vector<512x512xbf16>, vector<16x512xf32> -> vector<16x512xf32>
    %c0_92 = arith.constant 0 : index
    %c0_93 = arith.constant 0 : index
    %c0_94 = arith.constant 0 : index
    %324 = vector.load %arg10[%c0_92, %c0_93, %c0_94] : memref<1x1x512xf32, #tpu.memory_space<vmem>>, vector<1x1x512xf32>
    %325 = vector.shape_cast %324 : vector<1x1x512xf32> to vector<1x512xf32>
    %326 = vector.broadcast %325 : vector<1x512xf32> to vector<16x512xf32>
    %327 = arith.addf %323, %326 : vector<16x512xf32>
    %328 = arith.addf %3, %327 : vector<16x512xf32>
    %c0_95 = arith.constant 0 : index
    %c0_96 = arith.constant 0 : index
    %c0_97 = arith.constant 0 : index
    %329 = vector.load %arg11[%c0_95, %c0_96, %c0_97] : memref<1x1x512xf32, #tpu.memory_space<vmem>>, vector<1x1x512xf32>
    %330 = vector.shape_cast %329 : vector<1x1x512xf32> to vector<1x512xf32>
    %c0_98 = arith.constant 0 : index
    %c0_99 = arith.constant 0 : index
    %c0_100 = arith.constant 0 : index
    %331 = vector.load %arg12[%c0_98, %c0_99, %c0_100] : memref<1x1x512xf32, #tpu.memory_space<vmem>>, vector<1x1x512xf32>
    %332 = vector.shape_cast %331 : vector<1x1x512xf32> to vector<1x512xf32>
    %cst_101 = arith.constant dense<0.000000e+00> : vector<16xf32>
    %333 = vector.multi_reduction <add>, %328, %cst_101 [1] : vector<16x512xf32> to vector<16xf32>
    %334 = vector.shape_cast %333 : vector<16xf32> to vector<16x1xf32>
    %cst_102 = arith.constant 5.120000e+02 : f32
    %335 = vector.broadcast %cst_102 : f32 to vector<16x1xf32>
    %336 = arith.divf %334, %335 : vector<16x1xf32>
    %337 = vector.broadcast %336 : vector<16x1xf32> to vector<16x512xf32>
    %338 = arith.subf %328, %337 : vector<16x512xf32>
    %339 = arith.mulf %338, %338 : vector<16x512xf32>
    %cst_103 = arith.constant dense<0.000000e+00> : vector<16xf32>
    %340 = vector.multi_reduction <add>, %339, %cst_103 [1] : vector<16x512xf32> to vector<16xf32>
    %341 = vector.shape_cast %340 : vector<16xf32> to vector<16x1xf32>
    %cst_104 = arith.constant 5.120000e+02 : f32
    %342 = vector.broadcast %cst_104 : f32 to vector<16x1xf32>
    %343 = arith.divf %341, %342 : vector<16x1xf32>
    %cst_105 = arith.constant 9.99999974E-6 : f32
    %344 = vector.broadcast %cst_105 : f32 to vector<16x1xf32>
    %345 = arith.addf %343, %344 : vector<16x1xf32>
    %346 = math.rsqrt %345 : vector<16x1xf32>
    %347 = vector.broadcast %346 : vector<16x1xf32> to vector<16x512xf32>
    %348 = arith.mulf %338, %347 : vector<16x512xf32>
    %349 = vector.broadcast %330 : vector<1x512xf32> to vector<16x512xf32>
    %350 = arith.mulf %348, %349 : vector<16x512xf32>
    %351 = vector.broadcast %332 : vector<1x512xf32> to vector<16x512xf32>
    %352 = arith.addf %350, %351 : vector<16x512xf32>
    %353 = arith.truncf %352 : vector<16x512xf32> to vector<16x512xbf16>
    %c0_106 = arith.constant 0 : index
    %c0_107 = arith.constant 0 : index
    %c0_108 = arith.constant 0 : index
    %354 = vector.load %arg13[%c0_106, %c0_107, %c0_108] : memref<1x512x2048xbf16, #tpu.memory_space<vmem>>, vector<1x512x2048xbf16>
    %355 = vector.shape_cast %354 : vector<1x512x2048xbf16> to vector<512x2048xbf16>
    %cst_109 = arith.constant dense<0.000000e+00> : vector<16x2048xf32>
    %356 = tpu.matmul %353, %355, %cst_109 {dimension_numbers = #tpu.dot_dimension_numbers<[1], [0], [0], [1], [0, 0, 1, 1], [], []>} : vector<16x512xbf16>, vector<512x2048xbf16>, vector<16x2048xf32> -> vector<16x2048xf32>
    %c0_110 = arith.constant 0 : index
    %c0_111 = arith.constant 0 : index
    %c0_112 = arith.constant 0 : index
    %357 = vector.load %arg14[%c0_110, %c0_111, %c0_112] : memref<1x1x2048xf32, #tpu.memory_space<vmem>>, vector<1x1x2048xf32>
    %358 = vector.shape_cast %357 : vector<1x1x2048xf32> to vector<1x2048xf32>
    %359 = vector.broadcast %358 : vector<1x2048xf32> to vector<16x2048xf32>
    %360 = arith.addf %356, %359 : vector<16x2048xf32>
    %cst_113 = arith.constant 0.000000e+00 : f32
    %361 = vector.broadcast %cst_113 : f32 to vector<16x2048xf32>
    %362 = arith.maximumf %360, %361 : vector<16x2048xf32>
    %363 = arith.truncf %362 : vector<16x2048xf32> to vector<16x2048xbf16>
    %c0_114 = arith.constant 0 : index
    %c0_115 = arith.constant 0 : index
    %c0_116 = arith.constant 0 : index
    %364 = vector.load %arg15[%c0_114, %c0_115, %c0_116] : memref<1x2048x512xbf16, #tpu.memory_space<vmem>>, vector<1x2048x512xbf16>
    %365 = vector.shape_cast %364 : vector<1x2048x512xbf16> to vector<2048x512xbf16>
    %cst_117 = arith.constant dense<0.000000e+00> : vector<16x512xf32>
    %366 = tpu.matmul %363, %365, %cst_117 {dimension_numbers = #tpu.dot_dimension_numbers<[1], [0], [0], [1], [0, 0, 1, 1], [], []>} : vector<16x2048xbf16>, vector<2048x512xbf16>, vector<16x512xf32> -> vector<16x512xf32>
    %c0_118 = arith.constant 0 : index
    %c0_119 = arith.constant 0 : index
    %c0_120 = arith.constant 0 : index
    %367 = vector.load %arg16[%c0_118, %c0_119, %c0_120] : memref<1x1x512xf32, #tpu.memory_space<vmem>>, vector<1x1x512xf32>
    %368 = vector.shape_cast %367 : vector<1x1x512xf32> to vector<1x512xf32>
    %369 = vector.broadcast %368 : vector<1x512xf32> to vector<16x512xf32>
    %370 = arith.addf %366, %369 : vector<16x512xf32>
    %371 = arith.addf %352, %370 : vector<16x512xf32>
    %c0_121 = arith.constant 0 : index
    %c0_122 = arith.constant 0 : index
    %c0_123 = arith.constant 0 : index
    %372 = vector.load %arg17[%c0_121, %c0_122, %c0_123] : memref<1x1x512xf32, #tpu.memory_space<vmem>>, vector<1x1x512xf32>
    %373 = vector.shape_cast %372 : vector<1x1x512xf32> to vector<1x512xf32>
    %c0_124 = arith.constant 0 : index
    %c0_125 = arith.constant 0 : index
    %c0_126 = arith.constant 0 : index
    %374 = vector.load %arg18[%c0_124, %c0_125, %c0_126] : memref<1x1x512xf32, #tpu.memory_space<vmem>>, vector<1x1x512xf32>
    %375 = vector.shape_cast %374 : vector<1x1x512xf32> to vector<1x512xf32>
    %cst_127 = arith.constant dense<0.000000e+00> : vector<16xf32>
    %376 = vector.multi_reduction <add>, %371, %cst_127 [1] : vector<16x512xf32> to vector<16xf32>
    %377 = vector.shape_cast %376 : vector<16xf32> to vector<16x1xf32>
    %cst_128 = arith.constant 5.120000e+02 : f32
    %378 = vector.broadcast %cst_128 : f32 to vector<16x1xf32>
    %379 = arith.divf %377, %378 : vector<16x1xf32>
    %380 = vector.broadcast %379 : vector<16x1xf32> to vector<16x512xf32>
    %381 = arith.subf %371, %380 : vector<16x512xf32>
    %382 = arith.mulf %381, %381 : vector<16x512xf32>
    %cst_129 = arith.constant dense<0.000000e+00> : vector<16xf32>
    %383 = vector.multi_reduction <add>, %382, %cst_129 [1] : vector<16x512xf32> to vector<16xf32>
    %384 = vector.shape_cast %383 : vector<16xf32> to vector<16x1xf32>
    %cst_130 = arith.constant 5.120000e+02 : f32
    %385 = vector.broadcast %cst_130 : f32 to vector<16x1xf32>
    %386 = arith.divf %384, %385 : vector<16x1xf32>
    %cst_131 = arith.constant 9.99999974E-6 : f32
    %387 = vector.broadcast %cst_131 : f32 to vector<16x1xf32>
    %388 = arith.addf %386, %387 : vector<16x1xf32>
    %389 = math.rsqrt %388 : vector<16x1xf32>
    %390 = vector.broadcast %389 : vector<16x1xf32> to vector<16x512xf32>
    %391 = arith.mulf %381, %390 : vector<16x512xf32>
    %392 = vector.broadcast %373 : vector<1x512xf32> to vector<16x512xf32>
    %393 = arith.mulf %391, %392 : vector<16x512xf32>
    %394 = vector.broadcast %375 : vector<1x512xf32> to vector<16x512xf32>
    %395 = arith.addf %393, %394 : vector<16x512xf32>
    %c0_132 = arith.constant 0 : index
    %c0_133 = arith.constant 0 : index
    %396 = vector.load %arg26[%c0_132, %c0_133] : memref<16x512xf32, #tpu.memory_space<vmem>>, vector<16x512xf32>
    tpu.vector_store %arg26[%c0_132, %c0_133], %395 {strides = array<i32>} : memref<16x512xf32, #tpu.memory_space<vmem>>, vector<16x512xf32>,
    %c2_i32 = arith.constant 2 : i32
    %397 = arith.cmpi eq, %arg0, %c2_i32 : i32
    %398 = arith.extui %397 : i1 to i32
    %c0_i32_134 = arith.constant 0 : i32
    %399 = arith.cmpi ne, %398, %c0_i32_134 : i32
    scf.if %399 {
      %400 = arith.truncf %395 : vector<16x512xf32> to vector<16x512xbf16>
      %c0_135 = arith.constant 0 : index
      %c0_136 = arith.constant 0 : index
      %401 = vector.load %arg19[%c0_135, %c0_136] : memref<512x256xbf16, #tpu.memory_space<vmem>>, vector<512x256xbf16>
      %cst_137 = arith.constant dense<0.000000e+00> : vector<16x256xf32>
      %402 = tpu.matmul %400, %401, %cst_137 {dimension_numbers = #tpu.dot_dimension_numbers<[1], [0], [0], [1], [0, 0, 1, 1], [], []>} : vector<16x512xbf16>, vector<512x256xbf16>, vector<16x256xf32> -> vector<16x256xf32>
      %c0_138 = arith.constant 0 : index
      %c0_139 = arith.constant 0 : index
      %403 = vector.load %arg20[%c0_138, %c0_139] : memref<1x256xf32, #tpu.memory_space<vmem>>, vector<1x256xf32>
      %404 = vector.broadcast %403 : vector<1x256xf32> to vector<16x256xf32>
      %405 = arith.addf %402, %404 : vector<16x256xf32>
      %406 = vector.extract_strided_slice %405 {offsets = [0, 0], sizes = [8, 256], strides = [1, 1]} : vector<16x256xf32> to vector<8x256xf32>
      %407 = vector.extract_strided_slice %405 {offsets = [8, 0], sizes = [8, 256], strides = [1, 1]} : vector<16x256xf32> to vector<8x256xf32>
      %408 = arith.subf %406, %407 : vector<8x256xf32>
      %409 = math.absf %408 : vector<8x256xf32>
      %c0_140 = arith.constant 0 : index
      %c0_141 = arith.constant 0 : index
      %410 = vector.load %arg21[%c0_140, %c0_141] : memref<256x16xf32, #tpu.memory_space<vmem>>, vector<256x16xf32>
      %cst_142 = arith.constant dense<0.000000e+00> : vector<8x16xf32>
      %411 = tpu.matmul %409, %410, %cst_142 {dimension_numbers = #tpu.dot_dimension_numbers<[1], [0], [0], [1], [0, 0, 1, 1], [], []>} : vector<8x256xf32>, vector<256x16xf32>, vector<8x16xf32> -> vector<8x16xf32>
      %c0_143 = arith.constant 0 : index
      %c0_144 = arith.constant 0 : index
      %412 = vector.load %arg22[%c0_143, %c0_144] : memref<1x16xf32, #tpu.memory_space<vmem>>, vector<1x16xf32>
      %413 = vector.broadcast %412 : vector<1x16xf32> to vector<8x16xf32>
      %414 = arith.addf %411, %413 : vector<8x16xf32>
      %cst_145 = arith.constant 0.000000e+00 : f32
      %415 = vector.broadcast %cst_145 : f32 to vector<8x16xf32>
      %416 = arith.maximumf %414, %415 : vector<8x16xf32>
      %c0_146 = arith.constant 0 : index
      %c0_147 = arith.constant 0 : index
      %417 = vector.load %arg23[%c0_146, %c0_147] : memref<1x16xf32, #tpu.memory_space<vmem>>, vector<1x16xf32>
      %418 = vector.broadcast %417 : vector<1x16xf32> to vector<8x16xf32>
      %419 = arith.mulf %416, %418 : vector<8x16xf32>
      %cst_148 = arith.constant dense<0.000000e+00> : vector<8xf32>
      %420 = vector.multi_reduction <add>, %419, %cst_148 [1] : vector<8x16xf32> to vector<8xf32>
      %421 = vector.shape_cast %420 : vector<8xf32> to vector<8x1xf32>
      %c0_149 = arith.constant 0 : index
      %c0_150 = arith.constant 0 : index
      %422 = vector.load %arg24[%c0_149, %c0_150] : memref<1x1xf32, #tpu.memory_space<vmem>>, vector<1x1xf32>
      %423 = vector.broadcast %422 : vector<1x1xf32> to vector<8x1xf32>
      %424 = arith.addf %421, %423 : vector<8x1xf32>
      %425 = arith.negf %424 : vector<8x1xf32>
      %426 = math.exp %425 : vector<8x1xf32>
      %cst_151 = arith.constant 1.000000e+00 : f32
      %427 = vector.broadcast %cst_151 : f32 to vector<8x1xf32>
      %428 = arith.addf %427, %426 : vector<8x1xf32>
      %429 = arith.divf %427, %428 : vector<8x1xf32>
      %c0_152 = arith.constant 0 : index
      %c0_153 = arith.constant 0 : index
      %430 = vector.load %arg25[%c0_152, %c0_153] : memref<8x1xf32, #tpu.memory_space<vmem>>, vector<8x1xf32>
      tpu.vector_store %arg25[%c0_152, %c0_153], %429 {strides = array<i32>} : memref<8x1xf32, #tpu.memory_space<vmem>>, vector<8x1xf32>,
    } else {
    }
    return
  }
  func.func @transform_0(%arg0: i32) -> (i32, i32) {
    %c0_i32 = arith.constant 0 : i32
    %c0_i32_0 = arith.constant 0 : i32
    %c0_i32_1 = arith.constant 0 : i32
    return %c0_i32, %c0_i32_0 : i32, i32
  }
  func.func @transform_1(%arg0: i32) -> (i32, i32) {
    %c0_i32 = arith.constant 0 : i32
    %c0_i32_0 = arith.constant 0 : i32
    %c0_i32_1 = arith.constant 0 : i32
    return %c0_i32, %c0_i32_0 : i32, i32
  }
  func.func @transform_2(%arg0: i32) -> (i32, i32) {
    %c0_i32 = arith.constant 0 : i32
    %c0_i32_0 = arith.constant 0 : i32
    %c0_i32_1 = arith.constant 0 : i32
    return %c0_i32, %c0_i32_0 : i32, i32
  }
  func.func @transform_3(%arg0: i32) -> (i32, i32) {
    %c0_i32 = arith.constant 0 : i32
    %c0_i32_0 = arith.constant 0 : i32
    %c0_i32_1 = arith.constant 0 : i32
    return %c0_i32, %c0_i32_0 : i32, i32
  }
  func.func @transform_4(%arg0: i32) -> (i32, i32) {
    %c0_i32 = arith.constant 0 : i32
    %c0_i32_0 = arith.constant 0 : i32
    %c0_i32_1 = arith.constant 0 : i32
    return %c0_i32, %c0_i32_0 : i32, i32
  }
  func.func @transform_5(%arg0: i32) -> (i32, i32) {
    %c0_i32 = arith.constant 0 : i32
    %c0_i32_0 = arith.constant 0 : i32
    %c0_i32_1 = arith.constant 0 : i32
    return %c0_i32, %c0_i32_0 : i32, i32
  }
  func.func @transform_6(%arg0: i32) -> (i32, i32, i32) {
    %c0_i32 = arith.constant 0 : i32
    %c0_i32_0 = arith.constant 0 : i32
    %c0_i32_1 = arith.constant 0 : i32
    return %arg0, %c0_i32, %c0_i32_0 : i32, i32, i32
  }
  func.func @transform_7(%arg0: i32) -> (i32, i32, i32) {
    %c0_i32 = arith.constant 0 : i32
    %c0_i32_0 = arith.constant 0 : i32
    %c0_i32_1 = arith.constant 0 : i32
    return %arg0, %c0_i32, %c0_i32_0 : i32, i32, i32
  }
  func.func @transform_8(%arg0: i32) -> (i32, i32, i32) {
    %c0_i32 = arith.constant 0 : i32
    %c0_i32_0 = arith.constant 0 : i32
    %c0_i32_1 = arith.constant 0 : i32
    return %arg0, %c0_i32, %c0_i32_0 : i32, i32, i32
  }
  func.func @transform_9(%arg0: i32) -> (i32, i32, i32) {
    %c0_i32 = arith.constant 0 : i32
    %c0_i32_0 = arith.constant 0 : i32
    %c0_i32_1 = arith.constant 0 : i32
    return %arg0, %c0_i32, %c0_i32_0 : i32, i32, i32
  }
  func.func @transform_10(%arg0: i32) -> (i32, i32, i32) {
    %c0_i32 = arith.constant 0 : i32
    %c0_i32_0 = arith.constant 0 : i32
    %c0_i32_1 = arith.constant 0 : i32
    return %arg0, %c0_i32, %c0_i32_0 : i32, i32, i32
  }
  func.func @transform_11(%arg0: i32) -> (i32, i32, i32) {
    %c0_i32 = arith.constant 0 : i32
    %c0_i32_0 = arith.constant 0 : i32
    %c0_i32_1 = arith.constant 0 : i32
    return %arg0, %c0_i32, %c0_i32_0 : i32, i32, i32
  }
  func.func @transform_12(%arg0: i32) -> (i32, i32, i32) {
    %c0_i32 = arith.constant 0 : i32
    %c0_i32_0 = arith.constant 0 : i32
    %c0_i32_1 = arith.constant 0 : i32
    return %arg0, %c0_i32, %c0_i32_0 : i32, i32, i32
  }
  func.func @transform_13(%arg0: i32) -> (i32, i32, i32) {
    %c0_i32 = arith.constant 0 : i32
    %c0_i32_0 = arith.constant 0 : i32
    %c0_i32_1 = arith.constant 0 : i32
    return %arg0, %c0_i32, %c0_i32_0 : i32, i32, i32
  }
  func.func @transform_14(%arg0: i32) -> (i32, i32, i32) {
    %c0_i32 = arith.constant 0 : i32
    %c0_i32_0 = arith.constant 0 : i32
    %c0_i32_1 = arith.constant 0 : i32
    return %arg0, %c0_i32, %c0_i32_0 : i32, i32, i32
  }
  func.func @transform_15(%arg0: i32) -> (i32, i32, i32) {
    %c0_i32 = arith.constant 0 : i32
    %c0_i32_0 = arith.constant 0 : i32
    %c0_i32_1 = arith.constant 0 : i32
    return %arg0, %c0_i32, %c0_i32_0 : i32, i32, i32
  }
  func.func @transform_16(%arg0: i32) -> (i32, i32, i32) {
    %c0_i32 = arith.constant 0 : i32
    %c0_i32_0 = arith.constant 0 : i32
    %c0_i32_1 = arith.constant 0 : i32
    return %arg0, %c0_i32, %c0_i32_0 : i32, i32, i32
  }
  func.func @transform_17(%arg0: i32) -> (i32, i32, i32) {
    %c0_i32 = arith.constant 0 : i32
    %c0_i32_0 = arith.constant 0 : i32
    %c0_i32_1 = arith.constant 0 : i32
    return %arg0, %c0_i32, %c0_i32_0 : i32, i32, i32
  }
  func.func @transform_18(%arg0: i32) -> (i32, i32) {
    %c0_i32 = arith.constant 0 : i32
    %c0_i32_0 = arith.constant 0 : i32
    %c0_i32_1 = arith.constant 0 : i32
    return %c0_i32, %c0_i32_0 : i32, i32
  }
  func.func @transform_19(%arg0: i32) -> (i32, i32) {
    %c0_i32 = arith.constant 0 : i32
    %c0_i32_0 = arith.constant 0 : i32
    %c0_i32_1 = arith.constant 0 : i32
    return %c0_i32, %c0_i32_0 : i32, i32
  }
  func.func @transform_20(%arg0: i32) -> (i32, i32) {
    %c0_i32 = arith.constant 0 : i32
    %c0_i32_0 = arith.constant 0 : i32
    %c0_i32_1 = arith.constant 0 : i32
    return %c0_i32, %c0_i32_0 : i32, i32
  }
  func.func @transform_21(%arg0: i32) -> (i32, i32) {
    %c0_i32 = arith.constant 0 : i32
    %c0_i32_0 = arith.constant 0 : i32
    %c0_i32_1 = arith.constant 0 : i32
    return %c0_i32, %c0_i32_0 : i32, i32
  }
  func.func @transform_22(%arg0: i32) -> (i32, i32) {
    %c0_i32 = arith.constant 0 : i32
    %c0_i32_0 = arith.constant 0 : i32
    %c0_i32_1 = arith.constant 0 : i32
    return %c0_i32, %c0_i32_0 : i32, i32
  }
  func.func @transform_23(%arg0: i32) -> (i32, i32) {
    %c0_i32 = arith.constant 0 : i32
    %c0_i32_0 = arith.constant 0 : i32
    %c0_i32_1 = arith.constant 0 : i32
    return %c0_i32, %c0_i32_0 : i32, i32
  }
  func.func @transform_24(%arg0: i32) -> (i32, i32) {
    %c0_i32 = arith.constant 0 : i32
    %c0_i32_0 = arith.constant 0 : i32
    %c0_i32_1 = arith.constant 0 : i32
    return %c0_i32, %c0_i32_0 : i32, i32
  }
}

</mosaic_0001>

<bundles_post_ra>
// kernel: snn_forward.1
= control target key start
LH: loop header
LB: loop body
LE: loop exit
PB: predicated region body
PF: predicated region fallthrough
CT: control target
= control target key end

     0   :  { %s25107_s0 = inlined_call_operand.hbm [shape: f32[8,32], index: 0, kind: input, shape index: {}]   ;;  %s25108_s1 = inlined_call_operand.hbm [shape: f32[8,48], index: 1, kind: input, shape index: {}]   ;;  %s25109_s2 = inlined_call_operand.hbm [shape: f32[32,512], index: 2, kind: input, shape index: {}]   ;;  %s25110_s3 = inlined_call_operand.hbm [shape: f32[1,512], index: 3, kind: input, shape index: {}]   ;;  %s25111_s4 = inlined_call_operand.hbm [shape: f32[48,512], index: 4, kind: input, shape index: {}]   ;;  %s25112_s5 = inlined_call_operand.hbm [shape: f32[1,512], index: 5, kind: input, shape index: {}]   ;;  %s25113_s6 = inlined_call_operand.hbm [shape: bf16[3,512,1536], index: 6, kind: input, shape index: {}]   ;;  %s25114_s7 = inlined_call_operand.hbm [shape: f32[3,1,1536], index: 7, kind: input, shape index: {}]   ;;  %s25115_s8 = inlined_call_operand.hbm [shape: bf16[3,512,512], index: 8, kind: input, shape index: {}]   ;;  %s25116_s9 = inlined_call_operand.hbm [shape: f32[3,1,512], index: 9, kind: input, shape index: {}]   ;;  %s25117_s10 = inlined_call_operand.hbm [shape: f32[3,1,512], index: 10, kind: input, shape index: {}]   ;;  %s25118_s11 = inlined_call_operand.hbm [shape: f32[3,1,512], index: 11, kind: input, shape index: {}]   ;;  %s25119_s12 = inlined_call_operand.hbm [shape: bf16[3,512,2048], index: 12, kind: input, shape index: {}]   ;;  %s25120_s13 = inlined_call_operand.hbm [shape: f32[3,1,2048], index: 13, kind: input, shape index: {}]   ;;  %s25121_s14 = inlined_call_operand.hbm [shape: bf16[3,2048,512], index: 14, kind: input, shape index: {}]   ;;  %s25122_s15 = inlined_call_operand.hbm [shape: f32[3,1,512], index: 15, kind: input, shape index: {}]   ;;  %s25123_s16 = inlined_call_operand.hbm [shape: f32[3,1,512], index: 16, kind: input, shape index: {}]   ;;  %s25124_s17 = inlined_call_operand.hbm [shape: f32[3,1,512], index: 17, kind: input, shape index: {}]   ;;  %s25125_s18 = inlined_call_operand.hbm [shape: bf16[512,256], index: 18, kind: input, shape index: {}]   ;;  %s25126_s19 = inlined_call_operand.hbm [shape: f32[1,256], index: 19, kind: input, shape index: {}]   ;;  %s25127_s20 = inlined_call_operand.vmem [shape: f32[256,16], index: 20, kind: input, shape index: {}]   ;;  %s25128_s21 = inlined_call_operand.hbm [shape: f32[1,16], index: 21, kind: input, shape index: {}]   ;;  %s25129_s22 = inlined_call_operand.hbm [shape: f32[1,16], index: 22, kind: input, shape index: {}]   ;;  %s25130_s23 = inlined_call_operand.<no memory space> [shape: f32[1,1], index: 23, kind: input, shape index: {}]   ;;  %s25131_s24 = inlined_call_operand.vmem [shape: f32[8,1], index: 24, kind: output, shape index: {}]  }
   0x1   :  { %25180 = sst [smem:[#allocation60_spill]] %s25107_s0  ;;  %v29_v0 = vstv %s25130_s23 }
   0x2   :  { %25181 = sst [smem:[#allocation61_spill]] %s25108_s1  ;;  %30 = vst [vmem:[#allocation3] sm:$0x1] %v29_v0 }
   0x3   :  { %25182 = sst [smem:[#allocation62_spill]] %s25109_s2 }
   0x4   :  { %25183 = sst [smem:[#allocation63_spill]] %s25110_s3 }
   0x5   :  { %25184 = sst [smem:[#allocation64_spill]] %s25111_s4 }
   0x6   :  { %25185 = sst [smem:[#allocation65_spill]] %s25112_s5 }
   0x7   :  { %25186 = sst [smem:[#allocation66_spill]] %s25113_s6 }
   0x8   :  { %25187 = sst [smem:[#allocation67_spill]] %s25114_s7 }
   0x9   :  { %25188 = sst [smem:[#allocation68_spill]] %s25115_s8 }
   0xa   :  { %25189 = sst [smem:[#allocation69_spill]] %s25116_s9 }
   0xb   :  { %25190 = sst [smem:[#allocation70_spill]] %s25122_s15 }
   0xc   :  { %25191 = sst [smem:[#allocation71_spill]] %s25123_s16 }
   0xd   :  { %25192 = sst [smem:[#allocation72_spill]] %s25124_s17 }
   0xe   :  { %25193 = sst [smem:[#allocation73_spill]] %s25125_s18 }
   0xf   :  { %25194 = sst [smem:[#allocation74_spill]] %s25126_s19 }
  0x10   :  { %25195 = sst [smem:[#allocation75_spill]] %s25127_s20 }
  0x11   :  { %25196 = sst [smem:[#allocation76_spill]] %s25128_s21 }
  0x12   :  { %25197 = sst [smem:[#allocation77_spill]] %s25129_s22 }
  0x13   :  { %25198 = sst [smem:[#allocation78_spill]] %s25131_s24 }
  0x14   :  { %31 = vsyncpa [#allocation5], 0 }
  0x15   :  { %32 = vsyncpa [#allocation7], 0 }
  0x16   :  { %33 = vsyncpa [#allocation10], 0 }
  0x17   :  { %34 = vsyncpa [#allocation13], 0 }
  0x18   :  { %35 = vsyncpa [#allocation30], 0  ;;  %s21870_s27 = smov 0   ;;  %s21872_s28 = smov 0  }
  0x19   :  { %s21874_s6 = smov 0   ;;  %s21876_s2 = smov 0  }
  0x1a LB: > { %25199 = sst [smem:[#allocation40_spill]] %s21696_s28  ;;  %s21706_s23 = smov [#allocation4]   ;;  %s21704_s2 = sphi %s21876_s2, %s25297_s2   ;;  %s21700_s6 = sphi %s21874_s6, %s25300_s6   ;;  %s21696_s28 = sphi %s21872_s28, %s25299_s28   ;;  %s21692_s27 = sphi %s21870_s27, %s25298_s27  }
  0x1b   : > { %25200 = sst [smem:[#allocation41_spill]] %s21700_s6  ;;  %s644_s29 = sshll.u32 %s21706_s23, 4  ;;  %s645_s29 = int_to_ptr.vmem [resolvable:$true] %s644_s29 }
  0x1c   : > { %s21891_s0 = sadd.s32 4294967295, %s21704_s2   ;;  %p17095_p0 = scmp.ge.s32.totalorder %s21704_s2, 1 }
  0x1d   : > { %25201 = sst [smem:[#allocation42_spill]] %s21891_s0  ;;  %p25144_p1 = scmp.eq.s32.totalorder %s21891_s0, 0 }
  0x1e   : > { %p631_p2 = scmp.lt.s32.totalorder %s21704_s2, 4  ;;  %s21910_s3 = sadd.s32 1, %s21704_s2  }
  0x1f   : > { %25205 = sst [smem:[#allocation44_spill]] %s21910_s3  ;;  %s174_s25 = sadd.s32 1, %s21700_s6 }
  0x20   : > { %p21897_p4 = pnand %p17095_p0, %p631_p2  ;;  %s171_s8 = ssub.s32 %s21704_s2, %s21910_s3 }
  0x21   : > { %s21053_s1 = scalar_lea.vmem %s645_s29, 128  ;;  %p21061_p11 = scmp.lt.s32.totalorder %s645_s29, %s645_s29 }
  0x22   : > { %s25202_s7 = scalar_select %p21897_p4, 1, 0 }
  0x23   : > { %p19159_p5 = pneg %p21897_p4  ;;  %p21054_p8 = scmp.ne.s32.totalorder %s645_s29, %s21053_s1 }
  0x24   : > { %25203 = sst [smem:[#allocation43_spill]] %s25202_s7  ;;  %p21062_p12 = scmp.lt.s32.totalorder %s21053_s1, %s21053_s1 }
  0x25   : > { %p21905_p6 = pnand %p19159_p5, %p25144_p1 }
  0x26   : > { %p21063_p13 = por %p21062_p12, %p21061_p11 }
  0x27   : > { %s25204_s30 = scalar_select %p21905_p6, 1, 0 }
  0x28   : > { %p21917_p7 = pneg %p21905_p6 }
  0x2a   : > { %s25206_s4 = scalar_select %p21917_p7, 1, 0 }
  0x2b   : > { %p21056_p9 = pnand %p21054_p8, %p21917_p7 }
  0x2d   : > { %p21057_p10 = pneg %p21056_p9 }
  0x2f   : > { %p21064_p0 = pnand %p21063_p13, %p21057_p10 }
  0x31   : > { %21067 = shalt.err (!%p21064_p0)
}
  0x32   : > { %s25207_s23 = sld [smem:[#allocation60_spill]]  ;;  %p172_p2 = scmp.eq.s32.totalorder %s171_s8, 0 }
  0x33   : > { %p181_p5 = scmp.ne.s32.totalorder %s21700_s6, %s21696_s28  ;;  %p182_p8 = scmp.eq.s32.totalorder %s21704_s2, 0 }
  0x34   : > { %p187_p9 = scmp.ne.s32.totalorder %s21696_s28, %s21692_s27  ;;  %p19237_p12 = scmp.lt.s32.totalorder %s21704_s2, 3 }
  0x35   : > { %s21934_s1 = scalar_select %p172_p2, %s21700_s6, %s174_s25  }
  0x36   : > { %p183_p10 = por %p182_p8, %p181_p5  ;;  %p21938_p11 = por %p25144_p1, %p187_p9 }
  0x37   : > { %25208 = sst [smem:[#allocation45_spill]] %s21934_s1  ;;  %s766_s26 = sand.u32 1, %s21704_s2  }
  0x38   : > { %19162 = dma.hbm_to_vmem [thread:$0]  (!%p21905_p6), %s25207_s23, 128, %s645_s29, [#allocation5]  }
  0x39   : > { %s25209_s5 = scalar_select %p21938_p11, 1, 0 }
  0x3a   : > { %s21945_s3 = sand.u32 1, %s21700_s6   ;;  %p21948_p13 = pnand %p19237_p12, %p183_p10 }
  0x3b   : > { %25210 = sst [smem:[#allocation46_spill]] %s25209_s5  ;;  %s19089_s24 = smul.u32 3072, %s21945_s3 }
  0x3c   : > { %s25211_s29 = scalar_select %p21948_p13, 1, 0 }
  0x3d   : > { %s19090_s27 = smul.u32 49152, %s21704_s2  ;;  %s25212_s23 = sld [smem:[#allocation66_spill]] }
  0x3e   : > { %s770_s20 = scalar_lea.vmem [#allocation14], %s19089_s24  ;;  %s21960_s6 = scalar_lea.sflag [#allocation5], %s766_s26 }
  0x3f   : > { %s777_s5 = sshll.u32 %s770_s20, 4  ;;  %p21966_p2 = pneg %p21948_p13  ;;  %s21958_s5 = int_to_ptr.vmem [resolvable:$true] %s777_s5 }
  0x41   : > { %s25213_s0 = scalar_select %p21966_p2, 1, 0 }
  0x43   : > { %s21956_s1 = scalar_lea.hbm %s25212_s23, %s19090_s27  ;;  %s21073_s24 = scalar_lea.hbm %s25212_s23, 147456 }
  0x44   : > { %s21068_s28 = scalar_lea.hbm %s21956_s1, 49152  ;;  %p21074_p9 = scmp.lt.s32.totalorder %s21956_s1, %s25212_s23 }
  0x45   : > { %p21069_p0 = scmp.ne.s32.totalorder %s21956_s1, %s21068_s28  ;;  %p21075_p10 = scmp.lt.s32.totalorder %s21073_s24, %s21068_s28 }
  0x47   : > { %p21071_p5 = pnand %p21966_p2, %p21069_p0  ;;  %p21076_p12 = por %p21075_p10, %p21074_p9 }
  0x49   : > { %p21072_p8 = pneg %p21071_p5 }
  0x4b   : > { %p21077_p3 = pnand %p21076_p12, %p21072_p8 }
  0x4d   : > { %21080 = shalt.err (!%p21077_p3)
}
  0x4e   : > { %s21081_s26 = scalar_lea.vmem %s21958_s5, 49152  ;;  %s21707_s7 = smov [#allocation14]  }
  0x4f   : > { %p21082_p1 = scmp.ne.s32.totalorder %s21958_s5, %s21081_s26  ;;  %s21086_s27 = sshll.u32 %s21707_s7, 4  ;;  %s21087_s27 = int_to_ptr.vmem [resolvable:$false] %s21086_s27 }
  0x50   : > { %s21088_s25 = scalar_lea.vmem %s21087_s27, 98304  ;;  %p21089_p11 = scmp.lt.s32.totalorder %s21958_s5, %s21087_s27 }
  0x51   : > { %p21084_p0 = pnand %p21082_p1, %p21966_p2  ;;  %p21090_p4 = scmp.lt.s32.totalorder %s21088_s25, %s21081_s26 }
  0x53   : > { %p21085_p5 = pneg %p21084_p0  ;;  %p21091_p6 = por %p21090_p4, %p21089_p11 }
  0x55   : > { %p21092_p7 = pnand %p21091_p6, %p21085_p5 }
  0x57   : > { %21095 = shalt.err (!%p21092_p7)
}
  0x58   : > { %s21708_s28 = smov 768   ;;  %s21709_s24 = smov 48  }
  0x59   : > { %19193 = dma.hbm_to_vmem [thread:$0]  (!%p21948_p13), %s21956_s1, 49152, %s21958_s5, %s21960_s6, %s21708_s28, %s21708_s28, %s21709_s24  }
  0x5a   : > { %s19091_s7 = smul.u32 12, %s21945_s3  ;;  %s17109_s20 = sshll.u32 %s21945_s3, 10 }
  0x5b   : > { %s19092_s8 = smul.u32 192, %s21704_s2  ;;  %s18820_s26 = sshll.u32 %s21704_s2, 14 }
  0x5c   : > { %s25214_s23 = sld [smem:[#allocation67_spill]]  ;;  %s791_s17 = scalar_lea.vmem [#allocation15], %s19091_s7 }
  0x5d   : > { %s799_s21 = sshll.u32 %s791_s17, 4  ;;  %s25215_s16 = sld [smem:[#allocation68_spill]]  ;;  %s800_s21 = int_to_ptr.vmem [resolvable:$true] %s799_s21 }
  0x62   : > { %s21996_s22 = scalar_lea.hbm %s25214_s23, %s19092_s8  ;;  %s21101_s24 = scalar_lea.hbm %s25214_s23, 576 }
  0x63   : > { %s22001_s15 = scalar_lea.hbm %s25215_s16, %s18820_s26  ;;  %s21096_s1 = scalar_lea.hbm %s21996_s22, 192 }
  0x64   : > { %p21097_p1 = scmp.ne.s32.totalorder %s21996_s22, %s21096_s1  ;;  %p21102_p6 = scmp.lt.s32.totalorder %s21996_s22, %s25214_s23 }
  0x65   : > { %p21103_p7 = scmp.lt.s32.totalorder %s21101_s24, %s21096_s1 }
  0x66   : > { %p21099_p3 = pnand %p21097_p1, %p21966_p2 }
  0x67   : > { %p21104_p11 = por %p21103_p7, %p21102_p6 }
  0x68   : > { %p21100_p4 = pneg %p21099_p3 }
  0x6a   : > { %p21105_p8 = pnand %p21104_p11, %p21100_p4 }
  0x6c   : > { %21108 = shalt.err (!%p21105_p8)
}
  0x6d   : > { %s21109_s17 = scalar_lea.vmem %s800_s21, 192  ;;  %s21710_s18 = smov [#allocation15]  }
  0x6e   : > { %p21110_p9 = scmp.ne.s32.totalorder %s800_s21, %s21109_s17  ;;  %s21114_s19 = sshll.u32 %s21710_s18, 4  ;;  %s21115_s19 = int_to_ptr.vmem [resolvable:$false] %s21114_s19 }
  0x6f   : > { %s21116_s7 = scalar_lea.vmem %s21115_s19, 384  ;;  %p21117_p0 = scmp.lt.s32.totalorder %s800_s21, %s21115_s19 }
  0x70   : > { %p21112_p10 = pnand %p21110_p9, %p21966_p2  ;;  %p21118_p5 = scmp.lt.s32.totalorder %s21116_s7, %s21109_s17 }
  0x72   : > { %p21113_p12 = pneg %p21112_p10  ;;  %p21119_p1 = por %p21118_p5, %p21117_p0 }
  0x74   : > { %p21120_p3 = pnand %p21119_p1, %p21113_p12 }
  0x76   : > { %21123 = shalt.err (!%p21120_p3)
}
  0x77   : > { %19196 = dma.hbm_to_vmem [thread:$0]  (!%p21948_p13), %s21996_s22, 192, %s800_s21, %s21960_s6  }
  0x78   : > { %s810_s26 = scalar_lea.vmem [#allocation16], %s17109_s20  ;;  %s21124_s1 = scalar_lea.hbm %s22001_s15, 16384 }
  0x79   : > { %s817_s25 = sshll.u32 %s810_s26, 4  ;;  %p21125_p4 = scmp.ne.s32.totalorder %s22001_s15, %s21124_s1  ;;  %s22022_s25 = int_to_ptr.vmem [resolvable:$true] %s817_s25 }
  0x7a   : > { %s21129_s24 = scalar_lea.hbm %s25215_s16, 49152  ;;  %p21130_p11 = scmp.lt.s32.totalorder %s22001_s15, %s25215_s16 }
  0x7b   : > { %p21127_p6 = pnand %p21125_p4, %p21966_p2  ;;  %p21131_p8 = scmp.lt.s32.totalorder %s21129_s24, %s21124_s1 }
  0x7d   : > { %p21128_p7 = pneg %p21127_p6  ;;  %p21132_p9 = por %p21131_p8, %p21130_p11 }
  0x7f   : > { %p21133_p10 = pnand %p21132_p9, %p21128_p7 }
  0x81   : > { %21136 = shalt.err (!%p21133_p10)
}
  0x82   : > { %s21137_s21 = scalar_lea.vmem %s22022_s25, 16384  ;;  %s21711_s22 = smov [#allocation16]  }
  0x83   : > { %p21138_p12 = scmp.ne.s32.totalorder %s22022_s25, %s21137_s21  ;;  %s21142_s20 = sshll.u32 %s21711_s22, 4  ;;  %s21143_s20 = int_to_ptr.vmem [resolvable:$false] %s21142_s20 }
  0x84   : > { %s21144_s17 = scalar_lea.vmem %s21143_s20, 32768  ;;  %p21145_p1 = scmp.lt.s32.totalorder %s22022_s25, %s21143_s20 }
  0x85   : > { %p21140_p0 = pnand %p21138_p12, %p21966_p2  ;;  %p21146_p3 = scmp.lt.s32.totalorder %s21144_s17, %s21137_s21 }
  0x87   : > { %p21141_p5 = pneg %p21140_p0  ;;  %p21147_p4 = por %p21146_p3, %p21145_p1 }
  0x89   : > { %p21148_p6 = pnand %p21147_p4, %p21141_p5 }
  0x8b   : > { %21151 = shalt.err (!%p21148_p6)
}
  0x8c   : > { %s25156_s18 = smov 256   ;;  %s25157_s19 = smov 16  }
  0x8d   : > { %19199 = dma.hbm_to_vmem [thread:$0]  (!%p21948_p13), %s22001_s15, 16384, %s22022_s25, %s21960_s6, %s25156_s18, %s25156_s18, %s25157_s19  }
  0x8e   : > { %s22049_s7 = sshll.u32 %s21945_s3, 2  ;;  %s22052_s26 = sshll.u32 %s21704_s2, 6 }
  0x8f   : > { %s25216_s9 = sld [smem:[#allocation69_spill]]  ;;  %s831_s24 = scalar_lea.vmem [#allocation17], %s22049_s7 }
  0x90   : > { %s839_s8 = sshll.u32 %s831_s24, 4  ;;  %s22065_s25 = scalar_lea.hbm %s25117_s10, %s22052_s26  ;;  %s840_s8 = int_to_ptr.vmem [resolvable:$true] %s839_s8 }
  0x95   : > { %s22058_s28 = scalar_lea.hbm %s25216_s9, %s22052_s26  ;;  %s21157_s17 = scalar_lea.hbm %s25216_s9, 192 }
  0x96   : > { %s21152_s21 = scalar_lea.hbm %s22058_s28, 64  ;;  %p21158_p9 = scmp.lt.s32.totalorder %s22058_s28, %s25216_s9 }
  0x97   : > { %p21153_p7 = scmp.ne.s32.totalorder %s22058_s28, %s21152_s21  ;;  %p21159_p10 = scmp.lt.s32.totalorder %s21157_s17, %s21152_s21 }
  0x99   : > { %p21155_p11 = pnand %p21153_p7, %p21966_p2  ;;  %p21160_p12 = por %p21159_p10, %p21158_p9 }
  0x9b   : > { %p21156_p8 = pneg %p21155_p11 }
  0x9d   : > { %p21161_p0 = pnand %p21160_p12, %p21156_p8 }
  0x9f   : > { %21164 = shalt.err (!%p21161_p0)
}
  0xa0   : > { %s21165_s24 = scalar_lea.vmem %s840_s8, 64  ;;  %s21714_s27 = smov [#allocation17]  }
  0xa1   : > { %p21166_p5 = scmp.ne.s32.totalorder %s840_s8, %s21165_s24  ;;  %s21170_s15 = sshll.u32 %s21714_s27, 4  ;;  %s21171_s15 = int_to_ptr.vmem [resolvable:$false] %s21170_s15 }
  0xa2   : > { %s21172_s18 = scalar_lea.vmem %s21171_s15, 128  ;;  %p21173_p4 = scmp.lt.s32.totalorder %s840_s8, %s21171_s15 }
  0xa3   : > { %p21168_p1 = pnand %p21166_p5, %p21966_p2  ;;  %p21174_p6 = scmp.lt.s32.totalorder %s21172_s18, %s21165_s24 }
  0xa5   : > { %p21169_p3 = pneg %p21168_p1  ;;  %p21175_p7 = por %p21174_p6, %p21173_p4 }
  0xa7   : > { %p21176_p11 = pnand %p21175_p7, %p21169_p3 }
  0xa9   : > { %21179 = shalt.err (!%p21176_p11)
}
  0xaa   : > { %19202 = dma.hbm_to_vmem [thread:$0]  (!%p21948_p13), %s22058_s28, 64, %s840_s8, %s21960_s6  }
  0xab   : > { %s850_s21 = scalar_lea.vmem [#allocation18], %s22049_s7  ;;  %s22089_s18 = scalar_lea.hbm %s25118_s11, %s22052_s26 }
  0xac   : > { %s858_s22 = sshll.u32 %s850_s21, 4  ;;  %s21180_s1 = scalar_lea.hbm %s22065_s25, 64  ;;  %s859_s22 = int_to_ptr.vmem [resolvable:$true] %s858_s22 }
  0xad   : > { %p21181_p8 = scmp.ne.s32.totalorder %s22065_s25, %s21180_s1  ;;  %s21185_s27 = scalar_lea.hbm %s25117_s10, 192 }
  0xae   : > { %p21186_p12 = scmp.lt.s32.totalorder %s22065_s25, %s25117_s10  ;;  %p21187_p0 = scmp.lt.s32.totalorder %s21185_s27, %s21180_s1 }
  0xaf   : > { %p21183_p9 = pnand %p21181_p8, %p21966_p2 }
  0xb0   : > { %p21188_p5 = por %p21187_p0, %p21186_p12 }
  0xb1   : > { %p21184_p10 = pneg %p21183_p9 }
  0xb3   : > { %p21189_p1 = pnand %p21188_p5, %p21184_p10 }
  0xb5   : > { %21192 = shalt.err (!%p21189_p1)
}
  0xb6   : > { %s21193_s28 = scalar_lea.vmem %s859_s22, 64  ;;  %s21715_s8 = smov [#allocation18]  }
  0xb7   : > { %p21194_p3 = scmp.ne.s32.totalorder %s859_s22, %s21193_s28  ;;  %s21198_s21 = sshll.u32 %s21715_s8, 4  ;;  %s21199_s21 = int_to_ptr.vmem [resolvable:$false] %s21198_s21 }
  0xb8   : > { %s21200_s20 = scalar_lea.vmem %s21199_s21, 128  ;;  %p21201_p7 = scmp.lt.s32.totalorder %s859_s22, %s21199_s21 }
  0xb9   : > { %p21196_p4 = pnand %p21194_p3, %p21966_p2  ;;  %p21202_p11 = scmp.lt.s32.totalorder %s21200_s20, %s21193_s28 }
  0xbb   : > { %p21197_p6 = pneg %p21196_p4  ;;  %p21203_p8 = por %p21202_p11, %p21201_p7 }
  0xbd   : > { %p21204_p9 = pnand %p21203_p8, %p21197_p6 }
  0xbf   : > { %21207 = shalt.err (!%p21204_p9)
}
  0xc0   : > { %19205 = dma.hbm_to_vmem [thread:$0]  (!%p21948_p13), %s22065_s25, 64, %s859_s22, %s21960_s6  }
  0xc1   : > { %s869_s19 = scalar_lea.vmem [#allocation19], %s22049_s7  ;;  %s25158_s1 = sshll.u32 %s21945_s3, 12 }
  0xc2   : > { %s877_s17 = sshll.u32 %s869_s19, 4  ;;  %s21208_s5 = scalar_lea.hbm %s22089_s18, 64  ;;  %s878_s17 = int_to_ptr.vmem [resolvable:$true] %s877_s17 }
  0xc3   : > { %p21209_p10 = scmp.ne.s32.totalorder %s22089_s18, %s21208_s5  ;;  %s21213_s15 = scalar_lea.hbm %s25118_s11, 192 }
  0xc4   : > { %p21214_p5 = scmp.lt.s32.totalorder %s22089_s18, %s25118_s11  ;;  %p21215_p1 = scmp.lt.s32.totalorder %s21213_s15, %s21208_s5 }
  0xc5   : > { %p21211_p12 = pnand %p21209_p10, %p21966_p2 }
  0xc6   : > { %p21216_p3 = por %p21215_p1, %p21214_p5 }
  0xc7   : > { %p21212_p0 = pneg %p21211_p12 }
  0xc9   : > { %p21217_p4 = pnand %p21216_p3, %p21212_p0 }
  0xcb   : > { %21220 = shalt.err (!%p21217_p4)
}
  0xcc   : > { %s21221_s25 = scalar_lea.vmem %s878_s17, 64  ;;  %s21716_s22 = smov [#allocation19]  }
  0xcd   : > { %p21222_p6 = scmp.ne.s32.totalorder %s878_s17, %s21221_s25  ;;  %s21226_s21 = sshll.u32 %s21716_s22, 4  ;;  %s21227_s21 = int_to_ptr.vmem [resolvable:$false] %s21226_s21 }
  0xce   : > { %s21228_s20 = scalar_lea.vmem %s21227_s21, 128  ;;  %p21229_p8 = scmp.lt.s32.totalorder %s878_s17, %s21227_s21 }
  0xcf   : > { %p21224_p7 = pnand %p21222_p6, %p21966_p2  ;;  %p21230_p9 = scmp.lt.s32.totalorder %s21228_s20, %s21221_s25 }
  0xd1   : > { %p21225_p11 = pneg %p21224_p7  ;;  %p21231_p10 = por %p21230_p9, %p21229_p8 }
  0xd3   : > { %p21232_p12 = pnand %p21231_p10, %p21225_p11 }
  0xd5   : > { %21235 = shalt.err (!%p21232_p12)
}
  0xd6   : > { %19208 = dma.hbm_to_vmem [thread:$0]  (!%p21948_p13), %s22089_s18, 64, %s878_s17, %s21960_s6  }
  0xd7   : > { %s18824_s19 = sshll.u32 %s21704_s2, 16  ;;  %s888_s5 = scalar_lea.vmem [#allocation20], %s25158_s1 }
  0xd8   : > { %s895_s24 = sshll.u32 %s888_s5, 4  ;;  %s22135_s28 = scalar_lea.hbm %s25119_s12, %s18824_s19  ;;  %s22137_s24 = int_to_ptr.vmem [resolvable:$true] %s895_s24 }
  0xd9   : > { %s21236_s8 = scalar_lea.hbm %s22135_s28, 65536  ;;  %s21241_s25 = scalar_lea.hbm %s25119_s12, 196608 }
  0xda   : > { %p21237_p0 = scmp.ne.s32.totalorder %s22135_s28, %s21236_s8  ;;  %p21242_p3 = scmp.lt.s32.totalorder %s22135_s28, %s25119_s12 }
  0xdb   : > { %p21243_p4 = scmp.lt.s32.totalorder %s21241_s25, %s21236_s8 }
  0xdc   : > { %p21239_p5 = pnand %p21237_p0, %p21966_p2 }
  0xdd   : > { %p21244_p6 = por %p21243_p4, %p21242_p3 }
  0xde   : > { %p21240_p1 = pneg %p21239_p5 }
  0xe0   : > { %p21245_p7 = pnand %p21244_p6, %p21240_p1 }
  0xe2   : > { %21248 = shalt.err (!%p21245_p7)
}
  0xe3   : > { %s21249_s20 = scalar_lea.vmem %s22137_s24, 65536  ;;  %s21717_s5 = smov [#allocation20]  }
  0xe4   : > { %p21250_p11 = scmp.ne.s32.totalorder %s22137_s24, %s21249_s20  ;;  %s21254_s27 = sshll.u32 %s21717_s5, 4  ;;  %s21255_s27 = int_to_ptr.vmem [resolvable:$false] %s21254_s27 }
  0xe5   : > { %s21256_s15 = scalar_lea.vmem %s21255_s27, 131072  ;;  %p21257_p10 = scmp.lt.s32.totalorder %s22137_s24, %s21255_s27 }
  0xe6   : > { %p21252_p8 = pnand %p21250_p11, %p21966_p2  ;;  %p21258_p12 = scmp.lt.s32.totalorder %s21256_s15, %s21249_s20 }
  0xe8   : > { %p21253_p9 = pneg %p21252_p8  ;;  %p21259_p0 = por %p21258_p12, %p21257_p10 }
  0xea   : > { %p21260_p5 = pnand %p21259_p0, %p21253_p9 }
  0xec   : > { %21263 = shalt.err (!%p21260_p5)
}
  0xed   : > { %s21718_s8 = smov 1024   ;;  %s21719_s18 = smov 64  }
  0xee   : > { %19211 = dma.hbm_to_vmem [thread:$0]  (!%p21948_p13), %s22135_s28, 65536, %s22137_s24, %s21960_s6, %s21718_s8, %s21718_s8, %s21719_s18  }
  0xef   : > { %s17124_s17 = sshll.u32 %s21945_s3, 4  ;;  %s18825_s25 = sshll.u32 %s21704_s2, 8 }
  0xf0   : > { %s22165_s20 = scalar_lea.hbm %s25120_s13, %s18825_s25  ;;  %s909_s5 = scalar_lea.vmem [#allocation21], %s17124_s17 }
  0xf1   : > { %s917_s27 = sshll.u32 %s909_s5, 4  ;;  %s22172_s9 = scalar_lea.hbm %s25121_s14, %s18824_s19  ;;  %s918_s27 = int_to_ptr.vmem [resolvable:$true] %s917_s27 }
  0xf2   : > { %s21264_s24 = scalar_lea.hbm %s22165_s20, 256  ;;  %s21269_s18 = scalar_lea.hbm %s25120_s13, 768 }
  0xf3   : > { %p21265_p1 = scmp.ne.s32.totalorder %s22165_s20, %s21264_s24  ;;  %p21270_p6 = scmp.lt.s32.totalorder %s22165_s20, %s25120_s13 }
  0xf4   : > { %p21271_p7 = scmp.lt.s32.totalorder %s21269_s18, %s21264_s24 }
  0xf5   : > { %p21267_p3 = pnand %p21265_p1, %p21966_p2 }
  0xf6   : > { %p21272_p11 = por %p21271_p7, %p21270_p6 }
  0xf7   : > { %p21268_p4 = pneg %p21267_p3 }
  0xf9   : > { %p21273_p8 = pnand %p21272_p11, %p21268_p4 }
  0xfb   : > { %21276 = shalt.err (!%p21273_p8)
}
  0xfc   : > { %s21277_s2 = scalar_lea.vmem %s918_s27, 256  ;;  %s21720_s1 = smov [#allocation21]  }
  0xfd   : > { %p21278_p9 = scmp.ne.s32.totalorder %s918_s27, %s21277_s2  ;;  %s21282_s19 = sshll.u32 %s21720_s1, 4  ;;  %s21283_s19 = int_to_ptr.vmem [resolvable:$false] %s21282_s19 }
  0xfe   : > { %s21284_s17 = scalar_lea.vmem %s21283_s19, 512  ;;  %p21285_p0 = scmp.lt.s32.totalorder %s918_s27, %s21283_s19 }
  0xff   : > { %p21280_p10 = pnand %p21278_p9, %p21966_p2  ;;  %p21286_p5 = scmp.lt.s32.totalorder %s21284_s17, %s21277_s2 }
 0x101   : > { %p21281_p12 = pneg %p21280_p10  ;;  %p21287_p1 = por %p21286_p5, %p21285_p0 }
 0x103   : > { %p21288_p3 = pnand %p21287_p1, %p21281_p12 }
 0x105   : > { %21291 = shalt.err (!%p21288_p3)
}
 0x106   : > { %19214 = dma.hbm_to_vmem [thread:$0]  (!%p21948_p13), %s22165_s20, 256, %s918_s27, %s21960_s6  }
 0x107   : > { %s25217_s21 = sshll.u32 %s21945_s3, 12  ;;  %s21721_s24 = smov [#allocation6]  }
 0x108   : > { %s928_s5 = scalar_lea.vmem [#allocation22], %s25217_s21  ;;  %s22195_s28 = sshll.u32 %s21721_s24, 4  ;;  %s656_s28 = int_to_ptr.vmem [resolvable:$true] %s22195_s28 }
 0x109   : > { %s935_s15 = sshll.u32 %s928_s5, 4  ;;  %s21292_s8 = scalar_lea.hbm %s22172_s9, 65536  ;;  %s22193_s15 = int_to_ptr.vmem [resolvable:$true] %s935_s15 }
 0x10a   : > { %p21293_p4 = scmp.ne.s32.totalorder %s22172_s9, %s21292_s8  ;;  %s21297_s22 = scalar_lea.hbm %s25121_s14, 196608 }
 0x10b   : > { %p21298_p11 = scmp.lt.s32.totalorder %s22172_s9, %s25121_s14  ;;  %p21299_p8 = scmp.lt.s32.totalorder %s21297_s22, %s21292_s8 }
 0x10c   : > { %p21295_p6 = pnand %p21293_p4, %p21966_p2 }
 0x10d   : > { %p21300_p9 = por %p21299_p8, %p21298_p11 }
 0x10e   : > { %p21296_p7 = pneg %p21295_p6 }
 0x110   : > { %p21301_p10 = pnand %p21300_p9, %p21296_p7 }
 0x112   : > { %21304 = shalt.err (!%p21301_p10)
}
 0x113   : > { %s21305_s3 = scalar_lea.vmem %s22193_s15, 65536  ;;  %s21722_s20 = smov [#allocation22]  }
 0x114   : > { %p21306_p12 = scmp.ne.s32.totalorder %s22193_s15, %s21305_s3  ;;  %s21310_s27 = sshll.u32 %s21722_s20, 4  ;;  %s21311_s27 = int_to_ptr.vmem [resolvable:$false] %s21310_s27 }
 0x115   : > { %s21312_s19 = scalar_lea.vmem %s21311_s27, 131072  ;;  %p21313_p1 = scmp.lt.s32.totalorder %s22193_s15, %s21311_s27 }
 0x116   : > { %p21308_p0 = pnand %p21306_p12, %p21966_p2  ;;  %p21314_p3 = scmp.lt.s32.totalorder %s21312_s19, %s21305_s3 }
 0x118   : > { %p21309_p5 = pneg %p21308_p0  ;;  %p21315_p4 = por %p21314_p3, %p21313_p1 }
 0x11a   : > { %p21316_p6 = pnand %p21315_p4, %p21309_p5 }
 0x11c   : > { %21319 = shalt.err (!%p21316_p6)
}
 0x11d   : > { %s25218_s17 = smov 16   ;;  %s25219_s21 = smov 256  }
 0x11e   : > { %19217 = dma.hbm_to_vmem [thread:$0]  (!%p21948_p13), %s22172_s9, 65536, %s22193_s15, %s21960_s6, %s25219_s21, %s25219_s21, %s25218_s17  }
 0x11f   : > { %s21331_s5 = scalar_lea.vmem %s656_s28, 128  ;;  %p25220_p11 = scmp.ne.s32.totalorder %s25206_s4, 0 }
 0x120   : > { %p21332_p7 = scmp.ne.s32.totalorder %s656_s28, %s21331_s5  ;;  %p21339_p10 = scmp.lt.s32.totalorder %s656_s28, %s656_s28 }
 0x121   : > { %p21340_p12 = scmp.lt.s32.totalorder %s21331_s5, %s21331_s5 }
 0x122   : > { %p21334_p8 = pnand %p21332_p7, %p25220_p11 }
 0x123   : > { %p21341_p0 = por %p21340_p12, %p21339_p10 }
 0x124   : > { %p21335_p9 = pneg %p21334_p8 }
 0x126   : > { %p21342_p5 = pnand %p21341_p0, %p21335_p9 }
 0x128   : > { %21345 = shalt.err (!%p21342_p5)
}
 0x129   : > { %p25221_p1 = scmp.ne.s32.totalorder %s25204_s30, 0  ;;  %s25222_s18 = sld [smem:[#allocation61_spill]] }
 0x12a   : > { %s21723_s9 = smov [#allocation9]   ;;  %s25223_s2 = sld [smem:[#allocation70_spill]] }
 0x12b   : > { %s679_s15 = sshll.u32 %s21723_s9, 4  ;;  %s680_s15 = int_to_ptr.vmem [resolvable:$true] %s679_s15 }
 0x12c   : > { %s21357_s20 = scalar_lea.vmem %s680_s15, 64  ;;  %p21365_p7 = scmp.lt.s32.totalorder %s680_s15, %s680_s15 }
 0x12d   : > { %p21358_p3 = scmp.ne.s32.totalorder %s680_s15, %s21357_s20  ;;  %p21366_p8 = scmp.lt.s32.totalorder %s21357_s20, %s21357_s20 }
 0x12f   : > { %19165 = dma.hbm_to_vmem [thread:$0]  (!%p25221_p1), %s25222_s18, 128, %s656_s28, [#allocation7]  }
 0x130   : > { %s25224_s1 = smov %s25223_s2  ;;  %s22233_s3 = scalar_lea.hbm %s25223_s2, %s22052_s26 }
 0x131   : > { %p21360_p4 = pnand %p21358_p3, %p25220_p11  ;;  %p21367_p9 = por %p21366_p8, %p21365_p7 }
 0x133   : > { %p21361_p6 = pneg %p21360_p4 }
 0x135   : > { %p21368_p10 = pnand %p21367_p9, %p21361_p6 }
 0x137   : > { %21371 = shalt.err (!%p21368_p10)
}
 0x138   : > { %s25225_s19 = sld [smem:[#allocation63_spill]]  ;;  %s949_s17 = scalar_lea.vmem [#allocation23], %s22049_s7 }
 0x139   : > { %s957_s21 = sshll.u32 %s949_s17, 4  ;;  %s21724_s5 = smov [#allocation8]   ;;  %s958_s21 = int_to_ptr.vmem [resolvable:$true] %s957_s21 }
 0x13a   : > { %s665_s24 = sshll.u32 %s21724_s5, 4  ;;  %s21372_s8 = scalar_lea.hbm %s22233_s3, 64  ;;  %s666_s24 = int_to_ptr.vmem [resolvable:$true] %s665_s24 }
 0x13b   : > { %p21373_p12 = scmp.ne.s32.totalorder %s22233_s3, %s21372_s8  ;;  %s21377_s25 = scalar_lea.hbm %s25224_s1, 192 }
 0x13c   : > { %p21378_p3 = scmp.lt.s32.totalorder %s22233_s3, %s25224_s1  ;;  %p21379_p4 = scmp.lt.s32.totalorder %s21377_s25, %s21372_s8 }
 0x13d   : > { %p21375_p0 = pnand %p21373_p12, %p21966_p2 }
 0x13e   : > { %19171 = dma.hbm_to_vmem [thread:$0]  (!%p25221_p1), %s25225_s19, 64, %s680_s15, [#allocation10]  }
 0x13f   : > { %p21376_p5 = pneg %p21375_p0  ;;  %p21380_p6 = por %p21379_p4, %p21378_p3 }
 0x141   : > { %p21381_p7 = pnand %p21380_p6, %p21376_p5 }
 0x143   : > { %21384 = shalt.err (!%p21381_p7)
}
 0x144   : > { %s21385_s15 = scalar_lea.vmem %s958_s21, 64  ;;  %s21725_s20 = smov [#allocation23]  }
 0x145   : > { %p21386_p8 = scmp.ne.s32.totalorder %s958_s21, %s21385_s15  ;;  %s21390_s28 = sshll.u32 %s21725_s20, 4  ;;  %s21391_s28 = int_to_ptr.vmem [resolvable:$false] %s21390_s28 }
 0x146   : > { %s21392_s27 = scalar_lea.vmem %s21391_s28, 128  ;;  %p21393_p12 = scmp.lt.s32.totalorder %s958_s21, %s21391_s28 }
 0x147   : > { %p21388_p9 = pnand %p21386_p8, %p21966_p2  ;;  %p21394_p0 = scmp.lt.s32.totalorder %s21392_s27, %s21385_s15 }
 0x149   : > { %p21389_p10 = pneg %p21388_p9  ;;  %p21395_p1 = por %p21394_p0, %p21393_p12 }
 0x14b   : > { %p21396_p11 = pnand %p21395_p1, %p21389_p10 }
 0x14d   : > { %21399 = shalt.err (!%p21396_p11)
}
 0x14e   : > { %19220 = dma.hbm_to_vmem [thread:$0]  (!%p21948_p13), %s22233_s3, 64, %s958_s21, %s21960_s6  }
 0x14f   : > { %s21411_s19 = scalar_lea.vmem %s666_s24, 2048  ;;  %p25226_p3 = scmp.ne.s32.totalorder %s25206_s4, 0 }
 0x150   : > { %p21412_p5 = scmp.ne.s32.totalorder %s666_s24, %s21411_s19  ;;  %p21419_p7 = scmp.lt.s32.totalorder %s666_s24, %s666_s24 }
 0x151   : > { %p21420_p8 = scmp.lt.s32.totalorder %s21411_s19, %s21411_s19 }
 0x152   : > { %p21414_p4 = pnand %p21412_p5, %p25226_p3 }
 0x153   : > { %p21421_p9 = por %p21420_p8, %p21419_p7 }
 0x154   : > { %p21415_p6 = pneg %p21414_p4 }
 0x156   : > { %p21422_p2 = pnand %p21421_p9, %p21415_p6 }
 0x158   : > { %21425 = shalt.err (!%p21422_p2)
}
 0x159   : > { %s21726_s17 = smov 512   ;;  %s21727_s5 = smov 32  }
 0x15a   : > { %p25227_p11 = scmp.ne.s32.totalorder %s25204_s30, 0  ;;  %s25228_s9 = sld [smem:[#allocation62_spill]] }
 0x15b   : > { %s21728_s3 = smov [#allocation11]   ;;  %s21729_s25 = smov [#allocation12]  }
 0x15c   : > { %s689_s21 = sshll.u32 %s21728_s3, 4  ;;  %s703_s22 = sshll.u32 %s21729_s25, 4  ;;  %s690_s21 = int_to_ptr.vmem [resolvable:$true] %s689_s21  ;;  %s704_s22 = int_to_ptr.vmem [resolvable:$true] %s703_s22 }
 0x15d   : > { %s21437_s2 = scalar_lea.vmem %s690_s21, 3072  ;;  %p21445_p2 = scmp.lt.s32.totalorder %s690_s21, %s690_s21 }
 0x15e   : > { %p21438_p1 = scmp.ne.s32.totalorder %s690_s21, %s21437_s2  ;;  %p21446_p0 = scmp.lt.s32.totalorder %s21437_s2, %s21437_s2 }
 0x160   : > { %19168 = dma.hbm_to_vmem [thread:$0]  (!%p25227_p11), %s25228_s9, 2048, %s666_s24, [#allocation7], %s21726_s17, %s21726_s17, %s21727_s5  }
 0x161   : > { %p21440_p10 = pnand %p21438_p1, %p25226_p3  ;;  %p21447_p5 = por %p21446_p0, %p21445_p2 }
 0x163   : > { %p21441_p12 = pneg %p21440_p10 }
 0x165   : > { %p21448_p4 = pnand %p21447_p5, %p21441_p12 }
 0x167   : > { %21451 = shalt.err (!%p21448_p4)
}
 0x168   : > { %s25229_s24 = sld [smem:[#allocation64_spill]]  ;;  %s21463_s28 = scalar_lea.vmem %s704_s22, 64 }
 0x169   : > { %p21464_p6 = scmp.ne.s32.totalorder %s704_s22, %s21463_s28  ;;  %p21471_p9 = scmp.lt.s32.totalorder %s704_s22, %s704_s22 }
 0x16a   : > { %p21472_p1 = scmp.lt.s32.totalorder %s21463_s28, %s21463_s28 }
 0x16b   : > { %p21466_p7 = pnand %p21464_p6, %p25226_p3 }
 0x16c   : > { %p21473_p10 = por %p21472_p1, %p21471_p9 }
 0x16d   : > { %p21467_p8 = pneg %p21466_p7 }
 0x16e   : > { %19174 = dma.hbm_to_vmem [thread:$0]  (!%p25227_p11), %s25229_s24, 3072, %s690_s21, [#allocation10], %s21726_s17, %s21726_s17, %s21727_s5  }
 0x16f   : > { %p21474_p13 = pnand %p21473_p10, %p21467_p8 }
 0x171   : > { %21477 = shalt.err (!%p21474_p13)
}
 0x172   : > { %s25230_s8 = sld [smem:[#allocation65_spill]]  ;;  %s968_s3 = scalar_lea.vmem [#allocation24], %s22049_s7 }
 0x173   : > { %s25231_s18 = sld [smem:[#allocation71_spill]]  ;;  %s976_s21 = sshll.u32 %s968_s3, 4  ;;  %s977_s21 = int_to_ptr.vmem [resolvable:$true] %s976_s21 }
 0x174   : > { %p25232_p2 = scmp.ne.s32.totalorder %s25213_s0, 0 }
 0x178   : > { %19177 = dma.hbm_to_vmem [thread:$0]  (!%p25227_p11), %s25230_s8, 64, %s704_s22, [#allocation13]  }
 0x179   : > { %s974_s9 = scalar_lea.hbm %s25231_s18, %s22052_s26  ;;  %s21483_s20 = scalar_lea.hbm %s25231_s18, 192 }
 0x17a   : > { %s21478_s25 = scalar_lea.hbm %s974_s9, 64  ;;  %p21484_p5 = scmp.lt.s32.totalorder %s974_s9, %s25231_s18 }
 0x17b   : > { %p21479_p12 = scmp.ne.s32.totalorder %s974_s9, %s21478_s25  ;;  %p21485_p4 = scmp.lt.s32.totalorder %s21483_s20, %s21478_s25 }
 0x17d   : > { %p21481_p13 = pnand %p21479_p12, %p25232_p2  ;;  %p21486_p6 = por %p21485_p4, %p21484_p5 }
 0x17f   : > { %p21482_p0 = pneg %p21481_p13 }
 0x181   : > { %p21487_p7 = pnand %p21486_p6, %p21482_p0 }
 0x183   : > { %21490 = shalt.err (!%p21487_p7)
}
 0x184   : > { %s21491_s22 = scalar_lea.vmem %s977_s21, 64  ;;  %s21730_s27 = smov [#allocation24]  }
 0x185   : > { %p21492_p8 = scmp.ne.s32.totalorder %s977_s21, %s21491_s22  ;;  %s21496_s19 = sshll.u32 %s21730_s27, 4  ;;  %s21497_s19 = int_to_ptr.vmem [resolvable:$false] %s21496_s19 }
 0x186   : > { %s21498_s8 = scalar_lea.vmem %s21497_s19, 128  ;;  %p21499_p10 = scmp.lt.s32.totalorder %s977_s21, %s21497_s19 }
 0x187   : > { %p21494_p9 = pnand %p21492_p8, %p25232_p2  ;;  %p21500_p12 = scmp.lt.s32.totalorder %s21498_s8, %s21491_s22 }
 0x189   : > { %p21495_p1 = pneg %p21494_p9  ;;  %p21501_p13 = por %p21500_p12, %p21499_p10 }
 0x18b   : > { %p21502_p11 = pnand %p21501_p13, %p21495_p1 }
 0x18d   : > { %21505 = shalt.err (!%p21502_p11)
}
 0x18e   : > { %p25233_p3 = scmp.ne.s32.totalorder %s25211_s29, 0  ;;  %s21731_s17 = smov [#allocation26]  }
 0x18f   : > { %s713_s5 = sshll.u32 %s21731_s17, 4  ;;  %p25234_p5 = scmp.ne.s32.totalorder %s25206_s4, 0  ;;  %s714_s5 = int_to_ptr.vmem [resolvable:$true] %s713_s5 }
 0x190   : > { %19223 = dma.hbm_to_vmem [thread:$0]  (!%p25233_p3), %s974_s9, 64, %s977_s21, %s21960_s6  }
 0x191   : > { %s21517_s3 = scalar_lea.vmem %s714_s5, 8192  ;;  %p21525_p7 = scmp.lt.s32.totalorder %s714_s5, %s714_s5 }
 0x192   : > { %p21518_p0 = scmp.ne.s32.totalorder %s714_s5, %s21517_s3  ;;  %p21526_p8 = scmp.lt.s32.totalorder %s21517_s3, %s21517_s3 }
 0x194   : > { %p21520_p4 = pnand %p21518_p0, %p25234_p5  ;;  %p21527_p9 = por %p21526_p8, %p21525_p7 }
 0x196   : > { %p21521_p6 = pneg %p21520_p4 }
 0x198   : > { %p21528_p2 = pnand %p21527_p9, %p21521_p6 }
 0x19a   : > { %21531 = shalt.err (!%p21528_p2)
}
 0x19b   : > { %s21732_s25 = smov 128   ;;  %s21733_s2 = smov 8  }
 0x19c   : > { %p25235_p11 = scmp.ne.s32.totalorder %s25204_s30, 0  ;;  %s25236_s21 = sld [smem:[#allocation73_spill]] }
 0x19d   : > { %s21734_s20 = smov [#allocation27]   ;;  %s21735_s28 = smov [#allocation28]  }
 0x19e   : > { %s727_s24 = sshll.u32 %s21734_s20, 4  ;;  %s741_s22 = sshll.u32 %s21735_s28, 4  ;;  %s728_s24 = int_to_ptr.vmem [resolvable:$true] %s727_s24  ;;  %s742_s22 = int_to_ptr.vmem [resolvable:$true] %s741_s22 }
 0x19f   : > { %s21543_s27 = scalar_lea.vmem %s728_s24, 32  ;;  %p21551_p12 = scmp.lt.s32.totalorder %s728_s24, %s728_s24 }
 0x1a0   : > { %p21544_p1 = scmp.ne.s32.totalorder %s728_s24, %s21543_s27  ;;  %p21552_p13 = scmp.lt.s32.totalorder %s21543_s27, %s21543_s27 }
 0x1a2   : > { %19180 = dma.hbm_to_vmem [thread:$0]  (!%p25235_p11), %s25236_s21, 8192, %s714_s5, [#allocation7], %s21732_s25, %s21732_s25, %s21733_s2  }
 0x1a3   : > { %p21546_p10 = pnand %p21544_p1, %p25234_p5  ;;  %p21553_p0 = por %p21552_p13, %p21551_p12 }
 0x1a5   : > { %p21547_p2 = pneg %p21546_p10 }
 0x1a7   : > { %p21554_p4 = pnand %p21553_p0, %p21547_p2 }
 0x1a9   : > { %21557 = shalt.err (!%p21554_p4)
}
 0x1aa   : > { %s25237_s17 = sld [smem:[#allocation74_spill]]  ;;  %s21569_s5 = scalar_lea.vmem %s742_s22, 16 }
 0x1ab   : > { %p21570_p6 = scmp.ne.s32.totalorder %s742_s22, %s21569_s5  ;;  %s21576_s3 = scalar_lea.vmem %s742_s22, 32 }
 0x1ac   : > { %p21577_p9 = scmp.lt.s32.totalorder %s742_s22, %s742_s22  ;;  %p21578_p1 = scmp.lt.s32.totalorder %s21576_s3, %s21569_s5 }
 0x1ad   : > { %p21572_p7 = pnand %p21570_p6, %p25234_p5 }
 0x1ae   : > { %p21579_p10 = por %p21578_p1, %p21577_p9 }
 0x1af   : > { %p21573_p8 = pneg %p21572_p7 }
 0x1b0   : > { %19183 = dma.hbm_to_vmem [thread:$0]  (!%p25235_p11), %s25237_s17, 32, %s728_s24, [#allocation10]  }
 0x1b1   : > { %p21580_p3 = pnand %p21579_p10, %p21573_p8 }
 0x1b3   : > { %21583 = shalt.err (!%p21580_p3)
}
 0x1b4   : > { %s25238_s15 = sld [smem:[#allocation76_spill]]  ;;  %s21736_s9 = smov [#allocation29]  }
 0x1b5   : > { %s752_s21 = sshll.u32 %s21736_s9, 4  ;;  %s25239_s28 = sld [smem:[#allocation72_spill]]  ;;  %s753_s21 = int_to_ptr.vmem [resolvable:$true] %s752_s21 }
 0x1b6   : > { %s987_s8 = scalar_lea.vmem [#allocation25], %s22049_s7  ;;  %s21595_s5 = scalar_lea.vmem %s753_s21, 16 }
 0x1b7   : > { %s995_s17 = sshll.u32 %s987_s8, 4  ;;  %p21596_p3 = scmp.ne.s32.totalorder %s753_s21, %s21595_s5  ;;  %s996_s17 = int_to_ptr.vmem [resolvable:$true] %s995_s17 }
 0x1b8   : > { %s21602_s3 = scalar_lea.vmem %s753_s21, 32  ;;  %p21603_p13 = scmp.lt.s32.totalorder %s753_s21, %s753_s21 }
 0x1b9   : > { %p21598_p2 = pnand %p21596_p3, %p25234_p5  ;;  %p21604_p0 = scmp.lt.s32.totalorder %s21602_s3, %s21595_s5 }
 0x1ba   : > { %19186 = dma.hbm_to_vmem [thread:$0]  (!%p25235_p11), %s25238_s15, 16, %s742_s22, [#allocation13]  }
 0x1bb   : > { %s25240_s19 = smov %s25239_s28  ;;  %s22324_s27 = scalar_lea.hbm %s25239_s28, %s22052_s26 }
 0x1bc   : > { %p21599_p12 = pneg %p21598_p2  ;;  %p21605_p4 = por %p21604_p0, %p21603_p13 }
 0x1be   : > { %p21606_p6 = pnand %p21605_p4, %p21599_p12 }
 0x1c0   : > { %21609 = shalt.err (!%p21606_p6)
}
 0x1c1   : > { %s25241_s26 = sld [smem:[#allocation77_spill]]  ;;  %s21610_s4 = scalar_lea.hbm %s22324_s27, 64 }
 0x1c2   : > { %p21611_p5 = scmp.ne.s32.totalorder %s22324_s27, %s21610_s4  ;;  %p25242_p7 = scmp.ne.s32.totalorder %s25213_s0, 0 }
 0x1c3   : > { %s21615_s15 = scalar_lea.hbm %s25240_s19, 192  ;;  %p21616_p1 = scmp.lt.s32.totalorder %s22324_s27, %s25240_s19 }
 0x1c4   : > { %p21613_p8 = pnand %p21611_p5, %p25242_p7  ;;  %p21617_p10 = scmp.lt.s32.totalorder %s21615_s15, %s21610_s4 }
 0x1c6   : > { %p21614_p9 = pneg %p21613_p8  ;;  %p21618_p3 = por %p21617_p10, %p21616_p1 }
 0x1c7   : > { %19189 = dma.hbm_to_vmem [thread:$0]  (!%p25235_p11), %s25241_s26, 16, %s753_s21, [#allocation30]  }
 0x1c8   : > { %p21619_p2 = pnand %p21618_p3, %p21614_p9 }
 0x1ca   : > { %21622 = shalt.err (!%p21619_p2)
}
 0x1cb   : > { %s21623_s20 = scalar_lea.vmem %s996_s17, 64  ;;  %s21737_s21 = smov [#allocation25]  }
 0x1cc   : > { %p21624_p11 = scmp.ne.s32.totalorder %s996_s17, %s21623_s20  ;;  %s21628_s24 = sshll.u32 %s21737_s21, 4  ;;  %s21629_s24 = int_to_ptr.vmem [resolvable:$false] %s21628_s24 }
 0x1cd   : > { %s21630_s28 = scalar_lea.vmem %s21629_s24, 128  ;;  %p21631_p0 = scmp.lt.s32.totalorder %s996_s17, %s21629_s24 }
 0x1ce   : > { %p21626_p12 = pnand %p21624_p11, %p25242_p7  ;;  %p21632_p4 = scmp.lt.s32.totalorder %s21630_s28, %s21623_s20 }
 0x1d0   : > { %p21627_p13 = pneg %p21626_p12  ;;  %p21633_p6 = por %p21632_p4, %p21631_p0 }
 0x1d2   : > { %p21634_p5 = pnand %p21633_p6, %p21627_p13 }
 0x1d4   : > { %21637 = shalt.err (!%p21634_p5)
}
 0x1d5   : > { %p25243_p8 = scmp.ne.s32.totalorder %s25211_s29, 0  ;;  %s25244_s8 = sld [smem:[#allocation43_spill]] }
 0x1d7   : > { %19226 = dma.hbm_to_vmem [thread:$0]  (!%p25243_p8), %s22324_s27, 64, %s996_s17, %s21960_s6  }
 0x1db   : > { %p25245_p9 = scmp.ne.s32.totalorder %s25244_s8, 0 }
 0x1dd   : > { %1004 = sbr.rel (%p25245_p9) target bundleno = 4937 (0x1349), region = 116 }
 0x1e2   : > { %s25246_s0 = sld [smem:[#allocation42_spill]] }
 0x1e8   : > { %p25247_p7 = scmp.eq.s32.totalorder %s25246_s0, 0 }
 0x1ea   : > { %21655 = dma.done.wait (%p25247_p7), [#allocation5], 128   ;;  %p25248_p1 = pmov %p25247_p7 }
 0x1ec   : > { %21657 = vsyncadd (%p25248_p1), [#allocation5], 4294967168  ;;  %p25249_p10 = pmov %p25248_p1 }
 0x1ed   : > { %p25250_p3 = pmov %p25248_p1 }
 0x1ee   : > { %21659 = dma.done.wait (%p25249_p10), [#allocation7], 2176  }
 0x1ef   : > { %21661 = vsyncadd (%p25250_p3), [#allocation7], 4294965120  ;;  %p25251_p2 = pmov %p25248_p1 }
 0x1f0   : > { %p25252_p11 = pmov %p25248_p1 }
 0x1f1   : > { %21663 = dma.done.wait (%p25251_p2), [#allocation10], 3136  }
 0x1f2   : > { %21665 = vsyncadd (%p25252_p11), [#allocation10], 4294964160  ;;  %p25253_p12 = pmov %p25248_p1 }
 0x1f3   : > { %p25254_p13 = pmov %p25248_p1 }
 0x1f4   : > { %21667 = dma.done.wait (%p25253_p12), [#allocation13], 64  }
 0x1f5   : > { %21669 = vsyncadd (%p25254_p13), [#allocation13], 4294967232  ;;  %s25255_s6 = sld [smem:[#allocation40_spill]]  ;;  %s1030_s27 = sand.u32 1, %s25246_s0  }
 0x1f6   : > { %s25256_s29 = sld [smem:[#allocation46_spill]]  ;;  %s1031_s3 = scalar_lea.sflag [#allocation5], %s1030_s27 }
 0x1fb   : > { %s1032_s17 = sand.u32 1, %s25255_s6  }
 0x1fc   : > { %s19093_s5 = smul.u32 3072, %s1032_s17  ;;  %p25257_p0 = scmp.ne.s32.totalorder %s25256_s29, 0 }
 0x1fe   : > { %s22371_s22 = scalar_lea.vmem [#allocation14], %s19093_s5 }
 0x1ff   : > { %21671 = dma.done.wait (%p25257_p0), %s1031_s3, 197440  }
 0x200   : > { %21673 = vsyncadd (%p25257_p0), %s1031_s3, 4294769856  ;;  %s19094_s25 = smul.u32 12, %s1032_s17  ;;  %s17146_s26 = sshll.u32 %s1032_s17, 10 }
 0x201   : > { %s22377_s4 = sshll.u32 %s1032_s17, 2  ;;  %s17150_s7 = sshll.u32 %s1032_s17, 12 }
 0x202   : > { %s17151_s2 = sshll.u32 %s1032_s17, 4  ;;  %s22379_s15 = scalar_lea.vmem [#allocation15], %s19094_s25 }
 0x203   : > { %s22381_s9 = scalar_lea.vmem [#allocation16], %s17146_s26  ;;  %s1061_s30 = scalar_lea.vmem [#allocation17], %s22377_s4 }
 0x204   : > { %s1070_s20 = scalar_lea.vmem [#allocation18], %s22377_s4  ;;  %s1079_s21 = scalar_lea.vmem [#allocation19], %s22377_s4 }
 0x205   : > { %s22386_s24 = scalar_lea.vmem [#allocation20], %s17150_s7  ;;  %s22388_s28 = scalar_lea.vmem [#allocation21], %s17151_s2 }
 0x206   : > { %s22390_s8 = scalar_lea.vmem [#allocation22], %s17150_s7  ;;  %s1115_s6 = scalar_lea.vmem [#allocation23], %s22377_s4 }
 0x207   : > { %s1124_s29 = scalar_lea.vmem [#allocation24], %s22377_s4  ;;  %s1133_s27 = scalar_lea.vmem [#allocation25], %s22377_s4 }
 0x208   : > { %p25258_p4 = pmov %p25248_p1 }
 0x209   : > { %p25259_p6 = pmov %p25248_p1 }
 0x20a   : > { %21675 = dma.done.wait (%p25258_p4), [#allocation7], 8192  }
 0x20b   : > { %21677 = vsyncadd (%p25259_p6), [#allocation7], 4294959104  ;;  %p25260_p5 = pmov %p25248_p1 }
 0x20c   : > { %p25261_p8 = pmov %p25248_p1 }
 0x20d   : > { %21679 = dma.done.wait (%p25260_p5), [#allocation10], 32  }
 0x20e   : > { %21681 = vsyncadd (%p25261_p8), [#allocation10], 4294967264  ;;  %p25262_p9 = pmov %p25248_p1 }
 0x20f   : > { %p25263_p7 = pmov %p25248_p1 }
 0x210   : > { %21683 = dma.done.wait (%p25262_p9), [#allocation13], 16  }
 0x211   : > { %21685 = vsyncadd (%p25263_p7), [#allocation13], 4294967280 }
 0x212   : > { %21687 = dma.done.wait (%p25248_p1), [#allocation30], 16   ;;  %p25264_p10 = pmov %p25248_p1 }
 0x213   : > { %p25265_p3 = scmp.ne.s32.totalorder %s25246_s0, 0 }
 0x214   : > { %21689 = vsyncadd (%p25264_p10), [#allocation30], 4294967280 }
 0x215   : > { %1267 = sbr.rel (%p25265_p3) target bundleno = 760 (0x2f8), region = 208 }
 0x21a   : > { %v1282_v1 = vld [vmem:[#allocation8 + $0x68] sm:$0xff]  ;;  %v1284_v2 = vld [vmem:[#allocation8 + $0x78] sm:$0xff]  ;;  %v1281_v3 = vld [vmem:[#allocation8 + $0x60] sm:$0xff]  ;;  %vm1307_vm0 = vcmask 261120   ;;  %v21738_v18 = vmov 0.0   ;;  %vm1500_vm1 = vcmask 392192   ;;  %v1287_v44 = vlaneseq }
 0x21b   : > { %1335 = vmatprep.subr.mxu0 %v1282_v1  ;;  %1406 = vmatprep.subr.mxu1 %v1284_v2  ;;  %v1283_v4 = vld [vmem:[#allocation8 + $0x70] sm:$0xff]  ;;  %v1278_v5 = vld [vmem:[#allocation8 + $0x48] sm:$0xff]  ;;  %v1280_v6 = vld [vmem:[#allocation8 + $0x58] sm:$0xff] }
 0x21c   : > { %1336 = vmatpush1.msra.mxu0 %v1281_v3  ;;  %1407 = vmatpush1.msra.mxu1 %v1283_v4  ;;  %v1277_v7 = vld [vmem:[#allocation8 + $0x40] sm:$0xff]  ;;  %v1279_v8 = vld [vmem:[#allocation8 + $0x50] sm:$0xff]  ;;  %v1274_v9 = vld [vmem:[#allocation8 + $0x28] sm:$0xff]  ;;  %v1288_v45 = vshrl.u32 %v1287_v44, 7 }
 0x21d   : > { %1337 = vmatprep.subr.mxu0 %v1278_v5  ;;  %1408 = vmatprep.subr.mxu1 %v1280_v6  ;;  %v1276_v10 = vld [vmem:[#allocation8 + $0x38] sm:$0xff]  ;;  %v1273_v11 = vld [vmem:[#allocation8 + $0x20] sm:$0xff]  ;;  %v1275_v12 = vld [vmem:[#allocation8 + $0x30] sm:$0xff] }
 0x21e   : > { %1338 = vmatpush1.msra.mxu0 %v1277_v7  ;;  %1409 = vmatpush1.msra.mxu1 %v1279_v8  ;;  %v1270_v13 = vld [vmem:[#allocation8 + $0x8] sm:$0xff]  ;;  %v1272_v14 = vld [vmem:[#allocation8 + $0x18] sm:$0xff]  ;;  %v1269_v15 = vld [vmem:[#allocation8] sm:$0xff]  ;;  %v1289_v46 = vsub.s32 0, %v1288_v45  ;;  %v1297_v47 = vsub.s32 2, %v1288_v45  ;;  %v1293_v49 = vsub.s32 1, %v1288_v45 }
 0x21f   : > { %1339 = vmatprep.subr.mxu0 %v1274_v9  ;;  %1410 = vmatprep.subr.mxu1 %v1276_v10  ;;  %v1271_v16 = vld [vmem:[#allocation8 + $0x10] sm:$0xff]  ;;  %v1477_v20 = vld [vmem:[#allocation11 + $0xb8] sm:$0xff]  ;;  %v1474_v21 = vld [vmem:[#allocation11 + $0xa0] sm:$0xff]  ;;  %v1301_v50 = vsub.s32 3, %v1288_v45 }
 0x220   : > { %1340 = vmatpush1.msra.mxu0 %v1273_v11  ;;  %1411 = vmatpush1.msra.mxu1 %v1275_v12  ;;  %v1268_v17 = vld [vmem:[#allocation4] sm:$0xff]  ;;  %v1473_v24 = vld [vmem:[#allocation11 + $0x98] sm:$0xff]  ;;  %v1470_v25 = vld [vmem:[#allocation11 + $0x80] sm:$0xff] }
 0x221   : > { %1341 = vmatprep.subr.mxu0 %v1270_v13  ;;  %1412 = vmatprep.subr.mxu1 %v1272_v14  ;;  %v1475_v19 = vld [vmem:[#allocation11 + $0xa8] sm:$0xff]  ;;  %v1476_v22 = vld [vmem:[#allocation11 + $0xb0] sm:$0xff]  ;;  %v1469_v28 = vld [vmem:[#allocation11 + $0x78] sm:$0xff] }
 0x222   : > { %1342 = vmatpush1.msra.mxu0 %v1269_v15  ;;  %1375 = vmatprep.mubr.f32.mxu0 %v21738_v18  ;;  %v1471_v23 = vld [vmem:[#allocation11 + $0x88] sm:$0xff]  ;;  %v1472_v26 = vld [vmem:[#allocation11 + $0x90] sm:$0xff]  ;;  %v1466_v29 = vld [vmem:[#allocation11 + $0x60] sm:$0xff] }
 0x223   : > { %1413 = vmatpush1.msra.mxu1 %v1271_v16  ;;  %1446 = vmatprep.mubr.f32.mxu1 %v21738_v18  ;;  %v1467_v27 = vld [vmem:[#allocation11 + $0x68] sm:$0xff]  ;;  %v1468_v30 = vld [vmem:[#allocation11 + $0x70] sm:$0xff]  ;;  %v1465_v32 = vld [vmem:[#allocation11 + $0x58] sm:$0xff] }
 0x224   : > { %17161 = vmatmul.mubr.msk.f32.vlgmr.msra.gmra.mxu0 %vm1307_vm0, %v1268_v17  ;;  %17162 = vmatmul.mubr.msk.f32.vlgmr.msra.gmra.mxu1 %vm1307_vm0, %v1268_v17  ;;  %v1463_v31 = vld [vmem:[#allocation11 + $0x48] sm:$0xff]  ;;  %v1462_v33 = vld [vmem:[#allocation11 + $0x40] sm:$0xff]  ;;  %v1464_v34 = vld [vmem:[#allocation11 + $0x50] sm:$0xff] }
 0x225   : > { %1524 = vmatprep.subr.mxu0 %v1475_v19  ;;  %1595 = vmatprep.subr.mxu1 %v1477_v20  ;;  %v1459_v35 = vld [vmem:[#allocation11 + $0x28] sm:$0xff]  ;;  %v1461_v36 = vld [vmem:[#allocation11 + $0x38] sm:$0xff]  ;;  %v1458_v37 = vld [vmem:[#allocation11 + $0x20] sm:$0xff] }
 0x226   : > { %1525 = vmatpush1.msra.mxu0 %v1474_v21  ;;  %1596 = vmatpush1.msra.mxu1 %v1476_v22  ;;  %v1460_v38 = vld [vmem:[#allocation11 + $0x30] sm:$0xff]  ;;  %v1455_v39 = vld [vmem:[#allocation11 + $0x8] sm:$0xff]  ;;  %v1457_v40 = vld [vmem:[#allocation11 + $0x18] sm:$0xff] }
 0x227   : > { %1526 = vmatprep.subr.mxu0 %v1471_v23  ;;  %1597 = vmatprep.subr.mxu1 %v1473_v24  ;;  %v1454_v41 = vld [vmem:[#allocation11] sm:$0xff]  ;;  %v1456_v42 = vld [vmem:[#allocation11 + $0x10] sm:$0xff]  ;;  %v1285_v48 = vld [vmem:[#allocation9] sm:$0xf] }
 0x228   : > { %1527 = vmatpush1.msra.mxu0 %v1470_v25  ;;  %1598 = vmatpush1.msra.mxu1 %v1472_v26  ;;  %v1453_v43 = vld [vmem:[#allocation6] sm:$0xff]  ;;  %v1290_v51 = vrot.slane %v1285_v48, %v1289_v46  ;;  %v1298_v52 = vrot.slane %v1285_v48, %v1297_v47  ;;  %v1294_v53 = vrot.slane %v1285_v48, %v1293_v49  ;;  %v1478_v63 = vld [vmem:[#allocation12] sm:$0xf] }
 0x229   : > { %1528 = vmatprep.subr.mxu0 %v1467_v27  ;;  %1599 = vmatprep.subr.mxu1 %v1469_v28  ;;  %v1302_v54 = vrot.slane %v1285_v48, %v1301_v50  ;;  %v1483_v0 = vrot.slane %v1478_v63, %v1289_v46  ;;  %v1491_v1 = vrot.slane %v1478_v63, %v1297_v47 }
 0x22a   : > { %1529 = vmatpush1.msra.mxu0 %v1466_v29  ;;  %1600 = vmatpush1.msra.mxu1 %v1468_v30  ;;  %v1487_v2 = vrot.slane %v1478_v63, %v1293_v49  ;;  %v1495_v3 = vrot.slane %v1478_v63, %v1301_v50 }
 0x22b   : > { %1530 = vmatprep.subr.mxu0 %v1463_v31  ;;  %1601 = vmatprep.subr.mxu1 %v1465_v32 }
 0x22c   : > { %1531 = vmatpush1.msra.mxu0 %v1462_v33  ;;  %1602 = vmatpush1.msra.mxu1 %v1464_v34 }
 0x22d   : > { %1532 = vmatprep.subr.mxu0 %v1459_v35  ;;  %1603 = vmatprep.subr.mxu1 %v1461_v36 }
 0x22e   : > { %1533 = vmatpush1.msra.mxu0 %v1458_v37  ;;  %1604 = vmatpush1.msra.mxu1 %v1460_v38 }
 0x22f   : > { %1534 = vmatprep.subr.mxu0 %v1455_v39  ;;  %1605 = vmatprep.subr.mxu1 %v1457_v40 }
 0x230   : > { %1535 = vmatpush1.msra.mxu0 %v1454_v41  ;;  %1568 = vmatprep.mubr.f32.mxu0 %v21738_v18 }
 0x231   : > { %1606 = vmatpush1.msra.mxu1 %v1456_v42  ;;  %1639 = vmatprep.mubr.f32.mxu1 %v21738_v18 }
 0x232   : > { %17163 = vmatmul.mubr.msk.f32.vlgmr.msra.gmra.mxu0 %vm1500_vm1, %v1453_v43  ;;  %17164 = vmatmul.mubr.msk.f32.vlgmr.msra.gmra.mxu1 %vm1500_vm1, %v1453_v43 }
 0x2e4   : > { %v1377_v55 = vpop.f32.mrf.mxu0  ;;  %v1448_v56 = vpop.f32.mrf.mxu1 }
 0x2e5   : > { %v1378_v57 = vadd.f32 %v1377_v55, %v1290_v51  ;;  %v1449_v58 = vadd.f32 %v1448_v56, %v1298_v52 }
 0x2e6   : > { %v1379_v59 = vpop.f32.mrf.mxu0  ;;  %v1450_v60 = vpop.f32.mrf.mxu1 }
 0x2e7   : > { %1646 = vst [vmem:[#allocation2 + $0x30] sm:$0xff] %v1378_v57  ;;  %1648 = vst [vmem:[#allocation2 + $0x18] sm:$0xff] %v1449_v58  ;;  %v1380_v61 = vadd.f32 %v1379_v59, %v1294_v53  ;;  %v1451_v62 = vadd.f32 %v1450_v60, %v1302_v54 }
 0x2e9   : > { %1647 = vst [vmem:[#allocation2] sm:$0xff] %v1380_v61  ;;  %1649 = vst [vmem:[#allocation2 + $0x10] sm:$0xff] %v1451_v62 }
 0x2f2   : > { %v1570_v4 = vpop.f32.mrf.mxu0  ;;  %v1641_v5 = vpop.f32.mrf.mxu1 }
 0x2f3   : > { %v1571_v6 = vadd.f32 %v1570_v4, %v1483_v0  ;;  %v1642_v7 = vadd.f32 %v1641_v5, %v1491_v1 }
 0x2f4   : > { %v1572_v8 = vpop.f32.mrf.mxu0  ;;  %v1643_v9 = vpop.f32.mrf.mxu1 }
 0x2f5   : > { %1650 = vst [vmem:[#allocation2 + $0x8] sm:$0xff] %v1571_v6  ;;  %1652 = vst [vmem:[#allocation2 + $0x28] sm:$0xff] %v1642_v7  ;;  %v1573_v10 = vadd.f32 %v1572_v8, %v1487_v2  ;;  %v1644_v11 = vadd.f32 %v1643_v9, %v1495_v3 }
 0x2f7   : > { %1651 = vst [vmem:[#allocation2 + $0x20] sm:$0xff] %v1573_v10  ;;  %1653 = vst [vmem:[#allocation2 + $0x38] sm:$0xff] %v1644_v11 }
 0x2f8 PF: > { %v19324_v12 = vld [vmem:[%s22371_s22 + $0x2a4] ss:$48 sps:$4 sm:$0xff]   ;;  %v19328_v14 = vld [vmem:[%s22371_s22 + $0x2a0] ss:$48 sps:$4 sm:$0xff]   ;;  %vm21740_vm2 = vmmov 0   ;;  %vm4550_vm3 = vcmask 523264  }
 0x2f9   : > { %v19326_v13 = vld [vmem:[%s22371_s22 + $0x8a4] ss:$48 sps:$4 sm:$0xff]   ;;  %4034 = vmatprep.subr.bf16.mxu0 %v19324_v12  ;;  %v19329_v15 = vld [vmem:[%s22371_s22 + $0x8a0] ss:$48 sps:$4 sm:$0xff]   ;;  %s21741_s0 = smov 64   ;;  %vm4628_vm4 = vcmask 64512  }
 0x2fa   : > { %4077 = vmatprep.subr.bf16.mxu1 %v19326_v13  ;;  %v19330_v16 = vld [vmem:[%s22371_s22 + $0x244] ss:$48 sps:$4 sm:$0xff]   ;;  %4035 = vmatpush1.bf16.msra.mxu0 %v19328_v14  ;;  %v19334_v18 = vld [vmem:[%s22371_s22 + $0x240] ss:$48 sps:$4 sm:$0xff]   ;;  %s25292_s17 = sld [smem:[#allocation42_spill]] }
 0x2fb   : > { %4078 = vmatpush1.bf16.msra.mxu1 %v19329_v15  ;;  %v19332_v17 = vld [vmem:[%s22371_s22 + $0x844] ss:$48 sps:$4 sm:$0xff]   ;;  %4036 = vmatprep.subr.bf16.mxu0 %v19330_v16  ;;  %v19335_v19 = vld [vmem:[%s22371_s22 + $0x840] ss:$48 sps:$4 sm:$0xff]  }
 0x2fc   : > { %4079 = vmatprep.subr.bf16.mxu1 %v19332_v17  ;;  %v19336_v20 = vld [vmem:[%s22371_s22 + $0x1e4] ss:$48 sps:$4 sm:$0xff]   ;;  %v19340_v22 = vld [vmem:[%s22371_s22 + $0x1e0] ss:$48 sps:$4 sm:$0xff]  }
 0x2fd   : > { %v19338_v21 = vld [vmem:[%s22371_s22 + $0x7e4] ss:$48 sps:$4 sm:$0xff]   ;;  %v19341_v23 = vld [vmem:[%s22371_s22 + $0x7e0] ss:$48 sps:$4 sm:$0xff]  }
 0x2fe   : > { %4037 = vmatpush1.bf16.msra.mxu0 %v19334_v18  ;;  %v19342_v24 = vld [vmem:[%s22371_s22 + $0x184] ss:$48 sps:$4 sm:$0xff]   ;;  %v19346_v26 = vld [vmem:[%s22371_s22 + $0x180] ss:$48 sps:$4 sm:$0xff]  }
 0x2ff   : > { %4080 = vmatpush1.bf16.msra.mxu1 %v19335_v19  ;;  %4038 = vmatprep.subr.bf16.mxu0 %v19336_v20  ;;  %v19344_v25 = vld [vmem:[%s22371_s22 + $0x784] ss:$48 sps:$4 sm:$0xff]   ;;  %v19347_v27 = vld [vmem:[%s22371_s22 + $0x780] ss:$48 sps:$4 sm:$0xff]  }
 0x300   : > { %4081 = vmatprep.subr.bf16.mxu1 %v19338_v21  ;;  %v19348_v28 = vld [vmem:[%s22371_s22 + $0x124] ss:$48 sps:$4 sm:$0xff]   ;;  %v19352_v30 = vld [vmem:[%s22371_s22 + $0x120] ss:$48 sps:$4 sm:$0xff]   ;;  %p18749_p2 = scmp.ne.s32.totalorder %s25292_s17, 2 }
 0x301   : > { %v19350_v29 = vld [vmem:[%s22371_s22 + $0x724] ss:$48 sps:$4 sm:$0xff]   ;;  %v19353_v31 = vld [vmem:[%s22371_s22 + $0x720] ss:$48 sps:$4 sm:$0xff]   ;;  %s25296_s2 = sld [smem:[#allocation78_spill]] (!%p18749_p2) }
 0x302   : > { %4039 = vmatpush1.bf16.msra.mxu0 %v19340_v22  ;;  %v19354_v32 = vld [vmem:[%s22371_s22 + $0xc4] ss:$48 sps:$4 sm:$0xff]   ;;  %v19358_v34 = vld [vmem:[%s22371_s22 + $0xc0] ss:$48 sps:$4 sm:$0xff]   ;;  %v19422_v22 = vld [vmem:[%s22371_s22 + $0x2ac] ss:$48 sps:$4 sm:$0xff]  }
 0x303   : > { %4082 = vmatpush1.bf16.msra.mxu1 %v19341_v23  ;;  %4040 = vmatprep.subr.bf16.mxu0 %v19342_v24  ;;  %v19356_v33 = vld [vmem:[%s22371_s22 + $0x6c4] ss:$48 sps:$4 sm:$0xff]   ;;  %v19359_v35 = vld [vmem:[%s22371_s22 + $0x6c0] ss:$48 sps:$4 sm:$0xff]   ;;  %v19425_v23 = vld [vmem:[%s22371_s22 + $0x8ac] ss:$48 sps:$4 sm:$0xff]  }
 0x304   : > { %4083 = vmatprep.subr.bf16.mxu1 %v19344_v25  ;;  %v19360_v36 = vld [vmem:[%s22371_s22 + $0x64] ss:$48 sps:$4 sm:$0xff]   ;;  %v19364_v38 = vld [vmem:[%s22371_s22 + $0x60] ss:$48 sps:$4 sm:$0xff]  }
 0x305   : > { %v19362_v37 = vld [vmem:[%s22371_s22 + $0x664] ss:$48 sps:$4 sm:$0xff]   ;;  %v19365_v39 = vld [vmem:[%s22371_s22 + $0x660] ss:$48 sps:$4 sm:$0xff]  }
 0x306   : > { %4041 = vmatpush1.bf16.msra.mxu0 %v19346_v26  ;;  %v19366_v40 = vld [vmem:[%s22371_s22 + $0x4] ss:$48 sps:$4 sm:$0xff]   ;;  %v19370_v42 = vld [vmem:[%s22371_s22] ss:$48 sps:$4 sm:$0xff]   ;;  %v19420_v26 = vld [vmem:[%s22371_s22 + $0x2a8] ss:$48 sps:$4 sm:$0xff]  }
 0x307   : > { %4084 = vmatpush1.bf16.msra.mxu1 %v19347_v27  ;;  %4042 = vmatprep.subr.bf16.mxu0 %v19348_v28  ;;  %v19368_v41 = vld [vmem:[%s22371_s22 + $0x604] ss:$48 sps:$4 sm:$0xff]   ;;  %v19371_v43 = vld [vmem:[%s22371_s22 + $0x600] ss:$48 sps:$4 sm:$0xff]   ;;  %v19423_v27 = vld [vmem:[%s22371_s22 + $0x8a8] ss:$48 sps:$4 sm:$0xff]  }
 0x308   : > { %4085 = vmatprep.subr.bf16.mxu1 %v19350_v29  ;;  %v19372_v44 = vld [vmem:[%s22371_s22 + $0x5a4] ss:$48 sps:$4 sm:$0xff]   ;;  %v19376_v46 = vld [vmem:[%s22371_s22 + $0x5a0] ss:$48 sps:$4 sm:$0xff]   ;;  %v19428_v28 = vld [vmem:[%s22371_s22 + $0x24c] ss:$48 sps:$4 sm:$0xff]  }
 0x309   : > { %v19374_v45 = vld [vmem:[%s22371_s22 + $0xba4] ss:$48 sps:$4 sm:$0xff]   ;;  %v19377_v47 = vld [vmem:[%s22371_s22 + $0xba0] ss:$48 sps:$4 sm:$0xff]   ;;  %v19431_v29 = vld [vmem:[%s22371_s22 + $0x84c] ss:$48 sps:$4 sm:$0xff]  }
 0x30a   : > { %4043 = vmatpush1.bf16.msra.mxu0 %v19352_v30  ;;  %v19378_v48 = vld [vmem:[%s22371_s22 + $0x544] ss:$48 sps:$4 sm:$0xff]   ;;  %v19382_v50 = vld [vmem:[%s22371_s22 + $0x540] ss:$48 sps:$4 sm:$0xff]   ;;  %v19426_v30 = vld [vmem:[%s22371_s22 + $0x248] ss:$48 sps:$4 sm:$0xff]  }
 0x30b   : > { %4086 = vmatpush1.bf16.msra.mxu1 %v19353_v31  ;;  %4044 = vmatprep.subr.bf16.mxu0 %v19354_v32  ;;  %v19380_v49 = vld [vmem:[%s22371_s22 + $0xb44] ss:$48 sps:$4 sm:$0xff]   ;;  %v19383_v51 = vld [vmem:[%s22371_s22 + $0xb40] ss:$48 sps:$4 sm:$0xff]   ;;  %v19429_v31 = vld [vmem:[%s22371_s22 + $0x848] ss:$48 sps:$4 sm:$0xff]  }
 0x30c   : > { %4087 = vmatprep.subr.bf16.mxu1 %v19356_v33  ;;  %v19384_v52 = vld [vmem:[%s22371_s22 + $0x4e4] ss:$48 sps:$4 sm:$0xff]   ;;  %v19388_v54 = vld [vmem:[%s22371_s22 + $0x4e0] ss:$48 sps:$4 sm:$0xff]   ;;  %v19434_v32 = vld [vmem:[%s22371_s22 + $0x1ec] ss:$48 sps:$4 sm:$0xff]  }
 0x30d   : > { %v19386_v53 = vld [vmem:[%s22371_s22 + $0xae4] ss:$48 sps:$4 sm:$0xff]   ;;  %v19389_v55 = vld [vmem:[%s22371_s22 + $0xae0] ss:$48 sps:$4 sm:$0xff]   ;;  %v19437_v33 = vld [vmem:[%s22371_s22 + $0x7ec] ss:$48 sps:$4 sm:$0xff]  }
 0x30e   : > { %4045 = vmatpush1.bf16.msra.mxu0 %v19358_v34  ;;  %v19390_v56 = vld [vmem:[%s22371_s22 + $0x484] ss:$48 sps:$4 sm:$0xff]   ;;  %v19394_v62 = vld [vmem:[%s22371_s22 + $0x480] ss:$48 sps:$4 sm:$0xff]   ;;  %v19432_v34 = vld [vmem:[%s22371_s22 + $0x1e8] ss:$48 sps:$4 sm:$0xff]  }
 0x30f   : > { %4088 = vmatpush1.bf16.msra.mxu1 %v19359_v35  ;;  %4046 = vmatprep.subr.bf16.mxu0 %v19360_v36  ;;  %v19392_v57 = vld [vmem:[%s22371_s22 + $0xa84] ss:$48 sps:$4 sm:$0xff]   ;;  %v19395_v63 = vld [vmem:[%s22371_s22 + $0xa80] ss:$48 sps:$4 sm:$0xff]   ;;  %v19435_v35 = vld [vmem:[%s22371_s22 + $0x7e8] ss:$48 sps:$4 sm:$0xff]  }
 0x310   : > { %4089 = vmatprep.subr.bf16.mxu1 %v19362_v37  ;;  %v1655_v58 = vld [vmem:[#allocation2] sm:$0xff]  ;;  %v1657_v60 = vld [vmem:[#allocation2 + $0x10] sm:$0xff]  ;;  %v1661_v61 = vld [vmem:[#allocation2 + $0x38] sm:$0xff] }
 0x311   : > { %v1659_v59 = vld [vmem:[#allocation2 + $0x20] sm:$0xff]  ;;  %v22464_v2 = vpack.c.bf16 %v1661_v61, %v1657_v60  ;;  %v19400_v4 = vld [vmem:[%s22371_s22 + $0x420] ss:$48 sps:$4 sm:$0xff]   ;;  %v1654_v18 = vld [vmem:[#allocation2 + $0x30] sm:$0xff] }
 0x312   : > { %4047 = vmatpush1.bf16.msra.mxu0 %v19364_v38  ;;  %v19396_v0 = vld [vmem:[%s22371_s22 + $0x424] ss:$48 sps:$4 sm:$0xff]   ;;  %v22462_v1 = vpack.c.bf16 %v1659_v59, %v1655_v58  ;;  %v19401_v5 = vld [vmem:[%s22371_s22 + $0xa20] ss:$48 sps:$4 sm:$0xff]   ;;  %v19440_v36 = vld [vmem:[%s22371_s22 + $0x18c] ss:$48 sps:$4 sm:$0xff]  }
 0x313   : > { %4090 = vmatpush1.bf16.msra.mxu1 %v19365_v39  ;;  %4048 = vmatprep.subr.bf16.mxu0 %v19366_v40  ;;  %v19398_v3 = vld [vmem:[%s22371_s22 + $0xa24] ss:$48 sps:$4 sm:$0xff]   ;;  %v19406_v8 = vld [vmem:[%s22371_s22 + $0x3c0] ss:$48 sps:$4 sm:$0xff]   ;;  %v19443_v37 = vld [vmem:[%s22371_s22 + $0x78c] ss:$48 sps:$4 sm:$0xff]  }
 0x314   : > { %4091 = vmatprep.subr.bf16.mxu1 %v19368_v41  ;;  %4066 = vmatprep.mubr.bf16.mxu0 %v22462_v1  ;;  %v19402_v6 = vld [vmem:[%s22371_s22 + $0x3c4] ss:$48 sps:$4 sm:$0xff]   ;;  %v19407_v9 = vld [vmem:[%s22371_s22 + $0x9c0] ss:$48 sps:$4 sm:$0xff]   ;;  %v19438_v38 = vld [vmem:[%s22371_s22 + $0x188] ss:$48 sps:$4 sm:$0xff]  }
 0x315   : > { %4109 = vmatprep.mubr.bf16.mxu1 %v22464_v2  ;;  %v19404_v7 = vld [vmem:[%s22371_s22 + $0x9c4] ss:$48 sps:$4 sm:$0xff]   ;;  %v19412_v12 = vld [vmem:[%s22371_s22 + $0x360] ss:$48 sps:$4 sm:$0xff]   ;;  %v19441_v39 = vld [vmem:[%s22371_s22 + $0x788] ss:$48 sps:$4 sm:$0xff]  }
 0x316   : > { %4049 = vmatpush1.bf16.msra.mxu0 %v19370_v42  ;;  %v19408_v10 = vld [vmem:[%s22371_s22 + $0x364] ss:$48 sps:$4 sm:$0xff]   ;;  %v19413_v13 = vld [vmem:[%s22371_s22 + $0x960] ss:$48 sps:$4 sm:$0xff]   ;;  %v19446_v40 = vld [vmem:[%s22371_s22 + $0x12c] ss:$48 sps:$4 sm:$0xff]  }
 0x317   : > { %4092 = vmatpush1.bf16.msra.mxu1 %v19371_v43  ;;  %4050 = vmatprep.subr.bf16.mxu0 %v19372_v44  ;;  %v19410_v11 = vld [vmem:[%s22371_s22 + $0x964] ss:$48 sps:$4 sm:$0xff]   ;;  %v19418_v16 = vld [vmem:[%s22371_s22 + $0x300] ss:$48 sps:$4 sm:$0xff]   ;;  %v19449_v41 = vld [vmem:[%s22371_s22 + $0x72c] ss:$48 sps:$4 sm:$0xff]  }
 0x318   : > { %4093 = vmatprep.subr.bf16.mxu1 %v19374_v45  ;;  %v19414_v14 = vld [vmem:[%s22371_s22 + $0x304] ss:$48 sps:$4 sm:$0xff]   ;;  %v19419_v17 = vld [vmem:[%s22371_s22 + $0x900] ss:$48 sps:$4 sm:$0xff]   ;;  %v19444_v42 = vld [vmem:[%s22371_s22 + $0x128] ss:$48 sps:$4 sm:$0xff]  }
 0x319   : > { %v19416_v15 = vld [vmem:[%s22371_s22 + $0x904] ss:$48 sps:$4 sm:$0xff]   ;;  %v19447_v43 = vld [vmem:[%s22371_s22 + $0x728] ss:$48 sps:$4 sm:$0xff]   ;;  %v19452_v44 = vld [vmem:[%s22371_s22 + $0xcc] ss:$48 sps:$4 sm:$0xff]  }
 0x31a   : > { %4051 = vmatpush2.bf16.msra.mxu0 %v19376_v46  ;;  %v1658_v19 = vld [vmem:[#allocation2 + $0x8] sm:$0xff]  ;;  %v1656_v20 = vld [vmem:[#allocation2 + $0x18] sm:$0xff]  ;;  %v19450_v46 = vld [vmem:[%s22371_s22 + $0xc8] ss:$48 sps:$4 sm:$0xff]  }
 0x31b   : > { %4094 = vmatpush2.bf16.msra.mxu1 %v19377_v47  ;;  %4052 = vmatprep.subr.bf16.mxu0 %v19378_v48  ;;  %v1660_v21 = vld [vmem:[#allocation2 + $0x28] sm:$0xff]  ;;  %v22485_v24 = vpack.c.bf16 %v1658_v19, %v1654_v18  ;;  %v19453_v47 = vld [vmem:[%s22371_s22 + $0x6c8] ss:$48 sps:$4 sm:$0xff]  }
 0x31c   : > { %4095 = vmatprep.subr.bf16.mxu1 %v19380_v49  ;;  %v22487_v25 = vpack.c.bf16 %v1660_v21, %v1656_v20  ;;  %v19455_v45 = vld [vmem:[%s22371_s22 + $0x6cc] ss:$48 sps:$4 sm:$0xff]   ;;  %v19468_v58 = vld [vmem:[%s22371_s22 + $0x5a8] ss:$48 sps:$4 sm:$0xff]  }
 0x31d   : > { %v19458_v48 = vld [vmem:[%s22371_s22 + $0x6c] ss:$48 sps:$4 sm:$0xff]   ;;  %v19471_v59 = vld [vmem:[%s22371_s22 + $0xba8] ss:$48 sps:$4 sm:$0xff]  }
 0x31e   : > { %4053 = vmatpush2.bf16.msra.mxu0 %v19382_v50  ;;  %v19461_v49 = vld [vmem:[%s22371_s22 + $0x66c] ss:$48 sps:$4 sm:$0xff]   ;;  %v19456_v50 = vld [vmem:[%s22371_s22 + $0x68] ss:$48 sps:$4 sm:$0xff]  }
 0x31f   : > { %4096 = vmatpush2.bf16.msra.mxu1 %v19383_v51  ;;  %4054 = vmatprep.subr.bf16.mxu0 %v19384_v52  ;;  %v19459_v51 = vld [vmem:[%s22371_s22 + $0x668] ss:$48 sps:$4 sm:$0xff]   ;;  %v19464_v52 = vld [vmem:[%s22371_s22 + $0xc] ss:$48 sps:$4 sm:$0xff]  }
 0x320   : > { %4097 = vmatprep.subr.bf16.mxu1 %v19386_v53  ;;  %v19467_v53 = vld [vmem:[%s22371_s22 + $0x60c] ss:$48 sps:$4 sm:$0xff]   ;;  %v19504_v20 = vld [vmem:[%s22371_s22 + $0x368] ss:$48 sps:$4 sm:$0xff]  }
 0x321   : > { %v19476_v60 = vld [vmem:[%s22371_s22 + $0x54c] ss:$48 sps:$4 sm:$0xff]   ;;  %v19507_v21 = vld [vmem:[%s22371_s22 + $0x968] ss:$48 sps:$4 sm:$0xff]  }
 0x322   : > { %4055 = vmatpush2.bf16.msra.mxu0 %v19388_v54  ;;  %v19462_v54 = vld [vmem:[%s22371_s22 + $0x8] ss:$48 sps:$4 sm:$0xff]   ;;  %v19479_v61 = vld [vmem:[%s22371_s22 + $0xb4c] ss:$48 sps:$4 sm:$0xff]  }
 0x323   : > { %4098 = vmatpush2.bf16.msra.mxu1 %v19389_v55  ;;  %4056 = vmatprep.subr.bf16.mxu0 %v19390_v56  ;;  %v19465_v55 = vld [vmem:[%s22371_s22 + $0x608] ss:$48 sps:$4 sm:$0xff]   ;;  %v19470_v56 = vld [vmem:[%s22371_s22 + $0x5ac] ss:$48 sps:$4 sm:$0xff]  }
 0x324   : > { %4099 = vmatprep.subr.bf16.mxu1 %v19392_v57  ;;  %v19473_v57 = vld [vmem:[%s22371_s22 + $0xbac] ss:$48 sps:$4 sm:$0xff]  }
 0x325   : > { %v19506_v18 = vld [vmem:[%s22371_s22 + $0x36c] ss:$48 sps:$4 sm:$0xff]  }
 0x326   : > { %4057 = vmatpush2.bf16.msra.mxu0 %v19394_v62  ;;  %v19474_v62 = vld [vmem:[%s22371_s22 + $0x548] ss:$48 sps:$4 sm:$0xff]   ;;  %v19509_v19 = vld [vmem:[%s22371_s22 + $0x96c] ss:$48 sps:$4 sm:$0xff]  }
 0x327   : > { %4100 = vmatpush2.bf16.msra.mxu1 %v19395_v63  ;;  %4058 = vmatprep.subr.bf16.mxu0 %v19396_v0  ;;  %v19477_v63 = vld [vmem:[%s22371_s22 + $0xb48] ss:$48 sps:$4 sm:$0xff]   ;;  %v19482_v0 = vld [vmem:[%s22371_s22 + $0x4ec] ss:$48 sps:$4 sm:$0xff]  }
 0x328   : > { %4101 = vmatprep.subr.bf16.mxu1 %v19398_v3  ;;  %v19485_v3 = vld [vmem:[%s22371_s22 + $0xaec] ss:$48 sps:$4 sm:$0xff]  }
 0x32a   : > { %4059 = vmatpush2.bf16.msra.mxu0 %v19400_v4  ;;  %v19480_v4 = vld [vmem:[%s22371_s22 + $0x4e8] ss:$48 sps:$4 sm:$0xff]  }
 0x32b   : > { %4102 = vmatpush2.bf16.msra.mxu1 %v19401_v5  ;;  %4060 = vmatprep.subr.bf16.mxu0 %v19402_v6  ;;  %v19483_v5 = vld [vmem:[%s22371_s22 + $0xae8] ss:$48 sps:$4 sm:$0xff]   ;;  %v19488_v6 = vld [vmem:[%s22371_s22 + $0x48c] ss:$48 sps:$4 sm:$0xff]  }
 0x32c   : > { %4103 = vmatprep.subr.bf16.mxu1 %v19404_v7  ;;  %v19491_v7 = vld [vmem:[%s22371_s22 + $0xa8c] ss:$48 sps:$4 sm:$0xff]  }
 0x32e   : > { %4061 = vmatpush2.bf16.msra.mxu0 %v19406_v8  ;;  %v19486_v8 = vld [vmem:[%s22371_s22 + $0x488] ss:$48 sps:$4 sm:$0xff]  }
 0x32f   : > { %4104 = vmatpush2.bf16.msra.mxu1 %v19407_v9  ;;  %4062 = vmatprep.subr.bf16.mxu0 %v19408_v10  ;;  %v19489_v9 = vld [vmem:[%s22371_s22 + $0xa88] ss:$48 sps:$4 sm:$0xff]   ;;  %v19494_v10 = vld [vmem:[%s22371_s22 + $0x42c] ss:$48 sps:$4 sm:$0xff]  }
 0x330   : > { %4105 = vmatprep.subr.bf16.mxu1 %v19410_v11  ;;  %v19497_v11 = vld [vmem:[%s22371_s22 + $0xa2c] ss:$48 sps:$4 sm:$0xff]  }
 0x332   : > { %4063 = vmatpush2.bf16.msra.mxu0 %v19412_v12  ;;  %v19492_v12 = vld [vmem:[%s22371_s22 + $0x428] ss:$48 sps:$4 sm:$0xff]  }
 0x333   : > { %4106 = vmatpush2.bf16.msra.mxu1 %v19413_v13  ;;  %4064 = vmatprep.subr.bf16.mxu0 %v19414_v14  ;;  %v19495_v13 = vld [vmem:[%s22371_s22 + $0xa28] ss:$48 sps:$4 sm:$0xff]   ;;  %v19500_v14 = vld [vmem:[%s22371_s22 + $0x3cc] ss:$48 sps:$4 sm:$0xff]  }
 0x334   : > { %4107 = vmatprep.subr.bf16.mxu1 %v19416_v15  ;;  %v19503_v15 = vld [vmem:[%s22371_s22 + $0x9cc] ss:$48 sps:$4 sm:$0xff]  }
 0x336   : > { %4065 = vmatpush2.bf16.msra.mxu0 %v19418_v16  ;;  %v19498_v16 = vld [vmem:[%s22371_s22 + $0x3c8] ss:$48 sps:$4 sm:$0xff]  }
 0x337   : > { %4108 = vmatpush2.bf16.msra.mxu1 %v19419_v17  ;;  %4120 = vmatprep.subr.bf16.mxu0 %v19422_v22  ;;  %v19501_v17 = vld [vmem:[%s22371_s22 + $0x9c8] ss:$48 sps:$4 sm:$0xff]   ;;  %v19512_v22 = vld [vmem:[%s22371_s22 + $0x30c] ss:$48 sps:$4 sm:$0xff]  }
 0x338   : > { %4163 = vmatprep.subr.bf16.mxu1 %v19425_v23  ;;  %v19515_v23 = vld [vmem:[%s22371_s22 + $0x90c] ss:$48 sps:$4 sm:$0xff]  }
 0x339   : > { %4067 = vmatmul.mubr.bf16.vlgmr.msra.gmra.mxu0 %v22485_v24 }
 0x33a   : > { %4110 = vmatmul.mubr.bf16.vlgmr.msra.gmra.mxu1 %v22487_v25  ;;  %4121 = vmatpush1.bf16.msra.mxu0 %v19420_v26  ;;  %v19510_v26 = vld [vmem:[%s22371_s22 + $0x308] ss:$48 sps:$4 sm:$0xff]  }
 0x33b   : > { %4164 = vmatpush1.bf16.msra.mxu1 %v19423_v27  ;;  %4122 = vmatprep.subr.bf16.mxu0 %v19428_v28  ;;  %v19513_v27 = vld [vmem:[%s22371_s22 + $0x908] ss:$48 sps:$4 sm:$0xff]   ;;  %v19518_v28 = vld [vmem:[%s22371_s22 + $0x2b4] ss:$48 sps:$4 sm:$0xff]  }
 0x33c   : > { %4165 = vmatprep.subr.bf16.mxu1 %v19431_v29  ;;  %4152 = vmatprep.mubr.bf16.mxu0 %v22462_v1  ;;  %v19521_v29 = vld [vmem:[%s22371_s22 + $0x8b4] ss:$48 sps:$4 sm:$0xff]  }
 0x33d   : > { %4195 = vmatprep.mubr.bf16.mxu1 %v22464_v2 }
 0x33e   : > { %4123 = vmatpush1.bf16.msra.mxu0 %v19426_v30  ;;  %v19516_v30 = vld [vmem:[%s22371_s22 + $0x2b0] ss:$48 sps:$4 sm:$0xff]  }
 0x33f   : > { %4166 = vmatpush1.bf16.msra.mxu1 %v19429_v31  ;;  %4124 = vmatprep.subr.bf16.mxu0 %v19434_v32  ;;  %v19519_v31 = vld [vmem:[%s22371_s22 + $0x8b0] ss:$48 sps:$4 sm:$0xff]   ;;  %v19524_v32 = vld [vmem:[%s22371_s22 + $0x254] ss:$48 sps:$4 sm:$0xff]  }
 0x340   : > { %4167 = vmatprep.subr.bf16.mxu1 %v19437_v33  ;;  %v19527_v33 = vld [vmem:[%s22371_s22 + $0x854] ss:$48 sps:$4 sm:$0xff]  }
 0x342   : > { %4125 = vmatpush1.bf16.msra.mxu0 %v19432_v34  ;;  %v19522_v34 = vld [vmem:[%s22371_s22 + $0x250] ss:$48 sps:$4 sm:$0xff]  }
 0x343   : > { %4168 = vmatpush1.bf16.msra.mxu1 %v19435_v35  ;;  %4126 = vmatprep.subr.bf16.mxu0 %v19440_v36  ;;  %v19525_v35 = vld [vmem:[%s22371_s22 + $0x850] ss:$48 sps:$4 sm:$0xff]   ;;  %v19530_v36 = vld [vmem:[%s22371_s22 + $0x1f4] ss:$48 sps:$4 sm:$0xff]  }
 0x344   : > { %4169 = vmatprep.subr.bf16.mxu1 %v19443_v37  ;;  %v19533_v37 = vld [vmem:[%s22371_s22 + $0x7f4] ss:$48 sps:$4 sm:$0xff]  }
 0x346   : > { %4127 = vmatpush1.bf16.msra.mxu0 %v19438_v38  ;;  %v19528_v38 = vld [vmem:[%s22371_s22 + $0x1f0] ss:$48 sps:$4 sm:$0xff]  }
 0x347   : > { %4170 = vmatpush1.bf16.msra.mxu1 %v19441_v39  ;;  %4128 = vmatprep.subr.bf16.mxu0 %v19446_v40  ;;  %v19531_v39 = vld [vmem:[%s22371_s22 + $0x7f0] ss:$48 sps:$4 sm:$0xff]   ;;  %v19536_v40 = vld [vmem:[%s22371_s22 + $0x194] ss:$48 sps:$4 sm:$0xff]  }
 0x348   : > { %4171 = vmatprep.subr.bf16.mxu1 %v19449_v41  ;;  %v19539_v41 = vld [vmem:[%s22371_s22 + $0x794] ss:$48 sps:$4 sm:$0xff]  }
 0x34a   : > { %4129 = vmatpush1.bf16.msra.mxu0 %v19444_v42  ;;  %v19534_v42 = vld [vmem:[%s22371_s22 + $0x190] ss:$48 sps:$4 sm:$0xff]  }
 0x34b   : > { %4172 = vmatpush1.bf16.msra.mxu1 %v19447_v43  ;;  %4130 = vmatprep.subr.bf16.mxu0 %v19452_v44  ;;  %v19537_v43 = vld [vmem:[%s22371_s22 + $0x790] ss:$48 sps:$4 sm:$0xff]   ;;  %v19542_v44 = vld [vmem:[%s22371_s22 + $0x134] ss:$48 sps:$4 sm:$0xff]  }
 0x34c   : > { %4173 = vmatprep.subr.bf16.mxu1 %v19455_v45  ;;  %v19545_v45 = vld [vmem:[%s22371_s22 + $0x734] ss:$48 sps:$4 sm:$0xff]  }
 0x34e   : > { %4131 = vmatpush1.bf16.msra.mxu0 %v19450_v46  ;;  %v19540_v46 = vld [vmem:[%s22371_s22 + $0x130] ss:$48 sps:$4 sm:$0xff]  }
 0x34f   : > { %4174 = vmatpush1.bf16.msra.mxu1 %v19453_v47  ;;  %4132 = vmatprep.subr.bf16.mxu0 %v19458_v48  ;;  %v19543_v47 = vld [vmem:[%s22371_s22 + $0x730] ss:$48 sps:$4 sm:$0xff]   ;;  %v19548_v48 = vld [vmem:[%s22371_s22 + $0xd4] ss:$48 sps:$4 sm:$0xff]  }
 0x350   : > { %4175 = vmatprep.subr.bf16.mxu1 %v19461_v49  ;;  %v19551_v49 = vld [vmem:[%s22371_s22 + $0x6d4] ss:$48 sps:$4 sm:$0xff]  }
 0x352   : > { %4133 = vmatpush1.bf16.msra.mxu0 %v19456_v50  ;;  %v19546_v50 = vld [vmem:[%s22371_s22 + $0xd0] ss:$48 sps:$4 sm:$0xff]  }
 0x353   : > { %4176 = vmatpush1.bf16.msra.mxu1 %v19459_v51  ;;  %4134 = vmatprep.subr.bf16.mxu0 %v19464_v52  ;;  %v19549_v51 = vld [vmem:[%s22371_s22 + $0x6d0] ss:$48 sps:$4 sm:$0xff]   ;;  %v19554_v52 = vld [vmem:[%s22371_s22 + $0x74] ss:$48 sps:$4 sm:$0xff]  }
 0x354   : > { %4177 = vmatprep.subr.bf16.mxu1 %v19467_v53  ;;  %v19557_v53 = vld [vmem:[%s22371_s22 + $0x674] ss:$48 sps:$4 sm:$0xff]  }
 0x356   : > { %4135 = vmatpush1.bf16.msra.mxu0 %v19462_v54  ;;  %v19552_v54 = vld [vmem:[%s22371_s22 + $0x70] ss:$48 sps:$4 sm:$0xff]  }
 0x357   : > { %4178 = vmatpush1.bf16.msra.mxu1 %v19465_v55  ;;  %4136 = vmatprep.subr.bf16.mxu0 %v19470_v56  ;;  %v19555_v55 = vld [vmem:[%s22371_s22 + $0x670] ss:$48 sps:$4 sm:$0xff]   ;;  %v19560_v56 = vld [vmem:[%s22371_s22 + $0x14] ss:$48 sps:$4 sm:$0xff]  }
 0x358   : > { %4179 = vmatprep.subr.bf16.mxu1 %v19473_v57  ;;  %v19563_v57 = vld [vmem:[%s22371_s22 + $0x614] ss:$48 sps:$4 sm:$0xff]  }
 0x35a   : > { %4137 = vmatpush2.bf16.msra.mxu0 %v19468_v58  ;;  %v19558_v58 = vld [vmem:[%s22371_s22 + $0x10] ss:$48 sps:$4 sm:$0xff]  }
 0x35b   : > { %4180 = vmatpush2.bf16.msra.mxu1 %v19471_v59  ;;  %4138 = vmatprep.subr.bf16.mxu0 %v19476_v60  ;;  %v19561_v59 = vld [vmem:[%s22371_s22 + $0x610] ss:$48 sps:$4 sm:$0xff]   ;;  %v19566_v60 = vld [vmem:[%s22371_s22 + $0x5b4] ss:$48 sps:$4 sm:$0xff]  }
 0x35c   : > { %4181 = vmatprep.subr.bf16.mxu1 %v19479_v61  ;;  %v19569_v61 = vld [vmem:[%s22371_s22 + $0xbb4] ss:$48 sps:$4 sm:$0xff]  }
 0x35e   : > { %4139 = vmatpush2.bf16.msra.mxu0 %v19474_v62  ;;  %v19564_v62 = vld [vmem:[%s22371_s22 + $0x5b0] ss:$48 sps:$4 sm:$0xff]  }
 0x35f   : > { %4182 = vmatpush2.bf16.msra.mxu1 %v19477_v63  ;;  %4140 = vmatprep.subr.bf16.mxu0 %v19482_v0  ;;  %v19567_v63 = vld [vmem:[%s22371_s22 + $0xbb0] ss:$48 sps:$4 sm:$0xff]   ;;  %v19572_v0 = vld [vmem:[%s22371_s22 + $0x554] ss:$48 sps:$4 sm:$0xff]  }
 0x360   : > { %4183 = vmatprep.subr.bf16.mxu1 %v19485_v3  ;;  %v19575_v3 = vld [vmem:[%s22371_s22 + $0xb54] ss:$48 sps:$4 sm:$0xff]  }
 0x362   : > { %4141 = vmatpush2.bf16.msra.mxu0 %v19480_v4  ;;  %v19570_v4 = vld [vmem:[%s22371_s22 + $0x550] ss:$48 sps:$4 sm:$0xff]  }
 0x363   : > { %4184 = vmatpush2.bf16.msra.mxu1 %v19483_v5  ;;  %4142 = vmatprep.subr.bf16.mxu0 %v19488_v6  ;;  %v19573_v5 = vld [vmem:[%s22371_s22 + $0xb50] ss:$48 sps:$4 sm:$0xff]   ;;  %v19578_v6 = vld [vmem:[%s22371_s22 + $0x4f4] ss:$48 sps:$4 sm:$0xff]  }
 0x364   : > { %4185 = vmatprep.subr.bf16.mxu1 %v19491_v7  ;;  %v19581_v7 = vld [vmem:[%s22371_s22 + $0xaf4] ss:$48 sps:$4 sm:$0xff]  }
 0x366   : > { %4143 = vmatpush2.bf16.msra.mxu0 %v19486_v8  ;;  %v19576_v8 = vld [vmem:[%s22371_s22 + $0x4f0] ss:$48 sps:$4 sm:$0xff]  }
 0x367   : > { %4186 = vmatpush2.bf16.msra.mxu1 %v19489_v9  ;;  %4144 = vmatprep.subr.bf16.mxu0 %v19494_v10  ;;  %v19579_v9 = vld [vmem:[%s22371_s22 + $0xaf0] ss:$48 sps:$4 sm:$0xff]   ;;  %v19584_v10 = vld [vmem:[%s22371_s22 + $0x494] ss:$48 sps:$4 sm:$0xff]  }
 0x368   : > { %4187 = vmatprep.subr.bf16.mxu1 %v19497_v11  ;;  %v19587_v11 = vld [vmem:[%s22371_s22 + $0xa94] ss:$48 sps:$4 sm:$0xff]  }
 0x36a   : > { %4145 = vmatpush2.bf16.msra.mxu0 %v19492_v12  ;;  %v19582_v12 = vld [vmem:[%s22371_s22 + $0x490] ss:$48 sps:$4 sm:$0xff]  }
 0x36b   : > { %4188 = vmatpush2.bf16.msra.mxu1 %v19495_v13  ;;  %4146 = vmatprep.subr.bf16.mxu0 %v19500_v14  ;;  %v19585_v13 = vld [vmem:[%s22371_s22 + $0xa90] ss:$48 sps:$4 sm:$0xff]   ;;  %v19590_v14 = vld [vmem:[%s22371_s22 + $0x434] ss:$48 sps:$4 sm:$0xff]  }
 0x36c   : > { %4189 = vmatprep.subr.bf16.mxu1 %v19503_v15  ;;  %v19593_v15 = vld [vmem:[%s22371_s22 + $0xa34] ss:$48 sps:$4 sm:$0xff]  }
 0x36e   : > { %4147 = vmatpush2.bf16.msra.mxu0 %v19498_v16  ;;  %v19588_v16 = vld [vmem:[%s22371_s22 + $0x430] ss:$48 sps:$4 sm:$0xff]  }
 0x36f   : > { %4190 = vmatpush2.bf16.msra.mxu1 %v19501_v17  ;;  %4148 = vmatprep.subr.bf16.mxu0 %v19506_v18  ;;  %v19591_v17 = vld [vmem:[%s22371_s22 + $0xa30] ss:$48 sps:$4 sm:$0xff]   ;;  %v19596_v18 = vld [vmem:[%s22371_s22 + $0x3d4] ss:$48 sps:$4 sm:$0xff]  }
 0x370   : > { %4191 = vmatprep.subr.bf16.mxu1 %v19509_v19  ;;  %v19599_v19 = vld [vmem:[%s22371_s22 + $0x9d4] ss:$48 sps:$4 sm:$0xff]  }
 0x372   : > { %4149 = vmatpush2.bf16.msra.mxu0 %v19504_v20  ;;  %v19594_v20 = vld [vmem:[%s22371_s22 + $0x3d0] ss:$48 sps:$4 sm:$0xff]  }
 0x373   : > { %4192 = vmatpush2.bf16.msra.mxu1 %v19507_v21  ;;  %4150 = vmatprep.subr.bf16.mxu0 %v19512_v22  ;;  %v19597_v21 = vld [vmem:[%s22371_s22 + $0x9d0] ss:$48 sps:$4 sm:$0xff]   ;;  %v19602_v22 = vld [vmem:[%s22371_s22 + $0x374] ss:$48 sps:$4 sm:$0xff]  }
 0x374   : > { %4193 = vmatprep.subr.bf16.mxu1 %v19515_v23  ;;  %v19605_v23 = vld [vmem:[%s22371_s22 + $0x974] ss:$48 sps:$4 sm:$0xff]  }
 0x376   : > { %4151 = vmatpush2.bf16.msra.mxu0 %v19510_v26  ;;  %v19600_v26 = vld [vmem:[%s22371_s22 + $0x370] ss:$48 sps:$4 sm:$0xff]  }
 0x377   : > { %4194 = vmatpush2.bf16.msra.mxu1 %v19513_v27  ;;  %4206 = vmatprep.subr.bf16.mxu0 %v19518_v28  ;;  %v19603_v27 = vld [vmem:[%s22371_s22 + $0x970] ss:$48 sps:$4 sm:$0xff]   ;;  %v19608_v28 = vld [vmem:[%s22371_s22 + $0x314] ss:$48 sps:$4 sm:$0xff]  }
 0x378   : > { %4249 = vmatprep.subr.bf16.mxu1 %v19521_v29  ;;  %v19611_v29 = vld [vmem:[%s22371_s22 + $0x914] ss:$48 sps:$4 sm:$0xff]  }
 0x379   : > { %4153 = vmatmul.mubr.bf16.vlgmr.msra.gmra.mxu0 %v22485_v24 }
 0x37a   : > { %4196 = vmatmul.mubr.bf16.vlgmr.msra.gmra.mxu1 %v22487_v25  ;;  %4207 = vmatpush1.bf16.msra.mxu0 %v19516_v30  ;;  %v19606_v30 = vld [vmem:[%s22371_s22 + $0x310] ss:$48 sps:$4 sm:$0xff]  }
 0x37b   : > { %4250 = vmatpush1.bf16.msra.mxu1 %v19519_v31  ;;  %4208 = vmatprep.subr.bf16.mxu0 %v19524_v32  ;;  %v19609_v31 = vld [vmem:[%s22371_s22 + $0x910] ss:$48 sps:$4 sm:$0xff]   ;;  %v19614_v32 = vld [vmem:[%s22371_s22 + $0x2bc] ss:$48 sps:$4 sm:$0xff]  }
 0x37c   : > { %4251 = vmatprep.subr.bf16.mxu1 %v19527_v33  ;;  %4238 = vmatprep.mubr.bf16.mxu0 %v22462_v1  ;;  %v19617_v33 = vld [vmem:[%s22371_s22 + $0x8bc] ss:$48 sps:$4 sm:$0xff]  }
 0x37d   : > { %4281 = vmatprep.mubr.bf16.mxu1 %v22464_v2 }
 0x37e   : > { %4209 = vmatpush1.bf16.msra.mxu0 %v19522_v34  ;;  %v19612_v34 = vld [vmem:[%s22371_s22 + $0x2b8] ss:$48 sps:$4 sm:$0xff]  }
 0x37f   : > { %4252 = vmatpush1.bf16.msra.mxu1 %v19525_v35  ;;  %4210 = vmatprep.subr.bf16.mxu0 %v19530_v36  ;;  %v19615_v35 = vld [vmem:[%s22371_s22 + $0x8b8] ss:$48 sps:$4 sm:$0xff]   ;;  %v19620_v36 = vld [vmem:[%s22371_s22 + $0x25c] ss:$48 sps:$4 sm:$0xff]  }
 0x380   : > { %4253 = vmatprep.subr.bf16.mxu1 %v19533_v37  ;;  %v19623_v37 = vld [vmem:[%s22371_s22 + $0x85c] ss:$48 sps:$4 sm:$0xff]  }
 0x382   : > { %4211 = vmatpush1.bf16.msra.mxu0 %v19528_v38  ;;  %v19618_v38 = vld [vmem:[%s22371_s22 + $0x258] ss:$48 sps:$4 sm:$0xff]  }
 0x383   : > { %4254 = vmatpush1.bf16.msra.mxu1 %v19531_v39  ;;  %4212 = vmatprep.subr.bf16.mxu0 %v19536_v40  ;;  %v19621_v39 = vld [vmem:[%s22371_s22 + $0x858] ss:$48 sps:$4 sm:$0xff]   ;;  %v19626_v40 = vld [vmem:[%s22371_s22 + $0x1fc] ss:$48 sps:$4 sm:$0xff]  }
 0x384   : > { %4255 = vmatprep.subr.bf16.mxu1 %v19539_v41  ;;  %v19629_v41 = vld [vmem:[%s22371_s22 + $0x7fc] ss:$48 sps:$4 sm:$0xff]  }
 0x386   : > { %4213 = vmatpush1.bf16.msra.mxu0 %v19534_v42  ;;  %v19624_v42 = vld [vmem:[%s22371_s22 + $0x1f8] ss:$48 sps:$4 sm:$0xff]  }
 0x387   : > { %4256 = vmatpush1.bf16.msra.mxu1 %v19537_v43  ;;  %4214 = vmatprep.subr.bf16.mxu0 %v19542_v44  ;;  %v19627_v43 = vld [vmem:[%s22371_s22 + $0x7f8] ss:$48 sps:$4 sm:$0xff]   ;;  %v19632_v44 = vld [vmem:[%s22371_s22 + $0x19c] ss:$48 sps:$4 sm:$0xff]  }
 0x388   : > { %4257 = vmatprep.subr.bf16.mxu1 %v19545_v45  ;;  %v19635_v45 = vld [vmem:[%s22371_s22 + $0x79c] ss:$48 sps:$4 sm:$0xff]  }
 0x38a   : > { %4215 = vmatpush1.bf16.msra.mxu0 %v19540_v46  ;;  %v19630_v46 = vld [vmem:[%s22371_s22 + $0x198] ss:$48 sps:$4 sm:$0xff]  }
 0x38b   : > { %4258 = vmatpush1.bf16.msra.mxu1 %v19543_v47  ;;  %4216 = vmatprep.subr.bf16.mxu0 %v19548_v48  ;;  %v19633_v47 = vld [vmem:[%s22371_s22 + $0x798] ss:$48 sps:$4 sm:$0xff]   ;;  %v19638_v48 = vld [vmem:[%s22371_s22 + $0x13c] ss:$48 sps:$4 sm:$0xff]  }
 0x38c   : > { %4259 = vmatprep.subr.bf16.mxu1 %v19551_v49  ;;  %v19641_v49 = vld [vmem:[%s22371_s22 + $0x73c] ss:$48 sps:$4 sm:$0xff]  }
 0x38e   : > { %4217 = vmatpush1.bf16.msra.mxu0 %v19546_v50  ;;  %v19636_v50 = vld [vmem:[%s22371_s22 + $0x138] ss:$48 sps:$4 sm:$0xff]  }
 0x38f   : > { %4260 = vmatpush1.bf16.msra.mxu1 %v19549_v51  ;;  %4218 = vmatprep.subr.bf16.mxu0 %v19554_v52  ;;  %v19639_v51 = vld [vmem:[%s22371_s22 + $0x738] ss:$48 sps:$4 sm:$0xff]   ;;  %v19644_v52 = vld [vmem:[%s22371_s22 + $0xdc] ss:$48 sps:$4 sm:$0xff]  }
 0x390   : > { %4261 = vmatprep.subr.bf16.mxu1 %v19557_v53  ;;  %v19647_v53 = vld [vmem:[%s22371_s22 + $0x6dc] ss:$48 sps:$4 sm:$0xff]  }
 0x392   : > { %4219 = vmatpush1.bf16.msra.mxu0 %v19552_v54  ;;  %v19642_v54 = vld [vmem:[%s22371_s22 + $0xd8] ss:$48 sps:$4 sm:$0xff]  }
 0x393   : > { %4262 = vmatpush1.bf16.msra.mxu1 %v19555_v55  ;;  %4220 = vmatprep.subr.bf16.mxu0 %v19560_v56  ;;  %v19645_v55 = vld [vmem:[%s22371_s22 + $0x6d8] ss:$48 sps:$4 sm:$0xff]   ;;  %v19650_v56 = vld [vmem:[%s22371_s22 + $0x7c] ss:$48 sps:$4 sm:$0xff]  }
 0x394   : > { %4263 = vmatprep.subr.bf16.mxu1 %v19563_v57  ;;  %v19653_v57 = vld [vmem:[%s22371_s22 + $0x67c] ss:$48 sps:$4 sm:$0xff]  }
 0x396   : > { %4221 = vmatpush1.bf16.msra.mxu0 %v19558_v58  ;;  %v19648_v58 = vld [vmem:[%s22371_s22 + $0x78] ss:$48 sps:$4 sm:$0xff]  }
 0x397   : > { %4264 = vmatpush1.bf16.msra.mxu1 %v19561_v59  ;;  %4222 = vmatprep.subr.bf16.mxu0 %v19566_v60  ;;  %v19651_v59 = vld [vmem:[%s22371_s22 + $0x678] ss:$48 sps:$4 sm:$0xff]   ;;  %v19656_v60 = vld [vmem:[%s22371_s22 + $0x1c] ss:$48 sps:$4 sm:$0xff]  }
 0x398   : > { %4265 = vmatprep.subr.bf16.mxu1 %v19569_v61  ;;  %v19659_v61 = vld [vmem:[%s22371_s22 + $0x61c] ss:$48 sps:$4 sm:$0xff]  }
 0x39a   : > { %4223 = vmatpush2.bf16.msra.mxu0 %v19564_v62  ;;  %v19654_v62 = vld [vmem:[%s22371_s22 + $0x18] ss:$48 sps:$4 sm:$0xff]  }
 0x39b   : > { %4266 = vmatpush2.bf16.msra.mxu1 %v19567_v63  ;;  %4224 = vmatprep.subr.bf16.mxu0 %v19572_v0  ;;  %v19657_v63 = vld [vmem:[%s22371_s22 + $0x618] ss:$48 sps:$4 sm:$0xff]   ;;  %v19662_v0 = vld [vmem:[%s22371_s22 + $0x5bc] ss:$48 sps:$4 sm:$0xff]  }
 0x39c   : > { %4267 = vmatprep.subr.bf16.mxu1 %v19575_v3  ;;  %v19665_v3 = vld [vmem:[%s22371_s22 + $0xbbc] ss:$48 sps:$4 sm:$0xff]  }
 0x39e   : > { %4225 = vmatpush2.bf16.msra.mxu0 %v19570_v4  ;;  %v19660_v4 = vld [vmem:[%s22371_s22 + $0x5b8] ss:$48 sps:$4 sm:$0xff]  }
 0x39f   : > { %4268 = vmatpush2.bf16.msra.mxu1 %v19573_v5  ;;  %4226 = vmatprep.subr.bf16.mxu0 %v19578_v6  ;;  %v19663_v5 = vld [vmem:[%s22371_s22 + $0xbb8] ss:$48 sps:$4 sm:$0xff]   ;;  %v19668_v6 = vld [vmem:[%s22371_s22 + $0x55c] ss:$48 sps:$4 sm:$0xff]  }
 0x3a0   : > { %4269 = vmatprep.subr.bf16.mxu1 %v19581_v7  ;;  %v19671_v7 = vld [vmem:[%s22371_s22 + $0xb5c] ss:$48 sps:$4 sm:$0xff]  }
 0x3a2   : > { %4227 = vmatpush2.bf16.msra.mxu0 %v19576_v8  ;;  %v19666_v8 = vld [vmem:[%s22371_s22 + $0x558] ss:$48 sps:$4 sm:$0xff]  }
 0x3a3   : > { %4270 = vmatpush2.bf16.msra.mxu1 %v19579_v9  ;;  %4228 = vmatprep.subr.bf16.mxu0 %v19584_v10  ;;  %v19669_v9 = vld [vmem:[%s22371_s22 + $0xb58] ss:$48 sps:$4 sm:$0xff]   ;;  %v19674_v10 = vld [vmem:[%s22371_s22 + $0x4fc] ss:$48 sps:$4 sm:$0xff]  }
 0x3a4   : > { %4271 = vmatprep.subr.bf16.mxu1 %v19587_v11  ;;  %v19677_v11 = vld [vmem:[%s22371_s22 + $0xafc] ss:$48 sps:$4 sm:$0xff]  }
 0x3a6   : > { %4229 = vmatpush2.bf16.msra.mxu0 %v19582_v12  ;;  %v19672_v12 = vld [vmem:[%s22371_s22 + $0x4f8] ss:$48 sps:$4 sm:$0xff]  }
 0x3a7   : > { %4272 = vmatpush2.bf16.msra.mxu1 %v19585_v13  ;;  %4230 = vmatprep.subr.bf16.mxu0 %v19590_v14  ;;  %v19675_v13 = vld [vmem:[%s22371_s22 + $0xaf8] ss:$48 sps:$4 sm:$0xff]   ;;  %v19680_v14 = vld [vmem:[%s22371_s22 + $0x49c] ss:$48 sps:$4 sm:$0xff]  }
 0x3a8   : > { %4273 = vmatprep.subr.bf16.mxu1 %v19593_v15  ;;  %v19683_v15 = vld [vmem:[%s22371_s22 + $0xa9c] ss:$48 sps:$4 sm:$0xff]  }
 0x3aa   : > { %4231 = vmatpush2.bf16.msra.mxu0 %v19588_v16  ;;  %v19678_v16 = vld [vmem:[%s22371_s22 + $0x498] ss:$48 sps:$4 sm:$0xff]  }
 0x3ab   : > { %4274 = vmatpush2.bf16.msra.mxu1 %v19591_v17  ;;  %4232 = vmatprep.subr.bf16.mxu0 %v19596_v18  ;;  %v19681_v17 = vld [vmem:[%s22371_s22 + $0xa98] ss:$48 sps:$4 sm:$0xff]   ;;  %v19686_v18 = vld [vmem:[%s22371_s22 + $0x43c] ss:$48 sps:$4 sm:$0xff]  }
 0x3ac   : > { %4275 = vmatprep.subr.bf16.mxu1 %v19599_v19  ;;  %v19689_v19 = vld [vmem:[%s22371_s22 + $0xa3c] ss:$48 sps:$4 sm:$0xff]  }
 0x3ae   : > { %4233 = vmatpush2.bf16.msra.mxu0 %v19594_v20  ;;  %v19684_v20 = vld [vmem:[%s22371_s22 + $0x438] ss:$48 sps:$4 sm:$0xff]  }
 0x3af   : > { %4276 = vmatpush2.bf16.msra.mxu1 %v19597_v21  ;;  %4234 = vmatprep.subr.bf16.mxu0 %v19602_v22  ;;  %v19687_v21 = vld [vmem:[%s22371_s22 + $0xa38] ss:$48 sps:$4 sm:$0xff]   ;;  %v19692_v22 = vld [vmem:[%s22371_s22 + $0x3dc] ss:$48 sps:$4 sm:$0xff]  }
 0x3b0   : > { %4277 = vmatprep.subr.bf16.mxu1 %v19605_v23  ;;  %v19695_v23 = vld [vmem:[%s22371_s22 + $0x9dc] ss:$48 sps:$4 sm:$0xff]  }
 0x3b2   : > { %4235 = vmatpush2.bf16.msra.mxu0 %v19600_v26  ;;  %v19690_v26 = vld [vmem:[%s22371_s22 + $0x3d8] ss:$48 sps:$4 sm:$0xff]  }
 0x3b3   : > { %4278 = vmatpush2.bf16.msra.mxu1 %v19603_v27  ;;  %4236 = vmatprep.subr.bf16.mxu0 %v19608_v28  ;;  %v19693_v27 = vld [vmem:[%s22371_s22 + $0x9d8] ss:$48 sps:$4 sm:$0xff]   ;;  %v19698_v28 = vld [vmem:[%s22371_s22 + $0x37c] ss:$48 sps:$4 sm:$0xff]  }
 0x3b4   : > { %4279 = vmatprep.subr.bf16.mxu1 %v19611_v29  ;;  %v19701_v29 = vld [vmem:[%s22371_s22 + $0x97c] ss:$48 sps:$4 sm:$0xff]  }
 0x3b6   : > { %4237 = vmatpush2.bf16.msra.mxu0 %v19606_v30  ;;  %v19696_v30 = vld [vmem:[%s22371_s22 + $0x378] ss:$48 sps:$4 sm:$0xff]  }
 0x3b7   : > { %4280 = vmatpush2.bf16.msra.mxu1 %v19609_v31  ;;  %4292 = vmatprep.subr.bf16.mxu0 %v19614_v32  ;;  %v19699_v31 = vld [vmem:[%s22371_s22 + $0x978] ss:$48 sps:$4 sm:$0xff]   ;;  %v19704_v32 = vld [vmem:[%s22371_s22 + $0x31c] ss:$48 sps:$4 sm:$0xff]  }
 0x3b8   : > { %4335 = vmatprep.subr.bf16.mxu1 %v19617_v33  ;;  %v19707_v33 = vld [vmem:[%s22371_s22 + $0x91c] ss:$48 sps:$4 sm:$0xff]  }
 0x3b9   : > { %4239 = vmatmul.mubr.bf16.vlgmr.msra.gmra.mxu0 %v22485_v24 }
 0x3ba   : > { %4282 = vmatmul.mubr.bf16.vlgmr.msra.gmra.mxu1 %v22487_v25  ;;  %4293 = vmatpush1.bf16.msra.mxu0 %v19612_v34  ;;  %v19702_v34 = vld [vmem:[%s22371_s22 + $0x318] ss:$48 sps:$4 sm:$0xff]  }
 0x3bb   : > { %4336 = vmatpush1.bf16.msra.mxu1 %v19615_v35  ;;  %4294 = vmatprep.subr.bf16.mxu0 %v19620_v36  ;;  %v19705_v35 = vld [vmem:[%s22371_s22 + $0x918] ss:$48 sps:$4 sm:$0xff]   ;;  %v19710_v36 = vld [vmem:[%s22371_s22 + $0x2c4] ss:$48 sps:$4 sm:$0xff]  }
 0x3bc   : > { %4337 = vmatprep.subr.bf16.mxu1 %v19623_v37  ;;  %4324 = vmatprep.mubr.bf16.mxu0 %v22462_v1  ;;  %v19722_v37 = vld [vmem:[%s22371_s22 + $0x8c4] ss:$48 sps:$4 sm:$0xff]  }
 0x3bd   : > { %4367 = vmatprep.mubr.bf16.mxu1 %v22464_v2 }
 0x3be   : > { %4295 = vmatpush1.bf16.msra.mxu0 %v19618_v38  ;;  %v19708_v38 = vld [vmem:[%s22371_s22 + $0x2c0] ss:$48 sps:$4 sm:$0xff]  }
 0x3bf   : > { %4338 = vmatpush1.bf16.msra.mxu1 %v19621_v39  ;;  %4296 = vmatprep.subr.bf16.mxu0 %v19626_v40  ;;  %v19713_v39 = vld [vmem:[%s22371_s22 + $0x264] ss:$48 sps:$4 sm:$0xff]   ;;  %v19720_v40 = vld [vmem:[%s22371_s22 + $0x8c0] ss:$48 sps:$4 sm:$0xff]  }
 0x3c0   : > { %4339 = vmatprep.subr.bf16.mxu1 %v19629_v41  ;;  %v19728_v41 = vld [vmem:[%s22371_s22 + $0x864] ss:$48 sps:$4 sm:$0xff]  }
 0x3c2   : > { %4297 = vmatpush1.bf16.msra.mxu0 %v19624_v42  ;;  %v19711_v42 = vld [vmem:[%s22371_s22 + $0x260] ss:$48 sps:$4 sm:$0xff]  }
 0x3c3   : > { %4340 = vmatpush1.bf16.msra.mxu1 %v19627_v43  ;;  %4298 = vmatprep.subr.bf16.mxu0 %v19632_v44  ;;  %v19716_v43 = vld [vmem:[%s22371_s22 + $0x204] ss:$48 sps:$4 sm:$0xff]   ;;  %v19726_v44 = vld [vmem:[%s22371_s22 + $0x860] ss:$48 sps:$4 sm:$0xff]  }
 0x3c4   : > { %4341 = vmatprep.subr.bf16.mxu1 %v19635_v45  ;;  %v19734_v45 = vld [vmem:[%s22371_s22 + $0x804] ss:$48 sps:$4 sm:$0xff]  }
 0x3c6   : > { %4299 = vmatpush1.bf16.msra.mxu0 %v19630_v46  ;;  %v19714_v46 = vld [vmem:[%s22371_s22 + $0x200] ss:$48 sps:$4 sm:$0xff]  }
 0x3c7   : > { %4342 = vmatpush1.bf16.msra.mxu1 %v19633_v47  ;;  %4300 = vmatprep.subr.bf16.mxu0 %v19638_v48  ;;  %v19719_v47 = vld [vmem:[%s22371_s22 + $0x1a4] ss:$48 sps:$4 sm:$0xff]   ;;  %v19732_v48 = vld [vmem:[%s22371_s22 + $0x800] ss:$48 sps:$4 sm:$0xff]  }
 0x3c8   : > { %4343 = vmatprep.subr.bf16.mxu1 %v19641_v49  ;;  %v19740_v49 = vld [vmem:[%s22371_s22 + $0x7a4] ss:$48 sps:$4 sm:$0xff]  }
 0x3ca   : > { %4301 = vmatpush1.bf16.msra.mxu0 %v19636_v50  ;;  %v19717_v50 = vld [vmem:[%s22371_s22 + $0x1a0] ss:$48 sps:$4 sm:$0xff]  }
 0x3cb   : > { %4344 = vmatpush1.bf16.msra.mxu1 %v19639_v51  ;;  %4302 = vmatprep.subr.bf16.mxu0 %v19644_v52  ;;  %v19725_v51 = vld [vmem:[%s22371_s22 + $0x144] ss:$48 sps:$4 sm:$0xff]   ;;  %v19738_v52 = vld [vmem:[%s22371_s22 + $0x7a0] ss:$48 sps:$4 sm:$0xff]  }
 0x3cc   : > { %4345 = vmatprep.subr.bf16.mxu1 %v19647_v53  ;;  %v19746_v53 = vld [vmem:[%s22371_s22 + $0x744] ss:$48 sps:$4 sm:$0xff]  }
 0x3ce   : > { %4303 = vmatpush1.bf16.msra.mxu0 %v19642_v54  ;;  %v19723_v54 = vld [vmem:[%s22371_s22 + $0x140] ss:$48 sps:$4 sm:$0xff]  }
 0x3cf   : > { %4346 = vmatpush1.bf16.msra.mxu1 %v19645_v55  ;;  %4304 = vmatprep.subr.bf16.mxu0 %v19650_v56  ;;  %v19744_v55 = vld [vmem:[%s22371_s22 + $0x740] ss:$48 sps:$4 sm:$0xff]   ;;  %v19731_v56 = vld [vmem:[%s22371_s22 + $0xe4] ss:$48 sps:$4 sm:$0xff]  }
 0x3d0   : > { %4347 = vmatprep.subr.bf16.mxu1 %v19653_v57  ;;  %v19752_v57 = vld [vmem:[%s22371_s22 + $0x6e4] ss:$48 sps:$4 sm:$0xff]  }
 0x3d2   : > { %4305 = vmatpush1.bf16.msra.mxu0 %v19648_v58  ;;  %v19729_v58 = vld [vmem:[%s22371_s22 + $0xe0] ss:$48 sps:$4 sm:$0xff]  }
 0x3d3   : > { %4348 = vmatpush1.bf16.msra.mxu1 %v19651_v59  ;;  %4306 = vmatprep.subr.bf16.mxu0 %v19656_v60  ;;  %v19750_v59 = vld [vmem:[%s22371_s22 + $0x6e0] ss:$48 sps:$4 sm:$0xff]   ;;  %v19737_v60 = vld [vmem:[%s22371_s22 + $0x84] ss:$48 sps:$4 sm:$0xff]  }
 0x3d4   : > { %4349 = vmatprep.subr.bf16.mxu1 %v19659_v61  ;;  %v19758_v61 = vld [vmem:[%s22371_s22 + $0x684] ss:$48 sps:$4 sm:$0xff]  }
 0x3d6   : > { %4307 = vmatpush1.bf16.msra.mxu0 %v19654_v62  ;;  %v19735_v62 = vld [vmem:[%s22371_s22 + $0x80] ss:$48 sps:$4 sm:$0xff]  }
 0x3d7   : > { %4350 = vmatpush1.bf16.msra.mxu1 %v19657_v63  ;;  %4308 = vmatprep.subr.bf16.mxu0 %v19662_v0  ;;  %v19756_v63 = vld [vmem:[%s22371_s22 + $0x680] ss:$48 sps:$4 sm:$0xff]   ;;  %v19743_v0 = vld [vmem:[%s22371_s22 + $0x24] ss:$48 sps:$4 sm:$0xff]  }
 0x3d8   : > { %4351 = vmatprep.subr.bf16.mxu1 %v19665_v3  ;;  %v19764_v3 = vld [vmem:[%s22371_s22 + $0x624] ss:$48 sps:$4 sm:$0xff]  }
 0x3da   : > { %4309 = vmatpush2.bf16.msra.mxu0 %v19660_v4  ;;  %v19741_v4 = vld [vmem:[%s22371_s22 + $0x20] ss:$48 sps:$4 sm:$0xff]  }
 0x3db   : > { %4352 = vmatpush2.bf16.msra.mxu1 %v19663_v5  ;;  %4310 = vmatprep.subr.bf16.mxu0 %v19668_v6  ;;  %v19762_v5 = vld [vmem:[%s22371_s22 + $0x620] ss:$48 sps:$4 sm:$0xff]   ;;  %v19749_v6 = vld [vmem:[%s22371_s22 + $0x5c4] ss:$48 sps:$4 sm:$0xff]  }
 0x3dc   : > { %4353 = vmatprep.subr.bf16.mxu1 %v19671_v7  ;;  %v19770_v7 = vld [vmem:[%s22371_s22 + $0xbc4] ss:$48 sps:$4 sm:$0xff]  }
 0x3de   : > { %4311 = vmatpush2.bf16.msra.mxu0 %v19666_v8  ;;  %v19747_v8 = vld [vmem:[%s22371_s22 + $0x5c0] ss:$48 sps:$4 sm:$0xff]  }
 0x3df   : > { %4354 = vmatpush2.bf16.msra.mxu1 %v19669_v9  ;;  %4312 = vmatprep.subr.bf16.mxu0 %v19674_v10  ;;  %v19768_v9 = vld [vmem:[%s22371_s22 + $0xbc0] ss:$48 sps:$4 sm:$0xff]   ;;  %v19755_v10 = vld [vmem:[%s22371_s22 + $0x564] ss:$48 sps:$4 sm:$0xff]  }
 0x3e0   : > { %4355 = vmatprep.subr.bf16.mxu1 %v19677_v11  ;;  %v19776_v11 = vld [vmem:[%s22371_s22 + $0xb64] ss:$48 sps:$4 sm:$0xff]  }
 0x3e2   : > { %4313 = vmatpush2.bf16.msra.mxu0 %v19672_v12  ;;  %v19753_v12 = vld [vmem:[%s22371_s22 + $0x560] ss:$48 sps:$4 sm:$0xff]  }
 0x3e3   : > { %4356 = vmatpush2.bf16.msra.mxu1 %v19675_v13  ;;  %4314 = vmatprep.subr.bf16.mxu0 %v19680_v14  ;;  %v19774_v13 = vld [vmem:[%s22371_s22 + $0xb60] ss:$48 sps:$4 sm:$0xff]   ;;  %v19761_v14 = vld [vmem:[%s22371_s22 + $0x504] ss:$48 sps:$4 sm:$0xff]  }
 0x3e4   : > { %4357 = vmatprep.subr.bf16.mxu1 %v19683_v15  ;;  %v19782_v15 = vld [vmem:[%s22371_s22 + $0xb04] ss:$48 sps:$4 sm:$0xff]  }
 0x3e6   : > { %4315 = vmatpush2.bf16.msra.mxu0 %v19678_v16  ;;  %v19759_v16 = vld [vmem:[%s22371_s22 + $0x500] ss:$48 sps:$4 sm:$0xff]  }
 0x3e7   : > { %4358 = vmatpush2.bf16.msra.mxu1 %v19681_v17  ;;  %4316 = vmatprep.subr.bf16.mxu0 %v19686_v18  ;;  %v19780_v17 = vld [vmem:[%s22371_s22 + $0xb00] ss:$48 sps:$4 sm:$0xff]   ;;  %v19767_v18 = vld [vmem:[%s22371_s22 + $0x4a4] ss:$48 sps:$4 sm:$0xff]  }
 0x3e8   : > { %4359 = vmatprep.subr.bf16.mxu1 %v19689_v19  ;;  %v19788_v19 = vld [vmem:[%s22371_s22 + $0xaa4] ss:$48 sps:$4 sm:$0xff]  }
 0x3ea   : > { %4317 = vmatpush2.bf16.msra.mxu0 %v19684_v20  ;;  %v19765_v20 = vld [vmem:[%s22371_s22 + $0x4a0] ss:$48 sps:$4 sm:$0xff]  }
 0x3eb   : > { %4360 = vmatpush2.bf16.msra.mxu1 %v19687_v21  ;;  %4318 = vmatprep.subr.bf16.mxu0 %v19692_v22  ;;  %v19786_v21 = vld [vmem:[%s22371_s22 + $0xaa0] ss:$48 sps:$4 sm:$0xff]   ;;  %v19773_v22 = vld [vmem:[%s22371_s22 + $0x444] ss:$48 sps:$4 sm:$0xff]  }
 0x3ec   : > { %4361 = vmatprep.subr.bf16.mxu1 %v19695_v23  ;;  %v19794_v23 = vld [vmem:[%s22371_s22 + $0xa44] ss:$48 sps:$4 sm:$0xff]  }
 0x3ee   : > { %4319 = vmatpush2.bf16.msra.mxu0 %v19690_v26  ;;  %v19771_v26 = vld [vmem:[%s22371_s22 + $0x440] ss:$48 sps:$4 sm:$0xff]  }
 0x3ef   : > { %4362 = vmatpush2.bf16.msra.mxu1 %v19693_v27  ;;  %4320 = vmatprep.subr.bf16.mxu0 %v19698_v28  ;;  %v19792_v27 = vld [vmem:[%s22371_s22 + $0xa40] ss:$48 sps:$4 sm:$0xff]   ;;  %v19779_v28 = vld [vmem:[%s22371_s22 + $0x3e4] ss:$48 sps:$4 sm:$0xff]  }
 0x3f0   : > { %4363 = vmatprep.subr.bf16.mxu1 %v19701_v29  ;;  %v19800_v29 = vld [vmem:[%s22371_s22 + $0x9e4] ss:$48 sps:$4 sm:$0xff]  }
 0x3f2   : > { %4321 = vmatpush2.bf16.msra.mxu0 %v19696_v30  ;;  %v19777_v30 = vld [vmem:[%s22371_s22 + $0x3e0] ss:$48 sps:$4 sm:$0xff]  }
 0x3f3   : > { %4364 = vmatpush2.bf16.msra.mxu1 %v19699_v31  ;;  %4322 = vmatprep.subr.bf16.mxu0 %v19704_v32  ;;  %v19798_v31 = vld [vmem:[%s22371_s22 + $0x9e0] ss:$48 sps:$4 sm:$0xff]   ;;  %v19785_v32 = vld [vmem:[%s22371_s22 + $0x384] ss:$48 sps:$4 sm:$0xff]  }
 0x3f4   : > { %4365 = vmatprep.subr.bf16.mxu1 %v19707_v33  ;;  %v19806_v33 = vld [vmem:[%s22371_s22 + $0x984] ss:$48 sps:$4 sm:$0xff]  }
 0x3f6   : > { %4323 = vmatpush2.bf16.msra.mxu0 %v19702_v34  ;;  %v19783_v34 = vld [vmem:[%s22371_s22 + $0x380] ss:$48 sps:$4 sm:$0xff]  }
 0x3f7   : > { %4366 = vmatpush2.bf16.msra.mxu1 %v19705_v35  ;;  %4378 = vmatprep.subr.bf16.mxu0 %v19710_v36  ;;  %v19804_v35 = vld [vmem:[%s22371_s22 + $0x980] ss:$48 sps:$4 sm:$0xff]   ;;  %v19791_v36 = vld [vmem:[%s22371_s22 + $0x324] ss:$48 sps:$4 sm:$0xff]  }
 0x3f8   : > { %4421 = vmatprep.subr.bf16.mxu1 %v19722_v37  ;;  %v19812_v37 = vld [vmem:[%s22371_s22 + $0x924] ss:$48 sps:$4 sm:$0xff]  }
 0x3f9   : > { %4325 = vmatmul.mubr.bf16.vlgmr.msra.gmra.mxu0 %v22485_v24 }
 0x3fa   : > { %4368 = vmatmul.mubr.bf16.vlgmr.msra.gmra.mxu1 %v22487_v25  ;;  %4379 = vmatpush1.bf16.msra.mxu0 %v19708_v38  ;;  %v19789_v38 = vld [vmem:[%s22371_s22 + $0x320] ss:$48 sps:$4 sm:$0xff]  }
 0x3fb   : > { %4422 = vmatpush1.bf16.msra.mxu1 %v19720_v40  ;;  %4380 = vmatprep.subr.bf16.mxu0 %v19713_v39  ;;  %v19810_v39 = vld [vmem:[%s22371_s22 + $0x920] ss:$48 sps:$4 sm:$0xff]   ;;  %v19797_v40 = vld [vmem:[%s22371_s22 + $0x2cc] ss:$48 sps:$4 sm:$0xff]  }
 0x3fc   : > { %4423 = vmatprep.subr.bf16.mxu1 %v19728_v41  ;;  %4410 = vmatprep.mubr.bf16.mxu0 %v22462_v1  ;;  %v19818_v41 = vld [vmem:[%s22371_s22 + $0x8cc] ss:$48 sps:$4 sm:$0xff]  }
 0x3fd   : > { %4453 = vmatprep.mubr.bf16.mxu1 %v22464_v2 }
 0x3fe   : > { %4381 = vmatpush1.bf16.msra.mxu0 %v19711_v42  ;;  %v19795_v42 = vld [vmem:[%s22371_s22 + $0x2c8] ss:$48 sps:$4 sm:$0xff]  }
 0x3ff   : > { %4424 = vmatpush1.bf16.msra.mxu1 %v19726_v44  ;;  %4382 = vmatprep.subr.bf16.mxu0 %v19716_v43  ;;  %v19816_v43 = vld [vmem:[%s22371_s22 + $0x8c8] ss:$48 sps:$4 sm:$0xff]   ;;  %v19803_v44 = vld [vmem:[%s22371_s22 + $0x26c] ss:$48 sps:$4 sm:$0xff]  }
 0x400   : > { %4425 = vmatprep.subr.bf16.mxu1 %v19734_v45  ;;  %v19824_v45 = vld [vmem:[%s22371_s22 + $0x86c] ss:$48 sps:$4 sm:$0xff]  }
 0x402   : > { %4383 = vmatpush1.bf16.msra.mxu0 %v19714_v46  ;;  %v19801_v46 = vld [vmem:[%s22371_s22 + $0x268] ss:$48 sps:$4 sm:$0xff]  }
 0x403   : > { %4426 = vmatpush1.bf16.msra.mxu1 %v19732_v48  ;;  %4384 = vmatprep.subr.bf16.mxu0 %v19719_v47  ;;  %v19822_v47 = vld [vmem:[%s22371_s22 + $0x868] ss:$48 sps:$4 sm:$0xff]   ;;  %v19809_v48 = vld [vmem:[%s22371_s22 + $0x20c] ss:$48 sps:$4 sm:$0xff]  }
 0x404   : > { %4427 = vmatprep.subr.bf16.mxu1 %v19740_v49  ;;  %v19830_v49 = vld [vmem:[%s22371_s22 + $0x80c] ss:$48 sps:$4 sm:$0xff]  }
 0x406   : > { %4385 = vmatpush1.bf16.msra.mxu0 %v19717_v50  ;;  %v19807_v50 = vld [vmem:[%s22371_s22 + $0x208] ss:$48 sps:$4 sm:$0xff]  }
 0x407   : > { %4428 = vmatpush1.bf16.msra.mxu1 %v19738_v52  ;;  %4386 = vmatprep.subr.bf16.mxu0 %v19725_v51  ;;  %v19828_v51 = vld [vmem:[%s22371_s22 + $0x808] ss:$48 sps:$4 sm:$0xff]   ;;  %v19815_v52 = vld [vmem:[%s22371_s22 + $0x1ac] ss:$48 sps:$4 sm:$0xff]  }
 0x408   : > { %4429 = vmatprep.subr.bf16.mxu1 %v19746_v53  ;;  %v19836_v53 = vld [vmem:[%s22371_s22 + $0x7ac] ss:$48 sps:$4 sm:$0xff]  }
 0x40a   : > { %4387 = vmatpush1.bf16.msra.mxu0 %v19723_v54  ;;  %v19813_v54 = vld [vmem:[%s22371_s22 + $0x1a8] ss:$48 sps:$4 sm:$0xff]  }
 0x40b   : > { %4430 = vmatpush1.bf16.msra.mxu1 %v19744_v55  ;;  %4388 = vmatprep.subr.bf16.mxu0 %v19731_v56  ;;  %v19834_v55 = vld [vmem:[%s22371_s22 + $0x7a8] ss:$48 sps:$4 sm:$0xff]   ;;  %v19821_v56 = vld [vmem:[%s22371_s22 + $0x14c] ss:$48 sps:$4 sm:$0xff]  }
 0x40c   : > { %4431 = vmatprep.subr.bf16.mxu1 %v19752_v57  ;;  %v19842_v57 = vld [vmem:[%s22371_s22 + $0x74c] ss:$48 sps:$4 sm:$0xff]  }
 0x40e   : > { %4389 = vmatpush1.bf16.msra.mxu0 %v19729_v58  ;;  %v19827_v58 = vld [vmem:[%s22371_s22 + $0xec] ss:$48 sps:$4 sm:$0xff]  }
 0x40f   : > { %4432 = vmatpush1.bf16.msra.mxu1 %v19750_v59  ;;  %4390 = vmatprep.subr.bf16.mxu0 %v19737_v60  ;;  %v19848_v59 = vld [vmem:[%s22371_s22 + $0x6ec] ss:$48 sps:$4 sm:$0xff]   ;;  %v19825_v60 = vld [vmem:[%s22371_s22 + $0xe8] ss:$48 sps:$4 sm:$0xff]  }
 0x410   : > { %4433 = vmatprep.subr.bf16.mxu1 %v19758_v61  ;;  %v19846_v61 = vld [vmem:[%s22371_s22 + $0x6e8] ss:$48 sps:$4 sm:$0xff]  }
 0x412   : > { %4391 = vmatpush1.bf16.msra.mxu0 %v19735_v62  ;;  %v19833_v62 = vld [vmem:[%s22371_s22 + $0x8c] ss:$48 sps:$4 sm:$0xff]  }
 0x413   : > { %4434 = vmatpush1.bf16.msra.mxu1 %v19756_v63  ;;  %4392 = vmatprep.subr.bf16.mxu0 %v19743_v0  ;;  %v19854_v63 = vld [vmem:[%s22371_s22 + $0x68c] ss:$48 sps:$4 sm:$0xff]   ;;  %v19831_v0 = vld [vmem:[%s22371_s22 + $0x88] ss:$48 sps:$4 sm:$0xff]  }
 0x414   : > { %4435 = vmatprep.subr.bf16.mxu1 %v19764_v3  ;;  %v19852_v3 = vld [vmem:[%s22371_s22 + $0x688] ss:$48 sps:$4 sm:$0xff]  }
 0x416   : > { %4393 = vmatpush1.bf16.msra.mxu0 %v19741_v4  ;;  %v19839_v4 = vld [vmem:[%s22371_s22 + $0x2c] ss:$48 sps:$4 sm:$0xff]  }
 0x417   : > { %4436 = vmatpush1.bf16.msra.mxu1 %v19762_v5  ;;  %4394 = vmatprep.subr.bf16.mxu0 %v19749_v6  ;;  %v19860_v5 = vld [vmem:[%s22371_s22 + $0x62c] ss:$48 sps:$4 sm:$0xff]   ;;  %v19837_v6 = vld [vmem:[%s22371_s22 + $0x28] ss:$48 sps:$4 sm:$0xff]  }
 0x418   : > { %4437 = vmatprep.subr.bf16.mxu1 %v19770_v7  ;;  %v19858_v7 = vld [vmem:[%s22371_s22 + $0x628] ss:$48 sps:$4 sm:$0xff]  }
 0x41a   : > { %4395 = vmatpush2.bf16.msra.mxu0 %v19747_v8  ;;  %v19845_v8 = vld [vmem:[%s22371_s22 + $0x5cc] ss:$48 sps:$4 sm:$0xff]  }
 0x41b   : > { %4438 = vmatpush2.bf16.msra.mxu1 %v19768_v9  ;;  %4396 = vmatprep.subr.bf16.mxu0 %v19755_v10  ;;  %v19866_v9 = vld [vmem:[%s22371_s22 + $0xbcc] ss:$48 sps:$4 sm:$0xff]   ;;  %v19843_v10 = vld [vmem:[%s22371_s22 + $0x5c8] ss:$48 sps:$4 sm:$0xff]  }
 0x41c   : > { %4439 = vmatprep.subr.bf16.mxu1 %v19776_v11  ;;  %v19864_v11 = vld [vmem:[%s22371_s22 + $0xbc8] ss:$48 sps:$4 sm:$0xff]  }
 0x41e   : > { %4397 = vmatpush2.bf16.msra.mxu0 %v19753_v12  ;;  %v19851_v12 = vld [vmem:[%s22371_s22 + $0x56c] ss:$48 sps:$4 sm:$0xff]  }
 0x41f   : > { %4440 = vmatpush2.bf16.msra.mxu1 %v19774_v13  ;;  %4398 = vmatprep.subr.bf16.mxu0 %v19761_v14  ;;  %v19872_v13 = vld [vmem:[%s22371_s22 + $0xb6c] ss:$48 sps:$4 sm:$0xff]   ;;  %v19849_v14 = vld [vmem:[%s22371_s22 + $0x568] ss:$48 sps:$4 sm:$0xff]  }
 0x420   : > { %4441 = vmatprep.subr.bf16.mxu1 %v19782_v15  ;;  %v19870_v15 = vld [vmem:[%s22371_s22 + $0xb68] ss:$48 sps:$4 sm:$0xff]  }
 0x422   : > { %4399 = vmatpush2.bf16.msra.mxu0 %v19759_v16  ;;  %v19857_v16 = vld [vmem:[%s22371_s22 + $0x50c] ss:$48 sps:$4 sm:$0xff]  }
 0x423   : > { %4442 = vmatpush2.bf16.msra.mxu1 %v19780_v17  ;;  %4400 = vmatprep.subr.bf16.mxu0 %v19767_v18  ;;  %v19878_v17 = vld [vmem:[%s22371_s22 + $0xb0c] ss:$48 sps:$4 sm:$0xff]   ;;  %v19855_v18 = vld [vmem:[%s22371_s22 + $0x508] ss:$48 sps:$4 sm:$0xff]  }
 0x424   : > { %4443 = vmatprep.subr.bf16.mxu1 %v19788_v19  ;;  %v19876_v19 = vld [vmem:[%s22371_s22 + $0xb08] ss:$48 sps:$4 sm:$0xff]  }
 0x426   : > { %4401 = vmatpush2.bf16.msra.mxu0 %v19765_v20  ;;  %v22807_v20 = vpop.f32.mrf.mxu0 }
 0x427   : > { %4444 = vmatpush2.bf16.msra.mxu1 %v19786_v21  ;;  %4402 = vmatprep.subr.bf16.mxu0 %v19773_v22  ;;  %v22809_v21 = vpop.f32.mrf.mxu1  ;;  %v19863_v22 = vld [vmem:[%s22371_s22 + $0x4ac] ss:$48 sps:$4 sm:$0xff]  }
 0x428   : > { %4445 = vmatprep.subr.bf16.mxu1 %v19794_v23  ;;  %v19884_v23 = vld [vmem:[%s22371_s22 + $0xaac] ss:$48 sps:$4 sm:$0xff]  }
 0x42a   : > { %4403 = vmatpush2.bf16.msra.mxu0 %v19771_v26  ;;  %v19861_v26 = vld [vmem:[%s22371_s22 + $0x4a8] ss:$48 sps:$4 sm:$0xff]  }
 0x42b   : > { %4446 = vmatpush2.bf16.msra.mxu1 %v19792_v27  ;;  %4404 = vmatprep.subr.bf16.mxu0 %v19779_v28  ;;  %v19882_v27 = vld [vmem:[%s22371_s22 + $0xaa8] ss:$48 sps:$4 sm:$0xff]   ;;  %v22815_v28 = vpop.f32.mrf.mxu0 }
 0x42c   : > { %4447 = vmatprep.subr.bf16.mxu1 %v19800_v29  ;;  %v22817_v29 = vpop.f32.mrf.mxu1 }
 0x42e   : > { %4405 = vmatpush2.bf16.msra.mxu0 %v19777_v30  ;;  %v19869_v30 = vld [vmem:[%s22371_s22 + $0x44c] ss:$48 sps:$4 sm:$0xff]  }
 0x42f   : > { %4448 = vmatpush2.bf16.msra.mxu1 %v19798_v31  ;;  %4406 = vmatprep.subr.bf16.mxu0 %v19785_v32  ;;  %v19890_v31 = vld [vmem:[%s22371_s22 + $0xa4c] ss:$48 sps:$4 sm:$0xff]   ;;  %v19867_v32 = vld [vmem:[%s22371_s22 + $0x448] ss:$48 sps:$4 sm:$0xff]  }
 0x430   : > { %4449 = vmatprep.subr.bf16.mxu1 %v19806_v33  ;;  %v19888_v33 = vld [vmem:[%s22371_s22 + $0xa48] ss:$48 sps:$4 sm:$0xff]  }
 0x432   : > { %4407 = vmatpush2.bf16.msra.mxu0 %v19783_v34  ;;  %v22823_v34 = vpop.f32.mrf.mxu0 }
 0x433   : > { %4450 = vmatpush2.bf16.msra.mxu1 %v19804_v35  ;;  %4408 = vmatprep.subr.bf16.mxu0 %v19791_v36  ;;  %v22825_v35 = vpop.f32.mrf.mxu1  ;;  %v19875_v36 = vld [vmem:[%s22371_s22 + $0x3ec] ss:$48 sps:$4 sm:$0xff]  }
 0x434   : > { %4451 = vmatprep.subr.bf16.mxu1 %v19812_v37  ;;  %v19893_v37 = vld [vmem:[%s22371_s22 + $0x9ec] ss:$48 sps:$4 sm:$0xff]  }
 0x436   : > { %4409 = vmatpush2.bf16.msra.mxu0 %v19789_v38  ;;  %v19873_v38 = vld [vmem:[%s22371_s22 + $0x3e8] ss:$48 sps:$4 sm:$0xff]  }
 0x437   : > { %4452 = vmatpush2.bf16.msra.mxu1 %v19810_v39  ;;  %4464 = vmatprep.subr.bf16.mxu0 %v19797_v40  ;;  %v19891_v39 = vld [vmem:[%s22371_s22 + $0x9e8] ss:$48 sps:$4 sm:$0xff]   ;;  %v22831_v40 = vpop.f32.mrf.mxu0 }
 0x438   : > { %4507 = vmatprep.subr.bf16.mxu1 %v19818_v41  ;;  %v22833_v41 = vpop.f32.mrf.mxu1 }
 0x439   : > { %4411 = vmatmul.mubr.bf16.vlgmr.msra.gmra.mxu0 %v22485_v24 }
 0x43a   : > { %4454 = vmatmul.mubr.bf16.vlgmr.msra.gmra.mxu1 %v22487_v25  ;;  %4465 = vmatpush1.bf16.msra.mxu0 %v19795_v42  ;;  %v19881_v42 = vld [vmem:[%s22371_s22 + $0x38c] ss:$48 sps:$4 sm:$0xff]  }
 0x43b   : > { %4508 = vmatpush1.bf16.msra.mxu1 %v19816_v43  ;;  %4466 = vmatprep.subr.bf16.mxu0 %v19803_v44  ;;  %v19896_v43 = vld [vmem:[%s22371_s22 + $0x98c] ss:$48 sps:$4 sm:$0xff]   ;;  %v2054_v44 = vlaneseq }
 0x43c   : > { %4509 = vmatprep.subr.bf16.mxu1 %v19824_v45  ;;  %4496 = vmatprep.mubr.bf16.mxu0 %v22462_v1  ;;  %v19819_v1 = vld [vmem:[%s22371_s22 + $0x148] ss:$48 sps:$4 sm:$0xff]   ;;  %v22837_v45 = vpop.f32.mrf.mxu0 }
 0x43d   : > { %4539 = vmatprep.mubr.bf16.mxu1 %v22464_v2  ;;  %v19840_v2 = vld [vmem:[%s22371_s22 + $0x748] ss:$48 sps:$4 sm:$0xff]  }
 0x43e   : > { %4467 = vmatpush1.bf16.msra.mxu0 %v19801_v46  ;;  %v22839_v46 = vpop.f32.mrf.mxu1 }
 0x43f   : > { %4510 = vmatpush1.bf16.msra.mxu1 %v19822_v47  ;;  %4468 = vmatprep.subr.bf16.mxu0 %v19809_v48  ;;  %v19879_v47 = vld [vmem:[%s22371_s22 + $0x388] ss:$48 sps:$4 sm:$0xff]  }
 0x440   : > { %4511 = vmatprep.subr.bf16.mxu1 %v19830_v49  ;;  %v19894_v48 = vld [vmem:[%s22371_s22 + $0x988] ss:$48 sps:$4 sm:$0xff]   ;;  %v19887_v49 = vld [vmem:[%s22371_s22 + $0x32c] ss:$48 sps:$4 sm:$0xff]  }
 0x442   : > { %4469 = vmatpush1.bf16.msra.mxu0 %v19807_v50  ;;  %v19899_v50 = vld [vmem:[%s22371_s22 + $0x92c] ss:$48 sps:$4 sm:$0xff]  }
 0x443   : > { %4512 = vmatpush1.bf16.msra.mxu1 %v19828_v51  ;;  %4470 = vmatprep.subr.bf16.mxu0 %v19815_v52  ;;  %v22845_v51 = vshrl.u32 %v2054_v44, 7  ;;  %v22847_v52 = vpop.f32.mrf.mxu0 }
 0x444   : > { %4513 = vmatprep.subr.bf16.mxu1 %v19836_v53  ;;  %v22849_v53 = vpop.f32.mrf.mxu1 }
 0x445   : > { %v22970_v44 = vsub.s32 7, %v22845_v51 }
 0x446   : > { %4471 = vmatpush1.bf16.msra.mxu0 %v19813_v54  ;;  %v19885_v54 = vld [vmem:[%s22371_s22 + $0x328] ss:$48 sps:$4 sm:$0xff]  }
 0x447   : > { %4514 = vmatpush1.bf16.msra.mxu1 %v19834_v55  ;;  %4472 = vmatprep.subr.bf16.mxu0 %v19821_v56  ;;  %v19897_v55 = vld [vmem:[%s22371_s22 + $0x928] ss:$48 sps:$4 sm:$0xff]   ;;  %v22854_v56 = vld [vmem:[%s22379_s15] sm:$0xff]  ;;  %s25293_s22 = sld [smem:[#allocation75_spill]] (!%p18749_p2) }
 0x448   : > { %4515 = vmatprep.subr.bf16.mxu1 %v19842_v57  ;;  %v22857_v57 = vsub.s32 4, %v22845_v51 }
 0x44a   : > { %4473 = vmatpush1.bf16.msra.mxu0 %v19819_v1  ;;  %v22860_v1 = vsub.s32 0, %v22845_v51 }
 0x44b   : > { %4516 = vmatpush1.bf16.msra.mxu1 %v19840_v2  ;;  %4474 = vmatprep.subr.bf16.mxu0 %v19827_v58  ;;  %v22862_v2 = vpop.f32.mrf.mxu0  ;;  %v22864_v58 = vpop.f32.mrf.mxu1 }
 0x44c   : > { %4517 = vmatprep.subr.bf16.mxu1 %v19848_v59  ;;  %25266 = vst [vmem:[#allocation47_spill] sm:$0xff] %v22860_v1  ;;  %v2073_v59 = vrot.slane %v22854_v56, %v22857_v57 }
 0x44e   : > { %4475 = vmatpush1.bf16.msra.mxu0 %v19825_v60  ;;  %v2057_v60 = vrot.slane %v22854_v56, %v22860_v1 }
 0x44f   : > { %4518 = vmatpush1.bf16.msra.mxu1 %v19846_v61  ;;  %4476 = vmatprep.subr.bf16.mxu0 %v19833_v62  ;;  %v22870_v61 = vpop.f32.mrf.mxu0  ;;  %v22872_v62 = vpop.f32.mrf.mxu1 }
 0x450   : > { %4519 = vmatprep.subr.bf16.mxu1 %v19854_v63  ;;  %v21739_v63 = vmov 0.0  }
 0x452   : > { %4477 = vmatpush1.bf16.msra.mxu0 %v19831_v0 }
 0x453   : > { %4520 = vmatpush1.bf16.msra.mxu1 %v19852_v3  ;;  %4478 = vmatprep.subr.bf16.mxu0 %v19839_v4  ;;  %v22878_v4 = vsub.s32 5, %v22845_v51 }
 0x454   : > { %4521 = vmatprep.subr.bf16.mxu1 %v19860_v5 }
 0x456   : > { %4479 = vmatpush1.bf16.msra.mxu0 %v19837_v6  ;;  %v4069_v6 = vadd.f32 %v22807_v20, %v2057_v60 }
 0x457   : > { %4522 = vmatpush1.bf16.msra.mxu1 %v19858_v7  ;;  %4480 = vmatprep.subr.bf16.mxu0 %v19845_v8 }
 0x458   : > { %4523 = vmatprep.subr.bf16.mxu1 %v19866_v9 }
 0x45a   : > { %4481 = vmatpush2.bf16.msra.mxu0 %v19843_v10 }
 0x45b   : > { %4524 = vmatpush2.bf16.msra.mxu1 %v19864_v11  ;;  %4482 = vmatprep.subr.bf16.mxu0 %v19851_v12  ;;  %v4112_v12 = vadd.f32 %v22809_v21, %v4069_v6  ;;  %v22907_v21 = vsub.s32 2, %v22845_v51 }
 0x45c   : > { %4525 = vmatprep.subr.bf16.mxu1 %v19872_v13 }
 0x45e   : > { %4483 = vmatpush2.bf16.msra.mxu0 %v19849_v14 }
 0x45f   : > { %4526 = vmatpush2.bf16.msra.mxu1 %v19870_v15  ;;  %4484 = vmatprep.subr.bf16.mxu0 %v19857_v16  ;;  %v4073_v15 = vadd.f32 %v22823_v34, %v2057_v60 }
 0x460   : > { %4527 = vmatprep.subr.bf16.mxu1 %v19878_v17 }
 0x461   : > { %v4116_v20 = vadd.f32 %v22825_v35, %v4073_v15 }
 0x462   : > { %4485 = vmatpush2.bf16.msra.mxu0 %v19855_v18 }
 0x463   : > { %4528 = vmatpush2.bf16.msra.mxu1 %v19876_v19  ;;  %4486 = vmatprep.subr.bf16.mxu0 %v19863_v22 }
 0x464   : > { %4529 = vmatprep.subr.bf16.mxu1 %v19884_v23 }
 0x466   : > { %4487 = vmatpush2.bf16.msra.mxu0 %v19861_v26 }
 0x467   : > { %4530 = vmatpush2.bf16.msra.mxu1 %v19882_v27  ;;  %4488 = vmatprep.subr.bf16.mxu0 %v19869_v30 }
 0x468   : > { %4531 = vmatprep.subr.bf16.mxu1 %v19890_v31 }
 0x46a   : > { %4489 = vmatpush2.bf16.msra.mxu0 %v19867_v32 }
 0x46b   : > { %4532 = vmatpush2.bf16.msra.mxu1 %v19888_v33  ;;  %4490 = vmatprep.subr.bf16.mxu0 %v19875_v36  ;;  %v22935_v33 = vsub.s32 3, %v22845_v51 }
 0x46c   : > { %4533 = vmatprep.subr.bf16.mxu1 %v19893_v37 }
 0x46d   : > { %v2069_v35 = vrot.slane %v22854_v56, %v22935_v33 }
 0x46e   : > { %4491 = vmatpush2.bf16.msra.mxu0 %v19873_v38 }
 0x46f   : > { %4534 = vmatpush2.bf16.msra.mxu1 %v19891_v39  ;;  %4492 = vmatprep.subr.bf16.mxu0 %v19881_v42  ;;  %v4157_v37 = vadd.f32 %v22847_v52, %v2069_v35  ;;  %v22965_v42 = vsub.s32 6, %v22845_v51  ;;  %v2085_v52 = vrot.slane %v22854_v56, %v22970_v44 }
 0x470   : > { %4535 = vmatprep.subr.bf16.mxu1 %v19896_v43 }
 0x471   : > { %v22954_v39 = vadd.f32 %v22849_v53, %v4157_v37  ;;  %v2081_v43 = vrot.slane %v22854_v56, %v22965_v42 }
 0x472   : > { %4493 = vmatpush2.bf16.msra.mxu0 %v19879_v47 }
 0x473   : > { %4536 = vmatpush2.bf16.msra.mxu1 %v19894_v48  ;;  %4494 = vmatprep.subr.bf16.mxu0 %v19887_v49 }
 0x474   : > { %4537 = vmatprep.subr.bf16.mxu1 %v19899_v50 }
 0x476   : > { %4495 = vmatpush2.bf16.msra.mxu0 %v19885_v54 }
 0x477   : > { %4538 = vmatpush2.bf16.msra.mxu1 %v19897_v55  ;;  %18929 = vmatprep.subr.mxu0 %v21739_v63 }
 0x478   : > { %18934 = vmatprep.subr.mxu1 %v21739_v63 }
 0x479   : > { %v4240_v0 = vpop.f32.mrf.mxu0  ;;  %4497 = vmatmul.mubr.bf16.vlgmr.msra.gmra.mxu0 %v22485_v24  ;;  %v22887_v24 = vsub.s32 1, %v22845_v51 }
 0x47a   : > { %v4283_v3 = vpop.f32.mrf.mxu1  ;;  %4540 = vmatmul.mubr.bf16.vlgmr.msra.gmra.mxu1 %v22487_v25  ;;  %v4241_v5 = vadd.f32 %v4240_v0, %v2073_v59  ;;  %18931 = vmatprep.mubr.msk.f32.mxu0 %vm21740_vm2, %v21739_v63  ;;  %v2077_v25 = vrot.slane %v22854_v56, %v22878_v4  ;;  %v22993_v0 = vld [vmem:[%s22379_s15 + $0x8] sm:$0xf] }
 0x47b   : > { %18936 = vmatprep.mubr.msk.f32.mxu1 %vm21740_vm2, %v21739_v63  ;;  %v4242_v7 = vpop.f32.mrf.mxu0  ;;  %25267 = vst [vmem:[#allocation48_spill] sm:$0xff] %v22887_v24  ;;  %v2061_v14 = vrot.slane %v22854_v56, %v22887_v24  ;;  %v2089_v6 = vrot.slane %v22993_v0, %v22860_v1 }
 0x47c   : > { %v4285_v8 = vpop.f32.mrf.mxu1  ;;  %v4284_v9 = vadd.f32 %v4283_v3, %v4241_v5  ;;  %v4243_v17 = vadd.f32 %v4242_v7, %v2077_v25 }
 0x47d   : > { %v4244_v10 = vpop.f32.mrf.mxu0  ;;  %v4071_v19 = vadd.f32 %v22815_v28, %v2061_v14  ;;  %v4075_v27 = vadd.f32 %v22831_v40, %v2061_v14  ;;  %v2065_v28 = vrot.slane %v22854_v56, %v22907_v21  ;;  %v4161_v40 = vadd.f32 %v22870_v61, %v2069_v35 }
 0x47e   : > { %v4245_v11 = vadd.f32 %v4244_v10, %v2073_v59  ;;  %4876 = vrot.lane.b32.xlu0 %v4284_v9, %s21741_s0  ;;  %18930 = vmatpush3.xpose.msk.msra.mxu0 %vm4550_vm3, %v4284_v9  ;;  %v4287_v13 = vpop.f32.mrf.mxu1  ;;  %v22910_v22 = vadd.f32 %v4285_v8, %v4243_v17  ;;  %v2093_v8 = vrot.slane %v22993_v0, %v22887_v24 }
 0x47f   : > { %18939 = vmatprep.subr.mxu0 %v21739_v63  ;;  %v4246_v18 = vpop.f32.mrf.mxu0  ;;  %v22919_v26 = vadd.f32 %v22817_v29, %v4071_v19  ;;  %v22931_v32 = vadd.f32 %v22833_v41, %v4075_v27  ;;  %v4155_v29 = vadd.f32 %v22837_v45, %v2065_v28  ;;  %v4159_v36 = vadd.f32 %v22862_v2, %v2065_v28 }
 0x480   : > { %v4288_v16 = vadd.f32 %v4287_v13, %v4245_v11  ;;  %v4247_v23 = vadd.f32 %v4246_v18, %v2077_v25  ;;  %v4289_v30 = vpop.f32.mrf.mxu1  ;;  %v22960_v41 = vadd.f32 %v22872_v62, %v4161_v40 }
 0x481   : > { %18932 = vmatmul.mubr.msk.f32.vlgmr.msra.gmra.mxu0 %vm4550_vm3, %v4112_v12  ;;  %v22940_v34 = vadd.f32 %v22839_v46, %v4155_v29  ;;  %v22949_v38 = vadd.f32 %v22864_v58, %v4159_v36  ;;  %v2097_v29 = vrot.slane %v22993_v0, %v22907_v21  ;;  %v2101_v36 = vrot.slane %v22993_v0, %v22935_v33 }
 0x482   : > { %5043 = vrot.lane.b32.xlu1 %v4288_v16, %s21741_s0  ;;  %4874 = vrot.lane.b32.xlu0 %v4112_v12, %s21741_s0  ;;  %v22924_v31 = vadd.f32 %v4289_v30, %v4247_v23 }
 0x483   : > { %18940 = vmatpush3.xpose.msk.msra.mxu0 %vm4550_vm3, %v4288_v16  ;;  %18941 = vmatprep.mubr.msk.f32.mxu0 %vm21740_vm2, %v21739_v63 }
 0x484   : > { %18949 = vmatprep.subr.mxu0 %v21739_v63 }
 0x486   : > { %18942 = vmatmul.mubr.msk.f32.vlgmr.msra.gmra.mxu0 %vm4550_vm3, %v4116_v20  ;;  %5041 = vrot.lane.b32.xlu1 %v4116_v20, %s21741_s0 }
 0x487   : > { %5532 = vrot.lane.b32.xlu0 %v22910_v22, %s21741_s0  ;;  %18951 = vmatprep.mubr.msk.f32.mxu0 %vm21740_vm2, %v21739_v63 }
 0x48a   : > { %5530 = vrot.lane.b32.xlu1 %v22919_v26, %s21741_s0 }
 0x48b   : > { %5699 = vrot.lane.b32.xlu0 %v22924_v31, %s21741_s0 }
 0x48e   : > { %5697 = vrot.lane.b32.xlu1 %v22931_v32, %s21741_s0 }
 0x492   : > { %6186 = vrot.lane.b32.xlu1 %v22940_v34, %s21741_s0 }
 0x496   : > { %6353 = vrot.lane.b32.xlu1 %v22949_v38, %s21741_s0 }
 0x49a   : > { %6842 = vrot.lane.b32.xlu1 %v22954_v39, %s21741_s0 }
 0x49e   : > { %7009 = vrot.lane.b32.xlu1 %v22960_v41, %s21741_s0 }
 0x4b9   : > { %v4326_v45 = vpop.f32.mrf.mxu0 }
 0x4ba   : > { %v4369_v46 = vpop.f32.mrf.mxu1  ;;  %v4327_v47 = vadd.f32 %v4326_v45, %v2081_v43 }
 0x4bb   : > { %v4328_v48 = vpop.f32.mrf.mxu0 }
 0x4bc   : > { %v4371_v49 = vpop.f32.mrf.mxu1  ;;  %v22972_v50 = vadd.f32 %v4369_v46, %v4327_v47  ;;  %v4329_v2 = vadd.f32 %v4328_v48, %v2085_v52 }
 0x4bd   : > { %v4330_v53 = vpop.f32.mrf.mxu0 }
 0x4be   : > { %v4331_v54 = vadd.f32 %v4330_v53, %v2081_v43  ;;  %6188 = vrot.lane.b32.xlu0 %v22972_v50, %s21741_s0  ;;  %v4373_v55 = vpop.f32.mrf.mxu1  ;;  %v22982_v59 = vadd.f32 %v4371_v49, %v4329_v2 }
 0x4bf   : > { %v4332_v58 = vpop.f32.mrf.mxu0 }
 0x4c0   : > { %v22978_v51 = vadd.f32 %v4373_v55, %v4331_v54  ;;  %v4333_v60 = vadd.f32 %v4332_v58, %v2085_v52  ;;  %v4375_v56 = vpop.f32.mrf.mxu1 }
 0x4c2   : > { %6355 = vrot.lane.b32.xlu0 %v22978_v51, %s21741_s0  ;;  %v22986_v61 = vadd.f32 %v4375_v56, %v4333_v60 }
 0x4c6   : > { %6844 = vrot.lane.b32.xlu0 %v22982_v59, %s21741_s0 }
 0x4ca   : > { %7011 = vrot.lane.b32.xlu0 %v22986_v61, %s21741_s0 }
 0x4f0   : > { %v4877_v62 = vpop.permute.xlu0 %4876 }
 0x4f1   : > { %18950 = vmatpush3.xpose.msk.msra.mxu0 %vm4550_vm3, %v4877_v62 }
 0x4f2   : > { %18959 = vmatprep.subr.mxu0 %v21739_v63 }
 0x4f4   : > { %v5044_v3 = vpop.permute.xlu1 %5043  ;;  %v4875_v5 = vpop.permute.xlu0 %4874 }
 0x4f5   : > { %18952 = vmatmul.mubr.msk.f32.vlgmr.msra.gmra.mxu0 %vm4550_vm3, %v4875_v5 }
 0x4f6   : > { %18960 = vmatpush3.xpose.msk.msra.mxu0 %vm4550_vm3, %v5044_v3  ;;  %18961 = vmatprep.mubr.msk.f32.mxu0 %vm21740_vm2, %v21739_v63 }
 0x4f7   : > { %18969 = vmatprep.subr.mxu0 %v21739_v63 }
 0x4f8   : > { %v5042_v7 = vpop.permute.xlu1 %5041 }
 0x4f9   : > { %18962 = vmatmul.mubr.msk.f32.vlgmr.msra.gmra.mxu0 %vm4550_vm3, %v5042_v7  ;;  %v4412_v9 = vpop.f32.mrf.mxu0  ;;  %v5533_v16 = vpop.permute.xlu0 %5532 }
 0x4fa   : > { %18970 = vmatpush3.xpose.msk.msra.mxu0 %vm4550_vm3, %v22910_v22  ;;  %18971 = vmatprep.mubr.msk.f32.mxu0 %vm21740_vm2, %v21739_v63  ;;  %v4413_v25 = vadd.f32 %v4412_v9, %v2089_v6  ;;  %v4455_v10 = vpop.f32.mrf.mxu1 }
 0x4fb   : > { %18979 = vmatprep.subr.mxu0 %v21739_v63  ;;  %v4414_v11 = vpop.f32.mrf.mxu0 }
 0x4fc   : > { %v4415_v12 = vadd.f32 %v4414_v11, %v2093_v8  ;;  %v4456_v13 = vadd.f32 %v4455_v10, %v4413_v25  ;;  %v4457_v14 = vpop.f32.mrf.mxu1 }
 0x4fd   : > { %18972 = vmatmul.mubr.msk.f32.vlgmr.msra.gmra.mxu0 %vm4550_vm3, %v22919_v26  ;;  %v4416_v15 = vpop.f32.mrf.mxu0  ;;  %v5531_v26 = vpop.permute.xlu1 %5530 }
 0x4fe   : > { %18980 = vmatpush3.xpose.msk.msra.mxu0 %vm4550_vm3, %v22924_v31  ;;  %18981 = vmatprep.mubr.msk.f32.mxu0 %vm21740_vm2, %v21739_v63  ;;  %v4417_v17 = vadd.f32 %v4416_v15, %v2089_v6  ;;  %v23016_v18 = vadd.f32 %v4457_v14, %v4415_v12  ;;  %v4459_v20 = vpop.f32.mrf.mxu1  ;;  %v5700_v27 = vpop.permute.xlu0 %5699 }
 0x4ff   : > { %18989 = vmatprep.subr.mxu0 %v21739_v63  ;;  %v4418_v19 = vpop.f32.mrf.mxu0  ;;  %18935 = vmatpush3.msra.mxu1 %v4456_v13 }
 0x500   : > { %v23019_v22 = vadd.f32 %v4418_v19, %v2093_v8  ;;  %v23021_v23 = vadd.f32 %v4459_v20, %v4417_v17  ;;  %4965 = vrot.lane.b32.xlu0 %v4456_v13, %s21741_s0  ;;  %18944 = vmatprep.subr.mxu1 %v21739_v63  ;;  %v23064_v35 = vpop.f32.mrf.mxu1 }
 0x501   : > { %18982 = vmatmul.mubr.msk.f32.vlgmr.msra.gmra.mxu0 %vm4550_vm3, %v22931_v32  ;;  %v5698_v28 = vpop.permute.xlu1 %5697 }
 0x502   : > { %18990 = vmatpush3.xpose.msk.msra.mxu0 %vm4550_vm3, %v5533_v16  ;;  %18991 = vmatprep.mubr.msk.f32.mxu0 %vm21740_vm2, %v21739_v63 }
 0x503   : > { %18999 = vmatprep.subr.mxu0 %v21739_v63  ;;  %5132 = vrot.lane.b32.xlu1 %v23021_v23, %s21741_s0 }
 0x505   : > { %18992 = vmatmul.mubr.msk.f32.vlgmr.msra.gmra.mxu0 %vm4550_vm3, %v5531_v26  ;;  %v6187_v31 = vpop.permute.xlu1 %6186 }
 0x506   : > { %19000 = vmatpush3.xpose.msk.msra.mxu0 %vm4550_vm3, %v5700_v27  ;;  %19001 = vmatprep.mubr.msk.f32.mxu0 %vm21740_vm2, %v21739_v63 }
 0x507   : > { %19009 = vmatprep.subr.mxu0 %v21739_v63 }
 0x509   : > { %19002 = vmatmul.mubr.msk.f32.vlgmr.msra.gmra.mxu0 %vm4550_vm3, %v5698_v28 }
 0x50a   : > { %19010 = vmatpush3.xpose.msk.msra.mxu0 %vm4550_vm3, %v22972_v50  ;;  %19011 = vmatprep.mubr.msk.f32.mxu0 %vm21740_vm2, %v21739_v63 }
 0x50b   : > { %19019 = vmatprep.subr.mxu0 %v21739_v63 }
 0x50d   : > { %19012 = vmatmul.mubr.msk.f32.vlgmr.msra.gmra.mxu0 %vm4550_vm3, %v22940_v34  ;;  %v6354_v34 = vpop.permute.xlu1 %6353 }
 0x50e   : > { %19020 = vmatpush3.xpose.msk.msra.mxu0 %vm4550_vm3, %v22978_v51  ;;  %19021 = vmatprep.mubr.msk.f32.mxu0 %vm21740_vm2, %v21739_v63 }
 0x50f   : > { %19029 = vmatprep.subr.mxu0 %v21739_v63 }
 0x511   : > { %19022 = vmatmul.mubr.msk.f32.vlgmr.msra.gmra.mxu0 %vm4550_vm3, %v22949_v38 }
 0x512   : > { %19031 = vmatprep.mubr.msk.f32.mxu0 %vm21740_vm2, %v21739_v63 }
 0x530   : > { %v6189_v30 = vpop.permute.xlu0 %6188 }
 0x531   : > { %19030 = vmatpush3.xpose.msk.msra.mxu0 %vm4550_vm3, %v6189_v30 }
 0x532   : > { %19039 = vmatprep.subr.mxu0 %v21739_v63 }
 0x534   : > { %v6356_v32 = vpop.permute.xlu0 %6355  ;;  %19032 = vmatmul.mubr.msk.f32.vlgmr.msra.gmra.mxu0 %vm4550_vm3, %v6187_v31 }
 0x535   : > { %19040 = vmatpush3.xpose.msk.msra.mxu0 %vm4550_vm3, %v6356_v32  ;;  %19041 = vmatprep.mubr.msk.f32.mxu0 %vm21740_vm2, %v21739_v63 }
 0x536   : > { %19049 = vmatprep.subr.mxu0 %v21739_v63 }
 0x538   : > { %19042 = vmatmul.mubr.msk.f32.vlgmr.msra.gmra.mxu0 %vm4550_vm3, %v6354_v34  ;;  %v6845_v48 = vpop.permute.xlu0 %6844 }
 0x539   : > { %v4498_v37 = vpop.f32.mrf.mxu0  ;;  %19050 = vmatpush3.xpose.msk.msra.mxu0 %vm4550_vm3, %v22982_v59  ;;  %19051 = vmatprep.mubr.msk.f32.mxu0 %vm21740_vm2, %v21739_v63 }
 0x53a   : > { %v23073_v38 = vpop.f32.mrf.mxu1  ;;  %v23075_v40 = vadd.f32 %v4498_v37, %v2097_v29  ;;  %19059 = vmatprep.subr.mxu0 %v21739_v63 }
 0x53b   : > { %v4500_v43 = vpop.f32.mrf.mxu0 }
 0x53c   : > { %v4501_v45 = vadd.f32 %v4500_v43, %v2101_v36  ;;  %19052 = vmatmul.mubr.msk.f32.vlgmr.msra.gmra.mxu0 %vm4550_vm3, %v22954_v39  ;;  %v4543_v47 = vpop.f32.mrf.mxu1  ;;  %v6843_v39 = vpop.permute.xlu1 %6842 }
 0x53d   : > { %v4502_v46 = vpop.f32.mrf.mxu0  ;;  %19060 = vmatpush3.xpose.msk.msra.mxu0 %vm4550_vm3, %v22986_v61  ;;  %19061 = vmatprep.mubr.msk.f32.mxu0 %vm21740_vm2, %v21739_v63  ;;  %v7012_v51 = vpop.permute.xlu0 %7011 }
 0x53e   : > { %v23084_v49 = vadd.f32 %v4502_v46, %v2097_v29  ;;  %19069 = vmatprep.subr.mxu0 %v21739_v63  ;;  %v23087_v50 = vadd.f32 %v4543_v47, %v4501_v45 }
 0x53f   : > { %v4504_v52 = vpop.f32.mrf.mxu0 }
 0x540   : > { %v23089_v53 = vadd.f32 %v4504_v52, %v2101_v36  ;;  %19062 = vmatmul.mubr.msk.f32.vlgmr.msra.gmra.mxu0 %vm4550_vm3, %v22960_v41  ;;  %v7010_v59 = vpop.permute.xlu1 %7009 }
 0x541   : > { %v4623_v54 = vpop.f32.mrf.mxu0  ;;  %19070 = vmatpush3.xpose.msk.msra.mxu0 %vm4550_vm3, %v6845_v48  ;;  %19071 = vmatprep.mubr.msk.f32.mxu0 %vm21740_vm2, %v21739_v63 }
 0x542   : > { %v4627_v55 = vmul.f32 0.125, %v4623_v54  ;;  %19079 = vmatprep.subr.mxu0 %v21739_v63 }
 0x543   : > { %v18933_v2 = vpop.f32.mrf.mxu0 }
 0x544   : > { %19072 = vmatmul.mubr.msk.f32.vlgmr.msra.gmra.mxu0 %vm4550_vm3, %v6843_v39  ;;  %v4629_v58 = vsel %vm4628_vm4, %v4627_v55, -inf }
 0x545   : > { %19080 = vmatpush3.xpose.msk.msra.mxu0 %vm4550_vm3, %v7012_v51  ;;  %4630 = vmax.xlane.f32.xlu0 %v4629_v58 }
 0x546   : > { %v4785_v41 = vpop.f32.mrf.mxu0  ;;  %19081 = vmatprep.mubr.msk.f32.mxu0 %vm21740_vm2, %v21739_v63 }
 0x547   : > { %v4789_v60 = vmul.f32 0.125, %v4785_v41 }
 0x548   : > { %v18943_v56 = vpop.f32.mrf.mxu0  ;;  %19082 = vmatmul.mubr.msk.f32.vlgmr.msra.gmra.mxu0 %vm4550_vm3, %v7010_v59 }
 0x549   : > { %v4790_v61 = vsel %vm4628_vm4, %v4789_v60, -inf }
 0x54a   : > { %4791 = vmax.xlane.f32.xlu1 %v4790_v61 }
 0x572   : > { %v23124_v28 = vpop.permute.xlu0 %4965 }
 0x575   : > { %v23132_v37 = vpop.permute.xlu1 %5132 }
 0x5b5   : > { %v4948_v62 = vpop.f32.mrf.mxu0 }
 0x5b6   : > { %v23104_v0 = vmul.f32 0.125, %v4948_v62 }
 0x5b7   : > { %v18953_v3 = vpop.f32.mrf.mxu0 }
 0x5b8   : > { %v4953_v5 = vsel %vm4628_vm4, %v23104_v0, -inf }
 0x5b9   : > { %4954 = vmax.xlane.f32.xlu0 %v4953_v5  ;;  %v5115_v6 = vpop.f32.mrf.mxu0 }
 0x5ba   : > { %v23108_v7 = vmul.f32 0.125, %v5115_v6 }
 0x5bb   : > { %v18963_v8 = vpop.f32.mrf.mxu0 }
 0x5bc   : > { %v5120_v9 = vsel %vm4628_vm4, %v23108_v7, -inf }
 0x5bd   : > { %5121 = vmax.xlane.f32.xlu0 %v5120_v9  ;;  %v5280_v25 = vpop.f32.mrf.mxu0 }
 0x5be   : > { %v23112_v10 = vmul.f32 0.125, %v5280_v25 }
 0x5bf   : > { %v18973_v11 = vpop.f32.mrf.mxu0 }
 0x5c0   : > { %v5285_v12 = vsel %vm4628_vm4, %v23112_v10, -inf }
 0x5c1   : > { %5286 = vmax.xlane.f32.xlu1 %v5285_v12  ;;  %v5441_v13 = vpop.f32.mrf.mxu0 }
 0x5c2   : > { %v23116_v14 = vmul.f32 0.125, %v5441_v13 }
 0x5c3   : > { %v18983_v15 = vpop.f32.mrf.mxu0 }
 0x5c4   : > { %v5446_v16 = vsel %vm4628_vm4, %v23116_v14, -inf }
 0x5c5   : > { %5447 = vmax.xlane.f32.xlu0 %v5446_v16  ;;  %v5604_v17 = vpop.f32.mrf.mxu0 }
 0x5c6   : > { %v23120_v19 = vmul.f32 0.125, %v5604_v17 }
 0x5c7   : > { %v18993_v20 = vpop.f32.mrf.mxu0 }
 0x5c8   : > { %v5609_v26 = vsel %vm4628_vm4, %v23120_v19, -inf }
 0x5c9   : > { %5610 = vmax.xlane.f32.xlu1 %v5609_v26  ;;  %v5771_v27 = vpop.f32.mrf.mxu0 }
 0x5ca   : > { %v23126_v30 = vmul.f32 0.125, %v5771_v27 }
 0x5cb   : > { %v19003_v31 = vpop.f32.mrf.mxu0 }
 0x5cc   : > { %v5776_v32 = vsel %vm4628_vm4, %v23126_v30, -inf }
 0x5cd   : > { %5777 = vmax.xlane.f32.xlu0 %v5776_v32  ;;  %v5936_v29 = vpop.f32.mrf.mxu0 }
 0x5ce   : > { %v23130_v34 = vmul.f32 0.125, %v5936_v29  ;;  %v4631_v36 = vpop.xlane.xlu0 %4630 }
 0x5cf   : > { %v4632_v43 = vsub.f32 %v4627_v55, %v4631_v36  ;;  %v19013_v45 = vpop.f32.mrf.mxu0 }
 0x5d0   : > { %v5941_v46 = vsel %vm4628_vm4, %v23130_v34, -inf }
 0x5d1   : > { %v4633_v47 = vmul.f32 1.442695, %v4632_v43  ;;  %5942 = vmax.xlane.f32.xlu1 %v5941_v46  ;;  %v6097_v48 = vpop.f32.mrf.mxu0  ;;  %v23174_v46 = vadd.f32 %v23064_v35, %v23019_v22 }
 0x5d2   : > { %v23136_v52 = vmul.f32 0.125, %v6097_v48 }
 0x5d3   : > { %20860 = vpow2.f32 %v4633_v47  ;;  %v4792_v39 = vpop.xlane.xlu1 %4791  ;;  %v19023_v54 = vpop.f32.mrf.mxu0 }
 0x5d4   : > { %v4793_v2 = vsub.f32 %v4789_v60, %v4792_v39  ;;  %v6102_v51 = vsel %vm4628_vm4, %v23136_v52, -inf }
 0x5d5   : > { %6103 = vmax.xlane.f32.xlu0 %v6102_v51 }
 0x5d6   : > { %v4794_v58 = vmul.f32 1.442695, %v4793_v2 }
 0x5d8   : > { %20862 = vpow2.f32 %v4794_v58 }
 0x5e0   : > { %v23140_v55 = vpop.eup %20860 }
 0x5e1   : > { %v4635_v41 = vsel %vm4628_vm4, %v23140_v55, 0.0 }
 0x5e2   : > { %4636 = vadd.xlane.f32.xlu1 %v4635_v41 }
 0x5e5   : > { %v23144_v59 = vpop.eup %20862 }
 0x5e6   : > { %v4796_v56 = vsel %vm4628_vm4, %v23144_v59, 0.0 }
 0x5e7   : > { %4797 = vadd.xlane.f32.xlu0 %v4796_v56 }
 0x5f4   : > { %v6260_v61 = vpop.f32.mrf.mxu0 }
 0x5f5   : > { %v23148_v60 = vmul.f32 0.125, %v6260_v61 }
 0x5f6   : > { %v19033_v62 = vpop.f32.mrf.mxu0 }
 0x5f7   : > { %v6265_v3 = vsel %vm4628_vm4, %v23148_v60, -inf }
 0x5f8   : > { %6266 = vmax.xlane.f32.xlu1 %v6265_v3  ;;  %v6427_v5 = vpop.f32.mrf.mxu0 }
 0x5f9   : > { %v23152_v6 = vmul.f32 0.125, %v6427_v5 }
 0x5fa   : > { %v19043_v8 = vpop.f32.mrf.mxu0 }
 0x5fb   : > { %v6432_v9 = vsel %vm4628_vm4, %v23152_v6, -inf }
 0x5fc   : > { %6433 = vmax.xlane.f32.xlu0 %v6432_v9  ;;  %v6592_v25 = vpop.f32.mrf.mxu0 }
 0x5fd   : > { %v23156_v11 = vmul.f32 0.125, %v6592_v25 }
 0x5fe   : > { %v19053_v12 = vpop.f32.mrf.mxu0 }
 0x5ff   : > { %v6597_v13 = vsel %vm4628_vm4, %v23156_v11, -inf }
 0x600   : > { %6598 = vmax.xlane.f32.xlu1 %v6597_v13  ;;  %v6753_v15 = vpop.f32.mrf.mxu0 }
 0x601   : > { %v23160_v16 = vmul.f32 0.125, %v6753_v15 }
 0x602   : > { %v19063_v17 = vpop.f32.mrf.mxu0 }
 0x603   : > { %v6758_v20 = vsel %vm4628_vm4, %v23160_v16, -inf }
 0x604   : > { %6759 = vmax.xlane.f32.xlu0 %v6758_v20  ;;  %v6916_v26 = vpop.f32.mrf.mxu0 }
 0x605   : > { %v23164_v27 = vmul.f32 0.125, %v6916_v26 }
 0x606   : > { %v19073_v31 = vpop.f32.mrf.mxu0 }
 0x607   : > { %v6921_v32 = vsel %vm4628_vm4, %v23164_v27, -inf }
 0x608   : > { %6922 = vmax.xlane.f32.xlu1 %v6921_v32  ;;  %v7083_v29 = vpop.f32.mrf.mxu0 }
 0x609   : > { %v23168_v36 = vmul.f32 0.125, %v7083_v29 }
 0x60a   : > { %v19083_v43 = vpop.f32.mrf.mxu0 }
 0x60b   : > { %v7088_v45 = vsel %vm4628_vm4, %v23168_v36, -inf }
 0x60c   : > { %7089 = vmax.xlane.f32.xlu0 %v7088_v45 }
 0x619   : > { %5788 = vrot.lane.b32.xlu1 %v23174_v46, %s21741_s0 }
 0x622   : > { %5621 = vrot.lane.b32.xlu0 %v23016_v18, %s21741_s0 }
 0x642   : > { %v4955_v47 = vpop.xlane.xlu0 %4954 }
 0x643   : > { %v4956_v48 = vsub.f32 %v23104_v0, %v4955_v47 }
 0x645   : > { %v4957_v39 = vmul.f32 1.442695, %v4956_v48 }
 0x646   : > { %v5122_v54 = vpop.xlane.xlu0 %5121 }
 0x647   : > { %20864 = vpow2.f32 %v4957_v39  ;;  %v5123_v2 = vsub.f32 %v23108_v7, %v5122_v54 }
 0x649   : > { %v5124_v51 = vmul.f32 1.442695, %v5123_v2 }
 0x64a   : > { %v5287_v58 = vpop.xlane.xlu1 %5286 }
 0x64b   : > { %20866 = vpow2.f32 %v5124_v51  ;;  %v5288_v22 = vsub.f32 %v23112_v10, %v5287_v58 }
 0x64d   : > { %v5289_v35 = vmul.f32 1.442695, %v5288_v22 }
 0x64e   : > { %v5448_v41 = vpop.xlane.xlu0 %5447 }
 0x64f   : > { %20868 = vpow2.f32 %v5289_v35  ;;  %v5449_v56 = vsub.f32 %v23116_v14, %v5448_v41  ;;  %v4545_v41 = vpop.f32.mrf.mxu1 }
 0x651   : > { %v5450_v61 = vmul.f32 1.442695, %v5449_v56  ;;  %v23228_v56 = vadd.f32 %v4545_v41, %v23084_v49 }
 0x652   : > { %v5611_v62 = vpop.xlane.xlu1 %5610 }
 0x653   : > { %20870 = vpow2.f32 %v5450_v61  ;;  %v5612_v0 = vsub.f32 %v23120_v19, %v5611_v62 }
 0x654   : > { %v23185_v3 = vpop.eup %20864 }
 0x655   : > { %v5613_v5 = vmul.f32 1.442695, %v5612_v0  ;;  %v4959_v7 = vsel %vm4628_vm4, %v23185_v3, 0.0 }
 0x656   : > { %v5778_v8 = vpop.xlane.xlu0 %5777  ;;  %4960 = vadd.xlane.f32.xlu1 %v4959_v7 }
 0x657   : > { %20872 = vpow2.f32 %v5613_v5  ;;  %v5779_v10 = vsub.f32 %v23126_v30, %v5778_v8 }
 0x658   : > { %v23190_v9 = vpop.eup %20866 }
 0x659   : > { %v5780_v25 = vmul.f32 1.442695, %v5779_v10  ;;  %v5126_v14 = vsel %vm4628_vm4, %v23190_v9, 0.0 }
 0x65a   : > { %v5943_v12 = vpop.xlane.xlu1 %5942  ;;  %5127 = vadd.xlane.f32.xlu0 %v5126_v14 }
 0x65b   : > { %20874 = vpow2.f32 %v5780_v25  ;;  %v5944_v19 = vsub.f32 %v23130_v34, %v5943_v12  ;;  %v23253_v12 = vadd.f32 %v23073_v38, %v23075_v40 }
 0x65c   : > { %v23195_v13 = vpop.eup %20868 }
 0x65d   : > { %v5945_v15 = vmul.f32 1.442695, %v5944_v19  ;;  %v5291_v17 = vsel %vm4628_vm4, %v23195_v13, 0.0 }
 0x65e   : > { %v6104_v20 = vpop.xlane.xlu0 %6103  ;;  %5292 = vadd.xlane.f32.xlu1 %v5291_v17 }
 0x65f   : > { %20876 = vpow2.f32 %v5945_v15  ;;  %v6105_v30 = vsub.f32 %v23136_v52, %v6104_v20 }
 0x660   : > { %v23200_v26 = vpop.eup %20870 }
 0x661   : > { %v6106_v31 = vmul.f32 1.442695, %v6105_v30  ;;  %v5452_v32 = vsel %vm4628_vm4, %v23200_v26, 0.0 }
 0x662   : > { %5453 = vadd.xlane.f32.xlu0 %v5452_v32  ;;  %v4547_v32 = vpop.f32.mrf.mxu1 }
 0x663   : > { %20878 = vpow2.f32 %v6106_v31 }
 0x664   : > { %v23204_v34 = vpop.eup %20872 }
 0x665   : > { %v5615_v29 = vsel %vm4628_vm4, %v23204_v34, 0.0 }
 0x666   : > { %5616 = vadd.xlane.f32.xlu1 %v5615_v29  ;;  %v23266_v29 = vadd.f32 %v4547_v32, %v23089_v53 }
 0x668   : > { %v23208_v43 = vpop.eup %20874 }
 0x669   : > { %v5782_v45 = vsel %vm4628_vm4, %v23208_v43, 0.0 }
 0x66a   : > { %5783 = vadd.xlane.f32.xlu0 %v5782_v45 }
 0x66b   : > { %v4637_v52 = vpop.xlane.xlu1 %4636 }
 0x66c   : > { %v23212_v47 = vpop.eup %20876  ;;  %20880 = vrcp.f32 %v4637_v52 }
 0x66d   : > { %v5947_v48 = vsel %vm4628_vm4, %v23212_v47, 0.0 }
 0x66e   : > { %5948 = vadd.xlane.f32.xlu1 %v5947_v48 }
 0x670   : > { %v23216_v39 = vpop.eup %20878  ;;  %v4798_v54 = vpop.xlane.xlu0 %4797 }
 0x671   : > { %20882 = vrcp.f32 %v4798_v54  ;;  %v6108_v2 = vsel %vm4628_vm4, %v23216_v39, 0.0 }
 0x672   : > { %6109 = vadd.xlane.f32.xlu1 %v6108_v2 }
 0x679   : > { %v20881_v51 = vpop.eup %20880 }
 0x67a   : > { %v4639_v58 = vmul.f32 %v20881_v51, %v23140_v55 }
 0x67c   : > { %18937 = vmatmul.mubr.msk.f32.vlgmr.msra.gmra.mxu1 %vm4628_vm4, %v4639_v58 }
 0x67d   : > { %18945 = vmatpush3.msra.mxu1 %v23021_v23  ;;  %18946 = vmatprep.mubr.msk.f32.mxu1 %vm21740_vm2, %v21739_v63 }
 0x67e   : > { %v20883_v22 = vpop.eup %20882  ;;  %18954 = vmatprep.subr.mxu1 %v21739_v63 }
 0x67f   : > { %v4800_v35 = vmul.f32 %v20883_v22, %v23144_v59 }
 0x681   : > { %18947 = vmatmul.mubr.msk.f32.vlgmr.msra.gmra.mxu1 %vm4628_vm4, %v4800_v35  ;;  %v6267_v61 = vpop.xlane.xlu1 %6266 }
 0x682   : > { %18955 = vmatpush3.msra.mxu1 %v23124_v28  ;;  %v6268_v55 = vsub.f32 %v23148_v60, %v6267_v61  ;;  %18956 = vmatprep.mubr.msk.f32.mxu1 %vm21740_vm2, %v21739_v63 }
 0x683   : > { %6444 = vrot.lane.b32.xlu1 %v23228_v56, %s21741_s0  ;;  %18964 = vmatprep.subr.mxu1 %v21739_v63 }
 0x684   : > { %v6269_v23 = vmul.f32 1.442695, %v6268_v55 }
 0x685   : > { %v6434_v59 = vpop.xlane.xlu0 %6433 }
 0x686   : > { %20884 = vpow2.f32 %v6269_v23  ;;  %v6435_v49 = vsub.f32 %v23152_v6, %v6434_v59 }
 0x688   : > { %v6436_v0 = vmul.f32 1.442695, %v6435_v49 }
 0x68a   : > { %20886 = vpow2.f32 %v6436_v0 }
 0x68d   : > { %v6760_v62 = vpop.xlane.xlu0 %6759 }
 0x68e   : > { %v6761_v5 = vsub.f32 %v23160_v16, %v6760_v62 }
 0x690   : > { %v6762_v8 = vmul.f32 1.442695, %v6761_v5 }
 0x692   : > { %20888 = vpow2.f32 %v6762_v8 }
 0x693   : > { %v23240_v28 = vpop.eup %20884 }
 0x694   : > { %v6271_v60 = vsel %vm4628_vm4, %v23240_v28, 0.0 }
 0x695   : > { %6272 = vadd.xlane.f32.xlu0 %v6271_v60  ;;  %v7090_v7 = vpop.xlane.xlu0 %7089 }
 0x696   : > { %v7091_v10 = vsub.f32 %v23168_v36, %v7090_v7  ;;  %v6599_v36 = vpop.xlane.xlu1 %6598 }
 0x697   : > { %v23245_v14 = vpop.eup %20886  ;;  %v6600_v20 = vsub.f32 %v23156_v11, %v6599_v36 }
 0x698   : > { %v7092_v25 = vmul.f32 1.442695, %v7091_v10  ;;  %v6438_v6 = vsel %vm4628_vm4, %v23245_v14, 0.0 }
 0x699   : > { %v6601_v31 = vmul.f32 1.442695, %v6600_v20  ;;  %v5622_v54 = vpop.permute.xlu0 %5621 }
 0x69a   : > { %20890 = vpow2.f32 %v7092_v25  ;;  %v6923_v30 = vpop.xlane.xlu1 %6922 }
 0x69b   : > { %v6924_v38 = vsub.f32 %v23164_v27, %v6923_v30  ;;  %20892 = vpow2.f32 %v6601_v31 }
 0x69d   : > { %v6925_v40 = vmul.f32 1.442695, %v6924_v38 }
 0x69e   : > { %v5789_v48 = vpop.permute.xlu1 %5788 }
 0x69f   : > { %v23249_v16 = vpop.eup %20888  ;;  %20894 = vpow2.f32 %v6925_v40 }
 0x6a0   : > { %v6764_v19 = vsel %vm4628_vm4, %v23249_v16, 0.0 }
 0x6a7   : > { %6439 = vadd.xlane.f32.xlu1 %v6438_v6  ;;  %v23257_v15 = vpop.eup %20890 }
 0x6a8   : > { %v7094_v17 = vsel %vm4628_vm4, %v23257_v15, 0.0  ;;  %v23270_v45 = vpop.eup %20892 }
 0x6a9   : > { %v6603_v52 = vsel %vm4628_vm4, %v23270_v45, 0.0 }
 0x6ab   : > { %6765 = vadd.xlane.f32.xlu1 %v6764_v19  ;;  %6277 = vrot.lane.b32.xlu0 %v23253_v12, %s21741_s0 }
 0x6ac   : > { %v23274_v11 = vpop.eup %20894 }
 0x6ad   : > { %v6927_v27 = vsel %vm4628_vm4, %v23274_v11, 0.0 }
 0x6af   : > { %7095 = vadd.xlane.f32.xlu1 %v7094_v17 }
 0x6c0   : > { %7100 = vrot.lane.b32.xlu1 %v23266_v29, %s21741_s0 }
 0x6ca   : > { %6604 = vadd.xlane.f32.xlu0 %v6603_v52 }
 0x6ce   : > { %6928 = vadd.xlane.f32.xlu0 %v6927_v27  ;;  %v19900_v27 = vld [vmem:[%s22381_s9 + $0xe0] ss:$16 sps:$4 sm:$0xff]  }
 0x6df   : > { %v4961_v2 = vpop.xlane.xlu1 %4960 }
 0x6e0   : > { %20896 = vrcp.f32 %v4961_v2  ;;  %v19908_v2 = vld [vmem:[%s22381_s9 + $0xa4] ss:$16 sps:$4 sm:$0xff]  }
 0x6e3   : > { %v5128_v53 = vpop.xlane.xlu0 %5127 }
 0x6e4   : > { %20898 = vrcp.f32 %v5128_v53  ;;  %6933 = vrot.lane.b32.xlu0 %v23087_v50, %s21741_s0  ;;  %v19909_v53 = vld [vmem:[%s22381_s9 + $0x80] ss:$16 sps:$4 sm:$0xff]  }
 0x6e7   : > { %v5293_v51 = vpop.xlane.xlu1 %5292 }
 0x6e8   : > { %20900 = vrcp.f32 %v5293_v51  ;;  %v19914_v51 = vld [vmem:[%s22381_s9 + $0x64] ss:$16 sps:$4 sm:$0xff]  }
 0x6eb   : > { %v5454_v58 = vpop.xlane.xlu0 %5453 }
 0x6ec   : > { %20902 = vrcp.f32 %v5454_v58  ;;  %v19912_v58 = vld [vmem:[%s22381_s9 + $0x60] ss:$16 sps:$4 sm:$0xff]  }
 0x6ed   : > { %v20897_v22 = vpop.eup %20896 }
 0x6ee   : > { %v4963_v35 = vmul.f32 %v20897_v22, %v23185_v3  ;;  %v19917_v22 = vld [vmem:[%s22381_s9 + $0x44] ss:$16 sps:$4 sm:$0xff]  }
 0x6ef   : > { %v5617_v41 = vpop.xlane.xlu1 %5616 }
 0x6f0   : > { %20904 = vrcp.f32 %v5617_v41  ;;  %18957 = vmatmul.mubr.msk.f32.vlgmr.msra.gmra.mxu1 %vm4628_vm4, %v4963_v35  ;;  %v19915_v35 = vld [vmem:[%s22381_s9 + $0x40] ss:$16 sps:$4 sm:$0xff]   ;;  %v19920_v41 = vld [vmem:[%s22381_s9 + $0x24] ss:$16 sps:$4 sm:$0xff]  }
 0x6f1   : > { %v20899_v61 = vpop.eup %20898  ;;  %18965 = vmatpush3.msra.mxu1 %v23132_v37  ;;  %18966 = vmatprep.mubr.msk.f32.mxu1 %vm21740_vm2, %v21739_v63 }
 0x6f2   : > { %18974 = vmatprep.subr.mxu1 %v21739_v63  ;;  %v5130_v55 = vmul.f32 %v20899_v61, %v23190_v9  ;;  %v19918_v61 = vld [vmem:[%s22381_s9 + $0x20] ss:$16 sps:$4 sm:$0xff]  }
 0x6f3   : > { %v5784_v23 = vpop.xlane.xlu0 %5783 }
 0x6f4   : > { %20906 = vrcp.f32 %v5784_v23  ;;  %18967 = vmatmul.mubr.msk.f32.vlgmr.msra.gmra.mxu1 %vm4628_vm4, %v5130_v55  ;;  %v19923_v55 = vld [vmem:[%s22381_s9 + $0x4] ss:$16 sps:$4 sm:$0xff]   ;;  %v19921_v23 = vld [vmem:[%s22381_s9] ss:$16 sps:$4 sm:$0xff]  }
 0x6f5   : > { %v20901_v59 = vpop.eup %20900  ;;  %18975 = vmatpush3.msra.mxu1 %v23016_v18  ;;  %18976 = vmatprep.mubr.msk.f32.mxu1 %vm21740_vm2, %v21739_v63 }
 0x6f6   : > { %18984 = vmatprep.subr.mxu1 %v21739_v63  ;;  %v5295_v37 = vmul.f32 %v20901_v59, %v23195_v13  ;;  %v19926_v59 = vld [vmem:[%s22381_s9 + $0x1e4] ss:$16 sps:$4 sm:$0xff]  }
 0x6f7   : > { %v5949_v3 = vpop.xlane.xlu1 %5948 }
 0x6f8   : > { %20908 = vrcp.f32 %v5949_v3  ;;  %18977 = vmatmul.mubr.msk.f32.vlgmr.msra.gmra.mxu1 %vm4628_vm4, %v5295_v37  ;;  %v19924_v37 = vld [vmem:[%s22381_s9 + $0x1e0] ss:$16 sps:$4 sm:$0xff]   ;;  %v19929_v3 = vld [vmem:[%s22381_s9 + $0x1c4] ss:$16 sps:$4 sm:$0xff]  }
 0x6f9   : > { %v20903_v49 = vpop.eup %20902  ;;  %18985 = vmatpush3.msra.mxu1 %v23174_v46  ;;  %18986 = vmatprep.mubr.msk.f32.mxu1 %vm21740_vm2, %v21739_v63 }
 0x6fa   : > { %18994 = vmatprep.subr.mxu1 %v21739_v63  ;;  %v5456_v18 = vmul.f32 %v20903_v49, %v23200_v26  ;;  %v19927_v49 = vld [vmem:[%s22381_s9 + $0x1c0] ss:$16 sps:$4 sm:$0xff]  }
 0x6fb   : > { %v6110_v9 = vpop.xlane.xlu1 %6109 }
 0x6fc   : > { %20910 = vrcp.f32 %v6110_v9  ;;  %18987 = vmatmul.mubr.msk.f32.vlgmr.msra.gmra.mxu1 %vm4628_vm4, %v5456_v18  ;;  %v19930_v18 = vld [vmem:[%s22381_s9 + $0x1a0] ss:$16 sps:$4 sm:$0xff]   ;;  %v19932_v9 = vld [vmem:[%s22381_s9 + $0x1a4] ss:$16 sps:$4 sm:$0xff]  }
 0x6fd   : > { %v20905_v62 = vpop.eup %20904  ;;  %18995 = vmatpush3.msra.mxu1 %v5622_v54  ;;  %18996 = vmatprep.mubr.msk.f32.mxu1 %vm21740_vm2, %v21739_v63  ;;  %v19905_v54 = vld [vmem:[%s22381_s9 + $0xc4] ss:$16 sps:$4 sm:$0xff]  }
 0x6fe   : > { %19004 = vmatprep.subr.mxu1 %v21739_v63  ;;  %v5619_v46 = vmul.f32 %v20905_v62, %v23204_v34  ;;  %v19935_v62 = vld [vmem:[%s22381_s9 + $0x184] ss:$16 sps:$4 sm:$0xff]  }
 0x700   : > { %18997 = vmatmul.mubr.msk.f32.vlgmr.msra.gmra.mxu1 %vm4628_vm4, %v5619_v46  ;;  %v19933_v46 = vld [vmem:[%s22381_s9 + $0x180] ss:$16 sps:$4 sm:$0xff]  }
 0x701   : > { %v20907_v13 = vpop.eup %20906  ;;  %19005 = vmatpush3.msra.mxu1 %v5789_v48  ;;  %19006 = vmatprep.mubr.msk.f32.mxu1 %vm21740_vm2, %v21739_v63  ;;  %v19902_v48 = vld [vmem:[%s22381_s9 + $0xe4] ss:$16 sps:$4 sm:$0xff]  }
 0x702   : > { %19014 = vmatprep.subr.mxu1 %v21739_v63  ;;  %v5786_v26 = vmul.f32 %v20907_v13, %v23208_v43  ;;  %8010 = vmatprep.subr.bf16.mxu0 %v19902_v48  ;;  %v19936_v13 = vld [vmem:[%s22381_s9 + $0x160] ss:$16 sps:$4 sm:$0xff]  }
 0x703   : > { %8011 = vmatpush1.bf16.msra.mxu0 %v19900_v27  ;;  %v19989_v27 = vld [vmem:[%s22381_s9 + $0x2c4] ss:$16 sps:$4 sm:$0xff]  }
 0x704   : > { %19007 = vmatmul.mubr.msk.f32.vlgmr.msra.gmra.mxu1 %vm4628_vm4, %v5786_v26  ;;  %8012 = vmatprep.subr.bf16.mxu0 %v19905_v54  ;;  %v19938_v26 = vld [vmem:[%s22381_s9 + $0x164] ss:$16 sps:$4 sm:$0xff]   ;;  %v19993_v54 = vld [vmem:[%s22381_s9 + $0x2a0] ss:$16 sps:$4 sm:$0xff]  }
 0x705   : > { %v20909_v0 = vpop.eup %20908  ;;  %19015 = vmatpush3.msra.mxu1 %v23253_v12  ;;  %19016 = vmatprep.mubr.msk.f32.mxu1 %vm21740_vm2, %v21739_v63 }
 0x706   : > { %19024 = vmatprep.subr.mxu1 %v21739_v63  ;;  %v5951_v34 = vmul.f32 %v20909_v0, %v23212_v47 }
 0x708   : > { %19017 = vmatmul.mubr.msk.f32.vlgmr.msra.gmra.mxu1 %vm4628_vm4, %v5951_v34 }
 0x709   : > { %v20911_v5 = vpop.eup %20910  ;;  %19025 = vmatpush3.msra.mxu1 %v23228_v56  ;;  %19026 = vmatprep.mubr.msk.f32.mxu1 %vm21740_vm2, %v21739_v63  ;;  %v6445_v56 = vpop.permute.xlu1 %6444 }
 0x70a   : > { %v6112_v43 = vmul.f32 %v20911_v5, %v23216_v39  ;;  %19034 = vmatprep.subr.mxu1 %v21739_v63  ;;  %v19939_v5 = vld [vmem:[%s22381_s9 + $0x140] ss:$16 sps:$4 sm:$0xff]  }
 0x70c   : > { %19027 = vmatmul.mubr.msk.f32.vlgmr.msra.gmra.mxu1 %vm4628_vm4, %v6112_v43  ;;  %v19941_v43 = vld [vmem:[%s22381_s9 + $0x144] ss:$16 sps:$4 sm:$0xff]  }
 0x70d   : > { %19036 = vmatprep.mubr.msk.f32.mxu1 %vm21740_vm2, %v21739_v63 }
 0x71e   : > { %v6273_v60 = vpop.xlane.xlu0 %6272 }
 0x71f   : > { %20912 = vrcp.f32 %v6273_v60  ;;  %v19944_v60 = vld [vmem:[%s22381_s9 + $0x124] ss:$16 sps:$4 sm:$0xff]  }
 0x722   : > { %v6278_v47 = vpop.permute.xlu0 %6277 }
 0x723   : > { %19035 = vmatpush3.msra.mxu1 %v6278_v47 }
 0x724   : > { %19044 = vmatprep.subr.mxu1 %v21739_v63 }
 0x72c   : > { %v20913_v7 = vpop.eup %20912 }
 0x72d   : > { %v6275_v8 = vmul.f32 %v20913_v7, %v23240_v28 }
 0x72f   : > { %19037 = vmatmul.mubr.msk.f32.vlgmr.msra.gmra.mxu1 %vm4628_vm4, %v6275_v8  ;;  %v19942_v8 = vld [vmem:[%s22381_s9 + $0x120] ss:$16 sps:$4 sm:$0xff]  }
 0x730   : > { %19045 = vmatpush3.msra.mxu1 %v6445_v56  ;;  %v6440_v39 = vpop.xlane.xlu1 %6439  ;;  %19046 = vmatprep.mubr.msk.f32.mxu1 %vm21740_vm2, %v21739_v63 }
 0x731   : > { %20914 = vrcp.f32 %v6440_v39  ;;  %19054 = vmatprep.subr.mxu1 %v21739_v63 }
 0x734   : > { %v6766_v36 = vpop.xlane.xlu1 %6765 }
 0x738   : > { %v7096_v30 = vpop.xlane.xlu1 %7095 }
 0x73c   : > { %v23330_v10 = vpop.f32.mrf.mxu1  ;;  %v7101_v52 = vpop.permute.xlu1 %7100 }
 0x73e   : > { %v20915_v25 = vpop.eup %20914  ;;  %v18938_v6 = vpop.f32.mrf.mxu1 }
 0x73f   : > { %v6442_v12 = vmul.f32 %v20915_v25, %v23245_v14  ;;  %v19945_v6 = vld [vmem:[%s22381_s9 + $0x100] ss:$16 sps:$4 sm:$0xff]  }
 0x741   : > { %v23333_v19 = vpop.f32.mrf.mxu1  ;;  %19047 = vmatmul.mubr.msk.f32.vlgmr.msra.gmra.mxu1 %vm4628_vm4, %v6442_v12  ;;  %v19947_v12 = vld [vmem:[%s22381_s9 + $0x104] ss:$16 sps:$4 sm:$0xff]  }
 0x742   : > { %19055 = vmatpush3.msra.mxu1 %v23087_v50  ;;  %19056 = vmatprep.mubr.msk.f32.mxu1 %vm21740_vm2, %v21739_v63 }
 0x743   : > { %v18948_v28 = vpop.f32.mrf.mxu1  ;;  %19064 = vmatprep.subr.mxu1 %v21739_v63 }
 0x753   : > { %v6605_v17 = vpop.xlane.xlu0 %6604 }
 0x754   : > { %20916 = vrcp.f32 %v6605_v17  ;;  %v19950_v17 = vld [vmem:[%s22381_s9 + $0xec] ss:$16 sps:$4 sm:$0xff]  }
 0x755   : > { %20918 = vrcp.f32 %v6766_v36 }
 0x757   : > { %v6929_v20 = vpop.xlane.xlu0 %6928 }
 0x758   : > { %20920 = vrcp.f32 %v6929_v20 }
 0x759   : > { %20922 = vrcp.f32 %v7096_v30 }
 0x75b   : > { %v6934_v32 = vpop.permute.xlu0 %6933 }
 0x761   : > { %v20917_v14 = vpop.eup %20916 }
 0x762   : > { %v6607_v31 = vmul.f32 %v20917_v14, %v23270_v45  ;;  %v20919_v38 = vpop.eup %20918 }
 0x763   : > { %v6768_v50 = vmul.f32 %v20919_v38, %v23249_v16 }
 0x764   : > { %19057 = vmatmul.mubr.msk.f32.vlgmr.msra.gmra.mxu1 %vm4628_vm4, %v6607_v31 }
 0x765   : > { %19065 = vmatpush3.msra.mxu1 %v23266_v29  ;;  %19066 = vmatprep.mubr.msk.f32.mxu1 %vm21740_vm2, %v21739_v63  ;;  %v20921_v40 = vpop.eup %20920 }
 0x766   : > { %19074 = vmatprep.subr.mxu1 %v21739_v63  ;;  %v6931_v29 = vmul.f32 %v20921_v40, %v23274_v11  ;;  %v20923_v45 = vpop.eup %20922  ;;  %v19903_v11 = vld [vmem:[%s22381_s9 + $0xc0] ss:$16 sps:$4 sm:$0xff]  }
 0x767   : > { %v7098_v16 = vmul.f32 %v20923_v45, %v23257_v15  ;;  %8013 = vmatpush1.bf16.msra.mxu0 %v19903_v11  ;;  %v19911_v15 = vld [vmem:[%s22381_s9 + $0x84] ss:$16 sps:$4 sm:$0xff]   ;;  %v19981_v45 = vld [vmem:[%s22381_s9 + $0x2e0] ss:$16 sps:$4 sm:$0xff]  }
 0x768   : > { %19067 = vmatmul.mubr.msk.f32.vlgmr.msra.gmra.mxu1 %vm4628_vm4, %v6768_v50  ;;  %8014 = vmatprep.subr.bf16.mxu0 %v19908_v2  ;;  %v19995_v2 = vld [vmem:[%s22381_s9 + $0x2a4] ss:$16 sps:$4 sm:$0xff]  }
 0x769   : > { %19075 = vmatpush3.msra.mxu1 %v6934_v32  ;;  %19076 = vmatprep.mubr.msk.f32.mxu1 %vm21740_vm2, %v21739_v63 }
 0x76a   : > { %19084 = vmatprep.subr.mxu1 %v21739_v63 }
 0x76c   : > { %19077 = vmatmul.mubr.msk.f32.vlgmr.msra.gmra.mxu1 %vm4628_vm4, %v6931_v29 }
 0x76d   : > { %19085 = vmatpush3.msra.mxu1 %v7101_v52  ;;  %19086 = vmatprep.mubr.msk.f32.mxu1 %vm21740_vm2, %v21739_v63  ;;  %v19906_v63 = vld [vmem:[%s22381_s9 + $0xa0] ss:$16 sps:$4 sm:$0xff]   ;;  %v19983_v52 = vld [vmem:[%s22381_s9 + $0x2e4] ss:$16 sps:$4 sm:$0xff]  }
 0x76e   : > { %8015 = vmatpush1.bf16.msra.mxu0 %v19906_v63  ;;  %8053 = vmatprep.subr.bf16.mxu1 %v19983_v52  ;;  %v20001_v63 = vld [vmem:[%s22381_s9 + $0x284] ss:$16 sps:$4 sm:$0xff]  }
 0x76f   : > { %8016 = vmatprep.subr.bf16.mxu0 %v19911_v15  ;;  %v19999_v15 = vld [vmem:[%s22381_s9 + $0x280] ss:$16 sps:$4 sm:$0xff]  }
 0x770   : > { %19087 = vmatmul.mubr.msk.f32.vlgmr.msra.gmra.mxu1 %vm4628_vm4, %v7098_v16  ;;  %v19987_v16 = vld [vmem:[%s22381_s9 + $0x2c0] ss:$16 sps:$4 sm:$0xff]  }
 0x771   : > { %8054 = vmatpush1.bf16.msra.mxu1 %v19981_v45 }
 0x772   : > { %8017 = vmatpush1.bf16.msra.mxu0 %v19909_v53  ;;  %8055 = vmatprep.subr.bf16.mxu1 %v19989_v27  ;;  %v20005_v53 = vld [vmem:[%s22381_s9 + $0x260] ss:$16 sps:$4 sm:$0xff]  }
 0x773   : > { %8018 = vmatprep.subr.bf16.mxu0 %v19914_v51  ;;  %v20007_v51 = vld [vmem:[%s22381_s9 + $0x264] ss:$16 sps:$4 sm:$0xff]  }
 0x775   : > { %8056 = vmatpush1.bf16.msra.mxu1 %v19987_v16 }
 0x776   : > { %8019 = vmatpush1.bf16.msra.mxu0 %v19912_v58  ;;  %8057 = vmatprep.subr.bf16.mxu1 %v19995_v2  ;;  %v20013_v58 = vld [vmem:[%s22381_s9 + $0x244] ss:$16 sps:$4 sm:$0xff]  }
 0x777   : > { %8020 = vmatprep.subr.bf16.mxu0 %v19917_v22  ;;  %v20011_v22 = vld [vmem:[%s22381_s9 + $0x240] ss:$16 sps:$4 sm:$0xff]  }
 0x779   : > { %8058 = vmatpush1.bf16.msra.mxu1 %v19993_v54 }
 0x77a   : > { %8021 = vmatpush1.bf16.msra.mxu0 %v19915_v35  ;;  %8059 = vmatprep.subr.bf16.mxu1 %v20001_v63  ;;  %v20016_v35 = vld [vmem:[%s22381_s9 + $0x224] ss:$16 sps:$4 sm:$0xff]   ;;  %v19948_v63 = vld [vmem:[%s22381_s9 + $0xe8] ss:$16 sps:$4 sm:$0xff]  }
 0x77b   : > { %8022 = vmatprep.subr.bf16.mxu0 %v19920_v41 }
 0x77d   : > { %8060 = vmatpush1.bf16.msra.mxu1 %v19999_v15 }
 0x77e   : > { %8023 = vmatpush1.bf16.msra.mxu0 %v19918_v61  ;;  %8061 = vmatprep.subr.bf16.mxu1 %v20007_v51  ;;  %v19957_v51 = vld [vmem:[%s22381_s9 + $0x88] ss:$16 sps:$4 sm:$0xff]  }
 0x77f   : > { %8024 = vmatprep.subr.bf16.mxu0 %v19923_v55  ;;  %v20014_v55 = vld [vmem:[%s22381_s9 + $0x220] ss:$16 sps:$4 sm:$0xff]  }
 0x781   : > { %8062 = vmatpush1.bf16.msra.mxu1 %v20005_v53  ;;  %v19953_v53 = vld [vmem:[%s22381_s9 + $0xcc] ss:$16 sps:$4 sm:$0xff]  }
 0x782   : > { %8025 = vmatpush1.bf16.msra.mxu0 %v19921_v23  ;;  %8063 = vmatprep.subr.bf16.mxu1 %v20013_v58  ;;  %v19962_v58 = vld [vmem:[%s22381_s9 + $0x6c] ss:$16 sps:$4 sm:$0xff]  }
 0x783   : > { %8026 = vmatprep.subr.bf16.mxu0 %v19926_v59  ;;  %v20019_v59 = vld [vmem:[%s22381_s9 + $0x204] ss:$16 sps:$4 sm:$0xff]  }
 0x785   : > { %8064 = vmatpush1.bf16.msra.mxu1 %v20011_v22  ;;  %v19960_v22 = vld [vmem:[%s22381_s9 + $0x68] ss:$16 sps:$4 sm:$0xff]  }
 0x786   : > { %8027 = vmatpush2.bf16.msra.mxu0 %v19924_v37  ;;  %8065 = vmatprep.subr.bf16.mxu1 %v20016_v35  ;;  %v20017_v37 = vld [vmem:[%s22381_s9 + $0x200] ss:$16 sps:$4 sm:$0xff]   ;;  %v19965_v35 = vld [vmem:[%s22381_s9 + $0x4c] ss:$16 sps:$4 sm:$0xff]  }
 0x787   : > { %8028 = vmatprep.subr.bf16.mxu0 %v19929_v3  ;;  %v20022_v3 = vld [vmem:[%s22381_s9 + $0x3e4] ss:$16 sps:$4 sm:$0xff]  }
 0x789   : > { %8066 = vmatpush1.bf16.msra.mxu1 %v20014_v55  ;;  %v19966_v55 = vld [vmem:[%s22381_s9 + $0x28] ss:$16 sps:$4 sm:$0xff]  }
 0x78a   : > { %8029 = vmatpush2.bf16.msra.mxu0 %v19927_v49  ;;  %8067 = vmatprep.subr.bf16.mxu1 %v20019_v59  ;;  %v20020_v49 = vld [vmem:[%s22381_s9 + $0x3e0] ss:$16 sps:$4 sm:$0xff]   ;;  %v19969_v59 = vld [vmem:[%s22381_s9 + $0x8] ss:$16 sps:$4 sm:$0xff]  }
 0x78b   : > { %8030 = vmatprep.subr.bf16.mxu0 %v19932_v9  ;;  %v20023_v9 = vld [vmem:[%s22381_s9 + $0x3c0] ss:$16 sps:$4 sm:$0xff]  }
 0x78d   : > { %8068 = vmatpush1.bf16.msra.mxu1 %v20017_v37  ;;  %v19974_v37 = vld [vmem:[%s22381_s9 + $0x1ec] ss:$16 sps:$4 sm:$0xff]  }
 0x78e   : > { %8031 = vmatpush2.bf16.msra.mxu0 %v19930_v18  ;;  %8069 = vmatprep.subr.bf16.mxu1 %v20022_v3  ;;  %v20025_v18 = vld [vmem:[%s22381_s9 + $0x3c4] ss:$16 sps:$4 sm:$0xff]   ;;  %v19972_v3 = vld [vmem:[%s22381_s9 + $0x1e8] ss:$16 sps:$4 sm:$0xff]  }
 0x78f   : > { %8032 = vmatprep.subr.bf16.mxu0 %v19935_v62  ;;  %v20028_v62 = vld [vmem:[%s22381_s9 + $0x3a4] ss:$16 sps:$4 sm:$0xff]  }
 0x791   : > { %8070 = vmatpush2.bf16.msra.mxu1 %v20020_v49  ;;  %v19977_v49 = vld [vmem:[%s22381_s9 + $0x1cc] ss:$16 sps:$4 sm:$0xff]  }
 0x792   : > { %8033 = vmatpush2.bf16.msra.mxu0 %v19933_v46  ;;  %8071 = vmatprep.subr.bf16.mxu1 %v20025_v18  ;;  %v20026_v46 = vld [vmem:[%s22381_s9 + $0x3a0] ss:$16 sps:$4 sm:$0xff]   ;;  %v19975_v18 = vld [vmem:[%s22381_s9 + $0x1c8] ss:$16 sps:$4 sm:$0xff]  }
 0x793   : > { %8034 = vmatprep.subr.bf16.mxu0 %v19938_v26  ;;  %v20029_v26 = vld [vmem:[%s22381_s9 + $0x380] ss:$16 sps:$4 sm:$0xff]  }
 0x795   : > { %8072 = vmatpush2.bf16.msra.mxu1 %v20023_v9  ;;  %v19980_v9 = vld [vmem:[%s22381_s9 + $0x1ac] ss:$16 sps:$4 sm:$0xff]  }
 0x796   : > { %8035 = vmatpush2.bf16.msra.mxu0 %v19936_v13  ;;  %8073 = vmatprep.subr.bf16.mxu1 %v20028_v62  ;;  %v20031_v13 = vld [vmem:[%s22381_s9 + $0x384] ss:$16 sps:$4 sm:$0xff]   ;;  %v19978_v62 = vld [vmem:[%s22381_s9 + $0x1a8] ss:$16 sps:$4 sm:$0xff]  }
 0x797   : > { %8036 = vmatprep.subr.bf16.mxu0 %v19941_v43  ;;  %v20035_v43 = vld [vmem:[%s22381_s9 + $0x340] ss:$16 sps:$4 sm:$0xff]  }
 0x799   : > { %8074 = vmatpush2.bf16.msra.mxu1 %v20026_v46  ;;  %v19986_v46 = vld [vmem:[%s22381_s9 + $0x18c] ss:$16 sps:$4 sm:$0xff]  }
 0x79a   : > { %8037 = vmatpush2.bf16.msra.mxu0 %v19939_v5  ;;  %8075 = vmatprep.subr.bf16.mxu1 %v20031_v13  ;;  %v20037_v5 = vld [vmem:[%s22381_s9 + $0x344] ss:$16 sps:$4 sm:$0xff]   ;;  %v19984_v13 = vld [vmem:[%s22381_s9 + $0x188] ss:$16 sps:$4 sm:$0xff]  }
 0x79b   : > { %8038 = vmatprep.subr.bf16.mxu0 %v19944_v60  ;;  %v20040_v60 = vld [vmem:[%s22381_s9 + $0x324] ss:$16 sps:$4 sm:$0xff]  }
 0x79d   : > { %8076 = vmatpush2.bf16.msra.mxu1 %v20029_v26  ;;  %v19992_v26 = vld [vmem:[%s22381_s9 + $0x16c] ss:$16 sps:$4 sm:$0xff]  }
 0x79e   : > { %8039 = vmatpush2.bf16.msra.mxu0 %v19942_v8  ;;  %v20041_v8 = vld [vmem:[%s22381_s9 + $0x300] ss:$16 sps:$4 sm:$0xff]  }
 0x79f   : > { %8040 = vmatprep.subr.bf16.mxu0 %v19947_v12 }
 0x7a2   : > { %8041 = vmatpush2.bf16.msra.mxu0 %v19945_v6 }
 0x7a3   : > { %8096 = vmatprep.subr.bf16.mxu0 %v19950_v17 }
 0x7b0   : > { %v5037_v0 = vpop.f32.mrf.mxu1 }
 0x7b2   : > { %v18958_v34 = vpop.f32.mrf.mxu1 }
 0x7b3   : > { %v20032_v34 = vld [vmem:[%s22381_s9 + $0x360] ss:$16 sps:$4 sm:$0xff]  }
 0x7b4   : > { %v5204_v47 = vpop.f32.mrf.mxu1 }
 0x7b5   : > { %v19304_v7 = vpack.i.bf16 %v5204_v47, %v5037_v0  ;;  %v20034_v0 = vld [vmem:[%s22381_s9 + $0x364] ss:$16 sps:$4 sm:$0xff]   ;;  %v20038_v47 = vld [vmem:[%s22381_s9 + $0x320] ss:$16 sps:$4 sm:$0xff]  }
 0x7b6   : > { %v18968_v56 = vpop.f32.mrf.mxu1  ;;  %8077 = vmatprep.subr.bf16.mxu1 %v20034_v0  ;;  %v19990_v0 = vld [vmem:[%s22381_s9 + $0x168] ss:$16 sps:$4 sm:$0xff]  }
 0x7b7   : > { %19305 = vrot.lane.b32.xlu1 %v19304_v7, %s21741_s0  ;;  %8078 = vmatpush2.bf16.msra.mxu1 %v20032_v34  ;;  %v19998_v34 = vld [vmem:[%s22381_s9 + $0x14c] ss:$16 sps:$4 sm:$0xff]  }
 0x7b8   : > { %v23388_v39 = vpop.f32.mrf.mxu1  ;;  %8079 = vmatprep.subr.bf16.mxu1 %v20037_v5  ;;  %v19996_v5 = vld [vmem:[%s22381_s9 + $0x148] ss:$16 sps:$4 sm:$0xff]  }
 0x7ba   : > { %v18978_v25 = vpop.f32.mrf.mxu1 }
 0x7bb   : > { %8080 = vmatpush2.bf16.msra.mxu1 %v20035_v43  ;;  %v20043_v25 = vld [vmem:[%s22381_s9 + $0x304] ss:$16 sps:$4 sm:$0xff]   ;;  %v20004_v43 = vld [vmem:[%s22381_s9 + $0x12c] ss:$16 sps:$4 sm:$0xff]  }
 0x7bc   : > { %v23392_v28 = vpop.f32.mrf.mxu1  ;;  %8081 = vmatprep.subr.bf16.mxu1 %v20040_v60  ;;  %v20002_v60 = vld [vmem:[%s22381_s9 + $0x128] ss:$16 sps:$4 sm:$0xff]  }
 0x7be   : > { %v18988_v36 = vpop.f32.mrf.mxu1 }
 0x7bf   : > { %8082 = vmatpush2.bf16.msra.mxu1 %v20038_v47  ;;  %v20046_v36 = vld [vmem:[%s22381_s9 + $0x2ec] ss:$16 sps:$4 sm:$0xff]  }
 0x7c0   : > { %v5693_v20 = vpop.f32.mrf.mxu1  ;;  %8083 = vmatprep.subr.bf16.mxu1 %v20043_v25  ;;  %v20010_v47 = vld [vmem:[%s22381_s9 + $0x10c] ss:$16 sps:$4 sm:$0xff]  }
 0x7c2   : > { %v18998_v30 = vpop.f32.mrf.mxu1 }
 0x7c3   : > { %8084 = vmatpush2.bf16.msra.mxu1 %v20041_v8 }
 0x7c4   : > { %v5860_v14 = vpop.f32.mrf.mxu1  ;;  %8139 = vmatprep.subr.bf16.mxu1 %v20046_v36 }
 0x7c5   : > { %v19309_v31 = vpack.i.bf16 %v5860_v14, %v5693_v20 }
 0x7c6   : > { %v19008_v38 = vpop.f32.mrf.mxu1 }
 0x7c7   : > { %19310 = vrot.lane.b32.xlu0 %v19309_v31, %s21741_s0 }
 0x7c8   : > { %v23396_v50 = vpop.f32.mrf.mxu1 }
 0x7ca   : > { %v19018_v40 = vpop.f32.mrf.mxu1 }
 0x7cc   : > { %v23398_v32 = vpop.f32.mrf.mxu1 }
 0x7ce   : > { %v19028_v29 = vpop.f32.mrf.mxu1 }
 0x7ef   : > { %v6349_v48 = vpop.f32.mrf.mxu1 }
 0x7f1   : > { %v19038_v11 = vpop.f32.mrf.mxu1 }
 0x801   : > { %v6516_v41 = vpop.f32.mrf.mxu1 }
 0x802   : > { %v19319_v61 = vpack.i.bf16 %v6516_v41, %v6349_v48  ;;  %v19963_v41 = vld [vmem:[%s22381_s9 + $0x48] ss:$16 sps:$4 sm:$0xff]  }
 0x803   : > { %v19048_v23 = vpop.f32.mrf.mxu1 }
 0x804   : > { %19320 = vrot.lane.b32.xlu1 %v19319_v61, %s21741_s0  ;;  %v19968_v61 = vld [vmem:[%s22381_s9 + $0x2c] ss:$16 sps:$4 sm:$0xff]  }
 0x805   : > { %v19971_v23 = vld [vmem:[%s22381_s9 + $0xc] ss:$16 sps:$4 sm:$0xff]  }
 0x824   : > { %v23431_v7 = vpop.f32.mrf.mxu1 }
 0x826   : > { %v19058_v56 = vpop.f32.mrf.mxu1 }
 0x827   : > { %v20008_v56 = vld [vmem:[%s22381_s9 + $0x108] ss:$16 sps:$4 sm:$0xff]  }
 0x828   : > { %v23435_v6 = vpop.f32.mrf.mxu1 }
 0x829   : > { %v19306_v38 = vpop.permute.xlu1 %19305 }
 0x82a   : > { %v19068_v12 = vpop.f32.mrf.mxu1  ;;  %v19308_v40 = vunpack.i.h.bf16 %v19306_v38  ;;  %v19307_v29 = vunpack.i.l.bf16 %v19306_v38 }
 0x82c   : > { %v7005_v17 = vpop.f32.mrf.mxu1  ;;  %v7209_v27 = vsel %vm4550_vm3, %v23333_v19, %v19308_v40  ;;  %v7208_v48 = vsel %vm4550_vm3, %v23330_v10, %v19307_v29  ;;  %v19951_v10 = vld [vmem:[%s22381_s9 + $0xc8] ss:$16 sps:$4 sm:$0xff]   ;;  %v19956_v19 = vld [vmem:[%s22381_s9 + $0xac] ss:$16 sps:$4 sm:$0xff]  }
 0x82d   : > { %v23448_v15 = vpack.c.bf16 %v7209_v27, %v7208_v48  ;;  %v20044_v29 = vld [vmem:[%s22381_s9 + $0x2e8] ss:$16 sps:$4 sm:$0xff]   ;;  %v20058_v27 = vld [vmem:[%s22381_s9 + $0x26c] ss:$16 sps:$4 sm:$0xff]  }
 0x82e   : > { %v19078_v20 = vpop.f32.mrf.mxu1  ;;  %v20056_v48 = vld [vmem:[%s22381_s9 + $0x268] ss:$16 sps:$4 sm:$0xff]  }
 0x830   : > { %v7172_v30 = vpop.f32.mrf.mxu1 }
 0x831   : > { %v19314_v14 = vpack.i.bf16 %v7172_v30, %v7005_v17 }
 0x832   : > { %v19088_v31 = vpop.f32.mrf.mxu1 }
 0x833   : > { %19315 = vrot.lane.b32.xlu0 %v19314_v14, %s21741_s0 }
 0x839   : > { %v19311_v45 = vpop.permute.xlu0 %19310 }
 0x83a   : > { %v19313_v52 = vunpack.i.h.bf16 %v19311_v45  ;;  %v19312_v16 = vunpack.i.l.bf16 %v19311_v45 }
 0x83c   : > { %v7210_v11 = vsel %vm4550_vm3, %v23388_v39, %v19312_v16  ;;  %v7211_v54 = vsel %vm4550_vm3, %v23392_v28, %v19313_v52  ;;  %v19954_v39 = vld [vmem:[%s22381_s9 + $0xa8] ss:$16 sps:$4 sm:$0xff]   ;;  %v19959_v28 = vld [vmem:[%s22381_s9 + $0x8c] ss:$16 sps:$4 sm:$0xff]  }
 0x83d   : > { %v7217_v2 = vpack.c.bf16 %v7211_v54, %v7210_v11  ;;  %v20049_v52 = vld [vmem:[%s22381_s9 + $0x2cc] ss:$16 sps:$4 sm:$0xff]   ;;  %v20053_v16 = vld [vmem:[%s22381_s9 + $0x288] ss:$16 sps:$4 sm:$0xff]  }
 0x83e   : > { %v20061_v11 = vld [vmem:[%s22381_s9 + $0x24c] ss:$16 sps:$4 sm:$0xff]   ;;  %v20059_v54 = vld [vmem:[%s22381_s9 + $0x248] ss:$16 sps:$4 sm:$0xff]  }
 0x83f   : > { %8042 = vmatprep.mubr.bf16.mxu0 %v7217_v2 }
 0x840   : > { %8043 = vmatmul.mubr.bf16.vlgmr.msra.gmra.mxu0 %v23448_v15 }
 0x841   : > { %8097 = vmatpush1.bf16.msra.mxu0 %v19948_v63  ;;  %8128 = vmatprep.mubr.bf16.mxu0 %v7217_v2  ;;  %v20064_v2 = vld [vmem:[%s22381_s9 + $0x22c] ss:$16 sps:$4 sm:$0xff]   ;;  %v20062_v63 = vld [vmem:[%s22381_s9 + $0x228] ss:$16 sps:$4 sm:$0xff]  }
 0x842   : > { %8098 = vmatprep.subr.bf16.mxu0 %v19953_v53  ;;  %v20065_v53 = vld [vmem:[%s22381_s9 + $0x208] ss:$16 sps:$4 sm:$0xff]  }
 0x845   : > { %8099 = vmatpush1.bf16.msra.mxu0 %v19951_v10  ;;  %v20070_v10 = vld [vmem:[%s22381_s9 + $0x3ec] ss:$16 sps:$4 sm:$0xff]  }
 0x846   : > { %8100 = vmatprep.subr.bf16.mxu0 %v19956_v19  ;;  %v20068_v19 = vld [vmem:[%s22381_s9 + $0x3e8] ss:$16 sps:$4 sm:$0xff]  }
 0x849   : > { %8101 = vmatpush1.bf16.msra.mxu0 %v19954_v39  ;;  %v20073_v39 = vld [vmem:[%s22381_s9 + $0x3cc] ss:$16 sps:$4 sm:$0xff]  }
 0x84a   : > { %8102 = vmatprep.subr.bf16.mxu0 %v19959_v28  ;;  %v20071_v28 = vld [vmem:[%s22381_s9 + $0x3c8] ss:$16 sps:$4 sm:$0xff]  }
 0x84d   : > { %8103 = vmatpush1.bf16.msra.mxu0 %v19957_v51  ;;  %v20076_v51 = vld [vmem:[%s22381_s9 + $0x3ac] ss:$16 sps:$4 sm:$0xff]  }
 0x84e   : > { %8104 = vmatprep.subr.bf16.mxu0 %v19962_v58  ;;  %v20074_v58 = vld [vmem:[%s22381_s9 + $0x3a8] ss:$16 sps:$4 sm:$0xff]  }
 0x851   : > { %8105 = vmatpush1.bf16.msra.mxu0 %v19960_v22  ;;  %v20079_v22 = vld [vmem:[%s22381_s9 + $0x38c] ss:$16 sps:$4 sm:$0xff]  }
 0x852   : > { %8106 = vmatprep.subr.bf16.mxu0 %v19965_v35  ;;  %v20077_v35 = vld [vmem:[%s22381_s9 + $0x388] ss:$16 sps:$4 sm:$0xff]  }
 0x855   : > { %8107 = vmatpush1.bf16.msra.mxu0 %v19963_v41  ;;  %v20082_v41 = vld [vmem:[%s22381_s9 + $0x36c] ss:$16 sps:$4 sm:$0xff]  }
 0x856   : > { %8108 = vmatprep.subr.bf16.mxu0 %v19968_v61  ;;  %v20080_v61 = vld [vmem:[%s22381_s9 + $0x368] ss:$16 sps:$4 sm:$0xff]  }
 0x859   : > { %8109 = vmatpush1.bf16.msra.mxu0 %v19966_v55  ;;  %v20085_v55 = vld [vmem:[%s22381_s9 + $0x34c] ss:$16 sps:$4 sm:$0xff]  }
 0x85a   : > { %8110 = vmatprep.subr.bf16.mxu0 %v19971_v23  ;;  %v20083_v23 = vld [vmem:[%s22381_s9 + $0x348] ss:$16 sps:$4 sm:$0xff]  }
 0x85d   : > { %8111 = vmatpush1.bf16.msra.mxu0 %v19969_v59  ;;  %v20088_v59 = vld [vmem:[%s22381_s9 + $0x32c] ss:$16 sps:$4 sm:$0xff]  }
 0x85e   : > { %8112 = vmatprep.subr.bf16.mxu0 %v19974_v37  ;;  %v20086_v37 = vld [vmem:[%s22381_s9 + $0x328] ss:$16 sps:$4 sm:$0xff]  }
 0x861   : > { %8113 = vmatpush2.bf16.msra.mxu0 %v19972_v3  ;;  %v20091_v3 = vld [vmem:[%s22381_s9 + $0x30c] ss:$16 sps:$4 sm:$0xff]  }
 0x862   : > { %8114 = vmatprep.subr.bf16.mxu0 %v19977_v49  ;;  %v20089_v49 = vld [vmem:[%s22381_s9 + $0x308] ss:$16 sps:$4 sm:$0xff]  }
 0x865   : > { %8115 = vmatpush2.bf16.msra.mxu0 %v19975_v18 }
 0x866   : > { %8116 = vmatprep.subr.bf16.mxu0 %v19980_v9 }
 0x869   : > { %8117 = vmatpush2.bf16.msra.mxu0 %v19978_v62 }
 0x86a   : > { %8118 = vmatprep.subr.bf16.mxu0 %v19986_v46 }
 0x86d   : > { %8119 = vmatpush2.bf16.msra.mxu0 %v19984_v13 }
 0x86e   : > { %8120 = vmatprep.subr.bf16.mxu0 %v19992_v26  ;;  %v7348_v26 = vld [vmem:[%s1061_s30] sm:$0xf] }
 0x871   : > { %8121 = vmatpush2.bf16.msra.mxu0 %v19990_v0 }
 0x872   : > { %8122 = vmatprep.subr.bf16.mxu0 %v19998_v34  ;;  %v7357_v34 = vrot.slane %v7348_v26, %v22887_v24 }
 0x875   : > { %8123 = vmatpush2.bf16.msra.mxu0 %v19996_v5 }
 0x876   : > { %8124 = vmatprep.subr.bf16.mxu0 %v20004_v43  ;;  %v19321_v8 = vpop.permute.xlu1 %19320  ;;  %v7353_v43 = vrot.slane %v7348_v26, %v22860_v1 }
 0x877   : > { %v19323_v25 = vunpack.i.h.bf16 %v19321_v8  ;;  %v19322_v12 = vunpack.i.l.bf16 %v19321_v8 }
 0x879   : > { %8125 = vmatpush2.bf16.msra.mxu0 %v20002_v60  ;;  %v7213_v30 = vsel %vm4550_vm3, %v23398_v32, %v19323_v25  ;;  %v7212_v14 = vsel %vm4550_vm3, %v23396_v50, %v19322_v12  ;;  %v20047_v50 = vld [vmem:[%s22381_s9 + $0x2c8] ss:$16 sps:$4 sm:$0xff]   ;;  %v20052_v32 = vld [vmem:[%s22381_s9 + $0x2ac] ss:$16 sps:$4 sm:$0xff]   ;;  %v7361_v25 = vrot.slane %v7348_v26, %v22907_v21 }
 0x87a   : > { %8126 = vmatprep.subr.bf16.mxu0 %v20010_v47  ;;  %v23491_v45 = vpack.c.bf16 %v7213_v30, %v7212_v14 }
 0x87d   : > { %8127 = vmatpush2.bf16.msra.mxu0 %v20008_v56 }
 0x880   : > { %8129 = vmatmul.mubr.bf16.vlgmr.msra.gmra.mxu0 %v23448_v15  ;;  %v20067_v15 = vld [vmem:[%s22381_s9 + $0x20c] ss:$16 sps:$4 sm:$0xff]  }
 0x8a5   : > { %v19316_v36 = vpop.permute.xlu0 %19315 }
 0x8a6   : > { %v19318_v17 = vunpack.i.h.bf16 %v19316_v36  ;;  %v19317_v20 = vunpack.i.l.bf16 %v19316_v36 }
 0x8a8   : > { %v7214_v31 = vsel %vm4550_vm3, %v23431_v7, %v19317_v20  ;;  %v7215_v38 = vsel %vm4550_vm3, %v23435_v6, %v19318_v17  ;;  %v20050_v7 = vld [vmem:[%s22381_s9 + $0x2a8] ss:$16 sps:$4 sm:$0xff]   ;;  %v20055_v6 = vld [vmem:[%s22381_s9 + $0x28c] ss:$16 sps:$4 sm:$0xff]   ;;  %v7365_v20 = vrot.slane %v7348_v26, %v22935_v33 }
 0x8a9   : > { %v7219_v40 = vpack.c.bf16 %v7215_v38, %v7214_v31  ;;  %v8675_v26 = vld [vmem:[%s22386_s24 + $0xb80] sm:$0xff] }
 0x8ab   : > { %8085 = vmatprep.mubr.bf16.mxu1 %v7219_v40 }
 0x8ac   : > { %8086 = vmatmul.mubr.bf16.vlgmr.msra.gmra.mxu1 %v23491_v45 }
 0x8ad   : > { %8140 = vmatpush1.bf16.msra.mxu1 %v20044_v29  ;;  %8171 = vmatprep.mubr.bf16.mxu1 %v7219_v40  ;;  %v20932_v40 = vld [vmem:[#allocation2] sm:$0xff] }
 0x8ae   : > { %8141 = vmatprep.subr.bf16.mxu1 %v20049_v52 }
 0x8b1   : > { %8142 = vmatpush1.bf16.msra.mxu1 %v20047_v50 }
 0x8b2   : > { %8143 = vmatprep.subr.bf16.mxu1 %v20052_v32 }
 0x8b5   : > { %8144 = vmatpush1.bf16.msra.mxu1 %v20050_v7  ;;  %v20933_v7 = vld [vmem:[#allocation2 + $0x30] sm:$0xff] }
 0x8b6   : > { %8145 = vmatprep.subr.bf16.mxu1 %v20055_v6 }
 0x8b9   : > { %8146 = vmatpush1.bf16.msra.mxu1 %v20053_v16 }
 0x8ba   : > { %8147 = vmatprep.subr.bf16.mxu1 %v20058_v27 }
 0x8bd   : > { %8148 = vmatpush1.bf16.msra.mxu1 %v20056_v48 }
 0x8be   : > { %8149 = vmatprep.subr.bf16.mxu1 %v20061_v11 }
 0x8c1   : > { %8150 = vmatpush1.bf16.msra.mxu1 %v20059_v54 }
 0x8c2   : > { %8151 = vmatprep.subr.bf16.mxu1 %v20064_v2  ;;  %v20934_v2 = vld [vmem:[#allocation2 + $0x20] sm:$0xff] }
 0x8c5   : > { %8152 = vmatpush1.bf16.msra.mxu1 %v20062_v63 }
 0x8c6   : > { %8153 = vmatprep.subr.bf16.mxu1 %v20067_v15  ;;  %v20935_v15 = vld [vmem:[#allocation2 + $0x18] sm:$0xff] }
 0x8c9   : > { %8154 = vmatpush1.bf16.msra.mxu1 %v20065_v53 }
 0x8ca   : > { %8155 = vmatprep.subr.bf16.mxu1 %v20070_v10 }
 0x8cd   : > { %8156 = vmatpush2.bf16.msra.mxu1 %v20068_v19 }
 0x8ce   : > { %8157 = vmatprep.subr.bf16.mxu1 %v20073_v39 }
 0x8d1   : > { %8158 = vmatpush2.bf16.msra.mxu1 %v20071_v28  ;;  %v20936_v28 = vld [vmem:[#allocation2 + $0x8] sm:$0xff] }
 0x8d2   : > { %8159 = vmatprep.subr.bf16.mxu1 %v20076_v51 }
 0x8d5   : > { %8160 = vmatpush2.bf16.msra.mxu1 %v20074_v58  ;;  %v20937_v58 = vld [vmem:[#allocation2 + $0x10] sm:$0xff] }
 0x8d6   : > { %8161 = vmatprep.subr.bf16.mxu1 %v20079_v22 }
 0x8d9   : > { %8162 = vmatpush2.bf16.msra.mxu1 %v20077_v35 }
 0x8da   : > { %8163 = vmatprep.subr.bf16.mxu1 %v20082_v41 }
 0x8dd   : > { %8164 = vmatpush2.bf16.msra.mxu1 %v20080_v61 }
 0x8de   : > { %8165 = vmatprep.subr.bf16.mxu1 %v20085_v55 }
 0x8e1   : > { %8166 = vmatpush2.bf16.msra.mxu1 %v20083_v23  ;;  %v20938_v23 = vld [vmem:[#allocation2 + $0x28] sm:$0xff] }
 0x8e2   : > { %8167 = vmatprep.subr.bf16.mxu1 %v20088_v59 }
 0x8e5   : > { %8168 = vmatpush2.bf16.msra.mxu1 %v20086_v37 }
 0x8e6   : > { %8169 = vmatprep.subr.bf16.mxu1 %v20091_v3 }
 0x8e9   : > { %8170 = vmatpush2.bf16.msra.mxu1 %v20089_v49  ;;  %v20939_v49 = vld [vmem:[#allocation2 + $0x38] sm:$0xff] }
 0x8ec   : > { %8172 = vmatmul.mubr.bf16.vlgmr.msra.gmra.mxu1 %v23491_v45 }
 0x900   : > { %v8044_v18 = vpop.f32.mrf.mxu0 }
 0x901   : > { %v8045_v8 = vadd.f32 %v8044_v18, %v7353_v43 }
 0x902   : > { %v8046_v9 = vpop.f32.mrf.mxu0 }
 0x903   : > { %v8047_v47 = vadd.f32 %v8046_v9, %v7357_v34 }
 0x904   : > { %v8048_v62 = vpop.f32.mrf.mxu0 }
 0x905   : > { %v8049_v31 = vadd.f32 %v8048_v62, %v7353_v43  ;;  %v8403_v43 = vld [vmem:[%s22386_s24 + $0x300] sm:$0xff] }
 0x906   : > { %v8050_v13 = vpop.f32.mrf.mxu0 }
 0x907   : > { %v8051_v17 = vadd.f32 %v8050_v13, %v7357_v34  ;;  %v8427_v13 = vld [vmem:[%s22386_s24 + $0x3c0] sm:$0xff] }
 0x940   : > { %v8130_v5 = vpop.f32.mrf.mxu0 }
 0x941   : > { %v8131_v38 = vadd.f32 %v8130_v5, %v7361_v25  ;;  %v8683_v5 = vld [vmem:[%s22386_s24 + $0xbc0] sm:$0xff] }
 0x942   : > { %v8132_v56 = vpop.f32.mrf.mxu0 }
 0x943   : > { %v8133_v50 = vadd.f32 %v8132_v56, %v7365_v20  ;;  %v18094_v56 = vcombine.high %v8675_v26, %v8683_v5 }
 0x944   : > { %v8134_v30 = vpop.f32.mrf.mxu0 }
 0x945   : > { %v8135_v48 = vadd.f32 %v8134_v30, %v7361_v25  ;;  %v8659_v25 = vld [vmem:[%s22386_s24 + $0xb00] sm:$0xff]  ;;  %11506 = vmatprep.subr.bf16.mxu1 %v18094_v56 }
 0x946   : > { %v8136_v32 = vpop.f32.mrf.mxu0  ;;  %v8643_v30 = vld [vmem:[%s22386_s24 + $0xa80] sm:$0xff] }
 0x947   : > { %v8137_v19 = vadd.f32 %v8136_v32, %v7365_v20  ;;  %v8395_v20 = vld [vmem:[%s22386_s24 + $0x2c0] sm:$0xff] }
 0x948   : > { %v8627_v32 = vld [vmem:[%s22386_s24 + $0xa00] sm:$0xff] }
 0x949   : > { %v8571_v56 = vld [vmem:[%s22386_s24 + $0x840] sm:$0xff] }
 0x96c   : > { %v8087_v46 = vpop.f32.mrf.mxu1 }
 0x96d   : > { %v8088_v14 = vadd.f32 %v8087_v46, %v8045_v8  ;;  %v8419_v46 = vld [vmem:[%s22386_s24 + $0x380] sm:$0xff] }
 0x96e   : > { %v8089_v0 = vpop.f32.mrf.mxu1  ;;  %v17838_v34 = vcombine.high %v8419_v46, %v8427_v13 }
 0x96f   : > { %v8090_v12 = vadd.f32 %v8089_v0, %v8047_v47  ;;  %v23533_v6 = vadd.f32 %v20933_v7, %v8088_v14  ;;  %v17837_v0 = vcombine.low %v8419_v46, %v8427_v13  ;;  %v18093_v47 = vcombine.low %v8675_v26, %v8683_v5  ;;  %v8651_v14 = vld [vmem:[%s22386_s24 + $0xac0] sm:$0xff] }
 0x970   : > { %v8091_v60 = vpop.f32.mrf.mxu1  ;;  %11463 = vmatprep.subr.bf16.mxu0 %v17838_v34  ;;  %v8635_v7 = vld [vmem:[%s22386_s24 + $0xa40] sm:$0xff] }
 0x971   : > { %v23531_v29 = vadd.f32 %v20932_v40, %v8090_v12  ;;  %v8092_v16 = vadd.f32 %v8091_v60, %v8049_v31  ;;  %v8411_v60 = vld [vmem:[%s22386_s24 + $0x340] sm:$0xff]  ;;  %11464 = vmatpush1.bf16.msra.mxu0 %v17837_v0  ;;  %11507 = vmatpush1.bf16.msra.mxu1 %v18093_v47 }
 0x972   : > { %v8093_v36 = vpop.f32.mrf.mxu1  ;;  %v17822_v8 = vcombine.high %v8403_v43, %v8411_v60  ;;  %v8667_v12 = vld [vmem:[%s22386_s24 + $0xb40] sm:$0xff]  ;;  %v17821_v31 = vcombine.low %v8403_v43, %v8411_v60 }
 0x973   : > { %v8094_v45 = vadd.f32 %v8093_v36, %v8051_v17  ;;  %v8192_v54 = vadd.f32 %v23531_v29, %v23533_v6  ;;  %v23541_v51 = vadd.f32 %v20936_v28, %v8092_v16  ;;  %v8387_v36 = vld [vmem:[%s22386_s24 + $0x280] sm:$0xff]  ;;  %v18078_v17 = vcombine.high %v8659_v25, %v8667_v12 }
 0x974   : > { %11465 = vmatprep.subr.bf16.mxu0 %v17822_v8  ;;  %v17806_v40 = vcombine.high %v8387_v36, %v8395_v20  ;;  %v17805_v16 = vcombine.low %v8387_v36, %v8395_v20  ;;  %v8579_v46 = vld [vmem:[%s22386_s24 + $0x880] sm:$0xff] }
 0x975   : > { %v23537_v63 = vadd.f32 %v20934_v2, %v8094_v45  ;;  %11508 = vmatprep.subr.bf16.mxu1 %v18078_v17  ;;  %v18062_v45 = vcombine.high %v8643_v30, %v8651_v14  ;;  %11466 = vmatpush1.bf16.msra.mxu0 %v17821_v31  ;;  %v8363_v2 = vld [vmem:[%s22386_s24 + $0x1c0] sm:$0xff] }
 0x976   : > { %11467 = vmatprep.subr.bf16.mxu0 %v17806_v40  ;;  %v8587_v13 = vld [vmem:[%s22386_s24 + $0x8c0] sm:$0xff] }
 0x977   : > { %v8197_v55 = vadd.f32 %v23537_v63, %v23541_v51  ;;  %v17998_v5 = vcombine.high %v8579_v46, %v8587_v13  ;;  %v8307_v43 = vld [vmem:[%s22386_s24] sm:$0xff] }
 0x978   : > { %v8315_v60 = vld [vmem:[%s22386_s24 + $0x40] sm:$0xff] }
 0x979   : > { %11468 = vmatpush1.bf16.msra.mxu0 %v17805_v16  ;;  %v8563_v47 = vld [vmem:[%s22386_s24 + $0x800] sm:$0xff]  ;;  %v17725_v31 = vcombine.low %v8307_v43, %v8315_v60 }
 0x97a   : > { %v17982_v36 = vcombine.high %v8563_v47, %v8571_v56  ;;  %v8547_v17 = vld [vmem:[%s22386_s24 + $0x780] sm:$0xff] }
 0x97b   : > { %v8555_v20 = vld [vmem:[%s22386_s24 + $0x7c0] sm:$0xff] }
 0x97c   : > { %v17966_v40 = vcombine.high %v8547_v17, %v8555_v20 }
 0x9ac   : > { %v8173_v52 = vpop.f32.mrf.mxu1 }
 0x9ad   : > { %v8174_v27 = vadd.f32 %v8173_v52, %v8131_v38  ;;  %v18077_v38 = vcombine.low %v8659_v25, %v8667_v12  ;;  %v8371_v52 = vld [vmem:[%s22386_s24 + $0x200] sm:$0xff]  ;;  %v17997_v25 = vcombine.low %v8579_v46, %v8587_v13  ;;  %v17726_v12 = vcombine.high %v8307_v43, %v8315_v60 }
 0x9ae   : > { %v8175_v11 = vpop.f32.mrf.mxu1  ;;  %v8779_v43 = vld [vmem:[%s22386_s24 + $0xec0] sm:$0xff] }
 0x9af   : > { %v23539_v53 = vadd.f32 %v20935_v15, %v8174_v27  ;;  %v8176_v10 = vadd.f32 %v8175_v11, %v8133_v50  ;;  %v8379_v50 = vld [vmem:[%s22386_s24 + $0x240] sm:$0xff]  ;;  %11509 = vmatpush1.bf16.msra.mxu1 %v18077_v38  ;;  %v18061_v27 = vcombine.low %v8643_v30, %v8651_v14  ;;  %v18046_v11 = vcombine.high %v8627_v32, %v8635_v7 }
 0x9b0   : > { %v8177_v39 = vpop.f32.mrf.mxu1  ;;  %11510 = vmatprep.subr.bf16.mxu1 %v18062_v45  ;;  %v8611_v15 = vld [vmem:[%s22386_s24 + $0x980] sm:$0xff]  ;;  %v17981_v38 = vcombine.low %v8563_v47, %v8571_v56 }
 0x9b1   : > { %v23543_v22 = vadd.f32 %v20937_v58, %v8176_v10  ;;  %v8178_v35 = vadd.f32 %v8177_v39, %v8135_v48  ;;  %v8193_v41 = vadd.f32 %v8192_v54, %v23539_v53  ;;  %v17790_v48 = vcombine.high %v8371_v52, %v8379_v50  ;;  %v8355_v54 = vld [vmem:[%s22386_s24 + $0x180] sm:$0xff] }
 0x9b2   : > { %v8179_v61 = vpop.f32.mrf.mxu1  ;;  %v8619_v10 = vld [vmem:[%s22386_s24 + $0x9c0] sm:$0xff]  ;;  %v18045_v39 = vcombine.low %v8627_v32, %v8635_v7  ;;  %v17774_v28 = vcombine.high %v8355_v54, %v8363_v2 }
 0x9b3   : > { %v23548_v59 = vadd.f32 %v20938_v23, %v8178_v35  ;;  %v8180_v37 = vadd.f32 %v8179_v61, %v8137_v19  ;;  %v8194_v3 = vadd.f32 %v8193_v41, %v23543_v22  ;;  %v17789_v19 = vcombine.low %v8371_v52, %v8379_v50  ;;  %11511 = vmatpush1.bf16.msra.mxu1 %v18061_v27  ;;  %v8339_v35 = vld [vmem:[%s22386_s24 + $0x100] sm:$0xff] }
 0x9b4   : > { %11469 = vmatprep.subr.bf16.mxu0 %v17790_v48  ;;  %11512 = vmatprep.subr.bf16.mxu1 %v18046_v11  ;;  %v18030_v58 = vcombine.high %v8611_v15, %v8619_v10  ;;  %v8347_v41 = vld [vmem:[%s22386_s24 + $0x140] sm:$0xff]  ;;  %v17773_v23 = vcombine.low %v8355_v54, %v8363_v2  ;;  %v17965_v52 = vcombine.low %v8547_v17, %v8555_v20 }
 0x9b5   : > { %v23551_v18 = vadd.f32 %v20939_v49, %v8180_v37  ;;  %8195 = vadd.xlane.f32.xlu0 %v8194_v3  ;;  %v8198_v9 = vadd.f32 %v8197_v55, %v23548_v59  ;;  %v8595_v61 = vld [vmem:[%s22386_s24 + $0x900] sm:$0xff]  ;;  %11470 = vmatpush1.bf16.msra.mxu0 %v17789_v19  ;;  %v18029_v37 = vcombine.low %v8611_v15, %v8619_v10 }
 0x9b6   : > { %v8603_v55 = vld [vmem:[%s22386_s24 + $0x940] sm:$0xff]  ;;  %11471 = vmatprep.subr.bf16.mxu0 %v17774_v28  ;;  %v17758_v3 = vcombine.high %v8339_v35, %v8347_v41  ;;  %v17757_v26 = vcombine.low %v8339_v35, %v8347_v41 }
 0x9b7   : > { %v8199_v62 = vadd.f32 %v8198_v9, %v23551_v18  ;;  %11513 = vmatpush1.bf16.msra.mxu1 %v18045_v39  ;;  %v18014_v49 = vcombine.high %v8595_v61, %v8603_v55  ;;  %v8323_v9 = vld [vmem:[%s22386_s24 + $0x80] sm:$0xff]  ;;  %v18013_v0 = vcombine.low %v8595_v61, %v8603_v55 }
 0x9b8   : > { %11514 = vmatprep.subr.bf16.mxu1 %v18030_v58  ;;  %v8803_v30 = vld [vmem:[%s22386_s24 + $0xf80] sm:$0xff] }
 0x9b9   : > { %8200 = vadd.xlane.f32.xlu1 %v8199_v62  ;;  %v8331_v62 = vld [vmem:[%s22386_s24 + $0xc0] sm:$0xff]  ;;  %11472 = vmatpush1.bf16.msra.mxu0 %v17773_v23 }
 0x9ba   : > { %11473 = vmatprep.subr.bf16.mxu0 %v17758_v3  ;;  %v17742_v34 = vcombine.high %v8323_v9, %v8331_v62  ;;  %v17741_v8 = vcombine.low %v8323_v9, %v8331_v62  ;;  %v8811_v14 = vld [vmem:[%s22386_s24 + $0xfc0] sm:$0xff] }
 0x9bb   : > { %11515 = vmatpush1.bf16.msra.mxu1 %v18029_v37  ;;  %v18222_v45 = vcombine.high %v8803_v30, %v8811_v14  ;;  %v18221_v50 = vcombine.low %v8803_v30, %v8811_v14  ;;  %v8531_v23 = vld [vmem:[%s22386_s24 + $0x700] sm:$0xff] }
 0x9bc   : > { %11516 = vmatprep.subr.bf16.mxu1 %v18014_v49  ;;  %v8539_v37 = vld [vmem:[%s22386_s24 + $0x740] sm:$0xff] }
 0x9bd   : > { %11474 = vmatpush1.bf16.msra.mxu0 %v17757_v26  ;;  %v8787_v3 = vld [vmem:[%s22386_s24 + $0xf00] sm:$0xff]  ;;  %v17950_v49 = vcombine.high %v8531_v23, %v8539_v37  ;;  %v17949_v62 = vcombine.low %v8531_v23, %v8539_v37 }
 0x9be   : > { %11475 = vmatprep.subr.bf16.mxu0 %v17742_v34  ;;  %v8795_v9 = vld [vmem:[%s22386_s24 + $0xf40] sm:$0xff] }
 0x9bf   : > { %11517 = vmatpush1.bf16.msra.mxu1 %v18013_v0  ;;  %v18205_v46 = vcombine.low %v8787_v3, %v8795_v9  ;;  %v18206_v13 = vcombine.high %v8787_v3, %v8795_v9  ;;  %v8515_v26 = vld [vmem:[%s22386_s24 + $0x680] sm:$0xff] }
 0x9c0   : > { %11518 = vmatprep.subr.bf16.mxu1 %v17998_v5  ;;  %v8523_v0 = vld [vmem:[%s22386_s24 + $0x6c0] sm:$0xff] }
 0x9c1   : > { %11476 = vmatpush1.bf16.msra.mxu0 %v17741_v8  ;;  %v8771_v34 = vld [vmem:[%s22386_s24 + $0xe80] sm:$0xff]  ;;  %v17934_v5 = vcombine.high %v8515_v26, %v8523_v0  ;;  %v17933_v60 = vcombine.low %v8515_v26, %v8523_v0  ;;  %v23660_v26 = vld [vmem:[%s22386_s24 + $0x388] sm:$0xff] }
 0x9c2   : > { %11477 = vmatprep.subr.bf16.mxu0 %v17726_v12  ;;  %v18189_v47 = vcombine.low %v8771_v34, %v8779_v43  ;;  %v18190_v56 = vcombine.high %v8771_v34, %v8779_v43  ;;  %v8499_v8 = vld [vmem:[%s22386_s24 + $0x600] sm:$0xff]  ;;  %v23663_v0 = vld [vmem:[%s22386_s24 + $0x3c8] sm:$0xff] }
 0x9c3   : > { %11519 = vmatpush1.bf16.msra.mxu1 %v17997_v25  ;;  %v8507_v25 = vld [vmem:[%s22386_s24 + $0x640] sm:$0xff]  ;;  %v23666_v34 = vld [vmem:[%s22386_s24 + $0xb88] sm:$0xff] }
 0x9c4   : > { %11520 = vmatprep.subr.bf16.mxu1 %v17982_v36  ;;  %v8755_v12 = vld [vmem:[%s22386_s24 + $0xe00] sm:$0xff]  ;;  %v17917_v36 = vcombine.low %v8499_v8, %v8507_v25  ;;  %v17918_v17 = vcombine.high %v8499_v8, %v8507_v25  ;;  %v23671_v43 = vld [vmem:[%s22386_s24 + $0xbc8] sm:$0xff] }
 0x9c5   : > { %11478 = vmatpush1.bf16.msra.mxu0 %v17725_v31  ;;  %v8763_v20 = vld [vmem:[%s22386_s24 + $0xe40] sm:$0xff] }
 0x9c6   : > { %11479 = vmatprep.subr.bf16.mxu0 %v17966_v40  ;;  %v8483_v30 = vld [vmem:[%s22386_s24 + $0x580] sm:$0xff]  ;;  %v18173_v31 = vcombine.low %v8755_v12, %v8763_v20 }
 0x9c7   : > { %11521 = vmatpush1.bf16.msra.mxu1 %v17981_v38  ;;  %v8491_v14 = vld [vmem:[%s22386_s24 + $0x5c0] sm:$0xff]  ;;  %v18174_v38 = vcombine.high %v8755_v12, %v8763_v20 }
 0x9c8   : > { %11522 = vmatprep.subr.bf16.mxu1 %v18222_v45  ;;  %v17902_v40 = vcombine.high %v8483_v30, %v8491_v14  ;;  %v8739_v45 = vld [vmem:[%s22386_s24 + $0xd80] sm:$0xff] }
 0x9c9   : > { %11480 = vmatpush2.bf16.msra.mxu0 %v17965_v52  ;;  %v8747_v52 = vld [vmem:[%s22386_s24 + $0xdc0] sm:$0xff] }
 0x9ca   : > { %11481 = vmatprep.subr.bf16.mxu0 %v17950_v49  ;;  %v8691_v23 = vld [vmem:[%s22386_s24 + $0xc00] sm:$0xff] }
 0x9cb   : > { %11523 = vmatpush2.bf16.msra.mxu1 %v18221_v50  ;;  %v8467_v50 = vld [vmem:[%s22386_s24 + $0x500] sm:$0xff] }
 0x9cc   : > { %11524 = vmatprep.subr.bf16.mxu1 %v18206_v13  ;;  %v8699_v37 = vld [vmem:[%s22386_s24 + $0xc40] sm:$0xff] }
 0x9cd   : > { %11482 = vmatpush2.bf16.msra.mxu0 %v17949_v62  ;;  %v18110_v62 = vcombine.high %v8691_v23, %v8699_v37  ;;  %v18109_v13 = vcombine.low %v8691_v23, %v8699_v37 }
 0x9ce   : > { %11483 = vmatprep.subr.bf16.mxu0 %v17934_v5  ;;  %v17840_v5 = vcombine.high %v23660_v26, %v23663_v0 }
 0x9cf   : > { %11525 = vmatpush2.bf16.msra.mxu1 %v18205_v46 }
 0x9d0   : > { %11526 = vmatprep.subr.bf16.mxu1 %v18190_v56  ;;  %v18096_v56 = vcombine.high %v23666_v34, %v23671_v43 }
 0x9d1   : > { %11484 = vmatpush2.bf16.msra.mxu0 %v17933_v60  ;;  %v17839_v60 = vcombine.low %v23660_v26, %v23663_v0  ;;  %v8380_v26 = vld [vmem:[%s22386_s24 + $0x248] sm:$0xff] }
 0x9d2   : > { %11485 = vmatprep.subr.bf16.mxu0 %v17918_v17  ;;  %v8628_v0 = vld [vmem:[%s22386_s24 + $0xa08] sm:$0xff] }
 0x9d3   : > { %11527 = vmatpush2.bf16.msra.mxu1 %v18189_v47  ;;  %v18095_v47 = vcombine.low %v23666_v34, %v23671_v43 }
 0x9d4   : > { %11528 = vmatprep.subr.bf16.mxu1 %v18174_v38 }
 0x9d5   : > { %11486 = vmatpush2.bf16.msra.mxu0 %v17917_v36 }
 0x9d6   : > { %11487 = vmatprep.subr.bf16.mxu0 %v17902_v40 }
 0x9d7   : > { %11529 = vmatpush2.bf16.msra.mxu1 %v18173_v31  ;;  %v8191_v31 = vld [vmem:[%s1079_s21] sm:$0xf] }
 0xa3e   : > { %v8196_v32 = vpop.xlane.xlu0 %8195 }
 0xa3f   : > { %v8203_v7 = vmul.f32 0.001953125, %v8196_v32  ;;  %v18158_v32 = vcombine.high %v8739_v45, %v8747_v52 }
 0xa41   : > { %v23592_v16 = vsub.f32 %v23533_v6, %v8203_v7  ;;  %v23595_v27 = vsub.f32 %v23531_v29, %v8203_v7  ;;  %v23598_v48 = vsub.f32 %v23539_v53, %v8203_v7  ;;  %v23601_v54 = vsub.f32 %v23543_v22, %v8203_v7  ;;  %v8475_v7 = vld [vmem:[%s22386_s24 + $0x540] sm:$0xff]  ;;  %11530 = vmatprep.subr.bf16.mxu1 %v18158_v32 }
 0xa42   : > { %v8201_v11 = vpop.xlane.xlu1 %8200 }
 0xa43   : > { %v8204_v2 = vmul.f32 0.001953125, %v8201_v11  ;;  %v8213_v15 = vmul.f32 %v23592_v16, %v23592_v16  ;;  %v8214_v10 = vmul.f32 %v23595_v27, %v23595_v27  ;;  %v8215_v6 = vmul.f32 %v23598_v48, %v23598_v48  ;;  %v8723_v11 = vld [vmem:[%s22386_s24 + $0xd00] sm:$0xff] }
 0xa44   : > { %v8216_v39 = vmul.f32 %v23601_v54, %v23601_v54 }
 0xa45   : > { %v23610_v29 = vsub.f32 %v23541_v51, %v8204_v2  ;;  %v23613_v53 = vsub.f32 %v23537_v63, %v8204_v2  ;;  %v8221_v19 = vadd.f32 %v8214_v10, %v8213_v15  ;;  %v23616_v22 = vsub.f32 %v23548_v59, %v8204_v2 }
 0xa46   : > { %v23621_v58 = vsub.f32 %v23551_v18, %v8204_v2  ;;  %v8731_v2 = vld [vmem:[%s22386_s24 + $0xd40] sm:$0xff]  ;;  %v17901_v15 = vcombine.low %v8483_v30, %v8491_v14  ;;  %v18157_v10 = vcombine.low %v8739_v45, %v8747_v52  ;;  %v8190_v30 = vld [vmem:[%s1070_s20] sm:$0xf] }
 0xa47   : > { %v8222_v28 = vadd.f32 %v8221_v19, %v8215_v6  ;;  %v8217_v51 = vmul.f32 %v23610_v29, %v23610_v29  ;;  %v8218_v63 = vmul.f32 %v23613_v53, %v23613_v53  ;;  %v8219_v59 = vmul.f32 %v23616_v22, %v23616_v22 }
 0xa48   : > { %v8220_v61 = vmul.f32 %v23621_v58, %v23621_v58  ;;  %v17886_v6 = vcombine.high %v8467_v50, %v8475_v7  ;;  %v18142_v19 = vcombine.high %v8723_v11, %v8731_v2  ;;  %11488 = vmatpush2.bf16.msra.mxu0 %v17901_v15  ;;  %11531 = vmatpush2.bf16.msra.mxu1 %v18157_v10 }
 0xa49   : > { %v8223_v35 = vadd.f32 %v8222_v28, %v8216_v39  ;;  %v8226_v41 = vadd.f32 %v8218_v63, %v8217_v51  ;;  %v8451_v39 = vld [vmem:[%s22386_s24 + $0x480] sm:$0xff]  ;;  %v8253_v40 = vrot.slane %v8190_v30, %v22887_v24  ;;  %v8261_v52 = vrot.slane %v8190_v30, %v22935_v33 }
 0xa4a   : > { %v8459_v28 = vld [vmem:[%s22386_s24 + $0x4c0] sm:$0xff]  ;;  %11489 = vmatprep.subr.bf16.mxu0 %v17886_v6  ;;  %11532 = vmatprep.subr.bf16.mxu1 %v18142_v19  ;;  %v8249_v32 = vrot.slane %v8190_v30, %v22860_v1  ;;  %v8282_v15 = vrot.slane %v8191_v31, %v22887_v24  ;;  %v8290_v10 = vrot.slane %v8191_v31, %v22935_v33 }
 0xa4b   : > { %8224 = vadd.xlane.f32.xlu0 %v8223_v35  ;;  %v8227_v55 = vadd.f32 %v8226_v41, %v8219_v59  ;;  %v8707_v51 = vld [vmem:[%s22386_s24 + $0xc80] sm:$0xff]  ;;  %v17885_v35 = vcombine.low %v8467_v50, %v8475_v7  ;;  %v18141_v59 = vcombine.low %v8723_v11, %v8731_v2  ;;  %v17870_v41 = vcombine.high %v8451_v39, %v8459_v28 }
 0xa4c   : > { %v8715_v63 = vld [vmem:[%s22386_s24 + $0xcc0] sm:$0xff]  ;;  %v17869_v3 = vcombine.low %v8451_v39, %v8459_v28  ;;  %v8257_v11 = vrot.slane %v8190_v30, %v22907_v21  ;;  %v8286_v6 = vrot.slane %v8191_v31, %v22907_v21 }
 0xa4d   : > { %v8228_v18 = vadd.f32 %v8227_v55, %v8220_v61  ;;  %v18126_v61 = vcombine.high %v8707_v51, %v8715_v63  ;;  %v8435_v55 = vld [vmem:[%s22386_s24 + $0x400] sm:$0xff]  ;;  %11490 = vmatpush2.bf16.msra.mxu0 %v17885_v35  ;;  %11533 = vmatpush2.bf16.msra.mxu1 %v18141_v59  ;;  %v18125_v49 = vcombine.low %v8707_v51, %v8715_v63 }
 0xa4e   : > { %11491 = vmatprep.subr.bf16.mxu0 %v17870_v41 }
 0xa4f   : > { %8229 = vadd.xlane.f32.xlu0 %v8228_v18  ;;  %v8443_v18 = vld [vmem:[%s22386_s24 + $0x440] sm:$0xff]  ;;  %11534 = vmatprep.subr.bf16.mxu1 %v18126_v61 }
 0xa50   : > { %v17854_v9 = vcombine.high %v8435_v55, %v8443_v18  ;;  %v17853_v46 = vcombine.low %v8435_v55, %v8443_v18 }
 0xa51   : > { %11492 = vmatpush2.bf16.msra.mxu0 %v17869_v3  ;;  %11535 = vmatpush2.bf16.msra.mxu1 %v18125_v49  ;;  %v8412_v49 = vld [vmem:[%s22386_s24 + $0x348] sm:$0xff] }
 0xa52   : > { %11493 = vmatprep.subr.bf16.mxu0 %v17854_v9  ;;  %11536 = vmatprep.subr.bf16.mxu1 %v18110_v62  ;;  %v8660_v9 = vld [vmem:[%s22386_s24 + $0xb08] sm:$0xff] }
 0xa53   : > { %v8668_v62 = vld [vmem:[%s22386_s24 + $0xb48] sm:$0xff] }
 0xa55   : > { %11494 = vmatpush2.bf16.msra.mxu0 %v17853_v46  ;;  %11537 = vmatpush2.bf16.msra.mxu1 %v18109_v13 }
 0xa56   : > { %11549 = vmatprep.subr.bf16.mxu0 %v17840_v5  ;;  %11592 = vmatprep.subr.bf16.mxu1 %v18096_v56 }
 0xad4   : > { %v8225_v8 = vpop.xlane.xlu0 %8224 }
 0xad5   : > { %v8231_v25 = vmul.f32 0.001953125, %v8225_v8  ;;  %v8388_v8 = vld [vmem:[%s22386_s24 + $0x288] sm:$0xff] }
 0xad7   : > { %v8233_v12 = vadd.f32 1e-05, %v8231_v25 }
 0xad8   : > { %v8230_v36 = vpop.xlane.xlu0 %8229 }
 0xad9   : > { %20924 = vrsqrt.f32 %v8233_v12  ;;  %v8232_v17 = vmul.f32 0.001953125, %v8230_v36  ;;  %v18080_v12 = vcombine.high %v8660_v9, %v8668_v62  ;;  %v8396_v36 = vld [vmem:[%s22386_s24 + $0x2c8] sm:$0xff] }
 0xada   : > { %v17807_v34 = vcombine.low %v8388_v8, %v8396_v36 }
 0xadb   : > { %v8234_v20 = vadd.f32 1e-05, %v8232_v17  ;;  %v8644_v17 = vld [vmem:[%s22386_s24 + $0xa88] sm:$0xff] }
 0xadd   : > { %20926 = vrsqrt.f32 %v8234_v20  ;;  %v8652_v20 = vld [vmem:[%s22386_s24 + $0xac8] sm:$0xff] }
 0xade   : > { %v18063_v43 = vcombine.low %v8644_v17, %v8652_v20 }
 0xae6   : > { %v20925_v14 = vpop.eup %20924 }
 0xae7   : > { %v8238_v38 = vmul.f32 %v20925_v14, %v23595_v27  ;;  %v8240_v45 = vmul.f32 %v20925_v14, %v23601_v54  ;;  %v8237_v50 = vmul.f32 %v20925_v14, %v23592_v16  ;;  %v8239_v7 = vmul.f32 %v20925_v14, %v23598_v48 }
 0xae8   : > { %v8278_v27 = vrot.slane %v8191_v31, %v22860_v1  ;;  %v18079_v14 = vcombine.low %v8660_v9, %v8668_v62  ;;  %v17808_v31 = vcombine.high %v8388_v8, %v8396_v36  ;;  %v8308_v9 = vld [vmem:[%s22386_s24 + $0x8] sm:$0xff] }
 0xae9   : > { %v8267_v19 = vmul.f32 %v8253_v40, %v8238_v38  ;;  %v8269_v39 = vmul.f32 %v8261_v52, %v8240_v45  ;;  %v8266_v28 = vmul.f32 %v8249_v32, %v8237_v50  ;;  %v8268_v63 = vmul.f32 %v8257_v11, %v8239_v7  ;;  %v8364_v50 = vld [vmem:[%s22386_s24 + $0x1c8] sm:$0xff] }
 0xaea   : > { %v20927_v2 = vpop.eup %20926  ;;  %v18064_v38 = vcombine.high %v8644_v17, %v8652_v20  ;;  %v8620_v7 = vld [vmem:[%s22386_s24 + $0x9c8] sm:$0xff] }
 0xaeb   : > { %v8242_v54 = vmul.f32 %v20927_v2, %v23613_v53  ;;  %v8244_v16 = vmul.f32 %v20927_v2, %v23621_v58  ;;  %v8241_v48 = vmul.f32 %v20927_v2, %v23610_v29  ;;  %v8243_v51 = vmul.f32 %v20927_v2, %v23616_v22  ;;  %v8404_v29 = vld [vmem:[%s22386_s24 + $0x308] sm:$0xff] }
 0xaec   : > { %v23699_v55 = vadd.f32 %v8282_v15, %v8267_v19  ;;  %v23703_v58 = vadd.f32 %v8290_v10, %v8269_v39  ;;  %v23708_v23 = vadd.f32 %v8278_v27, %v8266_v28  ;;  %v23712_v37 = vadd.f32 %v8286_v6, %v8268_v63  ;;  %v8604_v19 = vld [vmem:[%s22386_s24 + $0x948] sm:$0xff] }
 0xaed   : > { %v8271_v35 = vmul.f32 %v8253_v40, %v8242_v54  ;;  %v8273_v59 = vmul.f32 %v8261_v52, %v8244_v16  ;;  %v8270_v41 = vmul.f32 %v8249_v32, %v8241_v48  ;;  %v8272_v61 = vmul.f32 %v8257_v11, %v8243_v51  ;;  %v8372_v40 = vld [vmem:[%s22386_s24 + $0x208] sm:$0xff] }
 0xaee   : > { %25268 = vst [vmem:[#allocation49_spill] sm:$0xff] %v23699_v55  ;;  %25270 = vst [vmem:[#allocation51_spill] sm:$0xff] %v23703_v58  ;;  %v17824_v25 = vcombine.high %v8404_v29, %v8412_v49  ;;  %v17823_v30 = vcombine.low %v8404_v29, %v8412_v49  ;;  %v8356_v52 = vld [vmem:[%s22386_s24 + $0x188] sm:$0xff]  ;;  %v17791_v11 = vcombine.low %v8372_v40, %v8380_v26 }
 0xaef   : > { %v23701_v53 = vadd.f32 %v8282_v15, %v8271_v35  ;;  %v23705_v18 = vadd.f32 %v8290_v10, %v8273_v59  ;;  %25272 = vst [vmem:[#allocation53_spill] sm:$0xff] %v23708_v23  ;;  %v23710_v22 = vadd.f32 %v8278_v27, %v8270_v41  ;;  %25274 = vst [vmem:[#allocation55_spill] sm:$0xff] %v23712_v37  ;;  %v8612_v32 = vld [vmem:[%s22386_s24 + $0x988] sm:$0xff] }
 0xaf0   : > { %v23714_v3 = vadd.f32 %v8286_v6, %v8272_v61  ;;  %v17776_v15 = vcombine.high %v8356_v52, %v8364_v50  ;;  %v18032_v10 = vcombine.high %v8612_v32, %v8620_v7  ;;  %v8340_v27 = vld [vmem:[%s22386_s24 + $0x108] sm:$0xff]  ;;  %v17775_v16 = vcombine.low %v8356_v52, %v8364_v50 }
 0xaf1   : > { %25269 = vst [vmem:[#allocation50_spill] sm:$0xff] %v23701_v53  ;;  %25271 = vst [vmem:[#allocation52_spill] sm:$0xff] %v23705_v18  ;;  %v23721_v46 = vpack.c.bf16 %v23701_v53, %v23699_v55  ;;  %v23725_v13 = vpack.c.bf16 %v23705_v18, %v23703_v58  ;;  %v23729_v5 = vpack.c.bf16 %v23710_v22, %v23708_v23  ;;  %v8348_v6 = vld [vmem:[%s22386_s24 + $0x148] sm:$0xff] }
 0xaf2   : > { %25273 = vst [vmem:[#allocation54_spill] sm:$0xff] %v23710_v22  ;;  %25275 = vst [vmem:[#allocation56_spill] sm:$0xff] %v23714_v3  ;;  %v23733_v56 = vpack.c.bf16 %v23714_v3, %v23712_v37  ;;  %v8596_v54 = vld [vmem:[%s22386_s24 + $0x908] sm:$0xff]  ;;  %v18031_v39 = vcombine.low %v8612_v32, %v8620_v7  ;;  %v17760_v48 = vcombine.high %v8340_v27, %v8348_v6 }
 0xaf3   : > { %11495 = vmatprep.mubr.bf16.mxu0 %v23721_v46  ;;  %11538 = vmatprep.mubr.bf16.mxu1 %v23725_v13  ;;  %v18016_v28 = vcombine.high %v8596_v54, %v8604_v19  ;;  %v8324_v51 = vld [vmem:[%s22386_s24 + $0x88] sm:$0xff]  ;;  %v17759_v41 = vcombine.low %v8340_v27, %v8348_v6  ;;  %v18015_v61 = vcombine.low %v8596_v54, %v8604_v19 }
 0xaf4   : > { %11496 = vmatmul.mubr.bf16.vlgmr.msra.gmra.mxu0 %v23729_v5  ;;  %11539 = vmatmul.mubr.bf16.vlgmr.msra.gmra.mxu1 %v23733_v56  ;;  %v8332_v63 = vld [vmem:[%s22386_s24 + $0xc8] sm:$0xff] }
 0xaf5   : > { %11550 = vmatpush1.bf16.msra.mxu0 %v17839_v60  ;;  %11593 = vmatpush1.bf16.msra.mxu1 %v18095_v47  ;;  %v8636_v60 = vld [vmem:[%s22386_s24 + $0xa48] sm:$0xff]  ;;  %v17792_v47 = vcombine.high %v8372_v40, %v8380_v26  ;;  %v17744_v29 = vcombine.high %v8324_v51, %v8332_v63 }
 0xaf6   : > { %11581 = vmatprep.mubr.bf16.mxu0 %v23721_v46  ;;  %11624 = vmatprep.mubr.bf16.mxu1 %v23725_v13  ;;  %v18048_v45 = vcombine.high %v8628_v0, %v8636_v60  ;;  %v18047_v2 = vcombine.low %v8628_v0, %v8636_v60  ;;  %v8580_v35 = vld [vmem:[%s22386_s24 + $0x888] sm:$0xff] }
 0xaf7   : > { %11551 = vmatprep.subr.bf16.mxu0 %v17824_v25  ;;  %11594 = vmatprep.subr.bf16.mxu1 %v18080_v12  ;;  %v8588_v59 = vld [vmem:[%s22386_s24 + $0x8c8] sm:$0xff]  ;;  %v17743_v12 = vcombine.low %v8324_v51, %v8332_v63 }
 0xaf8   : > { %v18000_v49 = vcombine.high %v8580_v35, %v8588_v59  ;;  %v8316_v62 = vld [vmem:[%s22386_s24 + $0x48] sm:$0xff]  ;;  %v17999_v36 = vcombine.low %v8580_v35, %v8588_v59 }
 0xaf9   : > { %11552 = vmatpush1.bf16.msra.mxu0 %v17823_v30  ;;  %11595 = vmatpush1.bf16.msra.mxu1 %v18079_v14  ;;  %v8564_v8 = vld [vmem:[%s22386_s24 + $0x808] sm:$0xff]  ;;  %v17728_v17 = vcombine.high %v8308_v9, %v8316_v62  ;;  %v17727_v40 = vcombine.low %v8308_v9, %v8316_v62 }
 0xafa   : > { %11553 = vmatprep.subr.bf16.mxu0 %v17808_v31  ;;  %11596 = vmatprep.subr.bf16.mxu1 %v18064_v38  ;;  %v8572_v25 = vld [vmem:[%s22386_s24 + $0x848] sm:$0xff] }
 0xafb   : > { %v17984_v20 = vcombine.high %v8564_v8, %v8572_v25  ;;  %v8548_v30 = vld [vmem:[%s22386_s24 + $0x788] sm:$0xff]  ;;  %v17983_v26 = vcombine.low %v8564_v8, %v8572_v25 }
 0xafc   : > { %v8556_v14 = vld [vmem:[%s22386_s24 + $0x7c8] sm:$0xff] }
 0xafd   : > { %11554 = vmatpush1.bf16.msra.mxu0 %v17807_v34  ;;  %11597 = vmatpush1.bf16.msra.mxu1 %v18063_v43  ;;  %v8804_v31 = vld [vmem:[%s22386_s24 + $0xf88] sm:$0xff]  ;;  %v17968_v0 = vcombine.high %v8548_v30, %v8556_v14  ;;  %v17967_v52 = vcombine.low %v8548_v30, %v8556_v14 }
 0xafe   : > { %11555 = vmatprep.subr.bf16.mxu0 %v17792_v47  ;;  %11598 = vmatprep.subr.bf16.mxu1 %v18048_v45  ;;  %v8812_v38 = vld [vmem:[%s22386_s24 + $0xfc8] sm:$0xff] }
 0xaff   : > { %v18224_v60 = vcombine.high %v8804_v31, %v8812_v38  ;;  %v8532_v34 = vld [vmem:[%s22386_s24 + $0x708] sm:$0xff]  ;;  %v18223_v50 = vcombine.low %v8804_v31, %v8812_v38 }
 0xb00   : > { %v8540_v43 = vld [vmem:[%s22386_s24 + $0x748] sm:$0xff] }
 0xb01   : > { %11556 = vmatpush1.bf16.msra.mxu0 %v17791_v11  ;;  %11599 = vmatpush1.bf16.msra.mxu1 %v18047_v2  ;;  %v8788_v47 = vld [vmem:[%s22386_s24 + $0xf08] sm:$0xff]  ;;  %v17952_v32 = vcombine.high %v8532_v34, %v8540_v43  ;;  %v17951_v27 = vcombine.low %v8532_v34, %v8540_v43 }
 0xb02   : > { %11557 = vmatprep.subr.bf16.mxu0 %v17776_v15  ;;  %11600 = vmatprep.subr.bf16.mxu1 %v18032_v10  ;;  %v8796_v45 = vld [vmem:[%s22386_s24 + $0xf48] sm:$0xff] }
 0xb03   : > { %v18208_v7 = vcombine.high %v8788_v47, %v8796_v45  ;;  %v8516_v11 = vld [vmem:[%s22386_s24 + $0x688] sm:$0xff]  ;;  %v18207_v6 = vcombine.low %v8788_v47, %v8796_v45 }
 0xb04   : > { %v8524_v2 = vld [vmem:[%s22386_s24 + $0x6c8] sm:$0xff] }
 0xb05   : > { %11558 = vmatpush1.bf16.msra.mxu0 %v17775_v16  ;;  %11601 = vmatpush1.bf16.msra.mxu1 %v18031_v39  ;;  %v8772_v15 = vld [vmem:[%s22386_s24 + $0xe88] sm:$0xff]  ;;  %v17936_v54 = vcombine.high %v8516_v11, %v8524_v2  ;;  %v17935_v51 = vcombine.low %v8516_v11, %v8524_v2 }
 0xb06   : > { %11559 = vmatprep.subr.bf16.mxu0 %v17760_v48  ;;  %11602 = vmatprep.subr.bf16.mxu1 %v18016_v28  ;;  %v8780_v10 = vld [vmem:[%s22386_s24 + $0xec8] sm:$0xff] }
 0xb07   : > { %v18192_v19 = vcombine.high %v8772_v15, %v8780_v10  ;;  %v8500_v16 = vld [vmem:[%s22386_s24 + $0x608] sm:$0xff]  ;;  %v18191_v63 = vcombine.low %v8772_v15, %v8780_v10 }
 0xb08   : > { %v8508_v39 = vld [vmem:[%s22386_s24 + $0x648] sm:$0xff] }
 0xb09   : > { %11560 = vmatpush1.bf16.msra.mxu0 %v17759_v41  ;;  %11603 = vmatpush1.bf16.msra.mxu1 %v18015_v61  ;;  %v8756_v48 = vld [vmem:[%s22386_s24 + $0xe08] sm:$0xff]  ;;  %v17920_v35 = vcombine.high %v8500_v16, %v8508_v39  ;;  %v17919_v9 = vcombine.low %v8500_v16, %v8508_v39 }
 0xb0a   : > { %11561 = vmatprep.subr.bf16.mxu0 %v17744_v29  ;;  %11604 = vmatprep.subr.bf16.mxu1 %v18000_v49  ;;  %v8764_v28 = vld [vmem:[%s22386_s24 + $0xe48] sm:$0xff] }
 0xb0b   : > { %v18176_v59 = vcombine.high %v8756_v48, %v8764_v28  ;;  %v8484_v41 = vld [vmem:[%s22386_s24 + $0x588] sm:$0xff]  ;;  %v18175_v62 = vcombine.low %v8756_v48, %v8764_v28 }
 0xb0c   : > { %v8492_v61 = vld [vmem:[%s22386_s24 + $0x5c8] sm:$0xff] }
 0xb0d   : > { %11562 = vmatpush1.bf16.msra.mxu0 %v17743_v12  ;;  %11605 = vmatpush1.bf16.msra.mxu1 %v17999_v36  ;;  %v8740_v29 = vld [vmem:[%s22386_s24 + $0xd88] sm:$0xff]  ;;  %v17904_v8 = vcombine.high %v8484_v41, %v8492_v61  ;;  %v17903_v30 = vcombine.low %v8484_v41, %v8492_v61 }
 0xb0e   : > { %11563 = vmatprep.subr.bf16.mxu0 %v17728_v17  ;;  %11606 = vmatprep.subr.bf16.mxu1 %v17984_v20  ;;  %v8748_v49 = vld [vmem:[%s22386_s24 + $0xdc8] sm:$0xff] }
 0xb0f   : > { %v18160_v25 = vcombine.high %v8740_v29, %v8748_v49  ;;  %v8468_v12 = vld [vmem:[%s22386_s24 + $0x508] sm:$0xff]  ;;  %v18159_v14 = vcombine.low %v8740_v29, %v8748_v49 }
 0xb10   : > { %v8476_v36 = vld [vmem:[%s22386_s24 + $0x548] sm:$0xff] }
 0xb11   : > { %11564 = vmatpush1.bf16.msra.mxu0 %v17727_v40  ;;  %11607 = vmatpush1.bf16.msra.mxu1 %v17983_v26  ;;  %v8724_v17 = vld [vmem:[%s22386_s24 + $0xd08] sm:$0xff]  ;;  %v17888_v31 = vcombine.high %v8468_v12, %v8476_v36  ;;  %v17887_v34 = vcombine.low %v8468_v12, %v8476_v36 }
 0xb12   : > { %11565 = vmatprep.subr.bf16.mxu0 %v17968_v0  ;;  %11608 = vmatprep.subr.bf16.mxu1 %v18224_v60  ;;  %v8732_v20 = vld [vmem:[%s22386_s24 + $0xd48] sm:$0xff] }
 0xb13   : > { %v18144_v38 = vcombine.high %v8724_v17, %v8732_v20  ;;  %v8452_v40 = vld [vmem:[%s22386_s24 + $0x488] sm:$0xff]  ;;  %v18143_v43 = vcombine.low %v8724_v17, %v8732_v20 }
 0xb14   : > { %v8460_v26 = vld [vmem:[%s22386_s24 + $0x4c8] sm:$0xff] }
 0xb15   : > { %11566 = vmatpush2.bf16.msra.mxu0 %v17967_v52  ;;  %11609 = vmatpush2.bf16.msra.mxu1 %v18223_v50  ;;  %v8708_v0 = vld [vmem:[%s22386_s24 + $0xc88] sm:$0xff]  ;;  %v17872_v47 = vcombine.high %v8452_v40, %v8460_v26  ;;  %v17871_v11 = vcombine.low %v8452_v40, %v8460_v26 }
 0xb16   : > { %11567 = vmatprep.subr.bf16.mxu0 %v17952_v32  ;;  %11610 = vmatprep.subr.bf16.mxu1 %v18208_v7  ;;  %v8716_v60 = vld [vmem:[%s22386_s24 + $0xcc8] sm:$0xff] }
 0xb17   : > { %v18128_v45 = vcombine.high %v8708_v0, %v8716_v60  ;;  %v8436_v52 = vld [vmem:[%s22386_s24 + $0x408] sm:$0xff]  ;;  %v18127_v2 = vcombine.low %v8708_v0, %v8716_v60 }
 0xb18   : > { %v8444_v50 = vld [vmem:[%s22386_s24 + $0x448] sm:$0xff] }
 0xb19   : > { %11568 = vmatpush2.bf16.msra.mxu0 %v17951_v27  ;;  %11611 = vmatpush2.bf16.msra.mxu1 %v18207_v6  ;;  %v8692_v32 = vld [vmem:[%s22386_s24 + $0xc08] sm:$0xff]  ;;  %v17856_v15 = vcombine.high %v8436_v52, %v8444_v50  ;;  %v8421_v27 = vld [vmem:[%s22386_s24 + $0x390] sm:$0xff]  ;;  %v17855_v16 = vcombine.low %v8436_v52, %v8444_v50 }
 0xb1a   : > { %11569 = vmatprep.subr.bf16.mxu0 %v17936_v54  ;;  %11612 = vmatprep.subr.bf16.mxu1 %v18192_v19  ;;  %v8700_v7 = vld [vmem:[%s22386_s24 + $0xc48] sm:$0xff]  ;;  %v8429_v6 = vld [vmem:[%s22386_s24 + $0x3d0] sm:$0xff] }
 0xb1b   : > { %v18112_v10 = vcombine.high %v8692_v32, %v8700_v7  ;;  %v8677_v54 = vld [vmem:[%s22386_s24 + $0xb90] sm:$0xff]  ;;  %v18111_v39 = vcombine.low %v8692_v32, %v8700_v7  ;;  %v17842_v48 = vcombine.high %v8421_v27, %v8429_v6  ;;  %v17841_v41 = vcombine.low %v8421_v27, %v8429_v6 }
 0xb1c   : > { %v8685_v19 = vld [vmem:[%s22386_s24 + $0xbd0] sm:$0xff] }
 0xb1d   : > { %11570 = vmatpush2.bf16.msra.mxu0 %v17935_v51  ;;  %11613 = vmatpush2.bf16.msra.mxu1 %v18191_v63  ;;  %v18098_v28 = vcombine.high %v8677_v54, %v8685_v19  ;;  %v8405_v51 = vld [vmem:[%s22386_s24 + $0x310] sm:$0xff]  ;;  %v18097_v61 = vcombine.low %v8677_v54, %v8685_v19 }
 0xb1e   : > { %11571 = vmatprep.subr.bf16.mxu0 %v17920_v35  ;;  %11614 = vmatprep.subr.bf16.mxu1 %v18176_v59  ;;  %v8413_v63 = vld [vmem:[%s22386_s24 + $0x350] sm:$0xff] }
 0xb1f   : > { %v8661_v35 = vld [vmem:[%s22386_s24 + $0xb10] sm:$0xff]  ;;  %v17826_v29 = vcombine.high %v8405_v51, %v8413_v63  ;;  %v17825_v12 = vcombine.low %v8405_v51, %v8413_v63 }
 0xb20   : > { %v8669_v59 = vld [vmem:[%s22386_s24 + $0xb50] sm:$0xff] }
 0xb21   : > { %11572 = vmatpush2.bf16.msra.mxu0 %v17919_v9  ;;  %11615 = vmatpush2.bf16.msra.mxu1 %v18175_v62  ;;  %v18082_v49 = vcombine.high %v8661_v35, %v8669_v59  ;;  %v8389_v9 = vld [vmem:[%s22386_s24 + $0x290] sm:$0xff]  ;;  %v18081_v36 = vcombine.low %v8661_v35, %v8669_v59 }
 0xb22   : > { %11573 = vmatprep.subr.bf16.mxu0 %v17904_v8  ;;  %11616 = vmatprep.subr.bf16.mxu1 %v18160_v25  ;;  %v8397_v62 = vld [vmem:[%s22386_s24 + $0x2d0] sm:$0xff] }
 0xb23   : > { %v8645_v8 = vld [vmem:[%s22386_s24 + $0xa90] sm:$0xff]  ;;  %v17810_v17 = vcombine.high %v8389_v9, %v8397_v62  ;;  %v17809_v40 = vcombine.low %v8389_v9, %v8397_v62 }
 0xb24   : > { %v8653_v25 = vld [vmem:[%s22386_s24 + $0xad0] sm:$0xff] }
 0xb25   : > { %11574 = vmatpush2.bf16.msra.mxu0 %v17903_v30  ;;  %11617 = vmatpush2.bf16.msra.mxu1 %v18159_v14  ;;  %v18066_v20 = vcombine.high %v8645_v8, %v8653_v25  ;;  %v8373_v30 = vld [vmem:[%s22386_s24 + $0x210] sm:$0xff]  ;;  %v18065_v26 = vcombine.low %v8645_v8, %v8653_v25 }
 0xb26   : > { %11575 = vmatprep.subr.bf16.mxu0 %v17888_v31  ;;  %11618 = vmatprep.subr.bf16.mxu1 %v18144_v38  ;;  %v8381_v14 = vld [vmem:[%s22386_s24 + $0x250] sm:$0xff] }
 0xb27   : > { %v8629_v31 = vld [vmem:[%s22386_s24 + $0xa10] sm:$0xff]  ;;  %v17794_v0 = vcombine.high %v8373_v30, %v8381_v14  ;;  %v17793_v52 = vcombine.low %v8373_v30, %v8381_v14 }
 0xb28   : > { %v8637_v38 = vld [vmem:[%s22386_s24 + $0xa50] sm:$0xff] }
 0xb29   : > { %11576 = vmatpush2.bf16.msra.mxu0 %v17887_v34  ;;  %11619 = vmatpush2.bf16.msra.mxu1 %v18143_v43  ;;  %v18050_v60 = vcombine.high %v8629_v31, %v8637_v38  ;;  %v8357_v34 = vld [vmem:[%s22386_s24 + $0x190] sm:$0xff]  ;;  %v18049_v50 = vcombine.low %v8629_v31, %v8637_v38 }
 0xb2a   : > { %11577 = vmatprep.subr.bf16.mxu0 %v17872_v47  ;;  %11620 = vmatprep.subr.bf16.mxu1 %v18128_v45  ;;  %v8365_v43 = vld [vmem:[%s22386_s24 + $0x1d0] sm:$0xff] }
 0xb2b   : > { %v8613_v47 = vld [vmem:[%s22386_s24 + $0x990] sm:$0xff]  ;;  %v17778_v32 = vcombine.high %v8357_v34, %v8365_v43  ;;  %v17777_v27 = vcombine.low %v8357_v34, %v8365_v43 }
 0xb2c   : > { %v8621_v45 = vld [vmem:[%s22386_s24 + $0x9d0] sm:$0xff] }
 0xb2d   : > { %11578 = vmatpush2.bf16.msra.mxu0 %v17871_v11  ;;  %11621 = vmatpush2.bf16.msra.mxu1 %v18127_v2  ;;  %v18034_v7 = vcombine.high %v8613_v47, %v8621_v45  ;;  %v8341_v11 = vld [vmem:[%s22386_s24 + $0x110] sm:$0xff]  ;;  %v18033_v6 = vcombine.low %v8613_v47, %v8621_v45 }
 0xb2e   : > { %11579 = vmatprep.subr.bf16.mxu0 %v17856_v15  ;;  %11622 = vmatprep.subr.bf16.mxu1 %v18112_v10  ;;  %v8349_v2 = vld [vmem:[%s22386_s24 + $0x150] sm:$0xff] }
 0xb2f   : > { %v8597_v15 = vld [vmem:[%s22386_s24 + $0x910] sm:$0xff]  ;;  %v17762_v54 = vcombine.high %v8341_v11, %v8349_v2  ;;  %v17761_v51 = vcombine.low %v8341_v11, %v8349_v2 }
 0xb30   : > { %v8605_v10 = vld [vmem:[%s22386_s24 + $0x950] sm:$0xff] }
 0xb31   : > { %11580 = vmatpush2.bf16.msra.mxu0 %v17855_v16  ;;  %11623 = vmatpush2.bf16.msra.mxu1 %v18111_v39  ;;  %v18018_v19 = vcombine.high %v8597_v15, %v8605_v10  ;;  %v8325_v16 = vld [vmem:[%s22386_s24 + $0x90] sm:$0xff]  ;;  %v18017_v63 = vcombine.low %v8597_v15, %v8605_v10 }
 0xb32   : > { %11635 = vmatprep.subr.bf16.mxu0 %v17842_v48  ;;  %11678 = vmatprep.subr.bf16.mxu1 %v18098_v28  ;;  %v8333_v39 = vld [vmem:[%s22386_s24 + $0xd0] sm:$0xff] }
 0xb33   : > { %v8581_v48 = vld [vmem:[%s22386_s24 + $0x890] sm:$0xff]  ;;  %v17746_v35 = vcombine.high %v8325_v16, %v8333_v39  ;;  %v17745_v9 = vcombine.low %v8325_v16, %v8333_v39 }
 0xb34   : > { %11582 = vmatmul.mubr.bf16.vlgmr.msra.gmra.mxu0 %v23729_v5  ;;  %11625 = vmatmul.mubr.bf16.vlgmr.msra.gmra.mxu1 %v23733_v56  ;;  %v8589_v28 = vld [vmem:[%s22386_s24 + $0x8d0] sm:$0xff] }
 0xb35   : > { %11636 = vmatpush1.bf16.msra.mxu0 %v17841_v41  ;;  %11667 = vmatprep.mubr.bf16.mxu0 %v23721_v46  ;;  %v18002_v59 = vcombine.high %v8581_v48, %v8589_v28  ;;  %v8309_v41 = vld [vmem:[%s22386_s24 + $0x10] sm:$0xff]  ;;  %v18001_v62 = vcombine.low %v8581_v48, %v8589_v28 }
 0xb36   : > { %11679 = vmatpush1.bf16.msra.mxu1 %v18097_v61  ;;  %11710 = vmatprep.mubr.bf16.mxu1 %v23725_v13  ;;  %v8317_v61 = vld [vmem:[%s22386_s24 + $0x50] sm:$0xff] }
 0xb37   : > { %11637 = vmatprep.subr.bf16.mxu0 %v17826_v29  ;;  %11680 = vmatprep.subr.bf16.mxu1 %v18082_v49  ;;  %v8565_v29 = vld [vmem:[%s22386_s24 + $0x810] sm:$0xff]  ;;  %v17730_v8 = vcombine.high %v8309_v41, %v8317_v61  ;;  %v17729_v30 = vcombine.low %v8309_v41, %v8317_v61 }
 0xb38   : > { %v8573_v49 = vld [vmem:[%s22386_s24 + $0x850] sm:$0xff] }
 0xb39   : > { %11638 = vmatpush1.bf16.msra.mxu0 %v17825_v12  ;;  %v17986_v25 = vcombine.high %v8565_v29, %v8573_v49  ;;  %v8549_v12 = vld [vmem:[%s22386_s24 + $0x790] sm:$0xff]  ;;  %v17985_v14 = vcombine.low %v8565_v29, %v8573_v49 }
 0xb3a   : > { %11681 = vmatpush1.bf16.msra.mxu1 %v18081_v36  ;;  %11639 = vmatprep.subr.bf16.mxu0 %v17810_v17  ;;  %v8557_v36 = vld [vmem:[%s22386_s24 + $0x7d0] sm:$0xff] }
 0xb3b   : > { %11682 = vmatprep.subr.bf16.mxu1 %v18066_v20  ;;  %v8805_v17 = vld [vmem:[%s22386_s24 + $0xf90] sm:$0xff]  ;;  %v17970_v31 = vcombine.high %v8549_v12, %v8557_v36  ;;  %v17969_v34 = vcombine.low %v8549_v12, %v8557_v36 }
 0xb3c   : > { %v8813_v20 = vld [vmem:[%s22386_s24 + $0xfd0] sm:$0xff] }
 0xb3d   : > { %11640 = vmatpush1.bf16.msra.mxu0 %v17809_v40  ;;  %v18226_v38 = vcombine.high %v8805_v17, %v8813_v20  ;;  %v8533_v40 = vld [vmem:[%s22386_s24 + $0x710] sm:$0xff]  ;;  %v18225_v43 = vcombine.low %v8805_v17, %v8813_v20 }
 0xb3e   : > { %11683 = vmatpush1.bf16.msra.mxu1 %v18065_v26  ;;  %11641 = vmatprep.subr.bf16.mxu0 %v17794_v0  ;;  %v8541_v26 = vld [vmem:[%s22386_s24 + $0x750] sm:$0xff] }
 0xb3f   : > { %11684 = vmatprep.subr.bf16.mxu1 %v18050_v60  ;;  %v8789_v0 = vld [vmem:[%s22386_s24 + $0xf10] sm:$0xff]  ;;  %v17954_v47 = vcombine.high %v8533_v40, %v8541_v26  ;;  %v17953_v11 = vcombine.low %v8533_v40, %v8541_v26 }
 0xb40   : > { %v8797_v60 = vld [vmem:[%s22386_s24 + $0xf50] sm:$0xff] }
 0xb41   : > { %11642 = vmatpush1.bf16.msra.mxu0 %v17793_v52  ;;  %v18210_v45 = vcombine.high %v8789_v0, %v8797_v60  ;;  %v8517_v52 = vld [vmem:[%s22386_s24 + $0x690] sm:$0xff]  ;;  %v18209_v2 = vcombine.low %v8789_v0, %v8797_v60 }
 0xb42   : > { %11685 = vmatpush1.bf16.msra.mxu1 %v18049_v50  ;;  %11643 = vmatprep.subr.bf16.mxu0 %v17778_v32  ;;  %v8525_v50 = vld [vmem:[%s22386_s24 + $0x6d0] sm:$0xff] }
 0xb43   : > { %11686 = vmatprep.subr.bf16.mxu1 %v18034_v7  ;;  %v8773_v32 = vld [vmem:[%s22386_s24 + $0xe90] sm:$0xff]  ;;  %v17938_v15 = vcombine.high %v8517_v52, %v8525_v50  ;;  %v17937_v16 = vcombine.low %v8517_v52, %v8525_v50 }
 0xb44   : > { %v8781_v7 = vld [vmem:[%s22386_s24 + $0xed0] sm:$0xff] }
 0xb45   : > { %11644 = vmatpush1.bf16.msra.mxu0 %v17777_v27  ;;  %v18194_v10 = vcombine.high %v8773_v32, %v8781_v7  ;;  %v8501_v27 = vld [vmem:[%s22386_s24 + $0x610] sm:$0xff]  ;;  %v18193_v39 = vcombine.low %v8773_v32, %v8781_v7 }
 0xb46   : > { %11687 = vmatpush1.bf16.msra.mxu1 %v18033_v6  ;;  %11645 = vmatprep.subr.bf16.mxu0 %v17762_v54  ;;  %v8509_v6 = vld [vmem:[%s22386_s24 + $0x650] sm:$0xff] }
 0xb47   : > { %11688 = vmatprep.subr.bf16.mxu1 %v18018_v19  ;;  %v8757_v54 = vld [vmem:[%s22386_s24 + $0xe10] sm:$0xff]  ;;  %v17922_v48 = vcombine.high %v8501_v27, %v8509_v6  ;;  %v17921_v41 = vcombine.low %v8501_v27, %v8509_v6 }
 0xb48   : > { %v8765_v19 = vld [vmem:[%s22386_s24 + $0xe50] sm:$0xff] }
 0xb49   : > { %11646 = vmatpush1.bf16.msra.mxu0 %v17761_v51  ;;  %v18178_v28 = vcombine.high %v8757_v54, %v8765_v19  ;;  %v8485_v51 = vld [vmem:[%s22386_s24 + $0x590] sm:$0xff]  ;;  %v18177_v61 = vcombine.low %v8757_v54, %v8765_v19 }
 0xb4a   : > { %11689 = vmatpush1.bf16.msra.mxu1 %v18017_v63  ;;  %11647 = vmatprep.subr.bf16.mxu0 %v17746_v35  ;;  %v8493_v63 = vld [vmem:[%s22386_s24 + $0x5d0] sm:$0xff] }
 0xb4b   : > { %11690 = vmatprep.subr.bf16.mxu1 %v18002_v59  ;;  %v8741_v35 = vld [vmem:[%s22386_s24 + $0xd90] sm:$0xff]  ;;  %v17906_v29 = vcombine.high %v8485_v51, %v8493_v63  ;;  %v17905_v12 = vcombine.low %v8485_v51, %v8493_v63  ;;  %v8670_v51 = vld [vmem:[%s22386_s24 + $0xb58] sm:$0xff] }
 0xb4c   : > { %v8749_v59 = vld [vmem:[%s22386_s24 + $0xdd0] sm:$0xff] }
 0xb4d   : > { %11648 = vmatpush1.bf16.msra.mxu0 %v17745_v9  ;;  %v18162_v49 = vcombine.high %v8741_v35, %v8749_v59  ;;  %v8469_v9 = vld [vmem:[%s22386_s24 + $0x510] sm:$0xff]  ;;  %v18161_v36 = vcombine.low %v8741_v35, %v8749_v59  ;;  %v8390_v59 = vld [vmem:[%s22386_s24 + $0x298] sm:$0xff] }
 0xb4e   : > { %11691 = vmatpush1.bf16.msra.mxu1 %v18001_v62  ;;  %11649 = vmatprep.subr.bf16.mxu0 %v17730_v8  ;;  %v8477_v62 = vld [vmem:[%s22386_s24 + $0x550] sm:$0xff] }
 0xb4f   : > { %11692 = vmatprep.subr.bf16.mxu1 %v17986_v25  ;;  %v8725_v8 = vld [vmem:[%s22386_s24 + $0xd10] sm:$0xff]  ;;  %v17890_v17 = vcombine.high %v8469_v9, %v8477_v62  ;;  %v17889_v40 = vcombine.low %v8469_v9, %v8477_v62 }
 0xb50   : > { %v8733_v25 = vld [vmem:[%s22386_s24 + $0xd50] sm:$0xff] }
 0xb51   : > { %11650 = vmatpush1.bf16.msra.mxu0 %v17729_v30  ;;  %v18146_v20 = vcombine.high %v8725_v8, %v8733_v25  ;;  %v8453_v30 = vld [vmem:[%s22386_s24 + $0x490] sm:$0xff]  ;;  %v18145_v26 = vcombine.low %v8725_v8, %v8733_v25 }
 0xb52   : > { %11693 = vmatpush1.bf16.msra.mxu1 %v17985_v14  ;;  %11651 = vmatprep.subr.bf16.mxu0 %v17970_v31  ;;  %v8461_v14 = vld [vmem:[%s22386_s24 + $0x4d0] sm:$0xff] }
 0xb53   : > { %11694 = vmatprep.subr.bf16.mxu1 %v18226_v38  ;;  %v8709_v31 = vld [vmem:[%s22386_s24 + $0xc90] sm:$0xff]  ;;  %v17874_v0 = vcombine.high %v8453_v30, %v8461_v14  ;;  %v17873_v52 = vcombine.low %v8453_v30, %v8461_v14 }
 0xb54   : > { %v8717_v38 = vld [vmem:[%s22386_s24 + $0xcd0] sm:$0xff] }
 0xb55   : > { %11652 = vmatpush2.bf16.msra.mxu0 %v17969_v34  ;;  %v18130_v60 = vcombine.high %v8709_v31, %v8717_v38  ;;  %v8437_v34 = vld [vmem:[%s22386_s24 + $0x410] sm:$0xff]  ;;  %v18129_v50 = vcombine.low %v8709_v31, %v8717_v38 }
 0xb56   : > { %11695 = vmatpush2.bf16.msra.mxu1 %v18225_v43  ;;  %11653 = vmatprep.subr.bf16.mxu0 %v17954_v47  ;;  %v8445_v43 = vld [vmem:[%s22386_s24 + $0x450] sm:$0xff] }
 0xb57   : > { %11696 = vmatprep.subr.bf16.mxu1 %v18210_v45  ;;  %v8693_v47 = vld [vmem:[%s22386_s24 + $0xc10] sm:$0xff]  ;;  %v17858_v32 = vcombine.high %v8437_v34, %v8445_v43  ;;  %v17857_v27 = vcombine.low %v8437_v34, %v8445_v43 }
 0xb58   : > { %v8701_v45 = vld [vmem:[%s22386_s24 + $0xc50] sm:$0xff] }
 0xb59   : > { %11654 = vmatpush2.bf16.msra.mxu0 %v17953_v11  ;;  %v18114_v7 = vcombine.high %v8693_v47, %v8701_v45  ;;  %v8422_v11 = vld [vmem:[%s22386_s24 + $0x398] sm:$0xff]  ;;  %v18113_v6 = vcombine.low %v8693_v47, %v8701_v45 }
 0xb5a   : > { %11697 = vmatpush2.bf16.msra.mxu1 %v18209_v2  ;;  %11655 = vmatprep.subr.bf16.mxu0 %v17938_v15  ;;  %v8430_v2 = vld [vmem:[%s22386_s24 + $0x3d8] sm:$0xff] }
 0xb5b   : > { %11698 = vmatprep.subr.bf16.mxu1 %v18194_v10  ;;  %v8678_v15 = vld [vmem:[%s22386_s24 + $0xb98] sm:$0xff]  ;;  %v17844_v54 = vcombine.high %v8422_v11, %v8430_v2 }
 0xb5c   : > { %v8686_v10 = vld [vmem:[%s22386_s24 + $0xbd8] sm:$0xff] }
 0xb5d   : > { %11656 = vmatpush2.bf16.msra.mxu0 %v17937_v16  ;;  %v18100_v19 = vcombine.high %v8678_v15, %v8686_v10  ;;  %v8406_v16 = vld [vmem:[%s22386_s24 + $0x318] sm:$0xff]  ;;  %v18099_v63 = vcombine.low %v8678_v15, %v8686_v10 }
 0xb5e   : > { %11699 = vmatpush2.bf16.msra.mxu1 %v18193_v39  ;;  %11657 = vmatprep.subr.bf16.mxu0 %v17922_v48  ;;  %v8414_v39 = vld [vmem:[%s22386_s24 + $0x358] sm:$0xff]  ;;  %v17843_v48 = vcombine.low %v8422_v11, %v8430_v2 }
 0xb5f   : > { %11700 = vmatprep.subr.bf16.mxu1 %v18178_v28  ;;  %v8662_v28 = vld [vmem:[%s22386_s24 + $0xb18] sm:$0xff]  ;;  %v17828_v35 = vcombine.high %v8406_v16, %v8414_v39  ;;  %v17827_v9 = vcombine.low %v8406_v16, %v8414_v39 }
 0xb60   : > { %v18083_v62 = vcombine.low %v8662_v28, %v8670_v51 }
 0xb61   : > { %11658 = vmatpush2.bf16.msra.mxu0 %v17921_v41  ;;  %v8398_v41 = vld [vmem:[%s22386_s24 + $0x2d8] sm:$0xff] }
 0xb62   : > { %11701 = vmatpush2.bf16.msra.mxu1 %v18177_v61  ;;  %11659 = vmatprep.subr.bf16.mxu0 %v17906_v29  ;;  %v18084_v61 = vcombine.high %v8662_v28, %v8670_v51  ;;  %v8646_v29 = vld [vmem:[%s22386_s24 + $0xa98] sm:$0xff]  ;;  %v17812_v8 = vcombine.high %v8390_v59, %v8398_v41  ;;  %v17811_v30 = vcombine.low %v8390_v59, %v8398_v41 }
 0xb63   : > { %11702 = vmatprep.subr.bf16.mxu1 %v18162_v49  ;;  %v8654_v49 = vld [vmem:[%s22386_s24 + $0xad8] sm:$0xff] }
 0xb64   : > { %v18068_v25 = vcombine.high %v8646_v29, %v8654_v49  ;;  %v18067_v14 = vcombine.low %v8646_v29, %v8654_v49  ;;  %v8310_v51 = vld [vmem:[%s22386_s24 + $0x18] sm:$0xff] }
 0xb65   : > { %11660 = vmatpush2.bf16.msra.mxu0 %v17905_v12  ;;  %v8374_v12 = vld [vmem:[%s22386_s24 + $0x218] sm:$0xff] }
 0xb66   : > { %11703 = vmatpush2.bf16.msra.mxu1 %v18161_v36  ;;  %11661 = vmatprep.subr.bf16.mxu0 %v17890_v17  ;;  %v8382_v36 = vld [vmem:[%s22386_s24 + $0x258] sm:$0xff] }
 0xb67   : > { %11704 = vmatprep.subr.bf16.mxu1 %v18146_v20  ;;  %v8630_v17 = vld [vmem:[%s22386_s24 + $0xa18] sm:$0xff]  ;;  %v17796_v31 = vcombine.high %v8374_v12, %v8382_v36  ;;  %v17795_v34 = vcombine.low %v8374_v12, %v8382_v36 }
 0xb68   : > { %v8638_v20 = vld [vmem:[%s22386_s24 + $0xa58] sm:$0xff] }
 0xb69   : > { %11662 = vmatpush2.bf16.msra.mxu0 %v17889_v40  ;;  %v18052_v38 = vcombine.high %v8630_v17, %v8638_v20  ;;  %v8358_v40 = vld [vmem:[%s22386_s24 + $0x198] sm:$0xff]  ;;  %v18051_v43 = vcombine.low %v8630_v17, %v8638_v20 }
 0xb6a   : > { %11705 = vmatpush2.bf16.msra.mxu1 %v18145_v26  ;;  %11663 = vmatprep.subr.bf16.mxu0 %v17874_v0  ;;  %v8366_v26 = vld [vmem:[%s22386_s24 + $0x1d8] sm:$0xff] }
 0xb6b   : > { %11706 = vmatprep.subr.bf16.mxu1 %v18130_v60  ;;  %v8614_v0 = vld [vmem:[%s22386_s24 + $0x998] sm:$0xff]  ;;  %v17780_v47 = vcombine.high %v8358_v40, %v8366_v26  ;;  %v17779_v11 = vcombine.low %v8358_v40, %v8366_v26 }
 0xb6c   : > { %v8622_v60 = vld [vmem:[%s22386_s24 + $0x9d8] sm:$0xff] }
 0xb6d   : > { %11664 = vmatpush2.bf16.msra.mxu0 %v17873_v52  ;;  %v18036_v45 = vcombine.high %v8614_v0, %v8622_v60  ;;  %v8342_v52 = vld [vmem:[%s22386_s24 + $0x118] sm:$0xff]  ;;  %v18035_v2 = vcombine.low %v8614_v0, %v8622_v60 }
 0xb6e   : > { %11707 = vmatpush2.bf16.msra.mxu1 %v18129_v50  ;;  %11665 = vmatprep.subr.bf16.mxu0 %v17858_v32  ;;  %v8350_v50 = vld [vmem:[%s22386_s24 + $0x158] sm:$0xff] }
 0xb6f   : > { %11708 = vmatprep.subr.bf16.mxu1 %v18114_v7  ;;  %v8598_v32 = vld [vmem:[%s22386_s24 + $0x918] sm:$0xff]  ;;  %v17764_v15 = vcombine.high %v8342_v52, %v8350_v50  ;;  %v17763_v16 = vcombine.low %v8342_v52, %v8350_v50 }
 0xb70   : > { %v8606_v7 = vld [vmem:[%s22386_s24 + $0x958] sm:$0xff] }
 0xb71   : > { %11666 = vmatpush2.bf16.msra.mxu0 %v17857_v27  ;;  %v18020_v10 = vcombine.high %v8598_v32, %v8606_v7  ;;  %v8326_v27 = vld [vmem:[%s22386_s24 + $0x98] sm:$0xff]  ;;  %v18019_v39 = vcombine.low %v8598_v32, %v8606_v7 }
 0xb72   : > { %11709 = vmatpush2.bf16.msra.mxu1 %v18113_v6  ;;  %11721 = vmatprep.subr.bf16.mxu0 %v17844_v54  ;;  %v8334_v6 = vld [vmem:[%s22386_s24 + $0xd8] sm:$0xff] }
 0xb73   : > { %11764 = vmatprep.subr.bf16.mxu1 %v18100_v19  ;;  %v8582_v54 = vld [vmem:[%s22386_s24 + $0x898] sm:$0xff]  ;;  %v17747_v41 = vcombine.low %v8326_v27, %v8334_v6 }
 0xb74   : > { %11668 = vmatmul.mubr.bf16.vlgmr.msra.gmra.mxu0 %v23729_v5  ;;  %v8590_v19 = vld [vmem:[%s22386_s24 + $0x8d8] sm:$0xff] }
 0xb75   : > { %11711 = vmatmul.mubr.bf16.vlgmr.msra.gmra.mxu1 %v23733_v56  ;;  %11722 = vmatpush1.bf16.msra.mxu0 %v17843_v48  ;;  %v17748_v48 = vcombine.high %v8326_v27, %v8334_v6  ;;  %v18004_v28 = vcombine.high %v8582_v54, %v8590_v19  ;;  %v8574_v59 = vld [vmem:[%s22386_s24 + $0x858] sm:$0xff] }
 0xb76   : > { %11753 = vmatprep.mubr.bf16.mxu0 %v23721_v46  ;;  %11765 = vmatpush1.bf16.msra.mxu1 %v18099_v63  ;;  %v8318_v63 = vld [vmem:[%s22386_s24 + $0x58] sm:$0xff] }
 0xb77   : > { %11796 = vmatprep.mubr.bf16.mxu1 %v23725_v13  ;;  %11723 = vmatprep.subr.bf16.mxu0 %v17828_v35  ;;  %v8566_v35 = vld [vmem:[%s22386_s24 + $0x818] sm:$0xff]  ;;  %v17732_v29 = vcombine.high %v8310_v51, %v8318_v63  ;;  %v17731_v12 = vcombine.low %v8310_v51, %v8318_v63 }
 0xb78   : > { %11766 = vmatprep.subr.bf16.mxu1 %v18084_v61  ;;  %v18003_v61 = vcombine.low %v8582_v54, %v8590_v19  ;;  %v17988_v49 = vcombine.high %v8566_v35, %v8574_v59  ;;  %v17987_v36 = vcombine.low %v8566_v35, %v8574_v59 }
 0xb79   : > { %11724 = vmatpush1.bf16.msra.mxu0 %v17827_v9  ;;  %v8550_v9 = vld [vmem:[%s22386_s24 + $0x798] sm:$0xff] }
 0xb7a   : > { %11767 = vmatpush1.bf16.msra.mxu1 %v18083_v62  ;;  %11725 = vmatprep.subr.bf16.mxu0 %v17812_v8  ;;  %v8558_v62 = vld [vmem:[%s22386_s24 + $0x7d8] sm:$0xff] }
 0xb7b   : > { %11768 = vmatprep.subr.bf16.mxu1 %v18068_v25  ;;  %v8806_v8 = vld [vmem:[%s22386_s24 + $0xf98] sm:$0xff]  ;;  %v17972_v17 = vcombine.high %v8550_v9, %v8558_v62  ;;  %v17971_v40 = vcombine.low %v8550_v9, %v8558_v62 }
 0xb7c   : > { %v8814_v25 = vld [vmem:[%s22386_s24 + $0xfd8] sm:$0xff] }
 0xb7d   : > { %11726 = vmatpush1.bf16.msra.mxu0 %v17811_v30  ;;  %v18228_v20 = vcombine.high %v8806_v8, %v8814_v25  ;;  %v8534_v30 = vld [vmem:[%s22386_s24 + $0x718] sm:$0xff]  ;;  %v18227_v26 = vcombine.low %v8806_v8, %v8814_v25 }
 0xb7e   : > { %11769 = vmatpush1.bf16.msra.mxu1 %v18067_v14  ;;  %11727 = vmatprep.subr.bf16.mxu0 %v17796_v31  ;;  %v8542_v14 = vld [vmem:[%s22386_s24 + $0x758] sm:$0xff] }
 0xb7f   : > { %11770 = vmatprep.subr.bf16.mxu1 %v18052_v38  ;;  %v8790_v31 = vld [vmem:[%s22386_s24 + $0xf18] sm:$0xff]  ;;  %v17956_v0 = vcombine.high %v8534_v30, %v8542_v14  ;;  %v17955_v52 = vcombine.low %v8534_v30, %v8542_v14 }
 0xb80   : > { %v8798_v38 = vld [vmem:[%s22386_s24 + $0xf58] sm:$0xff] }
 0xb81   : > { %11728 = vmatpush1.bf16.msra.mxu0 %v17795_v34  ;;  %v18212_v60 = vcombine.high %v8790_v31, %v8798_v38  ;;  %v8518_v34 = vld [vmem:[%s22386_s24 + $0x698] sm:$0xff]  ;;  %v18211_v50 = vcombine.low %v8790_v31, %v8798_v38 }
 0xb82   : > { %11771 = vmatpush1.bf16.msra.mxu1 %v18051_v43  ;;  %11729 = vmatprep.subr.bf16.mxu0 %v17780_v47  ;;  %v8526_v43 = vld [vmem:[%s22386_s24 + $0x6d8] sm:$0xff] }
 0xb83   : > { %11772 = vmatprep.subr.bf16.mxu1 %v18036_v45  ;;  %v8774_v47 = vld [vmem:[%s22386_s24 + $0xe98] sm:$0xff]  ;;  %v17940_v32 = vcombine.high %v8518_v34, %v8526_v43  ;;  %v17939_v27 = vcombine.low %v8518_v34, %v8526_v43 }
 0xb84   : > { %v8782_v45 = vld [vmem:[%s22386_s24 + $0xed8] sm:$0xff] }
 0xb85   : > { %11730 = vmatpush1.bf16.msra.mxu0 %v17779_v11  ;;  %v18196_v7 = vcombine.high %v8774_v47, %v8782_v45  ;;  %v8502_v11 = vld [vmem:[%s22386_s24 + $0x618] sm:$0xff]  ;;  %v18195_v6 = vcombine.low %v8774_v47, %v8782_v45 }
 0xb86   : > { %11773 = vmatpush1.bf16.msra.mxu1 %v18035_v2  ;;  %11731 = vmatprep.subr.bf16.mxu0 %v17764_v15  ;;  %v8510_v2 = vld [vmem:[%s22386_s24 + $0x658] sm:$0xff] }
 0xb87   : > { %11774 = vmatprep.subr.bf16.mxu1 %v18020_v10  ;;  %v8758_v15 = vld [vmem:[%s22386_s24 + $0xe18] sm:$0xff]  ;;  %v17924_v54 = vcombine.high %v8502_v11, %v8510_v2  ;;  %v17923_v51 = vcombine.low %v8502_v11, %v8510_v2 }
 0xb88   : > { %v8766_v10 = vld [vmem:[%s22386_s24 + $0xe58] sm:$0xff] }
 0xb89   : > { %11732 = vmatpush1.bf16.msra.mxu0 %v17763_v16  ;;  %v18180_v19 = vcombine.high %v8758_v15, %v8766_v10  ;;  %v8486_v16 = vld [vmem:[%s22386_s24 + $0x598] sm:$0xff]  ;;  %v18179_v63 = vcombine.low %v8758_v15, %v8766_v10  ;;  %v23944_v10 = vld [vmem:[%s22388_s28] sm:$0xff] }
 0xb8a   : > { %11775 = vmatpush1.bf16.msra.mxu1 %v18019_v39  ;;  %11733 = vmatprep.subr.bf16.mxu0 %v17748_v48  ;;  %v8494_v39 = vld [vmem:[%s22386_s24 + $0x5d8] sm:$0xff] }
 0xb8b   : > { %11776 = vmatprep.subr.bf16.mxu1 %v18004_v28  ;;  %v8742_v48 = vld [vmem:[%s22386_s24 + $0xd98] sm:$0xff]  ;;  %v17908_v35 = vcombine.high %v8486_v16, %v8494_v39  ;;  %v17907_v9 = vcombine.low %v8486_v16, %v8494_v39  ;;  %v8826_v16 = vrot.slane %v23944_v10, %v22860_v1  ;;  %v8663_v39 = vld [vmem:[%s22386_s24 + $0xb20] sm:$0xff] }
 0xb8c   : > { %v8750_v28 = vld [vmem:[%s22386_s24 + $0xdd8] sm:$0xff] }
 0xb8d   : > { %11734 = vmatpush1.bf16.msra.mxu0 %v17747_v41  ;;  %v18164_v59 = vcombine.high %v8742_v48, %v8750_v28  ;;  %v8470_v41 = vld [vmem:[%s22386_s24 + $0x518] sm:$0xff]  ;;  %v18163_v62 = vcombine.low %v8742_v48, %v8750_v28  ;;  %v8671_v48 = vld [vmem:[%s22386_s24 + $0xb60] sm:$0xff] }
 0xb8e   : > { %11777 = vmatpush1.bf16.msra.mxu1 %v18003_v61  ;;  %11735 = vmatprep.subr.bf16.mxu0 %v17732_v29  ;;  %v8478_v61 = vld [vmem:[%s22386_s24 + $0x558] sm:$0xff] }
 0xb8f   : > { %11778 = vmatprep.subr.bf16.mxu1 %v17988_v49  ;;  %v8726_v29 = vld [vmem:[%s22386_s24 + $0xd18] sm:$0xff]  ;;  %v17892_v8 = vcombine.high %v8470_v41, %v8478_v61  ;;  %v17891_v30 = vcombine.low %v8470_v41, %v8478_v61  ;;  %v18086_v61 = vcombine.high %v8663_v39, %v8671_v48 }
 0xb90   : > { %v8734_v49 = vld [vmem:[%s22386_s24 + $0xd58] sm:$0xff] }
 0xb91   : > { %11736 = vmatpush1.bf16.msra.mxu0 %v17731_v12  ;;  %v18148_v25 = vcombine.high %v8726_v29, %v8734_v49  ;;  %v8454_v12 = vld [vmem:[%s22386_s24 + $0x498] sm:$0xff]  ;;  %v18147_v14 = vcombine.low %v8726_v29, %v8734_v49  ;;  %v8647_v29 = vld [vmem:[%s22386_s24 + $0xaa0] sm:$0xff] }
 0xb92   : > { %11779 = vmatpush1.bf16.msra.mxu1 %v17987_v36  ;;  %11737 = vmatprep.subr.bf16.mxu0 %v17972_v17  ;;  %v8462_v36 = vld [vmem:[%s22386_s24 + $0x4d8] sm:$0xff]  ;;  %v8655_v49 = vld [vmem:[%s22386_s24 + $0xae0] sm:$0xff] }
 0xb93   : > { %11780 = vmatprep.subr.bf16.mxu1 %v18228_v20  ;;  %v8710_v17 = vld [vmem:[%s22386_s24 + $0xc98] sm:$0xff]  ;;  %v17876_v31 = vcombine.high %v8454_v12, %v8462_v36  ;;  %v17875_v34 = vcombine.low %v8454_v12, %v8462_v36  ;;  %v18085_v12 = vcombine.low %v8663_v39, %v8671_v48  ;;  %v8351_v39 = vld [vmem:[%s22386_s24 + $0x160] sm:$0xff] }
 0xb94   : > { %v8718_v20 = vld [vmem:[%s22386_s24 + $0xcd8] sm:$0xff]  ;;  %v8599_v48 = vld [vmem:[%s22386_s24 + $0x920] sm:$0xff] }
 0xb95   : > { %11738 = vmatpush2.bf16.msra.mxu0 %v17971_v40  ;;  %v18132_v38 = vcombine.high %v8710_v17, %v8718_v20  ;;  %v8438_v40 = vld [vmem:[%s22386_s24 + $0x418] sm:$0xff]  ;;  %v18131_v43 = vcombine.low %v8710_v17, %v8718_v20  ;;  %v18070_v20 = vcombine.high %v8647_v29, %v8655_v49 }
 0xb96   : > { %11781 = vmatpush2.bf16.msra.mxu1 %v18227_v26  ;;  %11739 = vmatprep.subr.bf16.mxu0 %v17956_v0  ;;  %v8446_v26 = vld [vmem:[%s22386_s24 + $0x458] sm:$0xff] }
 0xb97   : > { %11782 = vmatprep.subr.bf16.mxu1 %v18212_v60  ;;  %v8694_v0 = vld [vmem:[%s22386_s24 + $0xc18] sm:$0xff]  ;;  %v17860_v47 = vcombine.high %v8438_v40, %v8446_v26  ;;  %v17859_v11 = vcombine.low %v8438_v40, %v8446_v26  ;;  %v8639_v40 = vld [vmem:[%s22386_s24 + $0xa60] sm:$0xff] }
 0xb98   : > { %v8702_v60 = vld [vmem:[%s22386_s24 + $0xc58] sm:$0xff] }
 0xb99   : > { %11740 = vmatpush2.bf16.msra.mxu0 %v17955_v52  ;;  %v18116_v45 = vcombine.high %v8694_v0, %v8702_v60  ;;  %v8423_v52 = vld [vmem:[%s22386_s24 + $0x3a0] sm:$0xff]  ;;  %v18115_v2 = vcombine.low %v8694_v0, %v8702_v60 }
 0xb9a   : > { %11783 = vmatpush2.bf16.msra.mxu1 %v18211_v50  ;;  %11741 = vmatprep.subr.bf16.mxu0 %v17940_v32  ;;  %v8431_v50 = vld [vmem:[%s22386_s24 + $0x3e0] sm:$0xff] }
 0xb9b   : > { %11784 = vmatprep.subr.bf16.mxu1 %v18196_v7  ;;  %v8679_v32 = vld [vmem:[%s22386_s24 + $0xba0] sm:$0xff]  ;;  %v17846_v15 = vcombine.high %v8423_v52, %v8431_v50 }
 0xb9c   : > { %v8687_v7 = vld [vmem:[%s22386_s24 + $0xbe0] sm:$0xff] }
 0xb9d   : > { %11742 = vmatpush2.bf16.msra.mxu0 %v17939_v27  ;;  %v18102_v27 = vcombine.high %v8679_v32, %v8687_v7  ;;  %v18101_v28 = vcombine.low %v8679_v32, %v8687_v7  ;;  %v8615_v32 = vld [vmem:[%s22386_s24 + $0x9a0] sm:$0xff] }
 0xb9e   : > { %11785 = vmatpush2.bf16.msra.mxu1 %v18195_v6  ;;  %11743 = vmatprep.subr.bf16.mxu0 %v17924_v54  ;;  %v8407_v6 = vld [vmem:[%s22386_s24 + $0x320] sm:$0xff] }
 0xb9f   : > { %11786 = vmatprep.subr.bf16.mxu1 %v18180_v19  ;;  %v8415_v54 = vld [vmem:[%s22386_s24 + $0x360] sm:$0xff]  ;;  %v17845_v19 = vcombine.low %v8423_v52, %v8431_v50 }
 0xba0   : > { %v8359_v52 = vld [vmem:[%s22386_s24 + $0x1a0] sm:$0xff] }
 0xba1   : > { %11744 = vmatpush2.bf16.msra.mxu0 %v17923_v51  ;;  %v17830_v51 = vcombine.high %v8407_v6, %v8415_v54  ;;  %v8367_v50 = vld [vmem:[%s22386_s24 + $0x1e0] sm:$0xff] }
 0xba2   : > { %11787 = vmatpush2.bf16.msra.mxu1 %v18179_v63  ;;  %11745 = vmatprep.subr.bf16.mxu0 %v17908_v35  ;;  %v8391_v63 = vld [vmem:[%s22386_s24 + $0x2a0] sm:$0xff] }
 0xba3   : > { %11788 = vmatprep.subr.bf16.mxu1 %v18164_v59  ;;  %v8399_v35 = vld [vmem:[%s22386_s24 + $0x2e0] sm:$0xff] }
 0xba4   : > { %v17814_v36 = vcombine.high %v8391_v63, %v8399_v35  ;;  %v17813_v0 = vcombine.low %v8391_v63, %v8399_v35  ;;  %v8623_v7 = vld [vmem:[%s22386_s24 + $0x9e0] sm:$0xff] }
 0xba5   : > { %11746 = vmatpush2.bf16.msra.mxu0 %v17907_v9  ;;  %v18037_v63 = vcombine.low %v8615_v32, %v8623_v7 }
 0xba6   : > { %11789 = vmatpush2.bf16.msra.mxu1 %v18163_v62  ;;  %11747 = vmatprep.subr.bf16.mxu0 %v17892_v8  ;;  %v17829_v62 = vcombine.low %v8407_v6, %v8415_v54  ;;  %v17782_v6 = vcombine.high %v8359_v52, %v8367_v50 }
 0xba7   : > { %11790 = vmatprep.subr.bf16.mxu1 %v18148_v25 }
 0xba9   : > { %11748 = vmatpush2.bf16.msra.mxu0 %v17891_v30  ;;  %v8375_v30 = vld [vmem:[%s22386_s24 + $0x220] sm:$0xff] }
 0xbaa   : > { %11791 = vmatpush2.bf16.msra.mxu1 %v18147_v14  ;;  %11749 = vmatprep.subr.bf16.mxu0 %v17876_v31  ;;  %v8383_v14 = vld [vmem:[%s22386_s24 + $0x260] sm:$0xff] }
 0xbab   : > { %11792 = vmatprep.subr.bf16.mxu1 %v18132_v38  ;;  %v8631_v38 = vld [vmem:[%s22386_s24 + $0xa20] sm:$0xff] }
 0xbad   : > { %11750 = vmatpush2.bf16.msra.mxu0 %v17875_v34  ;;  %v18069_v34 = vcombine.low %v8647_v29, %v8655_v49  ;;  %v8583_v29 = vld [vmem:[%s22386_s24 + $0x8a0] sm:$0xff] }
 0xbae   : > { %11793 = vmatpush2.bf16.msra.mxu1 %v18131_v43  ;;  %11751 = vmatprep.subr.bf16.mxu0 %v17860_v47  ;;  %v17798_v43 = vcombine.high %v8375_v30, %v8383_v14  ;;  %v8591_v49 = vld [vmem:[%s22386_s24 + $0x8e0] sm:$0xff] }
 0xbaf   : > { %11794 = vmatprep.subr.bf16.mxu1 %v18116_v45  ;;  %v18054_v45 = vcombine.high %v8631_v38, %v8639_v40 }
 0xbb1   : > { %11752 = vmatpush2.bf16.msra.mxu0 %v17859_v11 }
 0xbb2   : > { %11795 = vmatpush2.bf16.msra.mxu1 %v18115_v2  ;;  %11807 = vmatprep.subr.bf16.mxu0 %v17846_v15  ;;  %v17797_v15 = vcombine.low %v8375_v30, %v8383_v14  ;;  %v8567_v30 = vld [vmem:[%s22386_s24 + $0x820] sm:$0xff] }
 0xbb3   : > { %11850 = vmatprep.subr.bf16.mxu1 %v18102_v27  ;;  %v18053_v27 = vcombine.low %v8631_v38, %v8639_v40  ;;  %v8575_v14 = vld [vmem:[%s22386_s24 + $0x860] sm:$0xff]  ;;  %v18005_v38 = vcombine.low %v8583_v29, %v8591_v49 }
 0xbb4   : > { %11754 = vmatmul.mubr.bf16.vlgmr.msra.gmra.mxu0 %v23729_v5  ;;  %v11497_v59 = vpop.f32.mrf.mxu0  ;;  %v11540_v41 = vpop.f32.mrf.mxu1 }
 0xbb5   : > { %11797 = vmatmul.mubr.bf16.vlgmr.msra.gmra.mxu1 %v23733_v56  ;;  %v11498_v9 = vadd.f32 %v11497_v59, %v8826_v16  ;;  %11808 = vmatpush1.bf16.msra.mxu0 %v17845_v19  ;;  %v18038_v19 = vcombine.high %v8615_v32, %v8623_v7  ;;  %v8535_v32 = vld [vmem:[%s22386_s24 + $0x720] sm:$0xff] }
 0xbb6   : > { %11839 = vmatprep.mubr.bf16.mxu0 %v23721_v46  ;;  %11851 = vmatpush1.bf16.msra.mxu1 %v18101_v28  ;;  %v23959_v8 = vpop.f32.mrf.mxu0  ;;  %v23961_v25 = vpop.f32.mrf.mxu1  ;;  %v8607_v28 = vld [vmem:[%s22386_s24 + $0x960] sm:$0xff] }
 0xbb7   : > { %v11541_v17 = vadd.f32 %v11540_v41, %v11498_v9  ;;  %11882 = vmatprep.mubr.bf16.mxu1 %v23725_v13  ;;  %11809 = vmatprep.subr.bf16.mxu0 %v17830_v51  ;;  %v17781_v51 = vcombine.low %v8359_v52, %v8367_v50  ;;  %v18022_v59 = vcombine.high %v8599_v48, %v8607_v28  ;;  %v8327_v41 = vld [vmem:[%s22386_s24 + $0xa0] sm:$0xff] }
 0xbb8   : > { %11852 = vmatprep.subr.bf16.mxu1 %v18086_v61  ;;  %v11501_v31 = vpop.f32.mrf.mxu0  ;;  %v11544_v60 = vpop.f32.mrf.mxu1  ;;  %v8335_v61 = vld [vmem:[%s22386_s24 + $0xe0] sm:$0xff] }
 0xbb9   : > { %v11502_v26 = vadd.f32 %v11501_v31, %v8826_v16  ;;  %11810 = vmatpush1.bf16.msra.mxu0 %v17829_v62  ;;  %v12151_v11 = vmax.f32 %v11541_v17, 0.0  ;;  %v8343_v16 = vld [vmem:[%s22386_s24 + $0x120] sm:$0xff]  ;;  %v18021_v62 = vcombine.low %v8599_v48, %v8607_v28  ;;  %v17749_v31 = vcombine.low %v8327_v41, %v8335_v61 }
 0xbba   : > { %11853 = vmatpush1.bf16.msra.mxu1 %v18085_v12  ;;  %11811 = vmatprep.subr.bf16.mxu0 %v17814_v36  ;;  %v17766_v35 = vcombine.high %v8343_v16, %v8351_v39  ;;  %v17765_v9 = vcombine.low %v8343_v16, %v8351_v39  ;;  %v17750_v12 = vcombine.high %v8327_v41, %v8335_v61  ;;  %v8311_v17 = vld [vmem:[%s22386_s24 + $0x20] sm:$0xff] }
 0xbbb   : > { %v11545_v47 = vadd.f32 %v11544_v60, %v11502_v26  ;;  %11854 = vmatprep.subr.bf16.mxu1 %v18070_v20  ;;  %v18006_v36 = vcombine.high %v8583_v29, %v8591_v49  ;;  %v8319_v20 = vld [vmem:[%s22386_s24 + $0x60] sm:$0xff]  ;;  %v17990_v26 = vcombine.high %v8567_v30, %v8575_v14 }
 0xbbc   : > { %v17734_v40 = vcombine.high %v8311_v17, %v8319_v20  ;;  %v8559_v60 = vld [vmem:[%s22386_s24 + $0x7e0] sm:$0xff] }
 0xbbd   : > { %v12167_v2 = vmax.f32 %v11545_v47, 0.0  ;;  %11812 = vmatpush1.bf16.msra.mxu0 %v17813_v0  ;;  %v8551_v0 = vld [vmem:[%s22386_s24 + $0x7a0] sm:$0xff]  ;;  %v17733_v47 = vcombine.low %v8311_v17, %v8319_v20 }
 0xbbe   : > { %11855 = vmatpush1.bf16.msra.mxu1 %v18069_v34  ;;  %11813 = vmatprep.subr.bf16.mxu0 %v17798_v43  ;;  %v8807_v34 = vld [vmem:[%s22386_s24 + $0xfa0] sm:$0xff]  ;;  %v17974_v52 = vcombine.high %v8551_v0, %v8559_v60 }
 0xbbf   : > { %v23972_v54 = vpack.c.bf16 %v12167_v2, %v12151_v11  ;;  %11856 = vmatprep.subr.bf16.mxu1 %v18054_v45  ;;  %v8815_v43 = vld [vmem:[%s22386_s24 + $0xfe0] sm:$0xff]  ;;  %v17989_v45 = vcombine.low %v8567_v30, %v8575_v14 }
 0xbc0   : > { %v18230_v50 = vcombine.high %v8807_v34, %v8815_v43  ;;  %v8543_v7 = vld [vmem:[%s22386_s24 + $0x760] sm:$0xff] }
 0xbc1   : > { %11814 = vmatpush1.bf16.msra.mxu0 %v17797_v15  ;;  %v8791_v11 = vld [vmem:[%s22386_s24 + $0xf20] sm:$0xff]  ;;  %v17973_v15 = vcombine.low %v8551_v0, %v8559_v60 }
 0xbc2   : > { %11857 = vmatpush1.bf16.msra.mxu1 %v18053_v27  ;;  %11815 = vmatprep.subr.bf16.mxu0 %v17782_v6  ;;  %v8799_v2 = vld [vmem:[%s22386_s24 + $0xf60] sm:$0xff]  ;;  %v18229_v27 = vcombine.low %v8807_v34, %v8815_v43  ;;  %v17958_v6 = vcombine.high %v8535_v32, %v8543_v7 }
 0xbc3   : > { %11858 = vmatprep.subr.bf16.mxu1 %v18038_v19  ;;  %v18214_v19 = vcombine.high %v8791_v11, %v8799_v2  ;;  %v8519_v16 = vld [vmem:[%s22386_s24 + $0x6a0] sm:$0xff] }
 0xbc4   : > { %v8527_v39 = vld [vmem:[%s22386_s24 + $0x6e0] sm:$0xff] }
 0xbc5   : > { %11816 = vmatpush1.bf16.msra.mxu0 %v17781_v51  ;;  %v8775_v48 = vld [vmem:[%s22386_s24 + $0xea0] sm:$0xff]  ;;  %v17957_v51 = vcombine.low %v8535_v32, %v8543_v7 }
 0xbc6   : > { %11859 = vmatpush1.bf16.msra.mxu1 %v18037_v63  ;;  %11817 = vmatprep.subr.bf16.mxu0 %v17766_v35  ;;  %v8783_v28 = vld [vmem:[%s22386_s24 + $0xee0] sm:$0xff]  ;;  %v18213_v63 = vcombine.low %v8791_v11, %v8799_v2  ;;  %v17942_v35 = vcombine.high %v8519_v16, %v8527_v39 }
 0xbc7   : > { %11860 = vmatprep.subr.bf16.mxu1 %v18022_v59  ;;  %v18198_v59 = vcombine.high %v8775_v48, %v8783_v28  ;;  %v8503_v41 = vld [vmem:[%s22386_s24 + $0x620] sm:$0xff] }
 0xbc8   : > { %v8511_v61 = vld [vmem:[%s22386_s24 + $0x660] sm:$0xff] }
 0xbc9   : > { %11818 = vmatpush1.bf16.msra.mxu0 %v17765_v9  ;;  %v8759_v29 = vld [vmem:[%s22386_s24 + $0xe20] sm:$0xff]  ;;  %v17941_v9 = vcombine.low %v8519_v16, %v8527_v39 }
 0xbca   : > { %11861 = vmatpush1.bf16.msra.mxu1 %v18021_v62  ;;  %11819 = vmatprep.subr.bf16.mxu0 %v17750_v12  ;;  %v8767_v49 = vld [vmem:[%s22386_s24 + $0xe60] sm:$0xff]  ;;  %v18197_v62 = vcombine.low %v8775_v48, %v8783_v28  ;;  %v17926_v12 = vcombine.high %v8503_v41, %v8511_v61 }
 0xbcb   : > { %11862 = vmatprep.subr.bf16.mxu1 %v18006_v36  ;;  %v18182_v36 = vcombine.high %v8759_v29, %v8767_v49  ;;  %v8487_v17 = vld [vmem:[%s22386_s24 + $0x5a0] sm:$0xff] }
 0xbcc   : > { %v8495_v20 = vld [vmem:[%s22386_s24 + $0x5e0] sm:$0xff] }
 0xbcd   : > { %11820 = vmatpush1.bf16.msra.mxu0 %v17749_v31  ;;  %v8743_v30 = vld [vmem:[%s22386_s24 + $0xda0] sm:$0xff]  ;;  %v17925_v31 = vcombine.low %v8503_v41, %v8511_v61  ;;  %v8424_v41 = vld [vmem:[%s22386_s24 + $0x3a8] sm:$0xff] }
 0xbce   : > { %11863 = vmatpush1.bf16.msra.mxu1 %v18005_v38  ;;  %11821 = vmatprep.subr.bf16.mxu0 %v17734_v40  ;;  %v8751_v14 = vld [vmem:[%s22386_s24 + $0xde0] sm:$0xff]  ;;  %v18181_v38 = vcombine.low %v8759_v29, %v8767_v49  ;;  %v17910_v40 = vcombine.high %v8487_v17, %v8495_v20  ;;  %v8432_v61 = vld [vmem:[%s22386_s24 + $0x3e8] sm:$0xff] }
 0xbcf   : > { %11864 = vmatprep.subr.bf16.mxu1 %v17990_v26  ;;  %v18166_v26 = vcombine.high %v8743_v30, %v8751_v14  ;;  %v8471_v0 = vld [vmem:[%s22386_s24 + $0x520] sm:$0xff]  ;;  %v8680_v29 = vld [vmem:[%s22386_s24 + $0xba8] sm:$0xff] }
 0xbd0   : > { %v8479_v60 = vld [vmem:[%s22386_s24 + $0x560] sm:$0xff]  ;;  %v8688_v49 = vld [vmem:[%s22386_s24 + $0xbe8] sm:$0xff] }
 0xbd1   : > { %11822 = vmatpush1.bf16.msra.mxu0 %v17733_v47  ;;  %v8727_v34 = vld [vmem:[%s22386_s24 + $0xd20] sm:$0xff]  ;;  %v17909_v47 = vcombine.low %v8487_v17, %v8495_v20  ;;  %v8408_v17 = vld [vmem:[%s22386_s24 + $0x328] sm:$0xff] }
 0xbd2   : > { %11865 = vmatpush1.bf16.msra.mxu1 %v17989_v45  ;;  %11823 = vmatprep.subr.bf16.mxu0 %v17974_v52  ;;  %v8735_v43 = vld [vmem:[%s22386_s24 + $0xd60] sm:$0xff]  ;;  %v18165_v45 = vcombine.low %v8743_v30, %v8751_v14  ;;  %v17894_v52 = vcombine.high %v8471_v0, %v8479_v60  ;;  %v8416_v20 = vld [vmem:[%s22386_s24 + $0x368] sm:$0xff]  ;;  %v8834_v30 = vrot.slane %v23944_v10, %v22907_v21 }
 0xbd3   : > { %11866 = vmatprep.subr.bf16.mxu1 %v18230_v50  ;;  %v18150_v50 = vcombine.high %v8727_v34, %v8735_v43  ;;  %v8455_v32 = vld [vmem:[%s22386_s24 + $0x4a0] sm:$0xff]  ;;  %v17847_v14 = vcombine.low %v8424_v41, %v8432_v61 }
 0xbd4   : > { %v8463_v7 = vld [vmem:[%s22386_s24 + $0x4e0] sm:$0xff] }
 0xbd5   : > { %11824 = vmatpush2.bf16.msra.mxu0 %v17973_v15  ;;  %v8711_v11 = vld [vmem:[%s22386_s24 + $0xca0] sm:$0xff]  ;;  %v17893_v15 = vcombine.low %v8471_v0, %v8479_v60  ;;  %v18103_v0 = vcombine.low %v8680_v29, %v8688_v49  ;;  %v17832_v60 = vcombine.high %v8408_v17, %v8416_v20 }
 0xbd6   : > { %11867 = vmatpush2.bf16.msra.mxu1 %v18229_v27  ;;  %11825 = vmatprep.subr.bf16.mxu0 %v17958_v6  ;;  %v8719_v2 = vld [vmem:[%s22386_s24 + $0xce0] sm:$0xff]  ;;  %v18149_v27 = vcombine.low %v8727_v34, %v8735_v43  ;;  %v17878_v6 = vcombine.high %v8455_v32, %v8463_v7  ;;  %v8392_v34 = vld [vmem:[%s22386_s24 + $0x2a8] sm:$0xff] }
 0xbd7   : > { %11868 = vmatprep.subr.bf16.mxu1 %v18214_v19  ;;  %v18134_v19 = vcombine.high %v8711_v11, %v8719_v2  ;;  %v8439_v16 = vld [vmem:[%s22386_s24 + $0x420] sm:$0xff]  ;;  %v8400_v43 = vld [vmem:[%s22386_s24 + $0x2e8] sm:$0xff] }
 0xbd8   : > { %v8447_v39 = vld [vmem:[%s22386_s24 + $0x460] sm:$0xff] }
 0xbd9   : > { %11826 = vmatpush2.bf16.msra.mxu0 %v17957_v51  ;;  %v8695_v48 = vld [vmem:[%s22386_s24 + $0xc20] sm:$0xff]  ;;  %v17877_v51 = vcombine.low %v8455_v32, %v8463_v7  ;;  %v8656_v32 = vld [vmem:[%s22386_s24 + $0xae8] sm:$0xff] }
 0xbda   : > { %11869 = vmatpush2.bf16.msra.mxu1 %v18213_v63  ;;  %11827 = vmatprep.subr.bf16.mxu0 %v17942_v35  ;;  %v8703_v28 = vld [vmem:[%s22386_s24 + $0xc60] sm:$0xff]  ;;  %v18133_v63 = vcombine.low %v8711_v11, %v8719_v2  ;;  %v17862_v35 = vcombine.high %v8439_v16, %v8447_v39  ;;  %v17831_v11 = vcombine.low %v8408_v17, %v8416_v20  ;;  %v8624_v17 = vld [vmem:[%s22386_s24 + $0x9e8] sm:$0xff] }
 0xbdb   : > { %11870 = vmatprep.subr.bf16.mxu1 %v18198_v59  ;;  %v18118_v59 = vcombine.high %v8695_v48, %v8703_v28 }
 0xbdd   : > { %11828 = vmatpush2.bf16.msra.mxu0 %v17941_v9  ;;  %v17861_v9 = vcombine.low %v8439_v16, %v8447_v39  ;;  %v8376_v39 = vld [vmem:[%s22386_s24 + $0x228] sm:$0xff] }
 0xbde   : > { %11871 = vmatpush2.bf16.msra.mxu1 %v18197_v62  ;;  %11829 = vmatprep.subr.bf16.mxu0 %v17926_v12  ;;  %v18117_v62 = vcombine.low %v8695_v48, %v8703_v28  ;;  %v17848_v12 = vcombine.high %v8424_v41, %v8432_v61  ;;  %v8384_v48 = vld [vmem:[%s22386_s24 + $0x268] sm:$0xff] }
 0xbdf   : > { %11872 = vmatprep.subr.bf16.mxu1 %v18182_v36  ;;  %v18104_v36 = vcombine.high %v8680_v29, %v8688_v49  ;;  %v17800_v29 = vcombine.high %v8376_v39, %v8384_v48 }
 0xbe1   : > { %11830 = vmatpush2.bf16.msra.mxu0 %v17925_v31  ;;  %v8664_v31 = vld [vmem:[%s22386_s24 + $0xb28] sm:$0xff] }
 0xbe2   : > { %11873 = vmatpush2.bf16.msra.mxu1 %v18181_v38  ;;  %11831 = vmatprep.subr.bf16.mxu0 %v17910_v40  ;;  %v8672_v38 = vld [vmem:[%s22386_s24 + $0xb68] sm:$0xff]  ;;  %v24028_v40 = vpop.f32.mrf.mxu0 }
 0xbe3   : > { %11874 = vmatprep.subr.bf16.mxu1 %v18166_v26  ;;  %v24030_v26 = vpop.f32.mrf.mxu1 }
 0xbe5   : > { %11832 = vmatpush2.bf16.msra.mxu0 %v17909_v47 }
 0xbe6   : > { %11875 = vmatpush2.bf16.msra.mxu1 %v18165_v45  ;;  %11833 = vmatprep.subr.bf16.mxu0 %v17894_v52  ;;  %v18088_v52 = vcombine.high %v8664_v31, %v8672_v38 }
 0xbe7   : > { %11876 = vmatprep.subr.bf16.mxu1 %v18150_v50  ;;  %v8648_v50 = vld [vmem:[%s22386_s24 + $0xaa8] sm:$0xff] }
 0xbe8   : > { %v18072_v16 = vcombine.high %v8648_v50, %v8656_v32  ;;  %v18071_v61 = vcombine.low %v8648_v50, %v8656_v32 }
 0xbe9   : > { %11834 = vmatpush2.bf16.msra.mxu0 %v17893_v15 }
 0xbea   : > { %11877 = vmatpush2.bf16.msra.mxu1 %v18149_v27  ;;  %11835 = vmatprep.subr.bf16.mxu0 %v17878_v6  ;;  %v18087_v27 = vcombine.low %v8664_v31, %v8672_v38  ;;  %v17816_v6 = vcombine.high %v8392_v34, %v8400_v43 }
 0xbeb   : > { %11878 = vmatprep.subr.bf16.mxu1 %v18134_v19 }
 0xbed   : > { %11836 = vmatpush2.bf16.msra.mxu0 %v17877_v51  ;;  %v8632_v51 = vld [vmem:[%s22386_s24 + $0xa28] sm:$0xff] }
 0xbee   : > { %11879 = vmatpush2.bf16.msra.mxu1 %v18133_v63  ;;  %11837 = vmatprep.subr.bf16.mxu0 %v17862_v35  ;;  %v8640_v63 = vld [vmem:[%s22386_s24 + $0xa68] sm:$0xff] }
 0xbef   : > { %11880 = vmatprep.subr.bf16.mxu1 %v18118_v59  ;;  %v17815_v59 = vcombine.low %v8392_v34, %v8400_v43  ;;  %v18055_v31 = vcombine.low %v8632_v51, %v8640_v63  ;;  %v8344_v34 = vld [vmem:[%s22386_s24 + $0x128] sm:$0xff] }
 0xbf0   : > { %v8352_v43 = vld [vmem:[%s22386_s24 + $0x168] sm:$0xff] }
 0xbf1   : > { %11838 = vmatpush2.bf16.msra.mxu0 %v17861_v9  ;;  %v18056_v9 = vcombine.high %v8632_v51, %v8640_v63  ;;  %v17768_v32 = vcombine.high %v8344_v34, %v8352_v43  ;;  %v8312_v51 = vld [vmem:[%s22386_s24 + $0x28] sm:$0xff] }
 0xbf2   : > { %11881 = vmatpush2.bf16.msra.mxu1 %v18117_v62  ;;  %11893 = vmatprep.subr.bf16.mxu0 %v17848_v12  ;;  %v8360_v62 = vld [vmem:[%s22386_s24 + $0x1a8] sm:$0xff] }
 0xbf3   : > { %11936 = vmatprep.subr.bf16.mxu1 %v18104_v36  ;;  %v8368_v12 = vld [vmem:[%s22386_s24 + $0x1e8] sm:$0xff] }
 0xbf4   : > { %v11583_v47 = vpop.f32.mrf.mxu0  ;;  %v11626_v45 = vpop.f32.mrf.mxu1  ;;  %11840 = vmatmul.mubr.bf16.vlgmr.msra.gmra.mxu0 %v23729_v5  ;;  %v8616_v36 = vld [vmem:[%s22386_s24 + $0x9a8] sm:$0xff]  ;;  %v17784_v38 = vcombine.high %v8360_v62, %v8368_v12 }
 0xbf5   : > { %v11584_v7 = vadd.f32 %v11583_v47, %v8834_v30  ;;  %11883 = vmatmul.mubr.bf16.vlgmr.msra.gmra.mxu1 %v23733_v56  ;;  %11894 = vmatpush1.bf16.msra.mxu0 %v17847_v14  ;;  %v17799_v14 = vcombine.low %v8376_v39, %v8384_v48  ;;  %v8600_v47 = vld [vmem:[%s22386_s24 + $0x928] sm:$0xff]  ;;  %v18039_v50 = vcombine.low %v8616_v36, %v8624_v17 }
 0xbf6   : > { %11925 = vmatprep.mubr.bf16.mxu0 %v23721_v46  ;;  %11937 = vmatpush1.bf16.msra.mxu1 %v18103_v0  ;;  %v24039_v2 = vpop.f32.mrf.mxu0  ;;  %v24041_v15 = vpop.f32.mrf.mxu1  ;;  %v8320_v63 = vld [vmem:[%s22386_s24 + $0x68] sm:$0xff] }
 0xbf7   : > { %v11627_v19 = vadd.f32 %v11626_v45, %v11584_v7  ;;  %11968 = vmatprep.mubr.bf16.mxu1 %v23725_v13  ;;  %11895 = vmatprep.subr.bf16.mxu0 %v17832_v60  ;;  %v18040_v60 = vcombine.high %v8616_v36, %v8624_v17  ;;  %v8608_v45 = vld [vmem:[%s22386_s24 + $0x968] sm:$0xff]  ;;  %v17735_v17 = vcombine.low %v8312_v51, %v8320_v63 }
 0xbf8   : > { %v11587_v28 = vpop.f32.mrf.mxu0  ;;  %11938 = vmatprep.subr.bf16.mxu1 %v18088_v52  ;;  %v11630_v41 = vpop.f32.mrf.mxu1  ;;  %v17783_v52 = vcombine.low %v8360_v62, %v8368_v12  ;;  %v18024_v7 = vcombine.high %v8600_v47, %v8608_v45  ;;  %v18023_v39 = vcombine.low %v8600_v47, %v8608_v45  ;;  %v8560_v62 = vld [vmem:[%s22386_s24 + $0x7e8] sm:$0xff] }
 0xbf9   : > { %v11588_v35 = vadd.f32 %v11587_v28, %v8834_v30  ;;  %11896 = vmatpush1.bf16.msra.mxu0 %v17831_v11  ;;  %v12153_v20 = vmax.f32 %v11627_v19, 0.0  ;;  %v8328_v11 = vld [vmem:[%s22386_s24 + $0xa8] sm:$0xff] }
 0xbfa   : > { %11939 = vmatpush1.bf16.msra.mxu1 %v18087_v27  ;;  %11897 = vmatprep.subr.bf16.mxu0 %v17816_v6  ;;  %v8336_v27 = vld [vmem:[%s22386_s24 + $0xe8] sm:$0xff] }
 0xbfb   : > { %v11631_v49 = vadd.f32 %v11630_v41, %v11588_v35  ;;  %11940 = vmatprep.subr.bf16.mxu1 %v18072_v16  ;;  %v8584_v6 = vld [vmem:[%s22386_s24 + $0x8a8] sm:$0xff]  ;;  %v17767_v16 = vcombine.low %v8344_v34, %v8352_v43  ;;  %v17752_v48 = vcombine.high %v8328_v11, %v8336_v27  ;;  %v17751_v41 = vcombine.low %v8328_v11, %v8336_v27 }
 0xbfc   : > { %v8592_v19 = vld [vmem:[%s22386_s24 + $0x8e8] sm:$0xff] }
 0xbfd   : > { %v12169_v30 = vmax.f32 %v11631_v49, 0.0  ;;  %11898 = vmatpush1.bf16.msra.mxu0 %v17815_v59  ;;  %v18008_v28 = vcombine.high %v8584_v6, %v8592_v19  ;;  %v8568_v35 = vld [vmem:[%s22386_s24 + $0x828] sm:$0xff] }
 0xbfe   : > { %11941 = vmatpush1.bf16.msra.mxu1 %v18071_v61  ;;  %11899 = vmatprep.subr.bf16.mxu0 %v17800_v29  ;;  %v8576_v59 = vld [vmem:[%s22386_s24 + $0x868] sm:$0xff]  ;;  %v18007_v61 = vcombine.low %v8584_v6, %v8592_v19  ;;  %v17736_v29 = vcombine.high %v8312_v51, %v8320_v63 }
 0xbff   : > { %v24052_v0 = vpack.c.bf16 %v12169_v30, %v12153_v20  ;;  %11942 = vmatprep.subr.bf16.mxu1 %v18056_v9  ;;  %v17992_v49 = vcombine.high %v8568_v35, %v8576_v59  ;;  %v8552_v9 = vld [vmem:[%s22386_s24 + $0x7a8] sm:$0xff]  ;;  %v17991_v20 = vcombine.low %v8568_v35, %v8576_v59 }
 0xc00   : > { %v8808_v12 = vld [vmem:[%s22386_s24 + $0xfa8] sm:$0xff]  ;;  %v17976_v30 = vcombine.high %v8552_v9, %v8560_v62  ;;  %v17975_v43 = vcombine.low %v8552_v9, %v8560_v62 }
 0xc01   : > { %11900 = vmatpush1.bf16.msra.mxu0 %v17799_v14  ;;  %v8816_v36 = vld [vmem:[%s22386_s24 + $0xfe8] sm:$0xff] }
 0xc02   : > { %11943 = vmatpush1.bf16.msra.mxu1 %v18055_v31  ;;  %11901 = vmatprep.subr.bf16.mxu0 %v17784_v38  ;;  %v18232_v14 = vcombine.high %v8808_v12, %v8816_v36  ;;  %v8536_v31 = vld [vmem:[%s22386_s24 + $0x728] sm:$0xff]  ;;  %v18231_v47 = vcombine.low %v8808_v12, %v8816_v36 }
 0xc03   : > { %11944 = vmatprep.subr.bf16.mxu1 %v18040_v60  ;;  %v8544_v38 = vld [vmem:[%s22386_s24 + $0x768] sm:$0xff] }
 0xc04   : > { %v8792_v60 = vld [vmem:[%s22386_s24 + $0xf28] sm:$0xff]  ;;  %v17960_v45 = vcombine.high %v8536_v31, %v8544_v38  ;;  %v17959_v27 = vcombine.low %v8536_v31, %v8544_v38 }
 0xc05   : > { %11902 = vmatpush1.bf16.msra.mxu0 %v17783_v52  ;;  %v8800_v34 = vld [vmem:[%s22386_s24 + $0xf68] sm:$0xff] }
 0xc06   : > { %11945 = vmatpush1.bf16.msra.mxu1 %v18039_v50  ;;  %11903 = vmatprep.subr.bf16.mxu0 %v17768_v32  ;;  %v18216_v52 = vcombine.high %v8792_v60, %v8800_v34  ;;  %v8520_v50 = vld [vmem:[%s22386_s24 + $0x6a8] sm:$0xff]  ;;  %v18215_v6 = vcombine.low %v8792_v60, %v8800_v34 }
 0xc07   : > { %11946 = vmatprep.subr.bf16.mxu1 %v18024_v7  ;;  %v8528_v32 = vld [vmem:[%s22386_s24 + $0x6e8] sm:$0xff] }
 0xc08   : > { %v8776_v7 = vld [vmem:[%s22386_s24 + $0xea8] sm:$0xff]  ;;  %v17944_v19 = vcombine.high %v8520_v50, %v8528_v32  ;;  %v17943_v63 = vcombine.low %v8520_v50, %v8528_v32 }
 0xc09   : > { %11904 = vmatpush1.bf16.msra.mxu0 %v17767_v16  ;;  %v8784_v11 = vld [vmem:[%s22386_s24 + $0xee8] sm:$0xff] }
 0xc0a   : > { %11947 = vmatpush1.bf16.msra.mxu1 %v18023_v39  ;;  %11905 = vmatprep.subr.bf16.mxu0 %v17752_v48  ;;  %v18200_v16 = vcombine.high %v8776_v7, %v8784_v11  ;;  %v8504_v39 = vld [vmem:[%s22386_s24 + $0x628] sm:$0xff]  ;;  %v18199_v35 = vcombine.low %v8776_v7, %v8784_v11 }
 0xc0b   : > { %11948 = vmatprep.subr.bf16.mxu1 %v18008_v28  ;;  %v8512_v48 = vld [vmem:[%s22386_s24 + $0x668] sm:$0xff] }
 0xc0c   : > { %v8760_v28 = vld [vmem:[%s22386_s24 + $0xe28] sm:$0xff]  ;;  %v17928_v59 = vcombine.high %v8504_v39, %v8512_v48  ;;  %v17927_v62 = vcombine.low %v8504_v39, %v8512_v48 }
 0xc0d   : > { %11906 = vmatpush1.bf16.msra.mxu0 %v17751_v41  ;;  %v8768_v51 = vld [vmem:[%s22386_s24 + $0xe68] sm:$0xff] }
 0xc0e   : > { %11949 = vmatpush1.bf16.msra.mxu1 %v18007_v61  ;;  %11907 = vmatprep.subr.bf16.mxu0 %v17736_v29  ;;  %v18184_v41 = vcombine.high %v8760_v28, %v8768_v51  ;;  %v8488_v61 = vld [vmem:[%s22386_s24 + $0x5a8] sm:$0xff]  ;;  %v18183_v12 = vcombine.low %v8760_v28, %v8768_v51 }
 0xc0f   : > { %11950 = vmatprep.subr.bf16.mxu1 %v17992_v49  ;;  %v8496_v29 = vld [vmem:[%s22386_s24 + $0x5e8] sm:$0xff] }
 0xc10   : > { %v8744_v49 = vld [vmem:[%s22386_s24 + $0xda8] sm:$0xff]  ;;  %v17912_v36 = vcombine.high %v8488_v61, %v8496_v29  ;;  %v17911_v38 = vcombine.low %v8488_v61, %v8496_v29  ;;  %v8689_v61 = vld [vmem:[%s22386_s24 + $0xbf0] sm:$0xff] }
 0xc11   : > { %11908 = vmatpush1.bf16.msra.mxu0 %v17735_v17  ;;  %v8752_v9 = vld [vmem:[%s22386_s24 + $0xde8] sm:$0xff] }
 0xc12   : > { %11951 = vmatpush1.bf16.msra.mxu1 %v17991_v20  ;;  %11909 = vmatprep.subr.bf16.mxu0 %v17976_v30  ;;  %v18168_v17 = vcombine.high %v8744_v49, %v8752_v9  ;;  %v8472_v20 = vld [vmem:[%s22386_s24 + $0x528] sm:$0xff]  ;;  %v18167_v60 = vcombine.low %v8744_v49, %v8752_v9 }
 0xc13   : > { %11952 = vmatprep.subr.bf16.mxu1 %v18232_v14  ;;  %v8480_v30 = vld [vmem:[%s22386_s24 + $0x568] sm:$0xff] }
 0xc14   : > { %v8728_v14 = vld [vmem:[%s22386_s24 + $0xd28] sm:$0xff]  ;;  %v17896_v34 = vcombine.high %v8472_v20, %v8480_v30  ;;  %v17895_v32 = vcombine.low %v8472_v20, %v8480_v30  ;;  %v8665_v30 = vld [vmem:[%s22386_s24 + $0xb30] sm:$0xff] }
 0xc15   : > { %11910 = vmatpush2.bf16.msra.mxu0 %v17975_v43  ;;  %v8736_v31 = vld [vmem:[%s22386_s24 + $0xd68] sm:$0xff] }
 0xc16   : > { %11953 = vmatpush2.bf16.msra.mxu1 %v18231_v47  ;;  %11911 = vmatprep.subr.bf16.mxu0 %v17960_v45  ;;  %v18152_v43 = vcombine.high %v8728_v14, %v8736_v31  ;;  %v8456_v47 = vld [vmem:[%s22386_s24 + $0x4a8] sm:$0xff]  ;;  %v18151_v7 = vcombine.low %v8728_v14, %v8736_v31  ;;  %v8673_v14 = vld [vmem:[%s22386_s24 + $0xb70] sm:$0xff]  ;;  %v24108_v31 = vpop.f32.mrf.mxu0 }
 0xc17   : > { %11954 = vmatprep.subr.bf16.mxu1 %v18216_v52  ;;  %v8464_v45 = vld [vmem:[%s22386_s24 + $0x4e8] sm:$0xff] }
 0xc18   : > { %v8712_v52 = vld [vmem:[%s22386_s24 + $0xca8] sm:$0xff]  ;;  %v17880_v11 = vcombine.high %v8456_v47, %v8464_v45  ;;  %v17879_v48 = vcombine.low %v8456_v47, %v8464_v45  ;;  %v8401_v47 = vld [vmem:[%s22386_s24 + $0x2f0] sm:$0xff] }
 0xc19   : > { %11912 = vmatpush2.bf16.msra.mxu0 %v17959_v27  ;;  %v8720_v50 = vld [vmem:[%s22386_s24 + $0xce8] sm:$0xff] }
 0xc1a   : > { %11955 = vmatpush2.bf16.msra.mxu1 %v18215_v6  ;;  %11913 = vmatprep.subr.bf16.mxu0 %v17944_v19  ;;  %v18136_v27 = vcombine.high %v8712_v52, %v8720_v50  ;;  %v8440_v6 = vld [vmem:[%s22386_s24 + $0x428] sm:$0xff]  ;;  %v18135_v28 = vcombine.low %v8712_v52, %v8720_v50  ;;  %v8649_v52 = vld [vmem:[%s22386_s24 + $0xab0] sm:$0xff] }
 0xc1b   : > { %11956 = vmatprep.subr.bf16.mxu1 %v18200_v16  ;;  %v8448_v19 = vld [vmem:[%s22386_s24 + $0x468] sm:$0xff]  ;;  %v8657_v50 = vld [vmem:[%s22386_s24 + $0xaf0] sm:$0xff] }
 0xc1c   : > { %v8696_v16 = vld [vmem:[%s22386_s24 + $0xc28] sm:$0xff]  ;;  %v17864_v51 = vcombine.high %v8440_v6, %v8448_v19  ;;  %v17863_v29 = vcombine.low %v8440_v6, %v8448_v19  ;;  %v18089_v6 = vcombine.low %v8665_v30, %v8673_v14 }
 0xc1d   : > { %11914 = vmatpush2.bf16.msra.mxu0 %v17943_v63  ;;  %v8704_v39 = vld [vmem:[%s22386_s24 + $0xc68] sm:$0xff] }
 0xc1e   : > { %11957 = vmatpush2.bf16.msra.mxu1 %v18199_v35  ;;  %11915 = vmatprep.subr.bf16.mxu0 %v17928_v59  ;;  %v18120_v63 = vcombine.high %v8696_v16, %v8704_v39  ;;  %v8425_v35 = vld [vmem:[%s22386_s24 + $0x3b0] sm:$0xff]  ;;  %v18119_v49 = vcombine.low %v8696_v16, %v8704_v39 }
 0xc1f   : > { %11958 = vmatprep.subr.bf16.mxu1 %v18184_v41  ;;  %v8433_v59 = vld [vmem:[%s22386_s24 + $0x3f0] sm:$0xff] }
 0xc20   : > { %v8681_v41 = vld [vmem:[%s22386_s24 + $0xbb0] sm:$0xff]  ;;  %v17850_v9 = vcombine.high %v8425_v35, %v8433_v59  ;;  %v17849_v20 = vcombine.low %v8425_v35, %v8433_v59 }
 0xc21   : > { %11916 = vmatpush2.bf16.msra.mxu0 %v17927_v62  ;;  %v18106_v62 = vcombine.high %v8681_v41, %v8689_v61  ;;  %v8633_v35 = vld [vmem:[%s22386_s24 + $0xa30] sm:$0xff] }
 0xc22   : > { %11959 = vmatpush2.bf16.msra.mxu1 %v18183_v12  ;;  %11917 = vmatprep.subr.bf16.mxu0 %v17912_v36  ;;  %v8409_v12 = vld [vmem:[%s22386_s24 + $0x330] sm:$0xff] }
 0xc23   : > { %11960 = vmatprep.subr.bf16.mxu1 %v18168_v17  ;;  %v8417_v36 = vld [vmem:[%s22386_s24 + $0x370] sm:$0xff]  ;;  %v8842_v17 = vrot.slane %v23944_v10, %v22857_v57  ;;  %v18090_v10 = vcombine.high %v8665_v30, %v8673_v14 }
 0xc24   : > { %v8641_v59 = vld [vmem:[%s22386_s24 + $0xa70] sm:$0xff] }
 0xc25   : > { %11918 = vmatpush2.bf16.msra.mxu0 %v17911_v38  ;;  %v18105_v38 = vcombine.low %v8681_v41, %v8689_v61  ;;  %v8617_v30 = vld [vmem:[%s22386_s24 + $0x9b0] sm:$0xff] }
 0xc26   : > { %11961 = vmatpush2.bf16.msra.mxu1 %v18167_v60  ;;  %11919 = vmatprep.subr.bf16.mxu0 %v17896_v34  ;;  %v24110_v60 = vpop.f32.mrf.mxu1  ;;  %v17834_v34 = vcombine.high %v8409_v12, %v8417_v36  ;;  %v8625_v14 = vld [vmem:[%s22386_s24 + $0x9f0] sm:$0xff] }
 0xc27   : > { %11962 = vmatprep.subr.bf16.mxu1 %v18152_v43  ;;  %v8393_v43 = vld [vmem:[%s22386_s24 + $0x2b0] sm:$0xff] }
 0xc28   : > { %v17818_v19 = vcombine.high %v8393_v43, %v8401_v47  ;;  %v17817_v61 = vcombine.low %v8393_v43, %v8401_v47  ;;  %v18057_v43 = vcombine.low %v8633_v35, %v8641_v59 }
 0xc29   : > { %11920 = vmatpush2.bf16.msra.mxu0 %v17895_v32 }
 0xc2a   : > { %11963 = vmatpush2.bf16.msra.mxu1 %v18151_v7  ;;  %11921 = vmatprep.subr.bf16.mxu0 %v17880_v11  ;;  %v17833_v11 = vcombine.low %v8409_v12, %v8417_v36  ;;  %v18058_v12 = vcombine.high %v8633_v35, %v8641_v59  ;;  %v8361_v36 = vld [vmem:[%s22386_s24 + $0x1b0] sm:$0xff] }
 0xc2b   : > { %11964 = vmatprep.subr.bf16.mxu1 %v18136_v27 }
 0xc2d   : > { %11922 = vmatpush2.bf16.msra.mxu0 %v17879_v48  ;;  %v18074_v48 = vcombine.high %v8649_v52, %v8657_v50 }
 0xc2e   : > { %11965 = vmatpush2.bf16.msra.mxu1 %v18135_v28  ;;  %11923 = vmatprep.subr.bf16.mxu0 %v17864_v51  ;;  %v8377_v28 = vld [vmem:[%s22386_s24 + $0x230] sm:$0xff] }
 0xc2f   : > { %11966 = vmatprep.subr.bf16.mxu1 %v18120_v63  ;;  %v8385_v51 = vld [vmem:[%s22386_s24 + $0x270] sm:$0xff] }
 0xc31   : > { %11924 = vmatpush2.bf16.msra.mxu0 %v17863_v29 }
 0xc32   : > { %11967 = vmatpush2.bf16.msra.mxu1 %v18119_v49  ;;  %11979 = vmatprep.subr.bf16.mxu0 %v17850_v9  ;;  %v18073_v49 = vcombine.low %v8649_v52, %v8657_v50  ;;  %v17802_v9 = vcombine.high %v8377_v28, %v8385_v51  ;;  %v8345_v52 = vld [vmem:[%s22386_s24 + $0x130] sm:$0xff] }
 0xc33   : > { %12022 = vmatprep.subr.bf16.mxu1 %v18106_v62  ;;  %v8353_v50 = vld [vmem:[%s22386_s24 + $0x170] sm:$0xff] }
 0xc34   : > { %v11669_v45 = vpop.f32.mrf.mxu0  ;;  %11926 = vmatmul.mubr.bf16.vlgmr.msra.gmra.mxu0 %v23729_v5  ;;  %v17769_v35 = vcombine.low %v8345_v52, %v8353_v50 }
 0xc35   : > { %v11670_v32 = vadd.f32 %v11669_v45, %v8842_v17  ;;  %v11712_v7 = vpop.f32.mrf.mxu1  ;;  %11969 = vmatmul.mubr.bf16.vlgmr.msra.gmra.mxu1 %v23733_v56  ;;  %11980 = vmatpush1.bf16.msra.mxu0 %v17849_v20  ;;  %v8369_v20 = vld [vmem:[%s22386_s24 + $0x1f0] sm:$0xff] }
 0xc36   : > { %12011 = vmatprep.mubr.bf16.mxu0 %v23721_v46  ;;  %12023 = vmatpush1.bf16.msra.mxu1 %v18105_v38  ;;  %v24119_v27 = vpop.f32.mrf.mxu0  ;;  %v17786_v47 = vcombine.high %v8361_v36, %v8369_v20 }
 0xc37   : > { %v11713_v16 = vadd.f32 %v11712_v7, %v11670_v32  ;;  %12054 = vmatprep.mubr.bf16.mxu1 %v23725_v13  ;;  %v24122_v39 = vpop.f32.mrf.mxu1  ;;  %11981 = vmatprep.subr.bf16.mxu0 %v17834_v34  ;;  %v17801_v34 = vcombine.low %v8377_v28, %v8385_v51  ;;  %v8601_v32 = vld [vmem:[%s22386_s24 + $0x930] sm:$0xff] }
 0xc38   : > { %v11673_v63 = vpop.f32.mrf.mxu0  ;;  %12024 = vmatprep.subr.bf16.mxu1 %v18090_v10  ;;  %v18042_v10 = vcombine.high %v8617_v30, %v8625_v14  ;;  %v8609_v7 = vld [vmem:[%s22386_s24 + $0x970] sm:$0xff] }
 0xc39   : > { %v11674_v41 = vadd.f32 %v11673_v63, %v8842_v17  ;;  %11982 = vmatpush1.bf16.msra.mxu0 %v17833_v11  ;;  %v11716_v29 = vpop.f32.mrf.mxu1  ;;  %v12155_v38 = vmax.f32 %v11713_v16, 0.0  ;;  %v17785_v11 = vcombine.low %v8361_v36, %v8369_v20  ;;  %v18026_v16 = vcombine.high %v8601_v32, %v8609_v7  ;;  %v8337_v28 = vld [vmem:[%s22386_s24 + $0xf0] sm:$0xff] }
 0xc3a   : > { %12025 = vmatpush1.bf16.msra.mxu1 %v18089_v6  ;;  %11983 = vmatprep.subr.bf16.mxu0 %v17818_v19  ;;  %v18041_v6 = vcombine.low %v8617_v30, %v8625_v14  ;;  %v17770_v19 = vcombine.high %v8345_v52, %v8353_v50  ;;  %v8585_v51 = vld [vmem:[%s22386_s24 + $0x8b0] sm:$0xff]  ;;  %v18025_v59 = vcombine.low %v8601_v32, %v8609_v7 }
 0xc3b   : > { %v11717_v62 = vadd.f32 %v11716_v29, %v11674_v41  ;;  %12026 = vmatprep.subr.bf16.mxu1 %v18074_v48  ;;  %v8329_v48 = vld [vmem:[%s22386_s24 + $0xb0] sm:$0xff] }
 0xc3c   : > { %v8593_v63 = vld [vmem:[%s22386_s24 + $0x8f0] sm:$0xff]  ;;  %v17754_v41 = vcombine.high %v8329_v48, %v8337_v28 }
 0xc3d   : > { %v12171_v17 = vmax.f32 %v11717_v62, 0.0  ;;  %11984 = vmatpush1.bf16.msra.mxu0 %v17817_v61  ;;  %v18010_v61 = vcombine.high %v8585_v51, %v8593_v63  ;;  %v8313_v29 = vld [vmem:[%s22386_s24 + $0x30] sm:$0xff]  ;;  %v18009_v36 = vcombine.low %v8585_v51, %v8593_v63 }
 0xc3e   : > { %12027 = vmatpush1.bf16.msra.mxu1 %v18073_v49  ;;  %11985 = vmatprep.subr.bf16.mxu0 %v17802_v9  ;;  %v8321_v49 = vld [vmem:[%s22386_s24 + $0x70] sm:$0xff] }
 0xc3f   : > { %v24132_v45 = vpack.c.bf16 %v12171_v17, %v12155_v38  ;;  %12028 = vmatprep.subr.bf16.mxu1 %v18058_v12  ;;  %v8569_v9 = vld [vmem:[%s22386_s24 + $0x830] sm:$0xff]  ;;  %v17753_v12 = vcombine.low %v8329_v48, %v8337_v28  ;;  %v17738_v20 = vcombine.high %v8313_v29, %v8321_v49 }
 0xc40   : > { %v8577_v62 = vld [vmem:[%s22386_s24 + $0x870] sm:$0xff] }
 0xc41   : > { %11986 = vmatpush1.bf16.msra.mxu0 %v17801_v34  ;;  %v17994_v30 = vcombine.high %v8569_v9, %v8577_v62  ;;  %v8553_v14 = vld [vmem:[%s22386_s24 + $0x7b0] sm:$0xff] }
 0xc42   : > { %12029 = vmatpush1.bf16.msra.mxu1 %v18057_v43  ;;  %11987 = vmatprep.subr.bf16.mxu0 %v17786_v47  ;;  %v8561_v38 = vld [vmem:[%s22386_s24 + $0x7f0] sm:$0xff]  ;;  %v17737_v43 = vcombine.low %v8313_v29, %v8321_v49  ;;  %v17993_v47 = vcombine.low %v8569_v9, %v8577_v62 }
 0xc43   : > { %12030 = vmatprep.subr.bf16.mxu1 %v18042_v10  ;;  %v8809_v17 = vld [vmem:[%s22386_s24 + $0xfb0] sm:$0xff]  ;;  %v17978_v10 = vcombine.high %v8553_v14, %v8561_v38 }
 0xc44   : > { %v8817_v34 = vld [vmem:[%s22386_s24 + $0xff0] sm:$0xff] }
 0xc45   : > { %11988 = vmatpush1.bf16.msra.mxu0 %v17785_v11  ;;  %v18234_v52 = vcombine.high %v8809_v17, %v8817_v34  ;;  %v8537_v50 = vld [vmem:[%s22386_s24 + $0x730] sm:$0xff] }
 0xc46   : > { %12031 = vmatpush1.bf16.msra.mxu1 %v18041_v6  ;;  %11989 = vmatprep.subr.bf16.mxu0 %v17770_v19  ;;  %v8545_v32 = vld [vmem:[%s22386_s24 + $0x770] sm:$0xff]  ;;  %v17977_v6 = vcombine.low %v8553_v14, %v8561_v38  ;;  %v18233_v19 = vcombine.low %v8809_v17, %v8817_v34 }
 0xc47   : > { %12032 = vmatprep.subr.bf16.mxu1 %v18026_v16  ;;  %v8793_v7 = vld [vmem:[%s22386_s24 + $0xf30] sm:$0xff]  ;;  %v17962_v16 = vcombine.high %v8537_v50, %v8545_v32 }
 0xc48   : > { %v8801_v11 = vld [vmem:[%s22386_s24 + $0xf70] sm:$0xff] }
 0xc49   : > { %11990 = vmatpush1.bf16.msra.mxu0 %v17769_v35  ;;  %v18218_v48 = vcombine.high %v8793_v7, %v8801_v11  ;;  %v8521_v28 = vld [vmem:[%s22386_s24 + $0x6b0] sm:$0xff] }
 0xc4a   : > { %12033 = vmatpush1.bf16.msra.mxu1 %v18025_v59  ;;  %11991 = vmatprep.subr.bf16.mxu0 %v17754_v41  ;;  %v8529_v51 = vld [vmem:[%s22386_s24 + $0x6f0] sm:$0xff]  ;;  %v17961_v59 = vcombine.low %v8537_v50, %v8545_v32  ;;  %v18217_v41 = vcombine.low %v8793_v7, %v8801_v11 }
 0xc4b   : > { %12034 = vmatprep.subr.bf16.mxu1 %v18010_v61  ;;  %v8777_v63 = vld [vmem:[%s22386_s24 + $0xeb0] sm:$0xff]  ;;  %v17946_v61 = vcombine.high %v8521_v28, %v8529_v51 }
 0xc4c   : > { %v8785_v35 = vld [vmem:[%s22386_s24 + $0xef0] sm:$0xff] }
 0xc4d   : > { %11992 = vmatpush1.bf16.msra.mxu0 %v17753_v12  ;;  %v18202_v29 = vcombine.high %v8777_v63, %v8785_v35  ;;  %v8505_v49 = vld [vmem:[%s22386_s24 + $0x630] sm:$0xff] }
 0xc4e   : > { %12035 = vmatpush1.bf16.msra.mxu1 %v18009_v36  ;;  %11993 = vmatprep.subr.bf16.mxu0 %v17738_v20  ;;  %v8513_v9 = vld [vmem:[%s22386_s24 + $0x670] sm:$0xff]  ;;  %v17945_v36 = vcombine.low %v8521_v28, %v8529_v51  ;;  %v18201_v20 = vcombine.low %v8777_v63, %v8785_v35 }
 0xc4f   : > { %12036 = vmatprep.subr.bf16.mxu1 %v17994_v30  ;;  %v8761_v62 = vld [vmem:[%s22386_s24 + $0xe30] sm:$0xff]  ;;  %v17930_v30 = vcombine.high %v8505_v49, %v8513_v9 }
 0xc50   : > { %v8769_v12 = vld [vmem:[%s22386_s24 + $0xe70] sm:$0xff] }
 0xc51   : > { %11994 = vmatpush1.bf16.msra.mxu0 %v17737_v43  ;;  %v18186_v14 = vcombine.high %v8761_v62, %v8769_v12  ;;  %v8489_v38 = vld [vmem:[%s22386_s24 + $0x5b0] sm:$0xff] }
 0xc52   : > { %12037 = vmatpush1.bf16.msra.mxu1 %v17993_v47  ;;  %11995 = vmatprep.subr.bf16.mxu0 %v17978_v10  ;;  %v8497_v17 = vld [vmem:[%s22386_s24 + $0x5f0] sm:$0xff]  ;;  %v17929_v47 = vcombine.low %v8505_v49, %v8513_v9  ;;  %v18185_v10 = vcombine.low %v8761_v62, %v8769_v12 }
 0xc53   : > { %12038 = vmatprep.subr.bf16.mxu1 %v18234_v52  ;;  %v8745_v34 = vld [vmem:[%s22386_s24 + $0xdb0] sm:$0xff]  ;;  %v17914_v52 = vcombine.high %v8489_v38, %v8497_v17 }
 0xc54   : > { %v8753_v43 = vld [vmem:[%s22386_s24 + $0xdf0] sm:$0xff] }
 0xc55   : > { %11996 = vmatpush2.bf16.msra.mxu0 %v17977_v6  ;;  %v18170_v50 = vcombine.high %v8745_v34, %v8753_v43  ;;  %v8473_v32 = vld [vmem:[%s22386_s24 + $0x530] sm:$0xff] }
 0xc56   : > { %12039 = vmatpush2.bf16.msra.mxu1 %v18233_v19  ;;  %11997 = vmatprep.subr.bf16.mxu0 %v17962_v16  ;;  %v8481_v7 = vld [vmem:[%s22386_s24 + $0x570] sm:$0xff]  ;;  %v17913_v19 = vcombine.low %v8489_v38, %v8497_v17  ;;  %v18169_v16 = vcombine.low %v8745_v34, %v8753_v43  ;;  %v8426_v17 = vld [vmem:[%s22386_s24 + $0x3b8] sm:$0xff] }
 0xc57   : > { %12040 = vmatprep.subr.bf16.mxu1 %v18218_v48  ;;  %v8729_v11 = vld [vmem:[%s22386_s24 + $0xd30] sm:$0xff]  ;;  %v17898_v48 = vcombine.high %v8473_v32, %v8481_v7  ;;  %v8434_v34 = vld [vmem:[%s22386_s24 + $0x3f8] sm:$0xff] }
 0xc58   : > { %v8737_v6 = vld [vmem:[%s22386_s24 + $0xd70] sm:$0xff]  ;;  %v8682_v43 = vld [vmem:[%s22386_s24 + $0xbb8] sm:$0xff] }
 0xc59   : > { %11998 = vmatpush2.bf16.msra.mxu0 %v17961_v59  ;;  %v18154_v28 = vcombine.high %v8729_v11, %v8737_v6  ;;  %v8457_v51 = vld [vmem:[%s22386_s24 + $0x4b0] sm:$0xff] }
 0xc5a   : > { %12041 = vmatpush2.bf16.msra.mxu1 %v18217_v41  ;;  %11999 = vmatprep.subr.bf16.mxu0 %v17946_v61  ;;  %v8465_v63 = vld [vmem:[%s22386_s24 + $0x4f0] sm:$0xff]  ;;  %v17897_v41 = vcombine.low %v8473_v32, %v8481_v7  ;;  %v18153_v61 = vcombine.low %v8729_v11, %v8737_v6  ;;  %v8410_v7 = vld [vmem:[%s22386_s24 + $0x338] sm:$0xff] }
 0xc5b   : > { %12042 = vmatprep.subr.bf16.mxu1 %v18202_v29  ;;  %v8713_v35 = vld [vmem:[%s22386_s24 + $0xcb0] sm:$0xff]  ;;  %v17882_v29 = vcombine.high %v8457_v51, %v8465_v63  ;;  %v8418_v11 = vld [vmem:[%s22386_s24 + $0x378] sm:$0xff] }
 0xc5c   : > { %v8721_v59 = vld [vmem:[%s22386_s24 + $0xcf0] sm:$0xff] }
 0xc5d   : > { %12000 = vmatpush2.bf16.msra.mxu0 %v17945_v36  ;;  %v18138_v49 = vcombine.high %v8713_v35, %v8721_v59  ;;  %v8441_v9 = vld [vmem:[%s22386_s24 + $0x430] sm:$0xff] }
 0xc5e   : > { %12043 = vmatpush2.bf16.msra.mxu1 %v18201_v20  ;;  %12001 = vmatprep.subr.bf16.mxu0 %v17930_v30  ;;  %v8449_v62 = vld [vmem:[%s22386_s24 + $0x470] sm:$0xff]  ;;  %v17881_v20 = vcombine.low %v8457_v51, %v8465_v63  ;;  %v18137_v30 = vcombine.low %v8713_v35, %v8721_v59  ;;  %v24191_v51 = vpop.f32.mrf.mxu0  ;;  %v24193_v35 = vpop.f32.mrf.mxu1  ;;  %v17836_v59 = vcombine.high %v8410_v7, %v8418_v11 }
 0xc5f   : > { %12044 = vmatprep.subr.bf16.mxu1 %v18186_v14  ;;  %v8697_v12 = vld [vmem:[%s22386_s24 + $0xc30] sm:$0xff]  ;;  %v17866_v14 = vcombine.high %v8441_v9, %v8449_v62 }
 0xc60   : > { %v8705_v36 = vld [vmem:[%s22386_s24 + $0xc70] sm:$0xff] }
 0xc61   : > { %12002 = vmatpush2.bf16.msra.mxu0 %v17929_v47  ;;  %v18122_v38 = vcombine.high %v8697_v12, %v8705_v36  ;;  %v8690_v47 = vld [vmem:[%s22386_s24 + $0xbf8] sm:$0xff]  ;;  %v24185_v6 = vld [vmem:[%s22388_s28] sm:$0xff] }
 0xc62   : > { %12045 = vmatpush2.bf16.msra.mxu1 %v18185_v10  ;;  %12003 = vmatprep.subr.bf16.mxu0 %v17914_v52  ;;  %v17865_v10 = vcombine.low %v8441_v9, %v8449_v62  ;;  %v18121_v52 = vcombine.low %v8697_v12, %v8705_v36  ;;  %v18108_v32 = vcombine.high %v8682_v43, %v8690_v47  ;;  %v8650_v9 = vld [vmem:[%s22386_s24 + $0xab8] sm:$0xff] }
 0xc63   : > { %12046 = vmatprep.subr.bf16.mxu1 %v18170_v50  ;;  %v17852_v50 = vcombine.high %v8426_v17, %v8434_v34  ;;  %v18107_v63 = vcombine.low %v8682_v43, %v8690_v47  ;;  %v8658_v62 = vld [vmem:[%s22386_s24 + $0xaf8] sm:$0xff] }
 0xc64   : > { %v18076_v43 = vcombine.high %v8650_v9, %v8658_v62  ;;  %v8378_v47 = vld [vmem:[%s22386_s24 + $0x238] sm:$0xff] }
 0xc65   : > { %12004 = vmatpush2.bf16.msra.mxu0 %v17913_v19  ;;  %v8850_v19 = vrot.slane %v24185_v6, %v22965_v42 }
 0xc66   : > { %12047 = vmatpush2.bf16.msra.mxu1 %v18169_v16  ;;  %12005 = vmatprep.subr.bf16.mxu0 %v17898_v48  ;;  %v17851_v16 = vcombine.low %v8426_v17, %v8434_v34  ;;  %v8666_v48 = vld [vmem:[%s22386_s24 + $0xb38] sm:$0xff] }
 0xc67   : > { %12048 = vmatprep.subr.bf16.mxu1 %v18154_v28  ;;  %v8674_v28 = vld [vmem:[%s22386_s24 + $0xb78] sm:$0xff] }
 0xc69   : > { %12006 = vmatpush2.bf16.msra.mxu0 %v17897_v41  ;;  %v8394_v41 = vld [vmem:[%s22386_s24 + $0x2b8] sm:$0xff] }
 0xc6a   : > { %12049 = vmatpush2.bf16.msra.mxu1 %v18153_v61  ;;  %12007 = vmatprep.subr.bf16.mxu0 %v17882_v29  ;;  %v8402_v61 = vld [vmem:[%s22386_s24 + $0x2f8] sm:$0xff] }
 0xc6b   : > { %12050 = vmatprep.subr.bf16.mxu1 %v18138_v49  ;;  %v18092_v49 = vcombine.high %v8666_v48, %v8674_v28 }
 0xc6d   : > { %12008 = vmatpush2.bf16.msra.mxu0 %v17881_v20  ;;  %v17835_v20 = vcombine.low %v8410_v7, %v8418_v11  ;;  %v17819_v7 = vcombine.low %v8394_v41, %v8402_v61 }
 0xc6e   : > { %12051 = vmatpush2.bf16.msra.mxu1 %v18137_v30  ;;  %12009 = vmatprep.subr.bf16.mxu0 %v17866_v14  ;;  %v18091_v14 = vcombine.low %v8666_v48, %v8674_v28 }
 0xc6f   : > { %12052 = vmatprep.subr.bf16.mxu1 %v18122_v38  ;;  %v17820_v38 = vcombine.high %v8394_v41, %v8402_v61 }
 0xc71   : > { %12010 = vmatpush2.bf16.msra.mxu0 %v17865_v10  ;;  %v8386_v10 = vld [vmem:[%s22386_s24 + $0x278] sm:$0xff] }
 0xc72   : > { %12053 = vmatpush2.bf16.msra.mxu1 %v18121_v52  ;;  %12065 = vmatprep.subr.bf16.mxu0 %v17852_v50  ;;  %v8642_v50 = vld [vmem:[%s22386_s24 + $0xa78] sm:$0xff]  ;;  %v17803_v41 = vcombine.low %v8378_v47, %v8386_v10 }
 0xc73   : > { %12108 = vmatprep.subr.bf16.mxu1 %v18108_v32 }
 0xc74   : > { %v11755_v29 = vpop.f32.mrf.mxu0  ;;  %12012 = vmatmul.mubr.bf16.vlgmr.msra.gmra.mxu0 %v23729_v5 }
 0xc75   : > { %v11756_v12 = vadd.f32 %v11755_v29, %v8850_v19  ;;  %v11798_v36 = vpop.f32.mrf.mxu1  ;;  %12055 = vmatmul.mubr.bf16.vlgmr.msra.gmra.mxu1 %v23733_v56  ;;  %12066 = vmatpush1.bf16.msra.mxu0 %v17851_v16  ;;  %v17804_v16 = vcombine.high %v8378_v47, %v8386_v10  ;;  %v8618_v29 = vld [vmem:[%s22386_s24 + $0x9b8] sm:$0xff] }
 0xc76   : > { %12097 = vmatprep.mubr.bf16.mxu0 %v23721_v46  ;;  %12109 = vmatpush1.bf16.msra.mxu1 %v18107_v63  ;;  %v24202_v30 = vpop.f32.mrf.mxu0  ;;  %v8634_v46 = vld [vmem:[%s22386_s24 + $0xa38] sm:$0xff] }
 0xc77   : > { %v11799_v17 = vadd.f32 %v11798_v36, %v11756_v12  ;;  %12140 = vmatprep.mubr.bf16.mxu1 %v23725_v13  ;;  %v24205_v34 = vpop.f32.mrf.mxu1  ;;  %12067 = vmatprep.subr.bf16.mxu0 %v17836_v59  ;;  %v18075_v13 = vcombine.low %v8650_v9, %v8658_v62  ;;  %v18060_v28 = vcombine.high %v8634_v46, %v8642_v50  ;;  %v8362_v63 = vld [vmem:[%s22386_s24 + $0x1b8] sm:$0xff] }
 0xc78   : > { %v11759_v52 = vpop.f32.mrf.mxu0  ;;  %12110 = vmatprep.subr.bf16.mxu1 %v18092_v49  ;;  %v8370_v59 = vld [vmem:[%s22386_s24 + $0x1f8] sm:$0xff]  ;;  %v18059_v61 = vcombine.low %v8634_v46, %v8642_v50 }
 0xc79   : > { %v11760_v32 = vadd.f32 %v11759_v52, %v8850_v19  ;;  %12068 = vmatpush1.bf16.msra.mxu0 %v17835_v20  ;;  %v11802_v11 = vpop.f32.mrf.mxu1  ;;  %v8626_v49 = vld [vmem:[%s22386_s24 + $0x9f8] sm:$0xff]  ;;  %v12157_v12 = vmax.f32 %v11799_v17, 0.0  ;;  %v17788_v9 = vcombine.high %v8362_v63, %v8370_v59  ;;  %v17787_v17 = vcombine.low %v8362_v63, %v8370_v59 }
 0xc7a   : > { %12111 = vmatpush1.bf16.msra.mxu1 %v18091_v14  ;;  %12069 = vmatprep.subr.bf16.mxu0 %v17820_v38  ;;  %v18044_v36 = vcombine.high %v8618_v29, %v8626_v49  ;;  %v8346_v20 = vld [vmem:[%s22386_s24 + $0x138] sm:$0xff]  ;;  %v18043_v47 = vcombine.low %v8618_v29, %v8626_v49 }
 0xc7b   : > { %v11803_v48 = vadd.f32 %v11802_v11, %v11760_v32  ;;  %12112 = vmatprep.subr.bf16.mxu1 %v18076_v43  ;;  %v8354_v14 = vld [vmem:[%s22386_s24 + $0x178] sm:$0xff] }
 0xc7c   : > { %v8602_v38 = vld [vmem:[%s22386_s24 + $0x938] sm:$0xff]  ;;  %v17772_v10 = vcombine.high %v8346_v20, %v8354_v14  ;;  %v17771_v11 = vcombine.low %v8346_v20, %v8354_v14 }
 0xc7d   : > { %v12173_v19 = vmax.f32 %v11803_v48, 0.0  ;;  %12070 = vmatpush1.bf16.msra.mxu0 %v17819_v7  ;;  %v8610_v43 = vld [vmem:[%s22386_s24 + $0x978] sm:$0xff] }
 0xc7e   : > { %12113 = vmatpush1.bf16.msra.mxu1 %v18075_v13  ;;  %12071 = vmatprep.subr.bf16.mxu0 %v17804_v16  ;;  %v18028_v52 = vcombine.high %v8602_v38, %v8610_v43  ;;  %v8330_v46 = vld [vmem:[%s22386_s24 + $0xb8] sm:$0xff]  ;;  %v18027_v13 = vcombine.low %v8602_v38, %v8610_v43 }
 0xc7f   : > { %v24215_v62 = vpack.c.bf16 %v12173_v19, %v12157_v12  ;;  %12114 = vmatprep.subr.bf16.mxu1 %v18060_v28  ;;  %v8338_v50 = vld [vmem:[%s22386_s24 + $0xf8] sm:$0xff] }
 0xc80   : > { %v8586_v32 = vld [vmem:[%s22386_s24 + $0x8b8] sm:$0xff]  ;;  %v17756_v16 = vcombine.high %v8330_v46, %v8338_v50  ;;  %v17755_v49 = vcombine.low %v8330_v46, %v8338_v50 }
 0xc81   : > { %12072 = vmatpush1.bf16.msra.mxu0 %v17803_v41  ;;  %v8594_v7 = vld [vmem:[%s22386_s24 + $0x8f8] sm:$0xff] }
 0xc82   : > { %12115 = vmatpush1.bf16.msra.mxu1 %v18059_v61  ;;  %12073 = vmatprep.subr.bf16.mxu0 %v17788_v9  ;;  %v18012_v48 = vcombine.high %v8586_v32, %v8594_v7  ;;  %v8314_v28 = vld [vmem:[%s22386_s24 + $0x38] sm:$0xff]  ;;  %v18011_v12 = vcombine.low %v8586_v32, %v8594_v7 }
 0xc83   : > { %12116 = vmatprep.subr.bf16.mxu1 %v18044_v36  ;;  %v8322_v63 = vld [vmem:[%s22386_s24 + $0x78] sm:$0xff] }
 0xc84   : > { %v8570_v59 = vld [vmem:[%s22386_s24 + $0x838] sm:$0xff]  ;;  %v17740_v19 = vcombine.high %v8314_v28, %v8322_v63  ;;  %v17739_v14 = vcombine.low %v8314_v28, %v8322_v63 }
 0xc85   : > { %12074 = vmatpush1.bf16.msra.mxu0 %v17787_v17  ;;  %v8578_v29 = vld [vmem:[%s22386_s24 + $0x878] sm:$0xff] }
 0xc86   : > { %12117 = vmatpush1.bf16.msra.mxu1 %v18043_v47  ;;  %12075 = vmatprep.subr.bf16.mxu0 %v17772_v10  ;;  %v17996_v41 = vcombine.high %v8570_v59, %v8578_v29  ;;  %v8554_v61 = vld [vmem:[%s22386_s24 + $0x7b8] sm:$0xff]  ;;  %v17995_v38 = vcombine.low %v8570_v59, %v8578_v29 }
 0xc87   : > { %12118 = vmatprep.subr.bf16.mxu1 %v18028_v52  ;;  %v8562_v9 = vld [vmem:[%s22386_s24 + $0x7f8] sm:$0xff] }
 0xc88   : > { %v8810_v36 = vld [vmem:[%s22386_s24 + $0xfb8] sm:$0xff]  ;;  %v17980_v43 = vcombine.high %v8554_v61, %v8562_v9  ;;  %v17979_v50 = vcombine.low %v8554_v61, %v8562_v9 }
 0xc89   : > { %12076 = vmatpush1.bf16.msra.mxu0 %v17771_v11  ;;  %v8818_v20 = vld [vmem:[%s22386_s24 + $0xff8] sm:$0xff] }
 0xc8a   : > { %12119 = vmatpush1.bf16.msra.mxu1 %v18027_v13  ;;  %12077 = vmatprep.subr.bf16.mxu0 %v17756_v16  ;;  %v18236_v17 = vcombine.high %v8810_v36, %v8818_v20  ;;  %v8538_v47 = vld [vmem:[%s22386_s24 + $0x738] sm:$0xff]  ;;  %v18235_v32 = vcombine.low %v8810_v36, %v8818_v20 }
 0xc8b   : > { %12120 = vmatprep.subr.bf16.mxu1 %v18012_v48  ;;  %v8546_v10 = vld [vmem:[%s22386_s24 + $0x778] sm:$0xff] }
 0xc8c   : > { %v8794_v52 = vld [vmem:[%s22386_s24 + $0xf38] sm:$0xff]  ;;  %v17964_v7 = vcombine.high %v8538_v47, %v8546_v10  ;;  %v17963_v63 = vcombine.low %v8538_v47, %v8546_v10 }
 0xc8d   : > { %12078 = vmatpush1.bf16.msra.mxu0 %v17755_v49  ;;  %v8802_v46 = vld [vmem:[%s22386_s24 + $0xf78] sm:$0xff] }
 0xc8e   : > { %12121 = vmatpush1.bf16.msra.mxu1 %v18011_v12  ;;  %12079 = vmatprep.subr.bf16.mxu0 %v17740_v19  ;;  %v18220_v11 = vcombine.high %v8794_v52, %v8802_v46  ;;  %v8522_v13 = vld [vmem:[%s22386_s24 + $0x6b8] sm:$0xff]  ;;  %v18219_v59 = vcombine.low %v8794_v52, %v8802_v46 }
 0xc8f   : > { %12122 = vmatprep.subr.bf16.mxu1 %v17996_v41  ;;  %v8530_v16 = vld [vmem:[%s22386_s24 + $0x6f8] sm:$0xff] }
 0xc90   : > { %v8778_v48 = vld [vmem:[%s22386_s24 + $0xeb8] sm:$0xff]  ;;  %v17948_v29 = vcombine.high %v8522_v13, %v8530_v16  ;;  %v17947_v9 = vcombine.low %v8522_v13, %v8530_v16 }
 0xc91   : > { %12080 = vmatpush1.bf16.msra.mxu0 %v17739_v14  ;;  %v8786_v28 = vld [vmem:[%s22386_s24 + $0xef8] sm:$0xff] }
 0xc92   : > { %12123 = vmatpush1.bf16.msra.mxu1 %v17995_v38  ;;  %12081 = vmatprep.subr.bf16.mxu0 %v17980_v43  ;;  %v18204_v49 = vcombine.high %v8778_v48, %v8786_v28  ;;  %v8506_v12 = vld [vmem:[%s22386_s24 + $0x638] sm:$0xff]  ;;  %v18203_v36 = vcombine.low %v8778_v48, %v8786_v28 }
 0xc93   : > { %12124 = vmatprep.subr.bf16.mxu1 %v18236_v17  ;;  %v8514_v19 = vld [vmem:[%s22386_s24 + $0x678] sm:$0xff] }
 0xc94   : > { %v8762_v41 = vld [vmem:[%s22386_s24 + $0xe38] sm:$0xff]  ;;  %v17932_v20 = vcombine.high %v8506_v12, %v8514_v19  ;;  %v17931_v10 = vcombine.low %v8506_v12, %v8514_v19 }
 0xc95   : > { %12082 = vmatpush2.bf16.msra.mxu0 %v17979_v50  ;;  %v8770_v61 = vld [vmem:[%s22386_s24 + $0xe78] sm:$0xff] }
 0xc96   : > { %12125 = vmatpush2.bf16.msra.mxu1 %v18235_v32  ;;  %12083 = vmatprep.subr.bf16.mxu0 %v17964_v7  ;;  %v18188_v14 = vcombine.high %v8762_v41, %v8770_v61  ;;  %v8490_v38 = vld [vmem:[%s22386_s24 + $0x5b8] sm:$0xff]  ;;  %v18187_v52 = vcombine.low %v8762_v41, %v8770_v61  ;;  %v8830_v41 = vrot.slane %v24185_v6, %v22887_v24 }
 0xc97   : > { %12126 = vmatprep.subr.bf16.mxu1 %v18220_v11  ;;  %v8498_v43 = vld [vmem:[%s22386_s24 + $0x5f8] sm:$0xff] }
 0xc98   : > { %v8746_v17 = vld [vmem:[%s22386_s24 + $0xdb8] sm:$0xff]  ;;  %v17916_v46 = vcombine.high %v8490_v38, %v8498_v43  ;;  %v17915_v16 = vcombine.low %v8490_v38, %v8498_v43  ;;  %v11504_v43 = vadd.f32 %v24028_v40, %v8830_v41 }
 0xc99   : > { %12084 = vmatpush2.bf16.msra.mxu0 %v17963_v63  ;;  %v8754_v47 = vld [vmem:[%s22386_s24 + $0xdf8] sm:$0xff] }
 0xc9a   : > { %12127 = vmatpush2.bf16.msra.mxu1 %v18219_v59  ;;  %12085 = vmatprep.subr.bf16.mxu0 %v17948_v29  ;;  %v18172_v50 = vcombine.high %v8746_v17, %v8754_v47  ;;  %v8474_v32 = vld [vmem:[%s22386_s24 + $0x538] sm:$0xff]  ;;  %v18171_v48 = vcombine.low %v8746_v17, %v8754_v47  ;;  %v11547_v40 = vadd.f32 %v24030_v26, %v11504_v43  ;;  %v20098_v43 = vld [vmem:[%s22390_s8 + $0xc0] ss:$16 sps:$4 sm:$0xff]  }
 0xc9b   : > { %12128 = vmatprep.subr.bf16.mxu1 %v18204_v49  ;;  %v8482_v7 = vld [vmem:[%s22386_s24 + $0x578] sm:$0xff] }
 0xc9c   : > { %v8730_v11 = vld [vmem:[%s22386_s24 + $0xd38] sm:$0xff]  ;;  %v17900_v28 = vcombine.high %v8474_v32, %v8482_v7  ;;  %v17899_v19 = vcombine.low %v8474_v32, %v8482_v7  ;;  %v12168_v26 = vmax.f32 %v11547_v40, 0.0  ;;  %v20112_v40 = vld [vmem:[%s22390_s8 + $0x84] ss:$16 sps:$4 sm:$0xff]  }
 0xc9d   : > { %12086 = vmatpush2.bf16.msra.mxu0 %v17947_v9  ;;  %v8738_v13 = vld [vmem:[%s22386_s24 + $0xd78] sm:$0xff] }
 0xc9e   : > { %12129 = vmatpush2.bf16.msra.mxu1 %v18203_v36  ;;  %12087 = vmatprep.subr.bf16.mxu0 %v17932_v20  ;;  %v18156_v63 = vcombine.high %v8730_v11, %v8738_v13  ;;  %v8458_v59 = vld [vmem:[%s22386_s24 + $0x4b8] sm:$0xff]  ;;  %v18155_v61 = vcombine.low %v8730_v11, %v8738_v13  ;;  %v8838_v36 = vrot.slane %v24185_v6, %v22935_v33 }
 0xc9f   : > { %12130 = vmatprep.subr.bf16.mxu1 %v18188_v14  ;;  %v8466_v29 = vld [vmem:[%s22386_s24 + $0x4f8] sm:$0xff] }
 0xca0   : > { %v8714_v49 = vld [vmem:[%s22386_s24 + $0xcb8] sm:$0xff]  ;;  %v17884_v9 = vcombine.high %v8458_v59, %v8466_v29  ;;  %v11586_v7 = vadd.f32 %v24039_v2, %v8838_v36 }
 0xca1   : > { %12088 = vmatpush2.bf16.msra.mxu0 %v17931_v10  ;;  %v8722_v12 = vld [vmem:[%s22386_s24 + $0xcf8] sm:$0xff]  ;;  %v11590_v10 = vadd.f32 %v24108_v31, %v8838_v36  ;;  %v20103_v36 = vld [vmem:[%s22390_s8 + $0x2c4] ss:$16 sps:$4 sm:$0xff]  }
 0xca2   : > { %12131 = vmatpush2.bf16.msra.mxu1 %v18187_v52  ;;  %12089 = vmatprep.subr.bf16.mxu0 %v17916_v46  ;;  %v18140_v20 = vcombine.high %v8714_v49, %v8722_v12  ;;  %v8442_v14 = vld [vmem:[%s22386_s24 + $0x438] sm:$0xff]  ;;  %v17883_v52 = vcombine.low %v8458_v59, %v8466_v29  ;;  %v11500_v46 = vadd.f32 %v23959_v8, %v8830_v41  ;;  %v20100_v41 = vld [vmem:[%s22390_s8 + $0xc4] ss:$16 sps:$4 sm:$0xff]  }
 0xca3   : > { %12132 = vmatprep.subr.bf16.mxu1 %v18172_v50  ;;  %v8450_v38 = vld [vmem:[%s22386_s24 + $0x478] sm:$0xff]  ;;  %v18139_v50 = vcombine.low %v8714_v49, %v8722_v12  ;;  %v11633_v13 = vadd.f32 %v24110_v60, %v11590_v10  ;;  %v11629_v2 = vadd.f32 %v24041_v15, %v11586_v7  ;;  %v24281_v49 = vpop.f32.mrf.mxu0  ;;  %v20095_v12 = vld [vmem:[%s22390_s8 + $0x2e0] ss:$16 sps:$4 sm:$0xff]   ;;  %v24284_v15 = vpop.f32.mrf.mxu1 }
 0xca4   : > { %v8698_v17 = vld [vmem:[%s22386_s24 + $0xc38] sm:$0xff]  ;;  %v17868_v32 = vcombine.high %v8442_v14, %v8450_v38  ;;  %v17867_v31 = vcombine.low %v8442_v14, %v8450_v38  ;;  %v11543_v8 = vadd.f32 %v23961_v25, %v11500_v46  ;;  %v20092_v25 = vld [vmem:[%s22390_s8 + $0xe0] ss:$16 sps:$4 sm:$0xff]  }
 0xca5   : > { %12090 = vmatpush2.bf16.msra.mxu0 %v17915_v16  ;;  %v8706_v47 = vld [vmem:[%s22386_s24 + $0xc78] sm:$0xff]  ;;  %v12170_v59 = vmax.f32 %v11633_v13, 0.0 }
 0xca6   : > { %12133 = vmatpush2.bf16.msra.mxu1 %v18171_v48  ;;  %12091 = vmatprep.subr.bf16.mxu0 %v17900_v28  ;;  %v18124_v11 = vcombine.high %v8698_v17, %v8706_v47  ;;  %v18123_v16 = vcombine.low %v8698_v17, %v8706_v47  ;;  %v24273_v48 = vld [vmem:[%s22388_s28 + $0x8] sm:$0xff]  ;;  %v20094_v28 = vld [vmem:[%s22390_s8 + $0xe4] ss:$16 sps:$4 sm:$0xff]   ;;  %v12152_v29 = vmax.f32 %v11543_v8, 0.0  ;;  %v20101_v47 = vld [vmem:[%s22390_s8 + $0x2c0] ss:$16 sps:$4 sm:$0xff]  }
 0xca7   : > { %12134 = vmatprep.subr.bf16.mxu1 %v18156_v63  ;;  %v20097_v63 = vld [vmem:[%s22390_s8 + $0x2e4] ss:$16 sps:$4 sm:$0xff]   ;;  %v8858_v60 = vrot.slane %v24273_v48, %v22860_v1 }
 0xca9   : > { %12092 = vmatpush2.bf16.msra.mxu0 %v17899_v19  ;;  %v12154_v19 = vmax.f32 %v11629_v2, 0.0  ;;  %v20113_v2 = vld [vmem:[%s22390_s8 + $0x280] ss:$16 sps:$4 sm:$0xff]  }
 0xcaa   : > { %12135 = vmatpush2.bf16.msra.mxu1 %v18155_v61  ;;  %12093 = vmatprep.subr.bf16.mxu0 %v17884_v9  ;;  %v24287_v61 = vpack.c.bf16 %v12168_v26, %v12152_v29  ;;  %v20124_v29 = vld [vmem:[%s22390_s8 + $0x44] ss:$16 sps:$4 sm:$0xff]  }
 0xcab   : > { %12136 = vmatprep.subr.bf16.mxu1 %v18140_v20  ;;  %v24291_v20 = vpack.c.bf16 %v12170_v59, %v12154_v19  ;;  %v20121_v59 = vld [vmem:[%s22390_s8 + $0x264] ss:$16 sps:$4 sm:$0xff]   ;;  %v20122_v19 = vld [vmem:[%s22390_s8 + $0x40] ss:$16 sps:$4 sm:$0xff]  }
 0xcad   : > { %12094 = vmatpush2.bf16.msra.mxu0 %v17883_v52 }
 0xcae   : > { %12137 = vmatpush2.bf16.msra.mxu1 %v18139_v50  ;;  %12095 = vmatprep.subr.bf16.mxu0 %v17868_v32  ;;  %v20104_v32 = vld [vmem:[%s22390_s8 + $0xa0] ss:$16 sps:$4 sm:$0xff]  }
 0xcaf   : > { %12138 = vmatprep.subr.bf16.mxu1 %v18124_v11  ;;  %v20107_v11 = vld [vmem:[%s22390_s8 + $0x2a0] ss:$16 sps:$4 sm:$0xff]  }
 0xcb1   : > { %12096 = vmatpush2.bf16.msra.mxu0 %v17867_v31  ;;  %v20115_v31 = vld [vmem:[%s22390_s8 + $0x284] ss:$16 sps:$4 sm:$0xff]  }
 0xcb2   : > { %12139 = vmatpush2.bf16.msra.mxu1 %v18123_v16  ;;  %15293 = vmatprep.subr.bf16.mxu0 %v20094_v28  ;;  %v20110_v28 = vld [vmem:[%s22390_s8 + $0x80] ss:$16 sps:$4 sm:$0xff]  }
 0xcb3   : > { %15336 = vmatprep.subr.bf16.mxu1 %v20097_v63  ;;  %v20118_v63 = vld [vmem:[%s22390_s8 + $0x64] ss:$16 sps:$4 sm:$0xff]  }
 0xcb4   : > { %v11841_v9 = vpop.f32.mrf.mxu0  ;;  %12098 = vmatmul.mubr.bf16.vlgmr.msra.gmra.mxu0 %v23729_v5  ;;  %v20106_v5 = vld [vmem:[%s22390_s8 + $0xa4] ss:$16 sps:$4 sm:$0xff]  }
 0xcb5   : > { %v11842_v14 = vadd.f32 %v11841_v9, %v8858_v60  ;;  %v11884_v38 = vpop.f32.mrf.mxu1  ;;  %12141 = vmatmul.mubr.bf16.vlgmr.msra.gmra.mxu1 %v23733_v56  ;;  %15294 = vmatpush1.bf16.msra.mxu0 %v20092_v25  ;;  %v20109_v56 = vld [vmem:[%s22390_s8 + $0x2a4] ss:$16 sps:$4 sm:$0xff]   ;;  %v20119_v25 = vld [vmem:[%s22390_s8 + $0x260] ss:$16 sps:$4 sm:$0xff]  }
 0xcb6   : > { %15325 = vmatprep.mubr.bf16.mxu0 %v24287_v61  ;;  %15337 = vmatpush1.bf16.msra.mxu1 %v20095_v12  ;;  %v24296_v17 = vpop.f32.mrf.mxu0  ;;  %v20127_v12 = vld [vmem:[%s22390_s8 + $0x244] ss:$16 sps:$4 sm:$0xff]  }
 0xcb7   : > { %v11885_v10 = vadd.f32 %v11884_v38, %v11842_v14  ;;  %15368 = vmatprep.mubr.bf16.mxu1 %v24291_v20  ;;  %v24301_v52 = vpop.f32.mrf.mxu1  ;;  %15295 = vmatprep.subr.bf16.mxu0 %v20100_v41  ;;  %v20125_v41 = vld [vmem:[%s22390_s8 + $0x240] ss:$16 sps:$4 sm:$0xff]   ;;  %v20130_v9 = vld [vmem:[%s22390_s8 + $0x24] ss:$16 sps:$4 sm:$0xff]  }
 0xcb8   : > { %v11845_v46 = vpop.f32.mrf.mxu0  ;;  %15338 = vmatprep.subr.bf16.mxu1 %v20103_v36  ;;  %v20133_v36 = vld [vmem:[%s22390_s8 + $0x224] ss:$16 sps:$4 sm:$0xff]   ;;  %v20128_v14 = vld [vmem:[%s22390_s8 + $0x20] ss:$16 sps:$4 sm:$0xff]  }
 0xcb9   : > { %v11846_v50 = vadd.f32 %v11845_v46, %v8858_v60  ;;  %15296 = vmatpush1.bf16.msra.mxu0 %v20098_v43  ;;  %v11888_v7 = vpop.f32.mrf.mxu1  ;;  %v12159_v8 = vmax.f32 %v11885_v10, 0.0  ;;  %v20116_v60 = vld [vmem:[%s22390_s8 + $0x60] ss:$16 sps:$4 sm:$0xff]   ;;  %v20136_v43 = vld [vmem:[%s22390_s8 + $0x4] ss:$16 sps:$4 sm:$0xff]  }
 0xcba   : > { %15339 = vmatpush1.bf16.msra.mxu1 %v20101_v47  ;;  %15297 = vmatprep.subr.bf16.mxu0 %v20106_v5  ;;  %v20131_v38 = vld [vmem:[%s22390_s8 + $0x220] ss:$16 sps:$4 sm:$0xff]   ;;  %v20139_v47 = vld [vmem:[%s22390_s8 + $0x204] ss:$16 sps:$4 sm:$0xff]  }
 0xcbb   : > { %v11889_v13 = vadd.f32 %v11888_v7, %v11846_v50  ;;  %15340 = vmatprep.subr.bf16.mxu1 %v20109_v56  ;;  %v20134_v5 = vld [vmem:[%s22390_s8] ss:$16 sps:$4 sm:$0xff]   ;;  %v20142_v56 = vld [vmem:[%s22390_s8 + $0x1e4] ss:$16 sps:$4 sm:$0xff]  }
 0xcbc   : > { %v20137_v10 = vld [vmem:[%s22390_s8 + $0x200] ss:$16 sps:$4 sm:$0xff]   ;;  %v20145_v46 = vld [vmem:[%s22390_s8 + $0x3e4] ss:$16 sps:$4 sm:$0xff]  }
 0xcbd   : > { %v12175_v16 = vmax.f32 %v11889_v13, 0.0  ;;  %15298 = vmatpush1.bf16.msra.mxu0 %v20104_v32  ;;  %v20140_v50 = vld [vmem:[%s22390_s8 + $0x1e0] ss:$16 sps:$4 sm:$0xff]   ;;  %v20148_v7 = vld [vmem:[%s22390_s8 + $0x1c4] ss:$16 sps:$4 sm:$0xff]  }
 0xcbe   : > { %15341 = vmatpush1.bf16.msra.mxu1 %v20107_v11  ;;  %15299 = vmatprep.subr.bf16.mxu0 %v20112_v40  ;;  %v20143_v32 = vld [vmem:[%s22390_s8 + $0x3e0] ss:$16 sps:$4 sm:$0xff]   ;;  %v20151_v11 = vld [vmem:[%s22390_s8 + $0x3c4] ss:$16 sps:$4 sm:$0xff]  }
 0xcbf   : > { %v24311_v26 = vpack.c.bf16 %v12175_v16, %v12159_v8  ;;  %15342 = vmatprep.subr.bf16.mxu1 %v20115_v31  ;;  %v20146_v40 = vld [vmem:[%s22390_s8 + $0x1c0] ss:$16 sps:$4 sm:$0xff]   ;;  %v20154_v31 = vld [vmem:[%s22390_s8 + $0x1a4] ss:$16 sps:$4 sm:$0xff]  }
 0xcc0   : > { %v20149_v13 = vld [vmem:[%s22390_s8 + $0x3c0] ss:$16 sps:$4 sm:$0xff]   ;;  %v20157_v8 = vld [vmem:[%s22390_s8 + $0x3a4] ss:$16 sps:$4 sm:$0xff]  }
 0xcc1   : > { %15300 = vmatpush1.bf16.msra.mxu0 %v20110_v28  ;;  %v20152_v16 = vld [vmem:[%s22390_s8 + $0x1a0] ss:$16 sps:$4 sm:$0xff]  }
 0xcc2   : > { %15343 = vmatpush1.bf16.msra.mxu1 %v20113_v2  ;;  %15301 = vmatprep.subr.bf16.mxu0 %v20118_v63  ;;  %v20155_v28 = vld [vmem:[%s22390_s8 + $0x3a0] ss:$16 sps:$4 sm:$0xff]   ;;  %v20160_v2 = vld [vmem:[%s22390_s8 + $0x184] ss:$16 sps:$4 sm:$0xff]  }
 0xcc3   : > { %15344 = vmatprep.subr.bf16.mxu1 %v20121_v59  ;;  %v20163_v63 = vld [vmem:[%s22390_s8 + $0x384] ss:$16 sps:$4 sm:$0xff]   ;;  %v20158_v59 = vld [vmem:[%s22390_s8 + $0x180] ss:$16 sps:$4 sm:$0xff]  }
 0xcc5   : > { %15302 = vmatpush1.bf16.msra.mxu0 %v20116_v60  ;;  %v20161_v60 = vld [vmem:[%s22390_s8 + $0x380] ss:$16 sps:$4 sm:$0xff]  }
 0xcc6   : > { %15345 = vmatpush1.bf16.msra.mxu1 %v20119_v25  ;;  %15303 = vmatprep.subr.bf16.mxu0 %v20124_v29  ;;  %v20166_v25 = vld [vmem:[%s22390_s8 + $0x164] ss:$16 sps:$4 sm:$0xff]  }
 0xcc7   : > { %15346 = vmatprep.subr.bf16.mxu1 %v20127_v12  ;;  %v20169_v29 = vld [vmem:[%s22390_s8 + $0x364] ss:$16 sps:$4 sm:$0xff]   ;;  %v20164_v12 = vld [vmem:[%s22390_s8 + $0x160] ss:$16 sps:$4 sm:$0xff]  }
 0xcc9   : > { %15304 = vmatpush1.bf16.msra.mxu0 %v20122_v19  ;;  %v20167_v19 = vld [vmem:[%s22390_s8 + $0x360] ss:$16 sps:$4 sm:$0xff]  }
 0xcca   : > { %15347 = vmatpush1.bf16.msra.mxu1 %v20125_v41  ;;  %15305 = vmatprep.subr.bf16.mxu0 %v20130_v9  ;;  %v20172_v41 = vld [vmem:[%s22390_s8 + $0x144] ss:$16 sps:$4 sm:$0xff]  }
 0xccb   : > { %15348 = vmatprep.subr.bf16.mxu1 %v20133_v36  ;;  %v20175_v9 = vld [vmem:[%s22390_s8 + $0x344] ss:$16 sps:$4 sm:$0xff]   ;;  %v20170_v36 = vld [vmem:[%s22390_s8 + $0x140] ss:$16 sps:$4 sm:$0xff]  }
 0xccd   : > { %15306 = vmatpush1.bf16.msra.mxu0 %v20128_v14  ;;  %v8846_v14 = vrot.slane %v24185_v6, %v22878_v4 }
 0xcce   : > { %15349 = vmatpush1.bf16.msra.mxu1 %v20131_v38  ;;  %15307 = vmatprep.subr.bf16.mxu0 %v20136_v43  ;;  %v20173_v38 = vld [vmem:[%s22390_s8 + $0x340] ss:$16 sps:$4 sm:$0xff]   ;;  %v20178_v43 = vld [vmem:[%s22390_s8 + $0x124] ss:$16 sps:$4 sm:$0xff]  }
 0xccf   : > { %15350 = vmatprep.subr.bf16.mxu1 %v20139_v47  ;;  %v8854_v47 = vrot.slane %v24185_v6, %v22970_v44 }
 0xcd1   : > { %15308 = vmatpush1.bf16.msra.mxu0 %v20134_v5  ;;  %v20181_v5 = vld [vmem:[%s22390_s8 + $0x324] ss:$16 sps:$4 sm:$0xff]   ;;  %v11758_v6 = vadd.f32 %v24202_v30, %v8854_v47 }
 0xcd2   : > { %15351 = vmatpush1.bf16.msra.mxu1 %v20137_v10  ;;  %15309 = vmatprep.subr.bf16.mxu0 %v20142_v56  ;;  %v11676_v10 = vadd.f32 %v24191_v51, %v8846_v14  ;;  %v11762_v56 = vadd.f32 %v24281_v49, %v8854_v47  ;;  %v20182_v49 = vld [vmem:[%s22390_s8 + $0x100] ss:$16 sps:$4 sm:$0xff]   ;;  %v20193_v30 = vld [vmem:[%s22390_s8 + $0x6e4] ss:$16 sps:$4 sm:$0xff]  }
 0xcd3   : > { %15352 = vmatprep.subr.bf16.mxu1 %v20145_v46  ;;  %v20176_v46 = vld [vmem:[%s22390_s8 + $0x120] ss:$16 sps:$4 sm:$0xff]  }
 0xcd4   : > { %v11805_v51 = vadd.f32 %v24284_v15, %v11762_v56  ;;  %v20188_v15 = vld [vmem:[%s22390_s8 + $0x4e0] ss:$16 sps:$4 sm:$0xff]  }
 0xcd5   : > { %15310 = vmatpush2.bf16.msra.mxu0 %v20140_v50  ;;  %v11672_v50 = vadd.f32 %v24119_v27, %v8846_v14  ;;  %v20185_v27 = vld [vmem:[%s22390_s8 + $0x300] ss:$16 sps:$4 sm:$0xff]  }
 0xcd6   : > { %15353 = vmatpush2.bf16.msra.mxu1 %v20143_v32  ;;  %15311 = vmatprep.subr.bf16.mxu0 %v20148_v7  ;;  %v20179_v32 = vld [vmem:[%s22390_s8 + $0x320] ss:$16 sps:$4 sm:$0xff]   ;;  %v20184_v7 = vld [vmem:[%s22390_s8 + $0x104] ss:$16 sps:$4 sm:$0xff]  }
 0xcd7   : > { %15354 = vmatprep.subr.bf16.mxu1 %v20151_v11  ;;  %v20187_v11 = vld [vmem:[%s22390_s8 + $0x304] ss:$16 sps:$4 sm:$0xff]  }
 0xcd9   : > { %15312 = vmatpush2.bf16.msra.mxu0 %v20146_v40  ;;  %v11719_v40 = vadd.f32 %v24193_v35, %v11676_v10  ;;  %v8866_v35 = vrot.slane %v24273_v48, %v22907_v21  ;;  %v20205_v10 = vld [vmem:[%s22390_s8 + $0x6a4] ss:$16 sps:$4 sm:$0xff]  }
 0xcda   : > { %15355 = vmatpush2.bf16.msra.mxu1 %v20149_v13  ;;  %15313 = vmatprep.subr.bf16.mxu0 %v20154_v31  ;;  %v11715_v13 = vadd.f32 %v24122_v39, %v11672_v50  ;;  %v20190_v31 = vld [vmem:[%s22390_s8 + $0x4e4] ss:$16 sps:$4 sm:$0xff]   ;;  %v24377_v39 = vpop.f32.mrf.mxu0  ;;  %v20200_v50 = vld [vmem:[%s22390_s8 + $0x4a0] ss:$16 sps:$4 sm:$0xff]  }
 0xcdb   : > { %15356 = vmatprep.subr.bf16.mxu1 %v20157_v8  ;;  %v11801_v8 = vadd.f32 %v24205_v34, %v11758_v6  ;;  %v24380_v34 = vpop.f32.mrf.mxu1  ;;  %v20208_v6 = vld [vmem:[%s22390_s8 + $0x484] ss:$16 sps:$4 sm:$0xff]  }
 0xcdd   : > { %15314 = vmatpush2.bf16.msra.mxu0 %v20152_v16  ;;  %v12172_v16 = vmax.f32 %v11719_v40, 0.0  ;;  %v20211_v40 = vld [vmem:[%s22390_s8 + $0x684] ss:$16 sps:$4 sm:$0xff]  }
 0xcde   : > { %15357 = vmatpush2.bf16.msra.mxu1 %v20155_v28  ;;  %15315 = vmatprep.subr.bf16.mxu0 %v20160_v2  ;;  %v12174_v28 = vmax.f32 %v11805_v51, 0.0  ;;  %v12156_v2 = vmax.f32 %v11715_v13, 0.0  ;;  %v20206_v13 = vld [vmem:[%s22390_s8 + $0x480] ss:$16 sps:$4 sm:$0xff]  }
 0xcdf   : > { %15358 = vmatprep.subr.bf16.mxu1 %v20163_v63  ;;  %v20191_v63 = vld [vmem:[%s22390_s8 + $0x6e0] ss:$16 sps:$4 sm:$0xff]  }
 0xce1   : > { %15316 = vmatpush2.bf16.msra.mxu0 %v20158_v59  ;;  %v12158_v59 = vmax.f32 %v11801_v8, 0.0 }
 0xce2   : > { %15359 = vmatpush2.bf16.msra.mxu1 %v20161_v60  ;;  %15317 = vmatprep.subr.bf16.mxu0 %v20166_v25  ;;  %v20196_v60 = vld [vmem:[%s22390_s8 + $0x4c4] ss:$16 sps:$4 sm:$0xff]   ;;  %v24383_v25 = vpack.c.bf16 %v12172_v16, %v12156_v2  ;;  %v20212_v16 = vld [vmem:[%s22390_s8 + $0x460] ss:$16 sps:$4 sm:$0xff]  }
 0xce3   : > { %15360 = vmatprep.subr.bf16.mxu1 %v20169_v29  ;;  %v20218_v2 = vld [vmem:[%s22390_s8 + $0x440] ss:$16 sps:$4 sm:$0xff]  }
 0xce5   : > { %15318 = vmatpush2.bf16.msra.mxu0 %v20164_v12  ;;  %v20199_v12 = vld [vmem:[%s22390_s8 + $0x6c4] ss:$16 sps:$4 sm:$0xff]  }
 0xce6   : > { %15361 = vmatpush2.bf16.msra.mxu1 %v20167_v19  ;;  %15319 = vmatprep.subr.bf16.mxu0 %v20172_v41  ;;  %v24387_v19 = vpack.c.bf16 %v12174_v28, %v12158_v59  ;;  %v20215_v28 = vld [vmem:[%s22390_s8 + $0x660] ss:$16 sps:$4 sm:$0xff]   ;;  %v20226_v59 = vld [vmem:[%s22390_s8 + $0x424] ss:$16 sps:$4 sm:$0xff]  }
 0xce7   : > { %15362 = vmatprep.subr.bf16.mxu1 %v20175_v9 }
 0xce9   : > { %15320 = vmatpush2.bf16.msra.mxu0 %v20170_v36  ;;  %v20194_v36 = vld [vmem:[%s22390_s8 + $0x4c0] ss:$16 sps:$4 sm:$0xff]  }
 0xcea   : > { %15363 = vmatpush2.bf16.msra.mxu1 %v20173_v38  ;;  %15321 = vmatprep.subr.bf16.mxu0 %v20178_v43  ;;  %v20197_v38 = vld [vmem:[%s22390_s8 + $0x6c0] ss:$16 sps:$4 sm:$0xff]   ;;  %v20202_v43 = vld [vmem:[%s22390_s8 + $0x4a4] ss:$16 sps:$4 sm:$0xff]  }
 0xceb   : > { %15364 = vmatprep.subr.bf16.mxu1 %v20181_v5 }
 0xced   : > { %15322 = vmatpush2.bf16.msra.mxu0 %v20176_v46 }
 0xcee   : > { %15365 = vmatpush2.bf16.msra.mxu1 %v20179_v32  ;;  %15323 = vmatprep.subr.bf16.mxu0 %v20184_v7  ;;  %v20203_v7 = vld [vmem:[%s22390_s8 + $0x6a0] ss:$16 sps:$4 sm:$0xff]  }
 0xcef   : > { %15366 = vmatprep.subr.bf16.mxu1 %v20187_v11 }
 0xcf1   : > { %15324 = vmatpush2.bf16.msra.mxu0 %v20182_v49 }
 0xcf2   : > { %15367 = vmatpush2.bf16.msra.mxu1 %v20185_v27  ;;  %15379 = vmatprep.subr.bf16.mxu0 %v20190_v31  ;;  %v20209_v27 = vld [vmem:[%s22390_s8 + $0x680] ss:$16 sps:$4 sm:$0xff]   ;;  %v20214_v31 = vld [vmem:[%s22390_s8 + $0x464] ss:$16 sps:$4 sm:$0xff]  }
 0xcf3   : > { %15422 = vmatprep.subr.bf16.mxu1 %v20193_v30  ;;  %v20217_v30 = vld [vmem:[%s22390_s8 + $0x664] ss:$16 sps:$4 sm:$0xff]  }
 0xcf4   : > { %v11927_v29 = vpop.f32.mrf.mxu0  ;;  %15326 = vmatmul.mubr.bf16.vlgmr.msra.gmra.mxu0 %v23972_v54 }
 0xcf5   : > { %v11928_v41 = vadd.f32 %v11927_v29, %v8866_v35  ;;  %v11970_v9 = vpop.f32.mrf.mxu1  ;;  %15369 = vmatmul.mubr.bf16.vlgmr.msra.gmra.mxu1 %v24052_v0  ;;  %15380 = vmatpush1.bf16.msra.mxu0 %v20188_v15  ;;  %v20223_v15 = vld [vmem:[%s22390_s8 + $0x644] ss:$16 sps:$4 sm:$0xff]   ;;  %v20224_v29 = vld [vmem:[%s22390_s8 + $0x420] ss:$16 sps:$4 sm:$0xff]  }
 0xcf6   : > { %15411 = vmatprep.mubr.bf16.mxu0 %v24383_v25  ;;  %15423 = vmatpush1.bf16.msra.mxu1 %v20191_v63  ;;  %v24392_v14 = vpop.f32.mrf.mxu0  ;;  %v20221_v63 = vld [vmem:[%s22390_s8 + $0x640] ss:$16 sps:$4 sm:$0xff]  }
 0xcf7   : > { %v11971_v47 = vadd.f32 %v11970_v9, %v11928_v41  ;;  %15454 = vmatprep.mubr.bf16.mxu1 %v24387_v19  ;;  %v24397_v5 = vpop.f32.mrf.mxu1  ;;  %15381 = vmatprep.subr.bf16.mxu0 %v20196_v60  ;;  %v20229_v60 = vld [vmem:[%s22390_s8 + $0x624] ss:$16 sps:$4 sm:$0xff]  }
 0xcf8   : > { %v11931_v56 = vpop.f32.mrf.mxu0  ;;  %15424 = vmatprep.subr.bf16.mxu1 %v20199_v12  ;;  %v20227_v12 = vld [vmem:[%s22390_s8 + $0x620] ss:$16 sps:$4 sm:$0xff]   ;;  %v20232_v41 = vld [vmem:[%s22390_s8 + $0x404] ss:$16 sps:$4 sm:$0xff]  }
 0xcf9   : > { %v11932_v46 = vadd.f32 %v11931_v56, %v8866_v35  ;;  %15382 = vmatpush1.bf16.msra.mxu0 %v20194_v36  ;;  %v11974_v32 = vpop.f32.mrf.mxu1  ;;  %v12161_v51 = vmax.f32 %v11971_v47, 0.0  ;;  %v20220_v35 = vld [vmem:[%s22390_s8 + $0x444] ss:$16 sps:$4 sm:$0xff]   ;;  %v20230_v36 = vld [vmem:[%s22390_s8 + $0x400] ss:$16 sps:$4 sm:$0xff]  }
 0xcfa   : > { %15425 = vmatpush1.bf16.msra.mxu1 %v20197_v38  ;;  %15383 = vmatprep.subr.bf16.mxu0 %v20202_v43  ;;  %v20235_v9 = vld [vmem:[%s22390_s8 + $0x604] ss:$16 sps:$4 sm:$0xff]   ;;  %v20233_v38 = vld [vmem:[%s22390_s8 + $0x600] ss:$16 sps:$4 sm:$0xff]  }
 0xcfb   : > { %v11975_v11 = vadd.f32 %v11974_v32, %v11932_v46  ;;  %15426 = vmatprep.subr.bf16.mxu1 %v20205_v10  ;;  %v20238_v43 = vld [vmem:[%s22390_s8 + $0x5e4] ss:$16 sps:$4 sm:$0xff]   ;;  %v20236_v10 = vld [vmem:[%s22390_s8 + $0x5e0] ss:$16 sps:$4 sm:$0xff]  }
 0xcfc   : > { %v20241_v47 = vld [vmem:[%s22390_s8 + $0x7e4] ss:$16 sps:$4 sm:$0xff]   ;;  %v20239_v56 = vld [vmem:[%s22390_s8 + $0x7e0] ss:$16 sps:$4 sm:$0xff]  }
 0xcfd   : > { %v12177_v49 = vmax.f32 %v11975_v11, 0.0  ;;  %15384 = vmatpush1.bf16.msra.mxu0 %v20200_v50  ;;  %v20244_v46 = vld [vmem:[%s22390_s8 + $0x5c4] ss:$16 sps:$4 sm:$0xff]   ;;  %v20242_v32 = vld [vmem:[%s22390_s8 + $0x5c0] ss:$16 sps:$4 sm:$0xff]  }
 0xcfe   : > { %15427 = vmatpush1.bf16.msra.mxu1 %v20203_v7  ;;  %15385 = vmatprep.subr.bf16.mxu0 %v20208_v6  ;;  %v20247_v50 = vld [vmem:[%s22390_s8 + $0x7c4] ss:$16 sps:$4 sm:$0xff]   ;;  %v20245_v7 = vld [vmem:[%s22390_s8 + $0x7c0] ss:$16 sps:$4 sm:$0xff]  }
 0xcff   : > { %v24407_v8 = vpack.c.bf16 %v12177_v49, %v12161_v51  ;;  %15428 = vmatprep.subr.bf16.mxu1 %v20211_v40  ;;  %v20250_v6 = vld [vmem:[%s22390_s8 + $0x5a4] ss:$16 sps:$4 sm:$0xff]   ;;  %v20248_v40 = vld [vmem:[%s22390_s8 + $0x5a0] ss:$16 sps:$4 sm:$0xff]  }
 0xd00   : > { %v20253_v11 = vld [vmem:[%s22390_s8 + $0x7a4] ss:$16 sps:$4 sm:$0xff]   ;;  %v20251_v51 = vld [vmem:[%s22390_s8 + $0x7a0] ss:$16 sps:$4 sm:$0xff]  }
 0xd01   : > { %15386 = vmatpush1.bf16.msra.mxu0 %v20206_v13  ;;  %v20256_v49 = vld [vmem:[%s22390_s8 + $0x584] ss:$16 sps:$4 sm:$0xff]  }
 0xd02   : > { %15429 = vmatpush1.bf16.msra.mxu1 %v20209_v27  ;;  %15387 = vmatprep.subr.bf16.mxu0 %v20214_v31  ;;  %v20259_v13 = vld [vmem:[%s22390_s8 + $0x784] ss:$16 sps:$4 sm:$0xff]   ;;  %v20254_v27 = vld [vmem:[%s22390_s8 + $0x580] ss:$16 sps:$4 sm:$0xff]  }
 0xd03   : > { %15430 = vmatprep.subr.bf16.mxu1 %v20217_v30  ;;  %v20257_v31 = vld [vmem:[%s22390_s8 + $0x780] ss:$16 sps:$4 sm:$0xff]   ;;  %v20262_v30 = vld [vmem:[%s22390_s8 + $0x564] ss:$16 sps:$4 sm:$0xff]  }
 0xd05   : > { %15388 = vmatpush1.bf16.msra.mxu0 %v20212_v16  ;;  %v20265_v16 = vld [vmem:[%s22390_s8 + $0x764] ss:$16 sps:$4 sm:$0xff]  }
 0xd06   : > { %15431 = vmatpush1.bf16.msra.mxu1 %v20215_v28  ;;  %15389 = vmatprep.subr.bf16.mxu0 %v20220_v35  ;;  %v20260_v28 = vld [vmem:[%s22390_s8 + $0x560] ss:$16 sps:$4 sm:$0xff]  }
 0xd07   : > { %15432 = vmatprep.subr.bf16.mxu1 %v20223_v15  ;;  %v20263_v35 = vld [vmem:[%s22390_s8 + $0x760] ss:$16 sps:$4 sm:$0xff]   ;;  %v20268_v15 = vld [vmem:[%s22390_s8 + $0x544] ss:$16 sps:$4 sm:$0xff]  }
 0xd09   : > { %15390 = vmatpush1.bf16.msra.mxu0 %v20218_v2  ;;  %v20271_v2 = vld [vmem:[%s22390_s8 + $0x744] ss:$16 sps:$4 sm:$0xff]  }
 0xd0a   : > { %15433 = vmatpush1.bf16.msra.mxu1 %v20221_v63  ;;  %15391 = vmatprep.subr.bf16.mxu0 %v20226_v59  ;;  %v20266_v63 = vld [vmem:[%s22390_s8 + $0x540] ss:$16 sps:$4 sm:$0xff]   ;;  %v8862_v59 = vrot.slane %v24273_v48, %v22887_v24 }
 0xd0b   : > { %15434 = vmatprep.subr.bf16.mxu1 %v20229_v60  ;;  %v11933_v60 = vpop.f32.mrf.mxu0 }
 0xd0d   : > { %15392 = vmatpush1.bf16.msra.mxu0 %v20224_v29  ;;  %v20269_v29 = vld [vmem:[%s22390_s8 + $0x740] ss:$16 sps:$4 sm:$0xff]  }
 0xd0e   : > { %15435 = vmatpush1.bf16.msra.mxu1 %v20227_v12  ;;  %15393 = vmatprep.subr.bf16.mxu0 %v20232_v41  ;;  %v20274_v12 = vld [vmem:[%s22390_s8 + $0x524] ss:$16 sps:$4 sm:$0xff]   ;;  %v8870_v41 = vrot.slane %v24273_v48, %v22935_v33 }
 0xd0f   : > { %15436 = vmatprep.subr.bf16.mxu1 %v20235_v9  ;;  %v20277_v9 = vld [vmem:[%s22390_s8 + $0x724] ss:$16 sps:$4 sm:$0xff]  }
 0xd11   : > { %15394 = vmatpush1.bf16.msra.mxu0 %v20230_v36  ;;  %v11848_v36 = vadd.f32 %v24377_v39, %v8862_v59  ;;  %v11976_v39 = vpop.f32.mrf.mxu1 }
 0xd12   : > { %15437 = vmatpush1.bf16.msra.mxu1 %v20233_v38  ;;  %15395 = vmatprep.subr.bf16.mxu0 %v20238_v43  ;;  %v11934_v38 = vadd.f32 %v11933_v60, %v8870_v41  ;;  %v20272_v43 = vld [vmem:[%s22390_s8 + $0x520] ss:$16 sps:$4 sm:$0xff]  }
 0xd13   : > { %15438 = vmatprep.subr.bf16.mxu1 %v20241_v47  ;;  %v11844_v47 = vadd.f32 %v24296_v17, %v8862_v59  ;;  %v20293_v60 = vld [vmem:[%s22390_s8 + $0xac0] ss:$16 sps:$4 sm:$0xff]  }
 0xd15   : > { %15396 = vmatpush2.bf16.msra.mxu0 %v20236_v10  ;;  %v20275_v10 = vld [vmem:[%s22390_s8 + $0x720] ss:$16 sps:$4 sm:$0xff]   ;;  %v11887_v17 = vadd.f32 %v24301_v52, %v11844_v47 }
 0xd16   : > { %15439 = vmatpush2.bf16.msra.mxu1 %v20239_v56  ;;  %15397 = vmatprep.subr.bf16.mxu0 %v20244_v46  ;;  %v20280_v56 = vld [vmem:[%s22390_s8 + $0x504] ss:$16 sps:$4 sm:$0xff]   ;;  %v11930_v46 = vadd.f32 %v24392_v14, %v8870_v41  ;;  %v20287_v52 = vld [vmem:[%s22390_s8 + $0xae0] ss:$16 sps:$4 sm:$0xff]  }
 0xd17   : > { %15440 = vmatprep.subr.bf16.mxu1 %v20247_v50  ;;  %v20283_v50 = vld [vmem:[%s22390_s8 + $0x704] ss:$16 sps:$4 sm:$0xff]  }
 0xd18   : > { %v20289_v14 = vld [vmem:[%s22390_s8 + $0xae4] ss:$16 sps:$4 sm:$0xff]  }
 0xd19   : > { %15398 = vmatpush2.bf16.msra.mxu0 %v20242_v32  ;;  %v11891_v32 = vadd.f32 %v24380_v34, %v11848_v36 }
 0xd1a   : > { %15441 = vmatpush2.bf16.msra.mxu1 %v20245_v7  ;;  %15399 = vmatprep.subr.bf16.mxu0 %v20250_v6  ;;  %v11977_v7 = vadd.f32 %v11976_v39, %v11934_v38  ;;  %v20278_v6 = vld [vmem:[%s22390_s8 + $0x500] ss:$16 sps:$4 sm:$0xff]  }
 0xd1b   : > { %15442 = vmatprep.subr.bf16.mxu1 %v20253_v11  ;;  %v20281_v11 = vld [vmem:[%s22390_s8 + $0x700] ss:$16 sps:$4 sm:$0xff]  }
 0xd1c   : > { %v12178_v34 = vmax.f32 %v11977_v7, 0.0  ;;  %v20302_v7 = vld [vmem:[%s22390_s8 + $0x880] ss:$16 sps:$4 sm:$0xff]  }
 0xd1d   : > { %15400 = vmatpush2.bf16.msra.mxu0 %v20248_v40  ;;  %v20286_v40 = vld [vmem:[%s22390_s8 + $0x8e4] ss:$16 sps:$4 sm:$0xff]  }
 0xd1e   : > { %15443 = vmatpush2.bf16.msra.mxu1 %v20251_v51  ;;  %15401 = vmatprep.subr.bf16.mxu0 %v20256_v49  ;;  %v11973_v51 = vadd.f32 %v24397_v5, %v11930_v46  ;;  %v12176_v49 = vmax.f32 %v11891_v32, 0.0  ;;  %v20292_v5 = vld [vmem:[%s22390_s8 + $0x8c4] ss:$16 sps:$4 sm:$0xff]  }
 0xd1f   : > { %15444 = vmatprep.subr.bf16.mxu1 %v20259_v13  ;;  %v8874_v13 = vrot.slane %v24273_v48, %v22857_v57 }
 0xd21   : > { %15402 = vmatpush2.bf16.msra.mxu0 %v20254_v27  ;;  %v20284_v27 = vld [vmem:[%s22390_s8 + $0x8e0] ss:$16 sps:$4 sm:$0xff]  }
 0xd22   : > { %15445 = vmatpush2.bf16.msra.mxu1 %v20257_v31  ;;  %15403 = vmatprep.subr.bf16.mxu0 %v20262_v30  ;;  %v12160_v31 = vmax.f32 %v11887_v17, 0.0  ;;  %v12162_v30 = vmax.f32 %v11973_v51, 0.0  ;;  %v20310_v17 = vld [vmem:[%s22390_s8 + $0x864] ss:$16 sps:$4 sm:$0xff]   ;;  %v20308_v51 = vld [vmem:[%s22390_s8 + $0x860] ss:$16 sps:$4 sm:$0xff]  }
 0xd23   : > { %15446 = vmatprep.subr.bf16.mxu1 %v20265_v16 }
 0xd24   : > { %v24473_v16 = vpack.c.bf16 %v12176_v49, %v12160_v31  ;;  %v20316_v49 = vld [vmem:[%s22390_s8 + $0x844] ss:$16 sps:$4 sm:$0xff]  }
 0xd25   : > { %15404 = vmatpush2.bf16.msra.mxu0 %v20260_v28  ;;  %v20322_v31 = vld [vmem:[%s22390_s8 + $0x824] ss:$16 sps:$4 sm:$0xff]  }
 0xd26   : > { %15447 = vmatpush2.bf16.msra.mxu1 %v20263_v35  ;;  %15405 = vmatprep.subr.bf16.mxu0 %v20268_v15  ;;  %v20295_v35 = vld [vmem:[%s22390_s8 + $0xac4] ss:$16 sps:$4 sm:$0xff]   ;;  %v24477_v15 = vpack.c.bf16 %v12178_v34, %v12162_v30  ;;  %v20320_v30 = vld [vmem:[%s22390_s8 + $0x820] ss:$16 sps:$4 sm:$0xff]  }
 0xd27   : > { %15448 = vmatprep.subr.bf16.mxu1 %v20271_v2  ;;  %v20319_v34 = vld [vmem:[%s22390_s8 + $0xa44] ss:$16 sps:$4 sm:$0xff]  }
 0xd29   : > { %15406 = vmatpush2.bf16.msra.mxu0 %v20266_v63  ;;  %v20290_v63 = vld [vmem:[%s22390_s8 + $0x8c0] ss:$16 sps:$4 sm:$0xff]  }
 0xd2a   : > { %15449 = vmatpush2.bf16.msra.mxu1 %v20269_v29  ;;  %15407 = vmatprep.subr.bf16.mxu0 %v20274_v12  ;;  %v20298_v29 = vld [vmem:[%s22390_s8 + $0x8a4] ss:$16 sps:$4 sm:$0xff]  }
 0xd2b   : > { %15450 = vmatprep.subr.bf16.mxu1 %v20277_v9  ;;  %v20301_v9 = vld [vmem:[%s22390_s8 + $0xaa4] ss:$16 sps:$4 sm:$0xff]  }
 0xd2d   : > { %15408 = vmatpush2.bf16.msra.mxu0 %v20272_v43  ;;  %v20296_v43 = vld [vmem:[%s22390_s8 + $0x8a0] ss:$16 sps:$4 sm:$0xff]  }
 0xd2e   : > { %15451 = vmatpush2.bf16.msra.mxu1 %v20275_v10  ;;  %15409 = vmatprep.subr.bf16.mxu0 %v20280_v56  ;;  %v20299_v10 = vld [vmem:[%s22390_s8 + $0xaa0] ss:$16 sps:$4 sm:$0xff]   ;;  %v20304_v56 = vld [vmem:[%s22390_s8 + $0x884] ss:$16 sps:$4 sm:$0xff]  }
 0xd2f   : > { %15452 = vmatprep.subr.bf16.mxu1 %v20283_v50  ;;  %v20307_v50 = vld [vmem:[%s22390_s8 + $0xa84] ss:$16 sps:$4 sm:$0xff]  }
 0xd31   : > { %15410 = vmatpush2.bf16.msra.mxu0 %v20278_v6  ;;  %v20305_v6 = vld [vmem:[%s22390_s8 + $0xa80] ss:$16 sps:$4 sm:$0xff]  }
 0xd32   : > { %15453 = vmatpush2.bf16.msra.mxu1 %v20281_v11  ;;  %15465 = vmatprep.subr.bf16.mxu0 %v20286_v40  ;;  %v20313_v40 = vld [vmem:[%s22390_s8 + $0xa64] ss:$16 sps:$4 sm:$0xff]  }
 0xd33   : > { %15508 = vmatprep.subr.bf16.mxu1 %v20289_v14  ;;  %v20311_v14 = vld [vmem:[%s22390_s8 + $0xa60] ss:$16 sps:$4 sm:$0xff]  }
 0xd34   : > { %v12013_v28 = vpop.f32.mrf.mxu0  ;;  %15412 = vmatmul.mubr.bf16.vlgmr.msra.gmra.mxu0 %v24132_v45 }
 0xd35   : > { %v12014_v57 = vadd.f32 %v12013_v28, %v8874_v13  ;;  %v12056_v2 = vpop.f32.mrf.mxu1  ;;  %15455 = vmatmul.mubr.bf16.vlgmr.msra.gmra.mxu1 %v24215_v62  ;;  %15466 = vmatpush1.bf16.msra.mxu0 %v20284_v27  ;;  %v20317_v27 = vld [vmem:[%s22390_s8 + $0xa40] ss:$16 sps:$4 sm:$0xff]   ;;  %v20328_v28 = vld [vmem:[%s22390_s8 + $0x804] ss:$16 sps:$4 sm:$0xff]  }
 0xd36   : > { %15497 = vmatprep.mubr.bf16.mxu0 %v24473_v16  ;;  %15509 = vmatpush1.bf16.msra.mxu1 %v20287_v52  ;;  %v24482_v59 = vpop.f32.mrf.mxu0  ;;  %v20325_v52 = vld [vmem:[%s22390_s8 + $0xa24] ss:$16 sps:$4 sm:$0xff]  }
 0xd37   : > { %v12057_v12 = vadd.f32 %v12056_v2, %v12014_v57  ;;  %15540 = vmatprep.mubr.bf16.mxu1 %v24477_v15  ;;  %v24487_v41 = vpop.f32.mrf.mxu1  ;;  %15467 = vmatprep.subr.bf16.mxu0 %v20292_v5  ;;  %v20323_v5 = vld [vmem:[%s22390_s8 + $0xa20] ss:$16 sps:$4 sm:$0xff]  }
 0xd38   : > { %v12017_v36 = vpop.f32.mrf.mxu0  ;;  %15510 = vmatprep.subr.bf16.mxu1 %v20295_v35  ;;  %v20331_v35 = vld [vmem:[%s22390_s8 + $0xa04] ss:$16 sps:$4 sm:$0xff]   ;;  %v20326_v57 = vld [vmem:[%s22390_s8 + $0x800] ss:$16 sps:$4 sm:$0xff]  }
 0xd39   : > { %v12018_v38 = vadd.f32 %v12017_v36, %v8874_v13  ;;  %15468 = vmatpush1.bf16.msra.mxu0 %v20290_v63  ;;  %v12060_v47 = vpop.f32.mrf.mxu1  ;;  %v12163_v32 = vmax.f32 %v12057_v12, 0.0  ;;  %v20314_v13 = vld [vmem:[%s22390_s8 + $0x840] ss:$16 sps:$4 sm:$0xff]   ;;  %v20334_v63 = vld [vmem:[%s22390_s8 + $0x9e4] ss:$16 sps:$4 sm:$0xff]  }
 0xd3a   : > { %15511 = vmatpush1.bf16.msra.mxu1 %v20293_v60  ;;  %15469 = vmatprep.subr.bf16.mxu0 %v20298_v29  ;;  %v20329_v2 = vld [vmem:[%s22390_s8 + $0xa00] ss:$16 sps:$4 sm:$0xff]   ;;  %v20337_v60 = vld [vmem:[%s22390_s8 + $0xbe4] ss:$16 sps:$4 sm:$0xff]  }
 0xd3b   : > { %v12061_v46 = vadd.f32 %v12060_v47, %v12018_v38  ;;  %15512 = vmatprep.subr.bf16.mxu1 %v20301_v9  ;;  %v20332_v29 = vld [vmem:[%s22390_s8 + $0x9e0] ss:$16 sps:$4 sm:$0xff]   ;;  %v20340_v9 = vld [vmem:[%s22390_s8 + $0x9c4] ss:$16 sps:$4 sm:$0xff]  }
 0xd3c   : > { %v20335_v12 = vld [vmem:[%s22390_s8 + $0xbe0] ss:$16 sps:$4 sm:$0xff]   ;;  %v20343_v36 = vld [vmem:[%s22390_s8 + $0xbc4] ss:$16 sps:$4 sm:$0xff]  }
 0xd3d   : > { %v12179_v39 = vmax.f32 %v12061_v46, 0.0  ;;  %15470 = vmatpush1.bf16.msra.mxu0 %v20296_v43  ;;  %v20338_v38 = vld [vmem:[%s22390_s8 + $0x9c0] ss:$16 sps:$4 sm:$0xff]   ;;  %v20346_v47 = vld [vmem:[%s22390_s8 + $0x9a4] ss:$16 sps:$4 sm:$0xff]  }
 0xd3e   : > { %15513 = vmatpush1.bf16.msra.mxu1 %v20299_v10  ;;  %15471 = vmatprep.subr.bf16.mxu0 %v20304_v56  ;;  %v20341_v43 = vld [vmem:[%s22390_s8 + $0xbc0] ss:$16 sps:$4 sm:$0xff]   ;;  %v20349_v10 = vld [vmem:[%s22390_s8 + $0xba4] ss:$16 sps:$4 sm:$0xff]  }
 0xd3f   : > { %v24497_v11 = vpack.c.bf16 %v12179_v39, %v12163_v32  ;;  %15514 = vmatprep.subr.bf16.mxu1 %v20307_v50  ;;  %v20344_v56 = vld [vmem:[%s22390_s8 + $0x9a0] ss:$16 sps:$4 sm:$0xff]   ;;  %v20352_v50 = vld [vmem:[%s22390_s8 + $0x984] ss:$16 sps:$4 sm:$0xff]  }
 0xd40   : > { %v20347_v46 = vld [vmem:[%s22390_s8 + $0xba0] ss:$16 sps:$4 sm:$0xff]   ;;  %v20355_v32 = vld [vmem:[%s22390_s8 + $0xb84] ss:$16 sps:$4 sm:$0xff]  }
 0xd41   : > { %15472 = vmatpush1.bf16.msra.mxu0 %v20302_v7  ;;  %v20350_v39 = vld [vmem:[%s22390_s8 + $0x980] ss:$16 sps:$4 sm:$0xff]  }
 0xd42   : > { %15515 = vmatpush1.bf16.msra.mxu1 %v20305_v6  ;;  %15473 = vmatprep.subr.bf16.mxu0 %v20310_v17  ;;  %v20353_v7 = vld [vmem:[%s22390_s8 + $0xb80] ss:$16 sps:$4 sm:$0xff]   ;;  %v20358_v6 = vld [vmem:[%s22390_s8 + $0x964] ss:$16 sps:$4 sm:$0xff]  }
 0xd43   : > { %15516 = vmatprep.subr.bf16.mxu1 %v20313_v40  ;;  %v20361_v17 = vld [vmem:[%s22390_s8 + $0xb64] ss:$16 sps:$4 sm:$0xff]   ;;  %v20356_v40 = vld [vmem:[%s22390_s8 + $0x960] ss:$16 sps:$4 sm:$0xff]  }
 0xd45   : > { %15474 = vmatpush1.bf16.msra.mxu0 %v20308_v51  ;;  %v20359_v51 = vld [vmem:[%s22390_s8 + $0xb60] ss:$16 sps:$4 sm:$0xff]  }
 0xd46   : > { %15517 = vmatpush1.bf16.msra.mxu1 %v20311_v14  ;;  %15475 = vmatprep.subr.bf16.mxu0 %v20316_v49  ;;  %v20364_v14 = vld [vmem:[%s22390_s8 + $0x944] ss:$16 sps:$4 sm:$0xff]  }
 0xd47   : > { %15518 = vmatprep.subr.bf16.mxu1 %v20319_v34  ;;  %v20367_v49 = vld [vmem:[%s22390_s8 + $0xb44] ss:$16 sps:$4 sm:$0xff]   ;;  %v12019_v34 = vpop.f32.mrf.mxu0 }
 0xd49   : > { %15476 = vmatpush1.bf16.msra.mxu0 %v20314_v13  ;;  %v20362_v13 = vld [vmem:[%s22390_s8 + $0x940] ss:$16 sps:$4 sm:$0xff]  }
 0xd4a   : > { %15519 = vmatpush1.bf16.msra.mxu1 %v20317_v27  ;;  %15477 = vmatprep.subr.bf16.mxu0 %v20322_v31  ;;  %v8878_v27 = vrot.slane %v24273_v48, %v22878_v4  ;;  %v20365_v31 = vld [vmem:[%s22390_s8 + $0xb40] ss:$16 sps:$4 sm:$0xff]   ;;  %v20376_v4 = vld [vmem:[%s22390_s8 + $0x904] ss:$16 sps:$4 sm:$0xff]  }
 0xd4b   : > { %15520 = vmatprep.subr.bf16.mxu1 %v20325_v52  ;;  %v20370_v52 = vld [vmem:[%s22390_s8 + $0x924] ss:$16 sps:$4 sm:$0xff]  }
 0xd4d   : > { %15478 = vmatpush1.bf16.msra.mxu0 %v20320_v30  ;;  %v20373_v30 = vld [vmem:[%s22390_s8 + $0xb24] ss:$16 sps:$4 sm:$0xff]  }
 0xd4e   : > { %15521 = vmatpush1.bf16.msra.mxu1 %v20323_v5  ;;  %15479 = vmatprep.subr.bf16.mxu0 %v20328_v28  ;;  %v12020_v5 = vadd.f32 %v12019_v34, %v8878_v27  ;;  %v20368_v28 = vld [vmem:[%s22390_s8 + $0x920] ss:$16 sps:$4 sm:$0xff]  }
 0xd4f   : > { %15522 = vmatprep.subr.bf16.mxu1 %v20331_v35  ;;  %v12016_v35 = vadd.f32 %v24482_v59, %v8878_v27  ;;  %v20377_v59 = vld [vmem:[%s22390_s8 + $0xb00] ss:$16 sps:$4 sm:$0xff]  }
 0xd50   : > { %v20392_v34 = vld [vmem:[%s22390_s8 + $0xca0] ss:$16 sps:$4 sm:$0xff]  }
 0xd51   : > { %15480 = vmatpush1.bf16.msra.mxu0 %v20326_v57  ;;  %v20371_v57 = vld [vmem:[%s22390_s8 + $0xb20] ss:$16 sps:$4 sm:$0xff]  }
 0xd52   : > { %15523 = vmatpush1.bf16.msra.mxu1 %v20329_v2  ;;  %15481 = vmatprep.subr.bf16.mxu0 %v20334_v63  ;;  %v12062_v2 = vpop.f32.mrf.mxu1  ;;  %v20379_v63 = vld [vmem:[%s22390_s8 + $0xb04] ss:$16 sps:$4 sm:$0xff]   ;;  %v20395_v27 = vld [vmem:[%s22390_s8 + $0xea0] ss:$16 sps:$4 sm:$0xff]  }
 0xd53   : > { %15524 = vmatprep.subr.bf16.mxu1 %v20337_v60  ;;  %v12063_v60 = vadd.f32 %v12062_v2, %v12020_v5  ;;  %v20403_v5 = vld [vmem:[%s22390_s8 + $0xe84] ss:$16 sps:$4 sm:$0xff]  }
 0xd54   : > { %v20406_v2 = vld [vmem:[%s22390_s8 + $0xc64] ss:$16 sps:$4 sm:$0xff]  }
 0xd55   : > { %15482 = vmatpush2.bf16.msra.mxu0 %v20332_v29  ;;  %v20374_v29 = vld [vmem:[%s22390_s8 + $0x900] ss:$16 sps:$4 sm:$0xff]  }
 0xd56   : > { %15525 = vmatpush2.bf16.msra.mxu1 %v20335_v12  ;;  %15483 = vmatprep.subr.bf16.mxu0 %v20340_v9  ;;  %v12059_v12 = vadd.f32 %v24487_v41, %v12016_v35  ;;  %v20382_v9 = vld [vmem:[%s22390_s8 + $0xce4] ss:$16 sps:$4 sm:$0xff]   ;;  %v8886_v41 = vrot.slane %v24273_v48, %v22970_v44  ;;  %v20389_v48 = vld [vmem:[%s22390_s8 + $0xec0] ss:$16 sps:$4 sm:$0xff]  }
 0xd57   : > { %15526 = vmatprep.subr.bf16.mxu1 %v20343_v36  ;;  %v20385_v36 = vld [vmem:[%s22390_s8 + $0xee4] ss:$16 sps:$4 sm:$0xff]  }
 0xd59   : > { %15484 = vmatpush2.bf16.msra.mxu0 %v20338_v38  ;;  %v12180_v38 = vmax.f32 %v12063_v60, 0.0 }
 0xd5a   : > { %15527 = vmatpush2.bf16.msra.mxu1 %v20341_v43  ;;  %15485 = vmatprep.subr.bf16.mxu0 %v20346_v47  ;;  %v20380_v43 = vld [vmem:[%s22390_s8 + $0xce0] ss:$16 sps:$4 sm:$0xff]   ;;  %v12164_v47 = vmax.f32 %v12059_v12, 0.0 }
 0xd5b   : > { %15528 = vmatprep.subr.bf16.mxu1 %v20349_v10  ;;  %v20383_v10 = vld [vmem:[%s22390_s8 + $0xee0] ss:$16 sps:$4 sm:$0xff]  }
 0xd5d   : > { %15486 = vmatpush2.bf16.msra.mxu0 %v20344_v56  ;;  %v20388_v56 = vld [vmem:[%s22390_s8 + $0xcc4] ss:$16 sps:$4 sm:$0xff]  }
 0xd5e   : > { %15529 = vmatpush2.bf16.msra.mxu1 %v20347_v46  ;;  %15487 = vmatprep.subr.bf16.mxu0 %v20352_v50  ;;  %v20391_v46 = vld [vmem:[%s22390_s8 + $0xec4] ss:$16 sps:$4 sm:$0xff]   ;;  %v24558_v50 = vpack.c.bf16 %v12180_v38, %v12164_v47  ;;  %v20413_v47 = vld [vmem:[%s22390_s8 + $0xe40] ss:$16 sps:$4 sm:$0xff]  }
 0xd5f   : > { %15530 = vmatprep.subr.bf16.mxu1 %v20355_v32  ;;  %v20415_v38 = vld [vmem:[%s22390_s8 + $0xe44] ss:$16 sps:$4 sm:$0xff]  }
 0xd61   : > { %15488 = vmatpush2.bf16.msra.mxu0 %v20350_v39 }
 0xd62   : > { %15531 = vmatpush2.bf16.msra.mxu1 %v20353_v7  ;;  %15489 = vmatprep.subr.bf16.mxu0 %v20358_v6  ;;  %v20386_v7 = vld [vmem:[%s22390_s8 + $0xcc0] ss:$16 sps:$4 sm:$0xff]   ;;  %v20394_v6 = vld [vmem:[%s22390_s8 + $0xca4] ss:$16 sps:$4 sm:$0xff]  }
 0xd63   : > { %15532 = vmatprep.subr.bf16.mxu1 %v20361_v17 }
 0xd65   : > { %15490 = vmatpush2.bf16.msra.mxu0 %v20356_v40 }
 0xd66   : > { %15533 = vmatpush2.bf16.msra.mxu1 %v20359_v51  ;;  %15491 = vmatprep.subr.bf16.mxu0 %v20364_v14  ;;  %v20397_v51 = vld [vmem:[%s22390_s8 + $0xea4] ss:$16 sps:$4 sm:$0xff]  }
 0xd67   : > { %15534 = vmatprep.subr.bf16.mxu1 %v20367_v49 }
 0xd69   : > { %15492 = vmatpush2.bf16.msra.mxu0 %v20362_v13 }
 0xd6a   : > { %15535 = vmatpush2.bf16.msra.mxu1 %v20365_v31  ;;  %15493 = vmatprep.subr.bf16.mxu0 %v20370_v52  ;;  %v20400_v31 = vld [vmem:[%s22390_s8 + $0xc84] ss:$16 sps:$4 sm:$0xff]  }
 0xd6b   : > { %15536 = vmatprep.subr.bf16.mxu1 %v20373_v30 }
 0xd6d   : > { %15494 = vmatpush2.bf16.msra.mxu0 %v20368_v28 }
 0xd6e   : > { %15537 = vmatpush2.bf16.msra.mxu1 %v20371_v57  ;;  %15495 = vmatprep.subr.bf16.mxu0 %v20376_v4  ;;  %v20398_v57 = vld [vmem:[%s22390_s8 + $0xc80] ss:$16 sps:$4 sm:$0xff]  }
 0xd6f   : > { %15538 = vmatprep.subr.bf16.mxu1 %v20379_v63  ;;  %v20401_v4 = vld [vmem:[%s22390_s8 + $0xe80] ss:$16 sps:$4 sm:$0xff]  }
 0xd71   : > { %15496 = vmatpush2.bf16.msra.mxu0 %v20374_v29  ;;  %v20409_v29 = vld [vmem:[%s22390_s8 + $0xe64] ss:$16 sps:$4 sm:$0xff]  }
 0xd72   : > { %15539 = vmatpush2.bf16.msra.mxu1 %v20377_v59  ;;  %15551 = vmatprep.subr.bf16.mxu0 %v20382_v9  ;;  %v20404_v59 = vld [vmem:[%s22390_s8 + $0xc60] ss:$16 sps:$4 sm:$0xff]  }
 0xd73   : > { %15594 = vmatprep.subr.bf16.mxu1 %v20385_v36  ;;  %v20407_v9 = vld [vmem:[%s22390_s8 + $0xe60] ss:$16 sps:$4 sm:$0xff]   ;;  %v20412_v36 = vld [vmem:[%s22390_s8 + $0xc44] ss:$16 sps:$4 sm:$0xff]  }
 0xd74   : > { %v24560_v32 = vpop.f32.mrf.mxu0  ;;  %15498 = vmatmul.mubr.bf16.vlgmr.msra.gmra.mxu0 %v24311_v26 }
 0xd75   : > { %v24563_v39 = vpop.f32.mrf.mxu1  ;;  %15541 = vmatmul.mubr.bf16.vlgmr.msra.gmra.mxu1 %v24407_v8  ;;  %15552 = vmatpush1.bf16.msra.mxu0 %v20380_v43  ;;  %v20410_v43 = vld [vmem:[%s22390_s8 + $0xc40] ss:$16 sps:$4 sm:$0xff]  }
 0xd76   : > { %15583 = vmatprep.mubr.bf16.mxu0 %v24558_v50  ;;  %15595 = vmatpush1.bf16.msra.mxu1 %v20383_v10  ;;  %v12101_v44 = vpop.f32.mrf.mxu0  ;;  %v20418_v10 = vld [vmem:[%s22390_s8 + $0xc24] ss:$16 sps:$4 sm:$0xff]  }
 0xd77   : > { %v12102_v17 = vadd.f32 %v12101_v44, %v8886_v41  ;;  %v12144_v40 = vpop.f32.mrf.mxu1  ;;  %15553 = vmatprep.subr.bf16.mxu0 %v20388_v56  ;;  %15596 = vmatprep.subr.bf16.mxu1 %v20391_v46  ;;  %v20416_v56 = vld [vmem:[%s22390_s8 + $0xc20] ss:$16 sps:$4 sm:$0xff]   ;;  %v20427_v44 = vld [vmem:[%s22390_s8 + $0xe04] ss:$16 sps:$4 sm:$0xff]  }
 0xd78   : > { %v24571_v14 = vpop.f32.mrf.mxu0  ;;  %v20419_v46 = vld [vmem:[%s22390_s8 + $0xe20] ss:$16 sps:$4 sm:$0xff]  }
 0xd79   : > { %v24573_v49 = vpop.f32.mrf.mxu1  ;;  %15554 = vmatpush1.bf16.msra.mxu0 %v20386_v7  ;;  %v12145_v52 = vadd.f32 %v12144_v40, %v12102_v17  ;;  %v20424_v7 = vld [vmem:[%s22390_s8 + $0xc04] ss:$16 sps:$4 sm:$0xff]  }
 0xd7a   : > { %15597 = vmatpush1.bf16.msra.mxu1 %v20389_v48  ;;  %v12105_v13 = vpop.f32.mrf.mxu0  ;;  %15555 = vmatprep.subr.bf16.mxu0 %v20394_v6  ;;  %v20422_v48 = vld [vmem:[%s22390_s8 + $0xc00] ss:$16 sps:$4 sm:$0xff]   ;;  %v20430_v17 = vld [vmem:[%s22390_s8 + $0xde4] ss:$16 sps:$4 sm:$0xff]  }
 0xd7b   : > { %v12106_v30 = vadd.f32 %v12105_v13, %v8886_v41  ;;  %15598 = vmatprep.subr.bf16.mxu1 %v20397_v51  ;;  %v12148_v28 = vpop.f32.mrf.mxu1  ;;  %v12166_v63 = vmax.f32 %v12145_v52, 0.0  ;;  %v20421_v41 = vld [vmem:[%s22390_s8 + $0xe24] ss:$16 sps:$4 sm:$0xff]   ;;  %v20425_v6 = vld [vmem:[%s22390_s8 + $0xe00] ss:$16 sps:$4 sm:$0xff]  }
 0xd7c   : > { %v20433_v40 = vld [vmem:[%s22390_s8 + $0xfe4] ss:$16 sps:$4 sm:$0xff]   ;;  %v20428_v51 = vld [vmem:[%s22390_s8 + $0xde0] ss:$16 sps:$4 sm:$0xff]  }
 0xd7d   : > { %v12149_v35 = vadd.f32 %v12148_v28, %v12106_v30  ;;  %15556 = vmatpush1.bf16.msra.mxu0 %v20392_v34  ;;  %v20431_v34 = vld [vmem:[%s22390_s8 + $0xfe0] ss:$16 sps:$4 sm:$0xff]   ;;  %v20436_v13 = vld [vmem:[%s22390_s8 + $0xdc4] ss:$16 sps:$4 sm:$0xff]  }
 0xd7e   : > { %15599 = vmatpush1.bf16.msra.mxu1 %v20395_v27  ;;  %15557 = vmatprep.subr.bf16.mxu0 %v20400_v31  ;;  %v20439_v27 = vld [vmem:[%s22390_s8 + $0xfc4] ss:$16 sps:$4 sm:$0xff]   ;;  %v20434_v31 = vld [vmem:[%s22390_s8 + $0xdc0] ss:$16 sps:$4 sm:$0xff]  }
 0xd7f   : > { %v12182_v60 = vmax.f32 %v12149_v35, 0.0  ;;  %15600 = vmatprep.subr.bf16.mxu1 %v20403_v5  ;;  %v20437_v52 = vld [vmem:[%s22390_s8 + $0xfc0] ss:$16 sps:$4 sm:$0xff]   ;;  %v20442_v30 = vld [vmem:[%s22390_s8 + $0xda4] ss:$16 sps:$4 sm:$0xff]  }
 0xd80   : > { %v20445_v5 = vld [vmem:[%s22390_s8 + $0xfa4] ss:$16 sps:$4 sm:$0xff]   ;;  %v20440_v28 = vld [vmem:[%s22390_s8 + $0xda0] ss:$16 sps:$4 sm:$0xff]  }
 0xd81   : > { %v24583_v12 = vpack.c.bf16 %v12182_v60, %v12166_v63  ;;  %15558 = vmatpush1.bf16.msra.mxu0 %v20398_v57  ;;  %v20443_v35 = vld [vmem:[%s22390_s8 + $0xfa0] ss:$16 sps:$4 sm:$0xff]   ;;  %v20448_v57 = vld [vmem:[%s22390_s8 + $0xd84] ss:$16 sps:$4 sm:$0xff]  }
 0xd82   : > { %15601 = vmatpush1.bf16.msra.mxu1 %v20401_v4  ;;  %15559 = vmatprep.subr.bf16.mxu0 %v20406_v2  ;;  %v20451_v4 = vld [vmem:[%s22390_s8 + $0xf84] ss:$16 sps:$4 sm:$0xff]   ;;  %v20446_v2 = vld [vmem:[%s22390_s8 + $0xd80] ss:$16 sps:$4 sm:$0xff]  }
 0xd83   : > { %15626 = vmatprep.mubr.bf16.mxu1 %v24583_v12  ;;  %15602 = vmatprep.subr.bf16.mxu1 %v20409_v29  ;;  %v20449_v63 = vld [vmem:[%s22390_s8 + $0xf80] ss:$16 sps:$4 sm:$0xff]   ;;  %v20454_v60 = vld [vmem:[%s22390_s8 + $0xd64] ss:$16 sps:$4 sm:$0xff]  }
 0xd84   : > { %v20457_v29 = vld [vmem:[%s22390_s8 + $0xf64] ss:$16 sps:$4 sm:$0xff]  }
 0xd85   : > { %15560 = vmatpush1.bf16.msra.mxu0 %v20404_v59  ;;  %v20452_v59 = vld [vmem:[%s22390_s8 + $0xd60] ss:$16 sps:$4 sm:$0xff]  }
 0xd86   : > { %15603 = vmatpush1.bf16.msra.mxu1 %v20407_v9  ;;  %15561 = vmatprep.subr.bf16.mxu0 %v20412_v36  ;;  %v20455_v9 = vld [vmem:[%s22390_s8 + $0xf60] ss:$16 sps:$4 sm:$0xff]   ;;  %v20460_v36 = vld [vmem:[%s22390_s8 + $0xd44] ss:$16 sps:$4 sm:$0xff]  }
 0xd87   : > { %15604 = vmatprep.subr.bf16.mxu1 %v20415_v38  ;;  %v20463_v38 = vld [vmem:[%s22390_s8 + $0xf44] ss:$16 sps:$4 sm:$0xff]  }
 0xd89   : > { %15562 = vmatpush1.bf16.msra.mxu0 %v20410_v43  ;;  %v20941_v43 = vld [vmem:[%s22388_s28 + $0x8] sm:$0xff] }
 0xd8a   : > { %15605 = vmatpush1.bf16.msra.mxu1 %v20413_v47  ;;  %15563 = vmatprep.subr.bf16.mxu0 %v20418_v10  ;;  %v8882_v47 = vrot.slane %v20941_v43, %v22965_v42  ;;  %v20458_v10 = vld [vmem:[%s22390_s8 + $0xd40] ss:$16 sps:$4 sm:$0xff]   ;;  %v20508_v43 = vld [vmem:[%s22390_s8 + $0x4c] ss:$16 sps:$4 sm:$0xff]  }
 0xd8b   : > { %15606 = vmatprep.subr.bf16.mxu1 %v20421_v41  ;;  %v20461_v41 = vld [vmem:[%s22390_s8 + $0xf40] ss:$16 sps:$4 sm:$0xff]  }
 0xd8c   : > { %v20467_v42 = vld [vmem:[%s22390_s8 + $0xf20] ss:$16 sps:$4 sm:$0xff]  }
 0xd8d   : > { %15564 = vmatpush1.bf16.msra.mxu0 %v20416_v56  ;;  %v20466_v56 = vld [vmem:[%s22390_s8 + $0xd24] ss:$16 sps:$4 sm:$0xff]  }
 0xd8e   : > { %15607 = vmatpush1.bf16.msra.mxu1 %v20419_v46  ;;  %15565 = vmatprep.subr.bf16.mxu0 %v20424_v7  ;;  %v12104_v46 = vadd.f32 %v24571_v14, %v8882_v47  ;;  %v20469_v7 = vld [vmem:[%s22390_s8 + $0xf24] ss:$16 sps:$4 sm:$0xff]  }
 0xd8f   : > { %15608 = vmatprep.subr.bf16.mxu1 %v20427_v44  ;;  %v12100_v44 = vadd.f32 %v24560_v32, %v8882_v47  ;;  %v20473_v32 = vld [vmem:[%s22390_s8 + $0xf00] ss:$16 sps:$4 sm:$0xff]   ;;  %v20511_v47 = vld [vmem:[%s22390_s8 + $0x24c] ss:$16 sps:$4 sm:$0xff]  }
 0xd91   : > { %15566 = vmatpush1.bf16.msra.mxu0 %v20422_v48  ;;  %v20464_v48 = vld [vmem:[%s22390_s8 + $0xd20] ss:$16 sps:$4 sm:$0xff]   ;;  %v12143_v14 = vadd.f32 %v24563_v39, %v12100_v44  ;;  %v20479_v39 = vld [vmem:[%s22390_s8 + $0x2e8] ss:$16 sps:$4 sm:$0xff]  }
 0xd92   : > { %15609 = vmatpush1.bf16.msra.mxu1 %v20425_v6  ;;  %15567 = vmatprep.subr.bf16.mxu0 %v20430_v17  ;;  %v20472_v6 = vld [vmem:[%s22390_s8 + $0xd04] ss:$16 sps:$4 sm:$0xff]   ;;  %v12147_v17 = vadd.f32 %v24573_v49, %v12104_v46  ;;  %v20476_v49 = vld [vmem:[%s22390_s8 + $0xe8] ss:$16 sps:$4 sm:$0xff]   ;;  %v20517_v46 = vld [vmem:[%s22390_s8 + $0x22c] ss:$16 sps:$4 sm:$0xff]  }
 0xd93   : > { %15610 = vmatprep.subr.bf16.mxu1 %v20433_v40  ;;  %v20475_v40 = vld [vmem:[%s22390_s8 + $0xf04] ss:$16 sps:$4 sm:$0xff]   ;;  %v20515_v44 = vld [vmem:[%s22390_s8 + $0x228] ss:$16 sps:$4 sm:$0xff]  }
 0xd95   : > { %15568 = vmatpush2.bf16.msra.mxu0 %v20428_v51  ;;  %v20470_v51 = vld [vmem:[%s22390_s8 + $0xd00] ss:$16 sps:$4 sm:$0xff]  }
 0xd96   : > { %15611 = vmatpush2.bf16.msra.mxu1 %v20431_v34  ;;  %15569 = vmatprep.subr.bf16.mxu0 %v20436_v13  ;;  %v20478_v34 = vld [vmem:[%s22390_s8 + $0xec] ss:$16 sps:$4 sm:$0xff]   ;;  %v12181_v13 = vmax.f32 %v12147_v17, 0.0  ;;  %v20521_v17 = vld [vmem:[%s22390_s8 + $0x208] ss:$16 sps:$4 sm:$0xff]  }
 0xd97   : > { %15612 = vmatprep.subr.bf16.mxu1 %v20439_v27  ;;  %v20481_v27 = vld [vmem:[%s22390_s8 + $0x2ec] ss:$16 sps:$4 sm:$0xff]  }
 0xd99   : > { %15570 = vmatpush2.bf16.msra.mxu0 %v20434_v31  ;;  %v12165_v31 = vmax.f32 %v12143_v14, 0.0  ;;  %v20529_v14 = vld [vmem:[%s22390_s8 + $0x3ec] ss:$16 sps:$4 sm:$0xff]  }
 0xd9a   : > { %15613 = vmatpush2.bf16.msra.mxu1 %v20437_v52  ;;  %15571 = vmatprep.subr.bf16.mxu0 %v20442_v30  ;;  %v20484_v30 = vld [vmem:[%s22390_s8 + $0xcc] ss:$16 sps:$4 sm:$0xff]  }
 0xd9b   : > { %15614 = vmatprep.subr.bf16.mxu1 %v20445_v5  ;;  %v24642_v52 = vpack.c.bf16 %v12181_v13, %v12165_v31  ;;  %v20487_v5 = vld [vmem:[%s22390_s8 + $0x2cc] ss:$16 sps:$4 sm:$0xff]   ;;  %v20533_v31 = vld [vmem:[%s22390_s8 + $0x3c8] ss:$16 sps:$4 sm:$0xff]  }
 0xd9c   : > { %v20535_v13 = vld [vmem:[%s22390_s8 + $0x3cc] ss:$16 sps:$4 sm:$0xff]  }
 0xd9d   : > { %15572 = vmatpush2.bf16.msra.mxu0 %v20440_v28  ;;  %v20482_v28 = vld [vmem:[%s22390_s8 + $0xc8] ss:$16 sps:$4 sm:$0xff]  }
 0xd9e   : > { %15615 = vmatpush2.bf16.msra.mxu1 %v20443_v35  ;;  %15573 = vmatprep.subr.bf16.mxu0 %v20448_v57  ;;  %v20485_v35 = vld [vmem:[%s22390_s8 + $0x2c8] ss:$16 sps:$4 sm:$0xff]   ;;  %v20490_v57 = vld [vmem:[%s22390_s8 + $0xac] ss:$16 sps:$4 sm:$0xff]  }
 0xd9f   : > { %15616 = vmatprep.subr.bf16.mxu1 %v20451_v4  ;;  %v20493_v4 = vld [vmem:[%s22390_s8 + $0x2ac] ss:$16 sps:$4 sm:$0xff]  }
 0xda1   : > { %15574 = vmatpush2.bf16.msra.mxu0 %v20446_v2  ;;  %v20488_v2 = vld [vmem:[%s22390_s8 + $0xa8] ss:$16 sps:$4 sm:$0xff]  }
 0xda2   : > { %15617 = vmatpush2.bf16.msra.mxu1 %v20449_v63  ;;  %15575 = vmatprep.subr.bf16.mxu0 %v20454_v60  ;;  %v20491_v63 = vld [vmem:[%s22390_s8 + $0x2a8] ss:$16 sps:$4 sm:$0xff]   ;;  %v20499_v60 = vld [vmem:[%s22390_s8 + $0x28c] ss:$16 sps:$4 sm:$0xff]  }
 0xda3   : > { %15618 = vmatprep.subr.bf16.mxu1 %v20457_v29  ;;  %v20497_v29 = vld [vmem:[%s22390_s8 + $0x288] ss:$16 sps:$4 sm:$0xff]  }
 0xda5   : > { %15576 = vmatpush2.bf16.msra.mxu0 %v20452_v59  ;;  %v20502_v59 = vld [vmem:[%s22390_s8 + $0x6c] ss:$16 sps:$4 sm:$0xff]  }
 0xda6   : > { %15619 = vmatpush2.bf16.msra.mxu1 %v20455_v9  ;;  %15577 = vmatprep.subr.bf16.mxu0 %v20460_v36  ;;  %v20505_v9 = vld [vmem:[%s22390_s8 + $0x26c] ss:$16 sps:$4 sm:$0xff]   ;;  %v20500_v36 = vld [vmem:[%s22390_s8 + $0x68] ss:$16 sps:$4 sm:$0xff]  }
 0xda7   : > { %15620 = vmatprep.subr.bf16.mxu1 %v20463_v38  ;;  %v20503_v38 = vld [vmem:[%s22390_s8 + $0x268] ss:$16 sps:$4 sm:$0xff]  }
 0xda9   : > { %15578 = vmatpush2.bf16.msra.mxu0 %v20458_v10  ;;  %v20506_v10 = vld [vmem:[%s22390_s8 + $0x48] ss:$16 sps:$4 sm:$0xff]  }
 0xdaa   : > { %15621 = vmatpush2.bf16.msra.mxu1 %v20461_v41  ;;  %15579 = vmatprep.subr.bf16.mxu0 %v20466_v56  ;;  %v20509_v41 = vld [vmem:[%s22390_s8 + $0x248] ss:$16 sps:$4 sm:$0xff]   ;;  %v20514_v56 = vld [vmem:[%s22390_s8 + $0x2c] ss:$16 sps:$4 sm:$0xff]  }
 0xdab   : > { %15622 = vmatprep.subr.bf16.mxu1 %v20469_v7  ;;  %v20512_v7 = vld [vmem:[%s22390_s8 + $0x28] ss:$16 sps:$4 sm:$0xff]  }
 0xdad   : > { %15580 = vmatpush2.bf16.msra.mxu0 %v20464_v48  ;;  %v20520_v48 = vld [vmem:[%s22390_s8 + $0xc] ss:$16 sps:$4 sm:$0xff]  }
 0xdae   : > { %15623 = vmatpush2.bf16.msra.mxu1 %v20467_v42  ;;  %15581 = vmatprep.subr.bf16.mxu0 %v20472_v6  ;;  %v20523_v42 = vld [vmem:[%s22390_s8 + $0x20c] ss:$16 sps:$4 sm:$0xff]   ;;  %v20518_v6 = vld [vmem:[%s22390_s8 + $0x8] ss:$16 sps:$4 sm:$0xff]  }
 0xdaf   : > { %15624 = vmatprep.subr.bf16.mxu1 %v20475_v40  ;;  %v20526_v40 = vld [vmem:[%s22390_s8 + $0x1ec] ss:$16 sps:$4 sm:$0xff]  }
 0xdb1   : > { %15582 = vmatpush2.bf16.msra.mxu0 %v20470_v51  ;;  %v20524_v51 = vld [vmem:[%s22390_s8 + $0x1e8] ss:$16 sps:$4 sm:$0xff]  }
 0xdb2   : > { %15625 = vmatpush2.bf16.msra.mxu1 %v20473_v32  ;;  %15637 = vmatprep.subr.bf16.mxu0 %v20478_v34  ;;  %v20527_v32 = vld [vmem:[%s22390_s8 + $0x3e8] ss:$16 sps:$4 sm:$0xff]   ;;  %v20532_v34 = vld [vmem:[%s22390_s8 + $0x1cc] ss:$16 sps:$4 sm:$0xff]  }
 0xdb3   : > { %15680 = vmatprep.subr.bf16.mxu1 %v20481_v27  ;;  %v20530_v27 = vld [vmem:[%s22390_s8 + $0x1c8] ss:$16 sps:$4 sm:$0xff]  }
 0xdb4   : > { %15584 = vmatmul.mubr.bf16.vlgmr.msra.gmra.mxu0 %v24497_v11 }
 0xdb5   : > { %15627 = vmatmul.mubr.bf16.vlgmr.msra.gmra.mxu1 %v24642_v52  ;;  %15638 = vmatpush1.bf16.msra.mxu0 %v20476_v49  ;;  %v20538_v49 = vld [vmem:[%s22390_s8 + $0x1ac] ss:$16 sps:$4 sm:$0xff]  }
 0xdb6   : > { %15669 = vmatprep.mubr.bf16.mxu0 %v24287_v61  ;;  %15681 = vmatpush1.bf16.msra.mxu1 %v20479_v39  ;;  %v20496_v61 = vld [vmem:[%s22390_s8 + $0x8c] ss:$16 sps:$4 sm:$0xff]  }
 0xdb7   : > { %15712 = vmatprep.mubr.bf16.mxu1 %v24291_v20  ;;  %15639 = vmatprep.subr.bf16.mxu0 %v20484_v30  ;;  %v20494_v20 = vld [vmem:[%s22390_s8 + $0x88] ss:$16 sps:$4 sm:$0xff]   ;;  %v20541_v39 = vld [vmem:[%s22390_s8 + $0x3ac] ss:$16 sps:$4 sm:$0xff]  }
 0xdb8   : > { %15682 = vmatprep.subr.bf16.mxu1 %v20487_v5  ;;  %v20536_v30 = vld [vmem:[%s22390_s8 + $0x1a8] ss:$16 sps:$4 sm:$0xff]  }
 0xdb9   : > { %15640 = vmatpush1.bf16.msra.mxu0 %v20482_v28  ;;  %v20539_v5 = vld [vmem:[%s22390_s8 + $0x3a8] ss:$16 sps:$4 sm:$0xff]   ;;  %v20544_v28 = vld [vmem:[%s22390_s8 + $0x18c] ss:$16 sps:$4 sm:$0xff]  }
 0xdba   : > { %15683 = vmatpush1.bf16.msra.mxu1 %v20485_v35  ;;  %15641 = vmatprep.subr.bf16.mxu0 %v20490_v57  ;;  %v20547_v35 = vld [vmem:[%s22390_s8 + $0x38c] ss:$16 sps:$4 sm:$0xff]   ;;  %v20542_v57 = vld [vmem:[%s22390_s8 + $0x188] ss:$16 sps:$4 sm:$0xff]  }
 0xdbb   : > { %15684 = vmatprep.subr.bf16.mxu1 %v20493_v4  ;;  %v20545_v4 = vld [vmem:[%s22390_s8 + $0x388] ss:$16 sps:$4 sm:$0xff]  }
 0xdbd   : > { %15642 = vmatpush1.bf16.msra.mxu0 %v20488_v2  ;;  %v20550_v2 = vld [vmem:[%s22390_s8 + $0x16c] ss:$16 sps:$4 sm:$0xff]  }
 0xdbe   : > { %15685 = vmatpush1.bf16.msra.mxu1 %v20491_v63  ;;  %15643 = vmatprep.subr.bf16.mxu0 %v20496_v61  ;;  %v20553_v63 = vld [vmem:[%s22390_s8 + $0x36c] ss:$16 sps:$4 sm:$0xff]   ;;  %v20548_v61 = vld [vmem:[%s22390_s8 + $0x168] ss:$16 sps:$4 sm:$0xff]  }
 0xdbf   : > { %15686 = vmatprep.subr.bf16.mxu1 %v20499_v60  ;;  %v20551_v60 = vld [vmem:[%s22390_s8 + $0x368] ss:$16 sps:$4 sm:$0xff]  }
 0xdc1   : > { %15644 = vmatpush1.bf16.msra.mxu0 %v20494_v20  ;;  %v20556_v20 = vld [vmem:[%s22390_s8 + $0x14c] ss:$16 sps:$4 sm:$0xff]  }
 0xdc2   : > { %15687 = vmatpush1.bf16.msra.mxu1 %v20497_v29  ;;  %15645 = vmatprep.subr.bf16.mxu0 %v20502_v59  ;;  %v20559_v29 = vld [vmem:[%s22390_s8 + $0x34c] ss:$16 sps:$4 sm:$0xff]   ;;  %v20554_v59 = vld [vmem:[%s22390_s8 + $0x148] ss:$16 sps:$4 sm:$0xff]  }
 0xdc3   : > { %15688 = vmatprep.subr.bf16.mxu1 %v20505_v9  ;;  %v20557_v9 = vld [vmem:[%s22390_s8 + $0x348] ss:$16 sps:$4 sm:$0xff]  }
 0xdc5   : > { %15646 = vmatpush1.bf16.msra.mxu0 %v20500_v36  ;;  %v20562_v36 = vld [vmem:[%s22390_s8 + $0x12c] ss:$16 sps:$4 sm:$0xff]  }
 0xdc6   : > { %15689 = vmatpush1.bf16.msra.mxu1 %v20503_v38  ;;  %15647 = vmatprep.subr.bf16.mxu0 %v20508_v43  ;;  %v20565_v38 = vld [vmem:[%s22390_s8 + $0x32c] ss:$16 sps:$4 sm:$0xff]   ;;  %v20560_v43 = vld [vmem:[%s22390_s8 + $0x128] ss:$16 sps:$4 sm:$0xff]  }
 0xdc7   : > { %15690 = vmatprep.subr.bf16.mxu1 %v20511_v47  ;;  %v20563_v47 = vld [vmem:[%s22390_s8 + $0x328] ss:$16 sps:$4 sm:$0xff]  }
 0xdc9   : > { %15648 = vmatpush1.bf16.msra.mxu0 %v20506_v10  ;;  %v20568_v10 = vld [vmem:[%s22390_s8 + $0x10c] ss:$16 sps:$4 sm:$0xff]  }
 0xdca   : > { %15691 = vmatpush1.bf16.msra.mxu1 %v20509_v41  ;;  %15649 = vmatprep.subr.bf16.mxu0 %v20514_v56  ;;  %v20571_v41 = vld [vmem:[%s22390_s8 + $0x30c] ss:$16 sps:$4 sm:$0xff]   ;;  %v20566_v56 = vld [vmem:[%s22390_s8 + $0x108] ss:$16 sps:$4 sm:$0xff]  }
 0xdcb   : > { %15692 = vmatprep.subr.bf16.mxu1 %v20517_v46  ;;  %v20569_v46 = vld [vmem:[%s22390_s8 + $0x308] ss:$16 sps:$4 sm:$0xff]  }
 0xdcd   : > { %15650 = vmatpush1.bf16.msra.mxu0 %v20512_v7  ;;  %v20574_v7 = vld [vmem:[%s22390_s8 + $0x4ec] ss:$16 sps:$4 sm:$0xff]  }
 0xdce   : > { %15693 = vmatpush1.bf16.msra.mxu1 %v20515_v44  ;;  %15651 = vmatprep.subr.bf16.mxu0 %v20520_v48  ;;  %v20577_v44 = vld [vmem:[%s22390_s8 + $0x6ec] ss:$16 sps:$4 sm:$0xff]   ;;  %v20572_v48 = vld [vmem:[%s22390_s8 + $0x4e8] ss:$16 sps:$4 sm:$0xff]  }
 0xdcf   : > { %15694 = vmatprep.subr.bf16.mxu1 %v20523_v42  ;;  %v20575_v42 = vld [vmem:[%s22390_s8 + $0x6e8] ss:$16 sps:$4 sm:$0xff]  }
 0xdd1   : > { %15652 = vmatpush1.bf16.msra.mxu0 %v20518_v6  ;;  %v20580_v6 = vld [vmem:[%s22390_s8 + $0x4cc] ss:$16 sps:$4 sm:$0xff]  }
 0xdd2   : > { %15695 = vmatpush1.bf16.msra.mxu1 %v20521_v17  ;;  %15653 = vmatprep.subr.bf16.mxu0 %v20526_v40  ;;  %v20583_v17 = vld [vmem:[%s22390_s8 + $0x6cc] ss:$16 sps:$4 sm:$0xff]   ;;  %v20578_v40 = vld [vmem:[%s22390_s8 + $0x4c8] ss:$16 sps:$4 sm:$0xff]  }
 0xdd3   : > { %15696 = vmatprep.subr.bf16.mxu1 %v20529_v14  ;;  %v20581_v14 = vld [vmem:[%s22390_s8 + $0x6c8] ss:$16 sps:$4 sm:$0xff]  }
 0xdd5   : > { %15654 = vmatpush2.bf16.msra.mxu0 %v20524_v51  ;;  %v20586_v51 = vld [vmem:[%s22390_s8 + $0x4ac] ss:$16 sps:$4 sm:$0xff]  }
 0xdd6   : > { %15697 = vmatpush2.bf16.msra.mxu1 %v20527_v32  ;;  %15655 = vmatprep.subr.bf16.mxu0 %v20532_v34  ;;  %v20587_v32 = vld [vmem:[%s22390_s8 + $0x6a8] ss:$16 sps:$4 sm:$0xff]   ;;  %v20595_v34 = vld [vmem:[%s22390_s8 + $0x68c] ss:$16 sps:$4 sm:$0xff]  }
 0xdd7   : > { %15698 = vmatprep.subr.bf16.mxu1 %v20535_v13  ;;  %v20593_v13 = vld [vmem:[%s22390_s8 + $0x688] ss:$16 sps:$4 sm:$0xff]  }
 0xdd9   : > { %15656 = vmatpush2.bf16.msra.mxu0 %v20530_v27  ;;  %v20598_v27 = vld [vmem:[%s22390_s8 + $0x46c] ss:$16 sps:$4 sm:$0xff]  }
 0xdda   : > { %15699 = vmatpush2.bf16.msra.mxu1 %v20533_v31  ;;  %15657 = vmatprep.subr.bf16.mxu0 %v20538_v49  ;;  %v20601_v31 = vld [vmem:[%s22390_s8 + $0x66c] ss:$16 sps:$4 sm:$0xff]   ;;  %v20596_v49 = vld [vmem:[%s22390_s8 + $0x468] ss:$16 sps:$4 sm:$0xff]  }
 0xddb   : > { %15700 = vmatprep.subr.bf16.mxu1 %v20541_v39  ;;  %v20599_v39 = vld [vmem:[%s22390_s8 + $0x668] ss:$16 sps:$4 sm:$0xff]  }
 0xddd   : > { %15658 = vmatpush2.bf16.msra.mxu0 %v20536_v30  ;;  %v20604_v30 = vld [vmem:[%s22390_s8 + $0x44c] ss:$16 sps:$4 sm:$0xff]  }
 0xdde   : > { %15701 = vmatpush2.bf16.msra.mxu1 %v20539_v5  ;;  %15659 = vmatprep.subr.bf16.mxu0 %v20544_v28  ;;  %v20607_v5 = vld [vmem:[%s22390_s8 + $0x64c] ss:$16 sps:$4 sm:$0xff]   ;;  %v20602_v28 = vld [vmem:[%s22390_s8 + $0x448] ss:$16 sps:$4 sm:$0xff]  }
 0xddf   : > { %15702 = vmatprep.subr.bf16.mxu1 %v20547_v35  ;;  %v20605_v35 = vld [vmem:[%s22390_s8 + $0x648] ss:$16 sps:$4 sm:$0xff]  }
 0xde1   : > { %15660 = vmatpush2.bf16.msra.mxu0 %v20542_v57  ;;  %v20610_v57 = vld [vmem:[%s22390_s8 + $0x42c] ss:$16 sps:$4 sm:$0xff]  }
 0xde2   : > { %15703 = vmatpush2.bf16.msra.mxu1 %v20545_v4  ;;  %15661 = vmatprep.subr.bf16.mxu0 %v20550_v2  ;;  %v20613_v4 = vld [vmem:[%s22390_s8 + $0x62c] ss:$16 sps:$4 sm:$0xff]   ;;  %v20608_v2 = vld [vmem:[%s22390_s8 + $0x428] ss:$16 sps:$4 sm:$0xff]  }
 0xde3   : > { %15704 = vmatprep.subr.bf16.mxu1 %v20553_v63  ;;  %v20611_v63 = vld [vmem:[%s22390_s8 + $0x628] ss:$16 sps:$4 sm:$0xff]  }
 0xde5   : > { %15662 = vmatpush2.bf16.msra.mxu0 %v20548_v61  ;;  %v20616_v61 = vld [vmem:[%s22390_s8 + $0x40c] ss:$16 sps:$4 sm:$0xff]  }
 0xde6   : > { %15705 = vmatpush2.bf16.msra.mxu1 %v20551_v60  ;;  %15663 = vmatprep.subr.bf16.mxu0 %v20556_v20  ;;  %v20619_v60 = vld [vmem:[%s22390_s8 + $0x60c] ss:$16 sps:$4 sm:$0xff]   ;;  %v20614_v20 = vld [vmem:[%s22390_s8 + $0x408] ss:$16 sps:$4 sm:$0xff]  }
 0xde7   : > { %15706 = vmatprep.subr.bf16.mxu1 %v20559_v29  ;;  %v20617_v29 = vld [vmem:[%s22390_s8 + $0x608] ss:$16 sps:$4 sm:$0xff]  }
 0xde9   : > { %15664 = vmatpush2.bf16.msra.mxu0 %v20554_v59  ;;  %v20622_v59 = vld [vmem:[%s22390_s8 + $0x5ec] ss:$16 sps:$4 sm:$0xff]  }
 0xdea   : > { %15707 = vmatpush2.bf16.msra.mxu1 %v20557_v9  ;;  %15665 = vmatprep.subr.bf16.mxu0 %v20562_v36  ;;  %v20625_v9 = vld [vmem:[%s22390_s8 + $0x7ec] ss:$16 sps:$4 sm:$0xff]   ;;  %v20620_v36 = vld [vmem:[%s22390_s8 + $0x5e8] ss:$16 sps:$4 sm:$0xff]  }
 0xdeb   : > { %15708 = vmatprep.subr.bf16.mxu1 %v20565_v38  ;;  %v20623_v38 = vld [vmem:[%s22390_s8 + $0x7e8] ss:$16 sps:$4 sm:$0xff]  }
 0xded   : > { %15666 = vmatpush2.bf16.msra.mxu0 %v20560_v43  ;;  %v20628_v43 = vld [vmem:[%s22390_s8 + $0x5cc] ss:$16 sps:$4 sm:$0xff]  }
 0xdee   : > { %15709 = vmatpush2.bf16.msra.mxu1 %v20563_v47  ;;  %15667 = vmatprep.subr.bf16.mxu0 %v20568_v10  ;;  %v20631_v47 = vld [vmem:[%s22390_s8 + $0x7cc] ss:$16 sps:$4 sm:$0xff]   ;;  %v20626_v10 = vld [vmem:[%s22390_s8 + $0x5c8] ss:$16 sps:$4 sm:$0xff]  }
 0xdef   : > { %15710 = vmatprep.subr.bf16.mxu1 %v20571_v41  ;;  %v20629_v41 = vld [vmem:[%s22390_s8 + $0x7c8] ss:$16 sps:$4 sm:$0xff]  }
 0xdf1   : > { %15668 = vmatpush2.bf16.msra.mxu0 %v20566_v56  ;;  %v20634_v56 = vld [vmem:[%s22390_s8 + $0x5ac] ss:$16 sps:$4 sm:$0xff]  }
 0xdf2   : > { %15711 = vmatpush2.bf16.msra.mxu1 %v20569_v46  ;;  %15723 = vmatprep.subr.bf16.mxu0 %v20574_v7  ;;  %v20637_v46 = vld [vmem:[%s22390_s8 + $0x7ac] ss:$16 sps:$4 sm:$0xff]   ;;  %v20632_v7 = vld [vmem:[%s22390_s8 + $0x5a8] ss:$16 sps:$4 sm:$0xff]  }
 0xdf3   : > { %15766 = vmatprep.subr.bf16.mxu1 %v20577_v44  ;;  %v20635_v44 = vld [vmem:[%s22390_s8 + $0x7a8] ss:$16 sps:$4 sm:$0xff]  }
 0xdf4   : > { %15670 = vmatmul.mubr.bf16.vlgmr.msra.gmra.mxu0 %v23972_v54  ;;  %v20589_v54 = vld [vmem:[%s22390_s8 + $0x6ac] ss:$16 sps:$4 sm:$0xff]  }
 0xdf5   : > { %15713 = vmatmul.mubr.bf16.vlgmr.msra.gmra.mxu1 %v24052_v0  ;;  %15724 = vmatpush1.bf16.msra.mxu0 %v20572_v48  ;;  %v20584_v0 = vld [vmem:[%s22390_s8 + $0x4a8] ss:$16 sps:$4 sm:$0xff]   ;;  %v20640_v48 = vld [vmem:[%s22390_s8 + $0x58c] ss:$16 sps:$4 sm:$0xff]  }
 0xdf6   : > { %15755 = vmatprep.mubr.bf16.mxu0 %v24383_v25  ;;  %15767 = vmatpush1.bf16.msra.mxu1 %v20575_v42  ;;  %v20592_v25 = vld [vmem:[%s22390_s8 + $0x48c] ss:$16 sps:$4 sm:$0xff]  }
 0xdf7   : > { %15798 = vmatprep.mubr.bf16.mxu1 %v24387_v19  ;;  %15725 = vmatprep.subr.bf16.mxu0 %v20580_v6  ;;  %v20590_v19 = vld [vmem:[%s22390_s8 + $0x488] ss:$16 sps:$4 sm:$0xff]   ;;  %v20643_v42 = vld [vmem:[%s22390_s8 + $0x78c] ss:$16 sps:$4 sm:$0xff]  }
 0xdf8   : > { %15768 = vmatprep.subr.bf16.mxu1 %v20583_v17  ;;  %v20638_v6 = vld [vmem:[%s22390_s8 + $0x588] ss:$16 sps:$4 sm:$0xff]  }
 0xdf9   : > { %15726 = vmatpush1.bf16.msra.mxu0 %v20578_v40  ;;  %v20641_v17 = vld [vmem:[%s22390_s8 + $0x788] ss:$16 sps:$4 sm:$0xff]   ;;  %v20646_v40 = vld [vmem:[%s22390_s8 + $0x56c] ss:$16 sps:$4 sm:$0xff]  }
 0xdfa   : > { %15769 = vmatpush1.bf16.msra.mxu1 %v20581_v14  ;;  %15727 = vmatprep.subr.bf16.mxu0 %v20586_v51  ;;  %v20649_v14 = vld [vmem:[%s22390_s8 + $0x76c] ss:$16 sps:$4 sm:$0xff]   ;;  %v20644_v51 = vld [vmem:[%s22390_s8 + $0x568] ss:$16 sps:$4 sm:$0xff]  }
 0xdfb   : > { %15770 = vmatprep.subr.bf16.mxu1 %v20589_v54  ;;  %v20647_v54 = vld [vmem:[%s22390_s8 + $0x768] ss:$16 sps:$4 sm:$0xff]  }
 0xdfd   : > { %15728 = vmatpush1.bf16.msra.mxu0 %v20584_v0  ;;  %v20652_v0 = vld [vmem:[%s22390_s8 + $0x54c] ss:$16 sps:$4 sm:$0xff]  }
 0xdfe   : > { %15771 = vmatpush1.bf16.msra.mxu1 %v20587_v32  ;;  %15729 = vmatprep.subr.bf16.mxu0 %v20592_v25  ;;  %v20655_v32 = vld [vmem:[%s22390_s8 + $0x74c] ss:$16 sps:$4 sm:$0xff]   ;;  %v20650_v25 = vld [vmem:[%s22390_s8 + $0x548] ss:$16 sps:$4 sm:$0xff]  }
 0xdff   : > { %15772 = vmatprep.subr.bf16.mxu1 %v20595_v34  ;;  %v20653_v34 = vld [vmem:[%s22390_s8 + $0x748] ss:$16 sps:$4 sm:$0xff]  }
 0xe01   : > { %15730 = vmatpush1.bf16.msra.mxu0 %v20590_v19  ;;  %v20658_v19 = vld [vmem:[%s22390_s8 + $0x52c] ss:$16 sps:$4 sm:$0xff]  }
 0xe02   : > { %15773 = vmatpush1.bf16.msra.mxu1 %v20593_v13  ;;  %15731 = vmatprep.subr.bf16.mxu0 %v20598_v27  ;;  %v20661_v13 = vld [vmem:[%s22390_s8 + $0x72c] ss:$16 sps:$4 sm:$0xff]   ;;  %v20656_v27 = vld [vmem:[%s22390_s8 + $0x528] ss:$16 sps:$4 sm:$0xff]  }
 0xe03   : > { %15774 = vmatprep.subr.bf16.mxu1 %v20601_v31  ;;  %v20659_v31 = vld [vmem:[%s22390_s8 + $0x728] ss:$16 sps:$4 sm:$0xff]  }
 0xe05   : > { %15732 = vmatpush1.bf16.msra.mxu0 %v20596_v49  ;;  %v20664_v49 = vld [vmem:[%s22390_s8 + $0x50c] ss:$16 sps:$4 sm:$0xff]  }
 0xe06   : > { %15775 = vmatpush1.bf16.msra.mxu1 %v20599_v39  ;;  %15733 = vmatprep.subr.bf16.mxu0 %v20604_v30  ;;  %v20667_v39 = vld [vmem:[%s22390_s8 + $0x70c] ss:$16 sps:$4 sm:$0xff]   ;;  %v20662_v30 = vld [vmem:[%s22390_s8 + $0x508] ss:$16 sps:$4 sm:$0xff]  }
 0xe07   : > { %15776 = vmatprep.subr.bf16.mxu1 %v20607_v5  ;;  %v20665_v5 = vld [vmem:[%s22390_s8 + $0x708] ss:$16 sps:$4 sm:$0xff]  }
 0xe09   : > { %15734 = vmatpush1.bf16.msra.mxu0 %v20602_v28  ;;  %v20670_v28 = vld [vmem:[%s22390_s8 + $0x8ec] ss:$16 sps:$4 sm:$0xff]  }
 0xe0a   : > { %15777 = vmatpush1.bf16.msra.mxu1 %v20605_v35  ;;  %15735 = vmatprep.subr.bf16.mxu0 %v20610_v57  ;;  %v20673_v35 = vld [vmem:[%s22390_s8 + $0xaec] ss:$16 sps:$4 sm:$0xff]   ;;  %v20668_v57 = vld [vmem:[%s22390_s8 + $0x8e8] ss:$16 sps:$4 sm:$0xff]  }
 0xe0b   : > { %15778 = vmatprep.subr.bf16.mxu1 %v20613_v4  ;;  %v20671_v4 = vld [vmem:[%s22390_s8 + $0xae8] ss:$16 sps:$4 sm:$0xff]  }
 0xe0d   : > { %15736 = vmatpush1.bf16.msra.mxu0 %v20608_v2  ;;  %v20676_v2 = vld [vmem:[%s22390_s8 + $0x8cc] ss:$16 sps:$4 sm:$0xff]  }
 0xe0e   : > { %15779 = vmatpush1.bf16.msra.mxu1 %v20611_v63  ;;  %15737 = vmatprep.subr.bf16.mxu0 %v20616_v61  ;;  %v20679_v63 = vld [vmem:[%s22390_s8 + $0xacc] ss:$16 sps:$4 sm:$0xff]   ;;  %v20674_v61 = vld [vmem:[%s22390_s8 + $0x8c8] ss:$16 sps:$4 sm:$0xff]  }
 0xe0f   : > { %15780 = vmatprep.subr.bf16.mxu1 %v20619_v60  ;;  %v20677_v60 = vld [vmem:[%s22390_s8 + $0xac8] ss:$16 sps:$4 sm:$0xff]  }
 0xe11   : > { %15738 = vmatpush1.bf16.msra.mxu0 %v20614_v20  ;;  %v20682_v20 = vld [vmem:[%s22390_s8 + $0x8ac] ss:$16 sps:$4 sm:$0xff]  }
 0xe12   : > { %15781 = vmatpush1.bf16.msra.mxu1 %v20617_v29  ;;  %15739 = vmatprep.subr.bf16.mxu0 %v20622_v59  ;;  %v20683_v29 = vld [vmem:[%s22390_s8 + $0xaa8] ss:$16 sps:$4 sm:$0xff]   ;;  %v20691_v59 = vld [vmem:[%s22390_s8 + $0xa8c] ss:$16 sps:$4 sm:$0xff]  }
 0xe13   : > { %15782 = vmatprep.subr.bf16.mxu1 %v20625_v9  ;;  %v20689_v9 = vld [vmem:[%s22390_s8 + $0xa88] ss:$16 sps:$4 sm:$0xff]  }
 0xe15   : > { %15740 = vmatpush2.bf16.msra.mxu0 %v20620_v36  ;;  %v20694_v36 = vld [vmem:[%s22390_s8 + $0x86c] ss:$16 sps:$4 sm:$0xff]  }
 0xe16   : > { %15783 = vmatpush2.bf16.msra.mxu1 %v20623_v38  ;;  %15741 = vmatprep.subr.bf16.mxu0 %v20628_v43  ;;  %v20697_v38 = vld [vmem:[%s22390_s8 + $0xa6c] ss:$16 sps:$4 sm:$0xff]   ;;  %v20692_v43 = vld [vmem:[%s22390_s8 + $0x868] ss:$16 sps:$4 sm:$0xff]  }
 0xe17   : > { %15784 = vmatprep.subr.bf16.mxu1 %v20631_v47  ;;  %v20695_v47 = vld [vmem:[%s22390_s8 + $0xa68] ss:$16 sps:$4 sm:$0xff]  }
 0xe19   : > { %15742 = vmatpush2.bf16.msra.mxu0 %v20626_v10  ;;  %v20700_v10 = vld [vmem:[%s22390_s8 + $0x84c] ss:$16 sps:$4 sm:$0xff]  }
 0xe1a   : > { %15785 = vmatpush2.bf16.msra.mxu1 %v20629_v41  ;;  %15743 = vmatprep.subr.bf16.mxu0 %v20634_v56  ;;  %v20703_v41 = vld [vmem:[%s22390_s8 + $0xa4c] ss:$16 sps:$4 sm:$0xff]   ;;  %v20698_v56 = vld [vmem:[%s22390_s8 + $0x848] ss:$16 sps:$4 sm:$0xff]  }
 0xe1b   : > { %15786 = vmatprep.subr.bf16.mxu1 %v20637_v46  ;;  %v20701_v46 = vld [vmem:[%s22390_s8 + $0xa48] ss:$16 sps:$4 sm:$0xff]  }
 0xe1d   : > { %15744 = vmatpush2.bf16.msra.mxu0 %v20632_v7  ;;  %v20706_v7 = vld [vmem:[%s22390_s8 + $0x82c] ss:$16 sps:$4 sm:$0xff]  }
 0xe1e   : > { %15787 = vmatpush2.bf16.msra.mxu1 %v20635_v44  ;;  %15745 = vmatprep.subr.bf16.mxu0 %v20640_v48  ;;  %v20709_v44 = vld [vmem:[%s22390_s8 + $0xa2c] ss:$16 sps:$4 sm:$0xff]   ;;  %v20704_v48 = vld [vmem:[%s22390_s8 + $0x828] ss:$16 sps:$4 sm:$0xff]  }
 0xe1f   : > { %15788 = vmatprep.subr.bf16.mxu1 %v20643_v42  ;;  %v20707_v42 = vld [vmem:[%s22390_s8 + $0xa28] ss:$16 sps:$4 sm:$0xff]  }
 0xe21   : > { %15746 = vmatpush2.bf16.msra.mxu0 %v20638_v6  ;;  %v20712_v6 = vld [vmem:[%s22390_s8 + $0x80c] ss:$16 sps:$4 sm:$0xff]  }
 0xe22   : > { %15789 = vmatpush2.bf16.msra.mxu1 %v20641_v17  ;;  %15747 = vmatprep.subr.bf16.mxu0 %v20646_v40  ;;  %v20715_v17 = vld [vmem:[%s22390_s8 + $0xa0c] ss:$16 sps:$4 sm:$0xff]   ;;  %v20710_v40 = vld [vmem:[%s22390_s8 + $0x808] ss:$16 sps:$4 sm:$0xff]  }
 0xe23   : > { %15790 = vmatprep.subr.bf16.mxu1 %v20649_v14  ;;  %v20713_v14 = vld [vmem:[%s22390_s8 + $0xa08] ss:$16 sps:$4 sm:$0xff]  }
 0xe25   : > { %15748 = vmatpush2.bf16.msra.mxu0 %v20644_v51  ;;  %v20718_v51 = vld [vmem:[%s22390_s8 + $0x9ec] ss:$16 sps:$4 sm:$0xff]  }
 0xe26   : > { %15791 = vmatpush2.bf16.msra.mxu1 %v20647_v54  ;;  %15749 = vmatprep.subr.bf16.mxu0 %v20652_v0  ;;  %v20721_v54 = vld [vmem:[%s22390_s8 + $0xbec] ss:$16 sps:$4 sm:$0xff]   ;;  %v20716_v0 = vld [vmem:[%s22390_s8 + $0x9e8] ss:$16 sps:$4 sm:$0xff]  }
 0xe27   : > { %15792 = vmatprep.subr.bf16.mxu1 %v20655_v32  ;;  %v20719_v32 = vld [vmem:[%s22390_s8 + $0xbe8] ss:$16 sps:$4 sm:$0xff]  }
 0xe29   : > { %15750 = vmatpush2.bf16.msra.mxu0 %v20650_v25  ;;  %v20724_v25 = vld [vmem:[%s22390_s8 + $0x9cc] ss:$16 sps:$4 sm:$0xff]  }
 0xe2a   : > { %15793 = vmatpush2.bf16.msra.mxu1 %v20653_v34  ;;  %15751 = vmatprep.subr.bf16.mxu0 %v20658_v19  ;;  %v20727_v34 = vld [vmem:[%s22390_s8 + $0xbcc] ss:$16 sps:$4 sm:$0xff]   ;;  %v20722_v19 = vld [vmem:[%s22390_s8 + $0x9c8] ss:$16 sps:$4 sm:$0xff]  }
 0xe2b   : > { %15794 = vmatprep.subr.bf16.mxu1 %v20661_v13  ;;  %v20725_v13 = vld [vmem:[%s22390_s8 + $0xbc8] ss:$16 sps:$4 sm:$0xff]  }
 0xe2d   : > { %15752 = vmatpush2.bf16.msra.mxu0 %v20656_v27  ;;  %v20730_v27 = vld [vmem:[%s22390_s8 + $0x9ac] ss:$16 sps:$4 sm:$0xff]  }
 0xe2e   : > { %15795 = vmatpush2.bf16.msra.mxu1 %v20659_v31  ;;  %15753 = vmatprep.subr.bf16.mxu0 %v20664_v49  ;;  %v20733_v31 = vld [vmem:[%s22390_s8 + $0xbac] ss:$16 sps:$4 sm:$0xff]   ;;  %v20728_v49 = vld [vmem:[%s22390_s8 + $0x9a8] ss:$16 sps:$4 sm:$0xff]  }
 0xe2f   : > { %15796 = vmatprep.subr.bf16.mxu1 %v20667_v39  ;;  %v20731_v39 = vld [vmem:[%s22390_s8 + $0xba8] ss:$16 sps:$4 sm:$0xff]  }
 0xe31   : > { %15754 = vmatpush2.bf16.msra.mxu0 %v20662_v30  ;;  %v20736_v30 = vld [vmem:[%s22390_s8 + $0x98c] ss:$16 sps:$4 sm:$0xff]  }
 0xe32   : > { %15797 = vmatpush2.bf16.msra.mxu1 %v20665_v5  ;;  %15809 = vmatprep.subr.bf16.mxu0 %v20670_v28  ;;  %v20739_v5 = vld [vmem:[%s22390_s8 + $0xb8c] ss:$16 sps:$4 sm:$0xff]   ;;  %v20734_v28 = vld [vmem:[%s22390_s8 + $0x988] ss:$16 sps:$4 sm:$0xff]  }
 0xe33   : > { %15852 = vmatprep.subr.bf16.mxu1 %v20673_v35  ;;  %v20737_v35 = vld [vmem:[%s22390_s8 + $0xb88] ss:$16 sps:$4 sm:$0xff]  }
 0xe34   : > { %15756 = vmatmul.mubr.bf16.vlgmr.msra.gmra.mxu0 %v24132_v45  ;;  %v20685_v45 = vld [vmem:[%s22390_s8 + $0xaac] ss:$16 sps:$4 sm:$0xff]  }
 0xe35   : > { %15799 = vmatmul.mubr.bf16.vlgmr.msra.gmra.mxu1 %v24215_v62  ;;  %15810 = vmatpush1.bf16.msra.mxu0 %v20668_v57  ;;  %v20680_v62 = vld [vmem:[%s22390_s8 + $0x8a8] ss:$16 sps:$4 sm:$0xff]   ;;  %v20742_v57 = vld [vmem:[%s22390_s8 + $0x96c] ss:$16 sps:$4 sm:$0xff]  }
 0xe36   : > { %15841 = vmatprep.mubr.bf16.mxu0 %v24473_v16  ;;  %15853 = vmatpush1.bf16.msra.mxu1 %v20671_v4  ;;  %v20688_v16 = vld [vmem:[%s22390_s8 + $0x88c] ss:$16 sps:$4 sm:$0xff]  }
 0xe37   : > { %15884 = vmatprep.mubr.bf16.mxu1 %v24477_v15  ;;  %15811 = vmatprep.subr.bf16.mxu0 %v20676_v2  ;;  %v20686_v15 = vld [vmem:[%s22390_s8 + $0x888] ss:$16 sps:$4 sm:$0xff]   ;;  %v20745_v4 = vld [vmem:[%s22390_s8 + $0xb6c] ss:$16 sps:$4 sm:$0xff]  }
 0xe38   : > { %15854 = vmatprep.subr.bf16.mxu1 %v20679_v63  ;;  %v20740_v2 = vld [vmem:[%s22390_s8 + $0x968] ss:$16 sps:$4 sm:$0xff]  }
 0xe39   : > { %15812 = vmatpush1.bf16.msra.mxu0 %v20674_v61  ;;  %v20743_v63 = vld [vmem:[%s22390_s8 + $0xb68] ss:$16 sps:$4 sm:$0xff]   ;;  %v20748_v61 = vld [vmem:[%s22390_s8 + $0x94c] ss:$16 sps:$4 sm:$0xff]  }
 0xe3a   : > { %15855 = vmatpush1.bf16.msra.mxu1 %v20677_v60  ;;  %15813 = vmatprep.subr.bf16.mxu0 %v20682_v20  ;;  %v20751_v60 = vld [vmem:[%s22390_s8 + $0xb4c] ss:$16 sps:$4 sm:$0xff]   ;;  %v20746_v20 = vld [vmem:[%s22390_s8 + $0x948] ss:$16 sps:$4 sm:$0xff]  }
 0xe3b   : > { %15856 = vmatprep.subr.bf16.mxu1 %v20685_v45  ;;  %v20749_v45 = vld [vmem:[%s22390_s8 + $0xb48] ss:$16 sps:$4 sm:$0xff]  }
 0xe3d   : > { %15814 = vmatpush1.bf16.msra.mxu0 %v20680_v62  ;;  %v20754_v62 = vld [vmem:[%s22390_s8 + $0x92c] ss:$16 sps:$4 sm:$0xff]  }
 0xe3e   : > { %15857 = vmatpush1.bf16.msra.mxu1 %v20683_v29  ;;  %15815 = vmatprep.subr.bf16.mxu0 %v20688_v16  ;;  %v20757_v29 = vld [vmem:[%s22390_s8 + $0xb2c] ss:$16 sps:$4 sm:$0xff]   ;;  %v20752_v16 = vld [vmem:[%s22390_s8 + $0x928] ss:$16 sps:$4 sm:$0xff]  }
 0xe3f   : > { %15858 = vmatprep.subr.bf16.mxu1 %v20691_v59  ;;  %v20755_v59 = vld [vmem:[%s22390_s8 + $0xb28] ss:$16 sps:$4 sm:$0xff]  }
 0xe41   : > { %15816 = vmatpush1.bf16.msra.mxu0 %v20686_v15  ;;  %v20760_v15 = vld [vmem:[%s22390_s8 + $0x90c] ss:$16 sps:$4 sm:$0xff]  }
 0xe42   : > { %15859 = vmatpush1.bf16.msra.mxu1 %v20689_v9  ;;  %15817 = vmatprep.subr.bf16.mxu0 %v20694_v36  ;;  %v20763_v9 = vld [vmem:[%s22390_s8 + $0xb0c] ss:$16 sps:$4 sm:$0xff]   ;;  %v20758_v36 = vld [vmem:[%s22390_s8 + $0x908] ss:$16 sps:$4 sm:$0xff]  }
 0xe43   : > { %15860 = vmatprep.subr.bf16.mxu1 %v20697_v38  ;;  %v20761_v38 = vld [vmem:[%s22390_s8 + $0xb08] ss:$16 sps:$4 sm:$0xff]  }
 0xe45   : > { %15818 = vmatpush1.bf16.msra.mxu0 %v20692_v43  ;;  %v20766_v43 = vld [vmem:[%s22390_s8 + $0xcec] ss:$16 sps:$4 sm:$0xff]  }
 0xe46   : > { %15861 = vmatpush1.bf16.msra.mxu1 %v20695_v47  ;;  %15819 = vmatprep.subr.bf16.mxu0 %v20700_v10  ;;  %v20769_v47 = vld [vmem:[%s22390_s8 + $0xeec] ss:$16 sps:$4 sm:$0xff]   ;;  %v20764_v10 = vld [vmem:[%s22390_s8 + $0xce8] ss:$16 sps:$4 sm:$0xff]  }
 0xe47   : > { %15862 = vmatprep.subr.bf16.mxu1 %v20703_v41  ;;  %v20767_v41 = vld [vmem:[%s22390_s8 + $0xee8] ss:$16 sps:$4 sm:$0xff]  }
 0xe49   : > { %15820 = vmatpush1.bf16.msra.mxu0 %v20698_v56  ;;  %v20772_v56 = vld [vmem:[%s22390_s8 + $0xccc] ss:$16 sps:$4 sm:$0xff]  }
 0xe4a   : > { %15863 = vmatpush1.bf16.msra.mxu1 %v20701_v46  ;;  %15821 = vmatprep.subr.bf16.mxu0 %v20706_v7  ;;  %v20775_v46 = vld [vmem:[%s22390_s8 + $0xecc] ss:$16 sps:$4 sm:$0xff]   ;;  %v20770_v7 = vld [vmem:[%s22390_s8 + $0xcc8] ss:$16 sps:$4 sm:$0xff]  }
 0xe4b   : > { %15864 = vmatprep.subr.bf16.mxu1 %v20709_v44  ;;  %v20773_v44 = vld [vmem:[%s22390_s8 + $0xec8] ss:$16 sps:$4 sm:$0xff]  }
 0xe4d   : > { %15822 = vmatpush1.bf16.msra.mxu0 %v20704_v48  ;;  %v20778_v48 = vld [vmem:[%s22390_s8 + $0xcac] ss:$16 sps:$4 sm:$0xff]  }
 0xe4e   : > { %15865 = vmatpush1.bf16.msra.mxu1 %v20707_v42  ;;  %15823 = vmatprep.subr.bf16.mxu0 %v20712_v6  ;;  %v20779_v42 = vld [vmem:[%s22390_s8 + $0xea8] ss:$16 sps:$4 sm:$0xff]   ;;  %v20787_v6 = vld [vmem:[%s22390_s8 + $0xe8c] ss:$16 sps:$4 sm:$0xff]  }
 0xe4f   : > { %15866 = vmatprep.subr.bf16.mxu1 %v20715_v17  ;;  %v20785_v17 = vld [vmem:[%s22390_s8 + $0xe88] ss:$16 sps:$4 sm:$0xff]  }
 0xe51   : > { %15824 = vmatpush1.bf16.msra.mxu0 %v20710_v40  ;;  %v20790_v40 = vld [vmem:[%s22390_s8 + $0xc6c] ss:$16 sps:$4 sm:$0xff]  }
 0xe52   : > { %15867 = vmatpush1.bf16.msra.mxu1 %v20713_v14  ;;  %15825 = vmatprep.subr.bf16.mxu0 %v20718_v51  ;;  %v20793_v14 = vld [vmem:[%s22390_s8 + $0xe6c] ss:$16 sps:$4 sm:$0xff]   ;;  %v20788_v51 = vld [vmem:[%s22390_s8 + $0xc68] ss:$16 sps:$4 sm:$0xff]  }
 0xe53   : > { %15868 = vmatprep.subr.bf16.mxu1 %v20721_v54  ;;  %v20791_v54 = vld [vmem:[%s22390_s8 + $0xe68] ss:$16 sps:$4 sm:$0xff]  }
 0xe55   : > { %15826 = vmatpush2.bf16.msra.mxu0 %v20716_v0  ;;  %v20796_v0 = vld [vmem:[%s22390_s8 + $0xc4c] ss:$16 sps:$4 sm:$0xff]  }
 0xe56   : > { %15869 = vmatpush2.bf16.msra.mxu1 %v20719_v32  ;;  %15827 = vmatprep.subr.bf16.mxu0 %v20724_v25  ;;  %v20799_v32 = vld [vmem:[%s22390_s8 + $0xe4c] ss:$16 sps:$4 sm:$0xff]   ;;  %v20794_v25 = vld [vmem:[%s22390_s8 + $0xc48] ss:$16 sps:$4 sm:$0xff]  }
 0xe57   : > { %15870 = vmatprep.subr.bf16.mxu1 %v20727_v34  ;;  %v20797_v34 = vld [vmem:[%s22390_s8 + $0xe48] ss:$16 sps:$4 sm:$0xff]  }
 0xe59   : > { %15828 = vmatpush2.bf16.msra.mxu0 %v20722_v19  ;;  %v20802_v19 = vld [vmem:[%s22390_s8 + $0xc2c] ss:$16 sps:$4 sm:$0xff]  }
 0xe5a   : > { %15871 = vmatpush2.bf16.msra.mxu1 %v20725_v13  ;;  %15829 = vmatprep.subr.bf16.mxu0 %v20730_v27  ;;  %v20805_v13 = vld [vmem:[%s22390_s8 + $0xe2c] ss:$16 sps:$4 sm:$0xff]   ;;  %v20800_v27 = vld [vmem:[%s22390_s8 + $0xc28] ss:$16 sps:$4 sm:$0xff]  }
 0xe5b   : > { %15872 = vmatprep.subr.bf16.mxu1 %v20733_v31  ;;  %v20803_v31 = vld [vmem:[%s22390_s8 + $0xe28] ss:$16 sps:$4 sm:$0xff]  }
 0xe5d   : > { %15830 = vmatpush2.bf16.msra.mxu0 %v20728_v49  ;;  %v20808_v49 = vld [vmem:[%s22390_s8 + $0xc0c] ss:$16 sps:$4 sm:$0xff]  }
 0xe5e   : > { %15873 = vmatpush2.bf16.msra.mxu1 %v20731_v39  ;;  %15831 = vmatprep.subr.bf16.mxu0 %v20736_v30  ;;  %v20811_v39 = vld [vmem:[%s22390_s8 + $0xe0c] ss:$16 sps:$4 sm:$0xff]   ;;  %v20806_v30 = vld [vmem:[%s22390_s8 + $0xc08] ss:$16 sps:$4 sm:$0xff]  }
 0xe5f   : > { %15874 = vmatprep.subr.bf16.mxu1 %v20739_v5  ;;  %v20809_v5 = vld [vmem:[%s22390_s8 + $0xe08] ss:$16 sps:$4 sm:$0xff]  }
 0xe61   : > { %15832 = vmatpush2.bf16.msra.mxu0 %v20734_v28  ;;  %v20814_v28 = vld [vmem:[%s22390_s8 + $0xdec] ss:$16 sps:$4 sm:$0xff]  }
 0xe62   : > { %15875 = vmatpush2.bf16.msra.mxu1 %v20737_v35  ;;  %15833 = vmatprep.subr.bf16.mxu0 %v20742_v57  ;;  %v20817_v35 = vld [vmem:[%s22390_s8 + $0xfec] ss:$16 sps:$4 sm:$0xff]   ;;  %v20812_v57 = vld [vmem:[%s22390_s8 + $0xde8] ss:$16 sps:$4 sm:$0xff]  }
 0xe63   : > { %15876 = vmatprep.subr.bf16.mxu1 %v20745_v4  ;;  %v20815_v4 = vld [vmem:[%s22390_s8 + $0xfe8] ss:$16 sps:$4 sm:$0xff]  }
 0xe65   : > { %15834 = vmatpush2.bf16.msra.mxu0 %v20740_v2  ;;  %v20820_v2 = vld [vmem:[%s22390_s8 + $0xdcc] ss:$16 sps:$4 sm:$0xff]  }
 0xe66   : > { %15877 = vmatpush2.bf16.msra.mxu1 %v20743_v63  ;;  %15835 = vmatprep.subr.bf16.mxu0 %v20748_v61  ;;  %v20823_v63 = vld [vmem:[%s22390_s8 + $0xfcc] ss:$16 sps:$4 sm:$0xff]   ;;  %v20818_v61 = vld [vmem:[%s22390_s8 + $0xdc8] ss:$16 sps:$4 sm:$0xff]  }
 0xe67   : > { %15878 = vmatprep.subr.bf16.mxu1 %v20751_v60  ;;  %v20821_v60 = vld [vmem:[%s22390_s8 + $0xfc8] ss:$16 sps:$4 sm:$0xff]  }
 0xe69   : > { %15836 = vmatpush2.bf16.msra.mxu0 %v20746_v20  ;;  %v20826_v20 = vld [vmem:[%s22390_s8 + $0xdac] ss:$16 sps:$4 sm:$0xff]  }
 0xe6a   : > { %15879 = vmatpush2.bf16.msra.mxu1 %v20749_v45  ;;  %15837 = vmatprep.subr.bf16.mxu0 %v20754_v62  ;;  %v20829_v45 = vld [vmem:[%s22390_s8 + $0xfac] ss:$16 sps:$4 sm:$0xff]   ;;  %v20824_v62 = vld [vmem:[%s22390_s8 + $0xda8] ss:$16 sps:$4 sm:$0xff]  }
 0xe6b   : > { %15880 = vmatprep.subr.bf16.mxu1 %v20757_v29  ;;  %v20827_v29 = vld [vmem:[%s22390_s8 + $0xfa8] ss:$16 sps:$4 sm:$0xff]  }
 0xe6d   : > { %15838 = vmatpush2.bf16.msra.mxu0 %v20752_v16  ;;  %v20832_v16 = vld [vmem:[%s22390_s8 + $0xd8c] ss:$16 sps:$4 sm:$0xff]  }
 0xe6e   : > { %15881 = vmatpush2.bf16.msra.mxu1 %v20755_v59  ;;  %15839 = vmatprep.subr.bf16.mxu0 %v20760_v15  ;;  %v20835_v59 = vld [vmem:[%s22390_s8 + $0xf8c] ss:$16 sps:$4 sm:$0xff]   ;;  %v20830_v15 = vld [vmem:[%s22390_s8 + $0xd88] ss:$16 sps:$4 sm:$0xff]  }
 0xe6f   : > { %15882 = vmatprep.subr.bf16.mxu1 %v20763_v9  ;;  %v20833_v9 = vld [vmem:[%s22390_s8 + $0xf88] ss:$16 sps:$4 sm:$0xff]  }
 0xe71   : > { %15840 = vmatpush2.bf16.msra.mxu0 %v20758_v36  ;;  %v20838_v36 = vld [vmem:[%s22390_s8 + $0xd6c] ss:$16 sps:$4 sm:$0xff]  }
 0xe72   : > { %15883 = vmatpush2.bf16.msra.mxu1 %v20761_v38  ;;  %15895 = vmatprep.subr.bf16.mxu0 %v20766_v43  ;;  %v20841_v38 = vld [vmem:[%s22390_s8 + $0xf6c] ss:$16 sps:$4 sm:$0xff]   ;;  %v20836_v43 = vld [vmem:[%s22390_s8 + $0xd68] ss:$16 sps:$4 sm:$0xff]  }
 0xe73   : > { %15938 = vmatprep.subr.bf16.mxu1 %v20769_v47  ;;  %v20839_v47 = vld [vmem:[%s22390_s8 + $0xf68] ss:$16 sps:$4 sm:$0xff]  }
 0xe74   : > { %15842 = vmatmul.mubr.bf16.vlgmr.msra.gmra.mxu0 %v24311_v26  ;;  %v20781_v26 = vld [vmem:[%s22390_s8 + $0xeac] ss:$16 sps:$4 sm:$0xff]  }
 0xe75   : > { %15885 = vmatmul.mubr.bf16.vlgmr.msra.gmra.mxu1 %v24407_v8  ;;  %15896 = vmatpush1.bf16.msra.mxu0 %v20764_v10  ;;  %v20776_v8 = vld [vmem:[%s22390_s8 + $0xca8] ss:$16 sps:$4 sm:$0xff]   ;;  %v20844_v10 = vld [vmem:[%s22390_s8 + $0xd4c] ss:$16 sps:$4 sm:$0xff]  }
 0xe76   : > { %15927 = vmatprep.mubr.bf16.mxu0 %v24558_v50  ;;  %15939 = vmatpush1.bf16.msra.mxu1 %v20767_v41  ;;  %v20784_v50 = vld [vmem:[%s22390_s8 + $0xc8c] ss:$16 sps:$4 sm:$0xff]  }
 0xe77   : > { %15970 = vmatprep.mubr.bf16.mxu1 %v24583_v12  ;;  %15897 = vmatprep.subr.bf16.mxu0 %v20772_v56  ;;  %v20782_v12 = vld [vmem:[%s22390_s8 + $0xc88] ss:$16 sps:$4 sm:$0xff]   ;;  %v20847_v41 = vld [vmem:[%s22390_s8 + $0xf4c] ss:$16 sps:$4 sm:$0xff]  }
 0xe78   : > { %15940 = vmatprep.subr.bf16.mxu1 %v20775_v46  ;;  %v20842_v56 = vld [vmem:[%s22390_s8 + $0xd48] ss:$16 sps:$4 sm:$0xff]  }
 0xe79   : > { %15898 = vmatpush1.bf16.msra.mxu0 %v20770_v7  ;;  %v20845_v46 = vld [vmem:[%s22390_s8 + $0xf48] ss:$16 sps:$4 sm:$0xff]   ;;  %v20850_v7 = vld [vmem:[%s22390_s8 + $0xd2c] ss:$16 sps:$4 sm:$0xff]  }
 0xe7a   : > { %15941 = vmatpush1.bf16.msra.mxu1 %v20773_v44  ;;  %15899 = vmatprep.subr.bf16.mxu0 %v20778_v48  ;;  %v20853_v44 = vld [vmem:[%s22390_s8 + $0xf2c] ss:$16 sps:$4 sm:$0xff]   ;;  %v20848_v48 = vld [vmem:[%s22390_s8 + $0xd28] ss:$16 sps:$4 sm:$0xff]  }
 0xe7b   : > { %15942 = vmatprep.subr.bf16.mxu1 %v20781_v26  ;;  %v20851_v26 = vld [vmem:[%s22390_s8 + $0xf28] ss:$16 sps:$4 sm:$0xff]  }
 0xe7d   : > { %15900 = vmatpush1.bf16.msra.mxu0 %v20776_v8  ;;  %v20856_v8 = vld [vmem:[%s22390_s8 + $0xd0c] ss:$16 sps:$4 sm:$0xff]  }
 0xe7e   : > { %15943 = vmatpush1.bf16.msra.mxu1 %v20779_v42  ;;  %15901 = vmatprep.subr.bf16.mxu0 %v20784_v50  ;;  %v20859_v42 = vld [vmem:[%s22390_s8 + $0xf0c] ss:$16 sps:$4 sm:$0xff]   ;;  %v20854_v50 = vld [vmem:[%s22390_s8 + $0xd08] ss:$16 sps:$4 sm:$0xff]  }
 0xe7f   : > { %15944 = vmatprep.subr.bf16.mxu1 %v20787_v6  ;;  %v20857_v6 = vld [vmem:[%s22390_s8 + $0xf08] ss:$16 sps:$4 sm:$0xff]  }
 0xe81   : > { %15902 = vmatpush1.bf16.msra.mxu0 %v20782_v12  ;;  %v15327_v12 = vpop.f32.mrf.mxu0 }
 0xe82   : > { %15945 = vmatpush1.bf16.msra.mxu1 %v20785_v17  ;;  %15903 = vmatprep.subr.bf16.mxu0 %v20790_v40  ;;  %v15370_v17 = vpop.f32.mrf.mxu1 }
 0xe83   : > { %15946 = vmatprep.subr.bf16.mxu1 %v20793_v14  ;;  %v15329_v40 = vpop.f32.mrf.mxu0 }
 0xe84   : > { %v15372_v14 = vpop.f32.mrf.mxu1 }
 0xe85   : > { %15904 = vmatpush1.bf16.msra.mxu0 %v20788_v51  ;;  %v15331_v51 = vpop.f32.mrf.mxu0 }
 0xe86   : > { %15947 = vmatpush1.bf16.msra.mxu1 %v20791_v54  ;;  %15905 = vmatprep.subr.bf16.mxu0 %v20796_v0  ;;  %v15374_v54 = vpop.f32.mrf.mxu1 }
 0xe87   : > { %15948 = vmatprep.subr.bf16.mxu1 %v20799_v32  ;;  %v15333_v0 = vpop.f32.mrf.mxu0 }
 0xe88   : > { %v15376_v32 = vpop.f32.mrf.mxu1 }
 0xe89   : > { %15906 = vmatpush1.bf16.msra.mxu0 %v20794_v25  ;;  %v15413_v25 = vpop.f32.mrf.mxu0 }
 0xe8a   : > { %15949 = vmatpush1.bf16.msra.mxu1 %v20797_v34  ;;  %15907 = vmatprep.subr.bf16.mxu0 %v20802_v19  ;;  %v15456_v34 = vpop.f32.mrf.mxu1 }
 0xe8b   : > { %15950 = vmatprep.subr.bf16.mxu1 %v20805_v13  ;;  %v15415_v19 = vpop.f32.mrf.mxu0 }
 0xe8c   : > { %v15458_v13 = vpop.f32.mrf.mxu1 }
 0xe8d   : > { %15908 = vmatpush1.bf16.msra.mxu0 %v20800_v27  ;;  %v15417_v27 = vpop.f32.mrf.mxu0 }
 0xe8e   : > { %15951 = vmatpush1.bf16.msra.mxu1 %v20803_v31  ;;  %15909 = vmatprep.subr.bf16.mxu0 %v20808_v49  ;;  %v24914_v31 = vpop.f32.mrf.mxu1 }
 0xe8f   : > { %15952 = vmatprep.subr.bf16.mxu1 %v20811_v39  ;;  %v15419_v49 = vpop.f32.mrf.mxu0 }
 0xe90   : > { %v15462_v39 = vpop.f32.mrf.mxu1 }
 0xe91   : > { %15910 = vmatpush1.bf16.msra.mxu0 %v20806_v30 }
 0xe92   : > { %15953 = vmatpush1.bf16.msra.mxu1 %v20809_v5  ;;  %15911 = vmatprep.subr.bf16.mxu0 %v20814_v28  ;;  %v24916_v30 = vpop.f32.mrf.mxu1 }
 0xe93   : > { %15954 = vmatprep.subr.bf16.mxu1 %v20817_v35 }
 0xe94   : > { %v15544_v5 = vpop.f32.mrf.mxu1 }
 0xe95   : > { %15912 = vmatpush2.bf16.msra.mxu0 %v20812_v57 }
 0xe96   : > { %15955 = vmatpush2.bf16.msra.mxu1 %v20815_v4  ;;  %15913 = vmatprep.subr.bf16.mxu0 %v20820_v2  ;;  %v24920_v35 = vpop.f32.mrf.mxu1 }
 0xe97   : > { %15956 = vmatprep.subr.bf16.mxu1 %v20823_v63 }
 0xe98   : > { %v24922_v4 = vpop.f32.mrf.mxu1 }
 0xe99   : > { %15914 = vmatpush2.bf16.msra.mxu0 %v20818_v61 }
 0xe9a   : > { %15957 = vmatpush2.bf16.msra.mxu1 %v20821_v60  ;;  %15915 = vmatprep.subr.bf16.mxu0 %v20826_v20  ;;  %v24926_v63 = vpop.f32.mrf.mxu1 }
 0xe9b   : > { %15958 = vmatprep.subr.bf16.mxu1 %v20829_v45 }
 0xe9c   : > { %v24928_v60 = vpop.f32.mrf.mxu1 }
 0xe9d   : > { %15916 = vmatpush2.bf16.msra.mxu0 %v20824_v62 }
 0xe9e   : > { %15959 = vmatpush2.bf16.msra.mxu1 %v20827_v29  ;;  %15917 = vmatprep.subr.bf16.mxu0 %v20832_v16  ;;  %v24932_v45 = vpop.f32.mrf.mxu1 }
 0xe9f   : > { %15960 = vmatprep.subr.bf16.mxu1 %v20835_v59  ;;  %25277 = vst [vmem:[#allocation58_spill] sm:$0xff] %v24932_v45 }
 0xea0   : > { %v24936_v29 = vpop.f32.mrf.mxu1 }
 0xea1   : > { %15918 = vmatpush2.bf16.msra.mxu0 %v20830_v15  ;;  %25278 = vst [vmem:[#allocation59_spill] sm:$0xff] %v24936_v29 }
 0xea2   : > { %15961 = vmatpush2.bf16.msra.mxu1 %v20833_v9  ;;  %15919 = vmatprep.subr.bf16.mxu0 %v20838_v36 }
 0xea3   : > { %15962 = vmatprep.subr.bf16.mxu1 %v20841_v38 }
 0xea5   : > { %15920 = vmatpush2.bf16.msra.mxu0 %v20836_v43  ;;  %v12711_v43 = vld [vmem:[%s1115_s6] sm:$0xf] }
 0xea6   : > { %15963 = vmatpush2.bf16.msra.mxu1 %v20839_v47  ;;  %15921 = vmatprep.subr.bf16.mxu0 %v20844_v10  ;;  %v12720_v47 = vrot.slane %v12711_v43, %v22887_v24  ;;  %v12728_v24 = vrot.slane %v12711_v43, %v22935_v33 }
 0xea7   : > { %15964 = vmatprep.subr.bf16.mxu1 %v20847_v41 }
 0xea9   : > { %15922 = vmatpush2.bf16.msra.mxu0 %v20842_v56  ;;  %v12716_v56 = vrot.slane %v12711_v43, %v22860_v1 }
 0xeaa   : > { %15965 = vmatpush2.bf16.msra.mxu1 %v20845_v46  ;;  %15923 = vmatprep.subr.bf16.mxu0 %v20850_v7 }
 0xeab   : > { %15966 = vmatprep.subr.bf16.mxu1 %v20853_v44  ;;  %v15330_v44 = vadd.f32 %v15329_v40, %v12720_v47  ;;  %v15332_v3 = vadd.f32 %v15331_v51, %v12716_v56 }
 0xead   : > { %15924 = vmatpush2.bf16.msra.mxu0 %v20848_v48  ;;  %v15328_v48 = vadd.f32 %v15327_v12, %v12716_v56  ;;  %v15375_v23 = vadd.f32 %v15374_v54, %v15332_v3 }
 0xeae   : > { %15967 = vmatpush2.bf16.msra.mxu1 %v20851_v26  ;;  %15925 = vmatprep.subr.bf16.mxu0 %v20856_v8 }
 0xeaf   : > { %15968 = vmatprep.subr.bf16.mxu1 %v20859_v42  ;;  %v15373_v42 = vadd.f32 %v15372_v14, %v15330_v44  ;;  %v15371_v18 = vadd.f32 %v15370_v17, %v15328_v48 }
 0xeb1   : > { %15926 = vmatpush2.bf16.msra.mxu0 %v20854_v50  ;;  %v15334_v50 = vadd.f32 %v15333_v0, %v12720_v47  ;;  %v15416_v58 = vadd.f32 %v15415_v19, %v15373_v42  ;;  %v15414_v45 = vadd.f32 %v15413_v25, %v15371_v18  ;;  %v15418_v0 = vadd.f32 %v15417_v27, %v15375_v23 }
 0xeb2   : > { %15969 = vmatpush2.bf16.msra.mxu1 %v20857_v6  ;;  %v12724_v6 = vrot.slane %v12711_v43, %v22907_v21 }
 0xeb3   : > { %v15377_v53 = vadd.f32 %v15376_v32, %v15334_v50  ;;  %v15459_v29 = vadd.f32 %v15458_v13, %v15416_v58  ;;  %v15457_v14 = vadd.f32 %v15456_v34, %v15414_v45  ;;  %v15461_v18 = vadd.f32 %v24914_v31, %v15418_v0  ;;  %v25283_v50 = vld [vmem:[#allocation58_spill] sm:$0xff] }
 0xeb4   : > { %15928 = vmatmul.mubr.bf16.vlgmr.msra.gmra.mxu0 %v24497_v11  ;;  %v15499_v11 = vpop.f32.mrf.mxu0 }
 0xeb5   : > { %15971 = vmatmul.mubr.bf16.vlgmr.msra.gmra.mxu1 %v24642_v52  ;;  %v15714_v59 = vpop.f32.mrf.mxu1  ;;  %v15420_v40 = vadd.f32 %v15419_v49, %v15377_v53  ;;  %v15500_v48 = vadd.f32 %v15499_v11, %v15457_v14 }
 0xeb6   : > { %v15501_v52 = vpop.f32.mrf.mxu0 }
 0xeb7   : > { %v15716_v9 = vpop.f32.mrf.mxu1  ;;  %v15502_v47 = vadd.f32 %v15501_v52, %v15459_v29  ;;  %v15463_v56 = vadd.f32 %v15462_v39, %v15420_v40  ;;  %v15543_v23 = vadd.f32 %v24916_v30, %v15500_v48 }
 0xeb8   : > { %v24918_v28 = vpop.f32.mrf.mxu0 }
 0xeb9   : > { %v15718_v38 = vpop.f32.mrf.mxu1  ;;  %v15545_v3 = vadd.f32 %v15544_v5, %v15502_v47  ;;  %v15504_v34 = vadd.f32 %v24918_v28, %v15461_v18  ;;  %v25284_v47 = vld [vmem:[#allocation50_spill] sm:$0xff] }
 0xeba   : > { %v15505_v57 = vpop.f32.mrf.mxu0 }
 0xebb   : > { %v15720_v41 = vpop.f32.mrf.mxu1  ;;  %v15506_v58 = vadd.f32 %v15505_v57, %v15463_v56  ;;  %v15547_v45 = vadd.f32 %v24920_v35, %v15504_v34 }
 0xebc   : > { %v24924_v2 = vpop.f32.mrf.mxu0 }
 0xebe   : > { %v15587_v61 = vpop.f32.mrf.mxu0 }
 0xec0   : > { %v24930_v20 = vpop.f32.mrf.mxu0 }
 0xec1   : > { %25276 = vst [vmem:[#allocation57_spill] sm:$0xff] %v24930_v20 }
 0xec2   : > { %v24934_v62 = vpop.f32.mrf.mxu0 }
 0xec4   : > { %v15671_v16 = vpop.f32.mrf.mxu0 }
 0xec5   : > { %v15672_v1 = vadd.f32 %v15671_v16, %v12724_v6 }
 0xec6   : > { %v15673_v15 = vpop.f32.mrf.mxu0 }
 0xec7   : > { %v15674_v55 = vadd.f32 %v15673_v15, %v12728_v24  ;;  %v15715_v17 = vadd.f32 %v15714_v59, %v15672_v1  ;;  %v15588_v1 = vadd.f32 %v15587_v61, %v15545_v3 }
 0xec8   : > { %v15675_v36 = vpop.f32.mrf.mxu0 }
 0xec9   : > { %v15676_v51 = vadd.f32 %v15675_v36, %v12724_v6  ;;  %v15717_v43 = vadd.f32 %v15716_v9, %v15674_v55  ;;  %v15549_v55 = vadd.f32 %v24922_v4, %v15506_v58  ;;  %v15631_v29 = vadd.f32 %v24928_v60, %v15588_v1  ;;  %v25287_v58 = vld [vmem:[#allocation51_spill] sm:$0xff]  ;;  %v25288_v1 = vld [vmem:[#allocation56_spill] sm:$0xff] }
 0xeca   : > { %v15677_v10 = vpop.f32.mrf.mxu0 }
 0xecb   : > { %v15678_v42 = vadd.f32 %v15677_v10, %v12728_v24  ;;  %v15719_v54 = vadd.f32 %v15718_v38, %v15676_v51  ;;  %v15586_v24 = vadd.f32 %v24924_v2, %v15543_v23  ;;  %v15592_v30 = vadd.f32 %v24934_v62, %v15549_v55  ;;  %v25280_v38 = vld [vmem:[#allocation49_spill] sm:$0xff]  ;;  %v25289_v55 = vld [vmem:[#allocation52_spill] sm:$0xff] }
 0xecc   : > { %v15982_v10 = vadd.f32 %v15631_v29, %v25280_v38 }
 0xecd   : > { %v15721_v27 = vadd.f32 %v15720_v41, %v15678_v42  ;;  %v15629_v16 = vadd.f32 %v24926_v63, %v15586_v24  ;;  %v25281_v41 = vld [vmem:[#allocation59_spill] sm:$0xff] }
 0xef4   : > { %v15757_v46 = vpop.f32.mrf.mxu0 }
 0xef5   : > { %v15800_v7 = vpop.f32.mrf.mxu1  ;;  %v15758_v32 = vadd.f32 %v15757_v46, %v15715_v17  ;;  %v15635_v46 = vadd.f32 %v25281_v41, %v15592_v30 }
 0xef6   : > { %v15759_v26 = vpop.f32.mrf.mxu0 }
 0xef7   : > { %v15802_v8 = vpop.f32.mrf.mxu1  ;;  %v15760_v25 = vadd.f32 %v15759_v26, %v15717_v43  ;;  %v15801_v49 = vadd.f32 %v15800_v7, %v15758_v32  ;;  %v25286_v32 = vld [vmem:[#allocation54_spill] sm:$0xff] }
 0xef8   : > { %v15761_v22 = vpop.f32.mrf.mxu0 }
 0xef9   : > { %v15804_v37 = vpop.f32.mrf.mxu1  ;;  %v15762_v39 = vadd.f32 %v15761_v22, %v15719_v54  ;;  %v15803_v31 = vadd.f32 %v15802_v8, %v15760_v25  ;;  %v25279_v22 = vld [vmem:[#allocation57_spill] sm:$0xff] }
 0xefa   : > { %v15763_v12 = vpop.f32.mrf.mxu0  ;;  %v15590_v59 = vadd.f32 %v25279_v22, %v15547_v45 }
 0xefb   : > { %v15806_v20 = vpop.f32.mrf.mxu1  ;;  %v15764_v52 = vadd.f32 %v15763_v12, %v15721_v27  ;;  %v15805_v28 = vadd.f32 %v15804_v37, %v15762_v39  ;;  %v25282_v37 = vld [vmem:[#allocation53_spill] sm:$0xff] }
 0xefc   : > { %v15981_v8 = vadd.f32 %v15629_v16, %v25282_v37  ;;  %v15633_v63 = vadd.f32 %v25283_v50, %v15590_v59 }
 0xefd   : > { %v15807_v15 = vadd.f32 %v15806_v20, %v15764_v52 }
 0xefe   : > { %v15991_v0 = vadd.f32 %v15982_v10, %v15981_v8  ;;  %v15985_v18 = vadd.f32 %v15633_v63, %v25286_v32 }
 0xf34   : > { %v15843_v44 = vpop.f32.mrf.mxu0 }
 0xf35   : > { %v15886_v19 = vpop.f32.mrf.mxu1  ;;  %v15844_v5 = vadd.f32 %v15843_v44, %v15801_v49  ;;  %v15986_v44 = vadd.f32 %v15635_v46, %v25284_v47 }
 0xf36   : > { %v15845_v53 = vpop.f32.mrf.mxu0 }
 0xf37   : > { %v15888_v13 = vpop.f32.mrf.mxu1  ;;  %v15846_v61 = vadd.f32 %v15845_v53, %v15803_v31  ;;  %v15887_v2 = vadd.f32 %v15886_v19, %v15844_v5  ;;  %v25285_v19 = vld [vmem:[#allocation55_spill] sm:$0xff]  ;;  %v15996_v34 = vadd.f32 %v15986_v44, %v15985_v18 }
 0xf38   : > { %v15847_v11 = vpop.f32.mrf.mxu0 }
 0xf39   : > { %v15890_v57 = vpop.f32.mrf.mxu1  ;;  %v15848_v9 = vadd.f32 %v15847_v11, %v15805_v28  ;;  %v15889_v7 = vadd.f32 %v15888_v13, %v15846_v61 }
 0xf3a   : > { %v15849_v4 = vpop.f32.mrf.mxu0 }
 0xf3b   : > { %v15892_v36 = vpop.f32.mrf.mxu1  ;;  %v15850_v60 = vadd.f32 %v15849_v4, %v15807_v15  ;;  %v15891_v40 = vadd.f32 %v15890_v57, %v15848_v9 }
 0xf3d   : > { %v15893_v51 = vadd.f32 %v15892_v36, %v15850_v60 }
 0xf74   : > { %v15929_v35 = vpop.f32.mrf.mxu0 }
 0xf75   : > { %v15930_v26 = vadd.f32 %v15929_v35, %v15887_v2  ;;  %v15972_v62 = vpop.f32.mrf.mxu1 }
 0xf76   : > { %v15931_v6 = vpop.f32.mrf.mxu0 }
 0xf77   : > { %v15973_v12 = vadd.f32 %v15972_v62, %v15930_v26  ;;  %v15932_v20 = vadd.f32 %v15931_v6, %v15889_v7  ;;  %v15974_v14 = vpop.f32.mrf.mxu1 }
 0xf78   : > { %v15933_v17 = vpop.f32.mrf.mxu0 }
 0xf79   : > { %v15983_v56 = vadd.f32 %v15973_v12, %v25285_v19  ;;  %v15975_v48 = vadd.f32 %v15974_v14, %v15932_v20  ;;  %v15934_v43 = vadd.f32 %v15933_v17, %v15891_v40  ;;  %v15976_v42 = vpop.f32.mrf.mxu1  ;;  %v15989_v20 = vld [vmem:[%s1124_s29] sm:$0xf]  ;;  %v15990_v14 = vld [vmem:[%s1133_s27] sm:$0xf] }
 0xf7a   : > { %v15935_v3 = vpop.f32.mrf.mxu0  ;;  %v16059_v19 = vrot.slane %v15989_v20, %v22935_v33  ;;  %v16088_v32 = vrot.slane %v15990_v14, %v22935_v33 }
 0xf7b   : > { %v15984_v53 = vadd.f32 %v15975_v48, %v25287_v58  ;;  %v15977_v54 = vadd.f32 %v15976_v42, %v15934_v43  ;;  %v15936_v25 = vadd.f32 %v15935_v3, %v15893_v51  ;;  %v15992_v13 = vadd.f32 %v15991_v0, %v15983_v56  ;;  %v15978_v23 = vpop.f32.mrf.mxu1  ;;  %v25290_v0 = vld [vmem:[#allocation47_spill] sm:$0xff] }
 0xf7c   : > { %v16047_v47 = vrot.slane %v15989_v20, %v25290_v0  ;;  %v16055_v51 = vrot.slane %v15989_v20, %v22907_v21  ;;  %v16076_v48 = vrot.slane %v15990_v14, %v25290_v0  ;;  %v16084_v42 = vrot.slane %v15990_v14, %v22907_v21 }
 0xf7d   : > { %v15987_v27 = vadd.f32 %v15977_v54, %v25288_v1  ;;  %v15979_v49 = vadd.f32 %v15978_v23, %v15936_v25  ;;  %v15993_v39 = vadd.f32 %v15992_v13, %v15984_v53 }
 0xf7f   : > { %v15988_v24 = vadd.f32 %v15979_v49, %v25289_v55  ;;  %15994 = vadd.xlane.f32.xlu1 %v15993_v39  ;;  %v15997_v11 = vadd.f32 %v15996_v34, %v15987_v27 }
 0xf81   : > { %v15998_v31 = vadd.f32 %v15997_v11, %v15988_v24 }
 0xf83   : > { %15999 = vadd.xlane.f32.xlu0 %v15998_v31 }
0x1008   : > { %v15995_v52 = vpop.xlane.xlu1 %15994 }
0x1009   : > { %v16001_v5 = vmul.f32 0.001953125, %v15995_v52 }
0x100b   : > { %v16003_v57 = vsub.f32 %v15981_v8, %v16001_v5  ;;  %v16004_v45 = vsub.f32 %v15982_v10, %v16001_v5  ;;  %v16005_v29 = vsub.f32 %v15983_v56, %v16001_v5  ;;  %v16006_v28 = vsub.f32 %v15984_v53, %v16001_v5 }
0x100c   : > { %v16000_v30 = vpop.xlane.xlu0 %15999 }
0x100d   : > { %v16002_v61 = vmul.f32 0.001953125, %v16000_v30  ;;  %v16011_v16 = vmul.f32 %v16003_v57, %v16003_v57  ;;  %v16012_v22 = vmul.f32 %v16004_v45, %v16004_v45  ;;  %v16013_v59 = vmul.f32 %v16005_v29, %v16005_v29 }
0x100e   : > { %v16014_v36 = vmul.f32 %v16006_v28, %v16006_v28 }
0x100f   : > { %v16007_v4 = vsub.f32 %v15985_v18, %v16002_v61  ;;  %v16008_v15 = vsub.f32 %v15986_v44, %v16002_v61  ;;  %v16019_v2 = vadd.f32 %v16012_v22, %v16011_v16  ;;  %v16009_v9 = vsub.f32 %v15987_v27, %v16002_v61  ;;  %v25291_v44 = vld [vmem:[#allocation48_spill] sm:$0xff] }
0x1010   : > { %v16010_v41 = vsub.f32 %v15988_v24, %v16002_v61  ;;  %v16051_v17 = vrot.slane %v15989_v20, %v25291_v44  ;;  %v16080_v43 = vrot.slane %v15990_v14, %v25291_v44 }
0x1011   : > { %v16020_v38 = vadd.f32 %v16019_v2, %v16013_v59  ;;  %v16015_v46 = vmul.f32 %v16007_v4, %v16007_v4  ;;  %v16016_v35 = vmul.f32 %v16008_v15, %v16008_v15  ;;  %v16017_v60 = vmul.f32 %v16009_v9, %v16009_v9 }
0x1012   : > { %v16018_v26 = vmul.f32 %v16010_v41, %v16010_v41 }
0x1013   : > { %v16021_v7 = vadd.f32 %v16020_v38, %v16014_v36  ;;  %v16024_v10 = vadd.f32 %v16016_v35, %v16015_v46 }
0x1015   : > { %16022 = vadd.xlane.f32.xlu1 %v16021_v7  ;;  %v16025_v62 = vadd.f32 %v16024_v10, %v16017_v60 }
0x1017   : > { %v16026_v37 = vadd.f32 %v16025_v62, %v16018_v26 }
0x1019   : > { %16027 = vadd.xlane.f32.xlu0 %v16026_v37 }
0x109e   : > { %v16023_v8 = vpop.xlane.xlu1 %16022 }
0x109f   : > { %v16029_v50 = vmul.f32 0.001953125, %v16023_v8 }
0x10a1   : > { %v16031_v63 = vadd.f32 1e-05, %v16029_v50 }
0x10a2   : > { %v16028_v6 = vpop.xlane.xlu0 %16027 }
0x10a3   : > { %20928 = vrsqrt.f32 %v16031_v63  ;;  %v16030_v40 = vmul.f32 0.001953125, %v16028_v6 }
0x10a5   : > { %v16032_v12 = vadd.f32 1e-05, %v16030_v40 }
0x10a7   : > { %20930 = vrsqrt.f32 %v16032_v12 }
0x10b0   : > { %v20929_v56 = vpop.eup %20928 }
0x10b1   : > { %v16035_v18 = vmul.f32 %v20929_v56, %v16003_v57  ;;  %v16036_v3 = vmul.f32 %v20929_v56, %v16004_v45  ;;  %v16037_v58 = vmul.f32 %v20929_v56, %v16005_v29  ;;  %v16038_v53 = vmul.f32 %v20929_v56, %v16006_v28 }
0x10b3   : > { %v16064_v54 = vmul.f32 %v16047_v47, %v16035_v18  ;;  %v16065_v25 = vmul.f32 %v16051_v17, %v16036_v3  ;;  %v16066_v13 = vmul.f32 %v16055_v51, %v16037_v58  ;;  %v16067_v23 = vmul.f32 %v16059_v19, %v16038_v53 }
0x10b4   : > { %v20931_v34 = vpop.eup %20930 }
0x10b5   : > { %v24976_v1 = vadd.f32 %v16076_v48, %v16064_v54  ;;  %v16094_v27 = vadd.f32 %v16080_v43, %v16065_v25  ;;  %v24978_v49 = vadd.f32 %v16084_v42, %v16066_v13  ;;  %v16096_v39 = vadd.f32 %v16088_v32, %v16067_v23 }
0x10b6   : > { %v16039_v55 = vmul.f32 %v20931_v34, %v16007_v4  ;;  %v16040_v24 = vmul.f32 %v20931_v34, %v16008_v15  ;;  %v16041_v21 = vmul.f32 %v20931_v34, %v16009_v9  ;;  %v16042_v11 = vmul.f32 %v20931_v34, %v16010_v41 }
0x10b7   : > { %16101 = vst [vmem:[#allocation2 + $0x30] sm:$0xff] %v24976_v1  ;;  %16102 = vst [vmem:[#allocation2] sm:$0xff] %v16094_v27 }
0x10b8   : > { %16103 = vst [vmem:[#allocation2 + $0x18] sm:$0xff] %v24978_v49  ;;  %16104 = vst [vmem:[#allocation2 + $0x10] sm:$0xff] %v16096_v39  ;;  %v16068_v33 = vmul.f32 %v16047_v47, %v16039_v55  ;;  %v16069_v31 = vmul.f32 %v16051_v17, %v16040_v24  ;;  %v16070_v52 = vmul.f32 %v16055_v51, %v16041_v21 }
0x10b9   : > { %v16071_v5 = vmul.f32 %v16059_v19, %v16042_v11  ;;  %16112 = sbr.rel (%p18749_p2) target bundleno = 4937 (0x1349), region = 212 }
0x10ba   : > { %v24982_v57 = vadd.f32 %v16076_v48, %v16068_v33  ;;  %v16098_v45 = vadd.f32 %v16080_v43, %v16069_v31  ;;  %v24984_v29 = vadd.f32 %v16084_v42, %v16070_v52 }
0x10bb   : > { %v16100_v30 = vadd.f32 %v16088_v32, %v16071_v5 }
0x10bc   : > { %16105 = vst [vmem:[#allocation2 + $0x8] sm:$0xff] %v24982_v57  ;;  %16106 = vst [vmem:[#allocation2 + $0x20] sm:$0xff] %v16098_v45 }
0x10bd   : > { %16107 = vst [vmem:[#allocation2 + $0x28] sm:$0xff] %v24984_v29  ;;  %16108 = vst [vmem:[#allocation2 + $0x38] sm:$0xff] %v16100_v30 }
0x10be   : > { %v20942_v28 = vld [vmem:[#allocation26 + $0x74] ss:$8 sps:$4 sm:$0xff]   ;;  %v16114_v61 = vpack.c.bf16 %v16098_v45, %v16094_v27  ;;  %v16116_v16 = vpack.c.bf16 %v16100_v30, %v16096_v39  ;;  %v20946_v59 = vld [vmem:[#allocation26 + $0x70] ss:$8 sps:$4 sm:$0xff]   ;;  %v20948_v15 = vld [vmem:[#allocation26 + $0x64] ss:$8 sps:$4 sm:$0xff]  }
0x10bf   : > { %v20944_v22 = vld [vmem:[#allocation26 + $0x174] ss:$8 sps:$4 sm:$0xff]   ;;  %16513 = vmatprep.subr.bf16.mxu0 %v20942_v28  ;;  %v20947_v4 = vld [vmem:[#allocation26 + $0x170] ss:$8 sps:$4 sm:$0xff]   ;;  %v20950_v2 = vld [vmem:[#allocation26 + $0x164] ss:$8 sps:$4 sm:$0xff]  }
0x10c0   : > { %16545 = vmatprep.mubr.bf16.mxu0 %v16114_v61  ;;  %16556 = vmatprep.subr.bf16.mxu1 %v20944_v22  ;;  %v20952_v9 = vld [vmem:[#allocation26 + $0x60] ss:$8 sps:$4 sm:$0xff]   ;;  %v20954_v38 = vld [vmem:[#allocation26 + $0x54] ss:$8 sps:$4 sm:$0xff]   ;;  %v20958_v46 = vld [vmem:[#allocation26 + $0x50] ss:$8 sps:$4 sm:$0xff]  }
0x10c1   : > { %16588 = vmatprep.mubr.bf16.mxu1 %v16116_v16  ;;  %16514 = vmatpush1.bf16.msra.mxu0 %v20946_v59  ;;  %v20953_v36 = vld [vmem:[#allocation26 + $0x160] ss:$8 sps:$4 sm:$0xff]   ;;  %v20956_v41 = vld [vmem:[#allocation26 + $0x154] ss:$8 sps:$4 sm:$0xff]   ;;  %v20959_v35 = vld [vmem:[#allocation26 + $0x150] ss:$8 sps:$4 sm:$0xff]  }
0x10c2   : > { %16557 = vmatpush1.bf16.msra.mxu1 %v20947_v4  ;;  %16515 = vmatprep.subr.bf16.mxu0 %v20948_v15  ;;  %v20960_v7 = vld [vmem:[#allocation26 + $0x44] ss:$8 sps:$4 sm:$0xff]   ;;  %v20964_v10 = vld [vmem:[#allocation26 + $0x40] ss:$8 sps:$4 sm:$0xff]   ;;  %v20966_v62 = vld [vmem:[#allocation26 + $0x34] ss:$8 sps:$4 sm:$0xff]  }
0x10c3   : > { %16558 = vmatprep.subr.bf16.mxu1 %v20950_v2  ;;  %v20962_v60 = vld [vmem:[#allocation26 + $0x144] ss:$8 sps:$4 sm:$0xff]   ;;  %v20965_v26 = vld [vmem:[#allocation26 + $0x140] ss:$8 sps:$4 sm:$0xff]   ;;  %v20968_v37 = vld [vmem:[#allocation26 + $0x134] ss:$8 sps:$4 sm:$0xff]   ;;  %v16113_v2 = vpack.c.bf16 %v24982_v57, %v24976_v1 }
0x10c4   : > { %v20970_v8 = vld [vmem:[#allocation26 + $0x30] ss:$8 sps:$4 sm:$0xff]   ;;  %v20972_v63 = vld [vmem:[#allocation26 + $0x24] ss:$8 sps:$4 sm:$0xff]   ;;  %v20976_v40 = vld [vmem:[#allocation26 + $0x20] ss:$8 sps:$4 sm:$0xff]  }
0x10c5   : > { %16516 = vmatpush1.bf16.msra.mxu0 %v20952_v9  ;;  %v20971_v50 = vld [vmem:[#allocation26 + $0x130] ss:$8 sps:$4 sm:$0xff]   ;;  %v20974_v6 = vld [vmem:[#allocation26 + $0x124] ss:$8 sps:$4 sm:$0xff]   ;;  %v20977_v12 = vld [vmem:[#allocation26 + $0x120] ss:$8 sps:$4 sm:$0xff]   ;;  %v16115_v9 = vpack.c.bf16 %v24984_v29, %v24978_v49 }
0x10c6   : > { %16559 = vmatpush1.bf16.msra.mxu1 %v20953_v36  ;;  %16517 = vmatprep.subr.bf16.mxu0 %v20954_v38  ;;  %v20978_v20 = vld [vmem:[#allocation26 + $0x14] ss:$8 sps:$4 sm:$0xff]   ;;  %v20982_v0 = vld [vmem:[#allocation26 + $0x10] ss:$8 sps:$4 sm:$0xff]   ;;  %v20984_v44 = vld [vmem:[#allocation26 + $0x4] ss:$8 sps:$4 sm:$0xff]  }
0x10c7   : > { %16560 = vmatprep.subr.bf16.mxu1 %v20956_v41  ;;  %v20980_v14 = vld [vmem:[#allocation26 + $0x114] ss:$8 sps:$4 sm:$0xff]   ;;  %v20983_v47 = vld [vmem:[#allocation26 + $0x110] ss:$8 sps:$4 sm:$0xff]   ;;  %v20986_v17 = vld [vmem:[#allocation26 + $0x104] ss:$8 sps:$4 sm:$0xff]  }
0x10c8   : > { %v20988_v51 = vld [vmem:[#allocation26] ss:$8 sps:$4 sm:$0xff]   ;;  %v20990_v56 = vld [vmem:[#allocation26 + $0xf4] ss:$8 sps:$4 sm:$0xff]   ;;  %v20994_v43 = vld [vmem:[#allocation26 + $0xf0] ss:$8 sps:$4 sm:$0xff]  }
0x10c9   : > { %16518 = vmatpush1.bf16.msra.mxu0 %v20958_v46  ;;  %v20989_v19 = vld [vmem:[#allocation26 + $0x100] ss:$8 sps:$4 sm:$0xff]   ;;  %v20992_v48 = vld [vmem:[#allocation26 + $0x1f4] ss:$8 sps:$4 sm:$0xff]   ;;  %v20995_v42 = vld [vmem:[#allocation26 + $0x1f0] ss:$8 sps:$4 sm:$0xff]  }
0x10ca   : > { %16561 = vmatpush1.bf16.msra.mxu1 %v20959_v35  ;;  %16519 = vmatprep.subr.bf16.mxu0 %v20960_v7  ;;  %v20996_v32 = vld [vmem:[#allocation26 + $0xe4] ss:$8 sps:$4 sm:$0xff]   ;;  %v21000_v3 = vld [vmem:[#allocation26 + $0xe0] ss:$8 sps:$4 sm:$0xff]   ;;  %v21002_v53 = vld [vmem:[#allocation26 + $0xd4] ss:$8 sps:$4 sm:$0xff]  }
0x10cb   : > { %16562 = vmatprep.subr.bf16.mxu1 %v20962_v60  ;;  %v20998_v18 = vld [vmem:[#allocation26 + $0x1e4] ss:$8 sps:$4 sm:$0xff]   ;;  %v21001_v58 = vld [vmem:[#allocation26 + $0x1e0] ss:$8 sps:$4 sm:$0xff]   ;;  %v21004_v54 = vld [vmem:[#allocation26 + $0x1d4] ss:$8 sps:$4 sm:$0xff]  }
0x10cc   : > { %v21006_v25 = vld [vmem:[#allocation26 + $0xd0] ss:$8 sps:$4 sm:$0xff]   ;;  %v21008_v23 = vld [vmem:[#allocation26 + $0xc4] ss:$8 sps:$4 sm:$0xff]   ;;  %v21012_v27 = vld [vmem:[#allocation26 + $0xc0] ss:$8 sps:$4 sm:$0xff]  }
0x10cd   : > { %16520 = vmatpush1.bf16.msra.mxu0 %v20964_v10  ;;  %v21007_v13 = vld [vmem:[#allocation26 + $0x1d0] ss:$8 sps:$4 sm:$0xff]   ;;  %v21010_v34 = vld [vmem:[#allocation26 + $0x1c4] ss:$8 sps:$4 sm:$0xff]   ;;  %v21013_v39 = vld [vmem:[#allocation26 + $0x1c0] ss:$8 sps:$4 sm:$0xff]  }
0x10ce   : > { %16563 = vmatpush1.bf16.msra.mxu1 %v20965_v26  ;;  %16521 = vmatprep.subr.bf16.mxu0 %v20966_v62  ;;  %v21014_v55 = vld [vmem:[#allocation26 + $0xb4] ss:$8 sps:$4 sm:$0xff]   ;;  %v21018_v21 = vld [vmem:[#allocation26 + $0xb0] ss:$8 sps:$4 sm:$0xff]   ;;  %v21020_v33 = vld [vmem:[#allocation26 + $0xa4] ss:$8 sps:$4 sm:$0xff]  }
0x10cf   : > { %16564 = vmatprep.subr.bf16.mxu1 %v20968_v37  ;;  %v21016_v24 = vld [vmem:[#allocation26 + $0x1b4] ss:$8 sps:$4 sm:$0xff]   ;;  %v21019_v11 = vld [vmem:[#allocation26 + $0x1b0] ss:$8 sps:$4 sm:$0xff]   ;;  %v21022_v31 = vld [vmem:[#allocation26 + $0x1a4] ss:$8 sps:$4 sm:$0xff]  }
0x10d0   : > { %v21024_v52 = vld [vmem:[#allocation26 + $0xa0] ss:$8 sps:$4 sm:$0xff]   ;;  %v21026_v45 = vld [vmem:[#allocation26 + $0x94] ss:$8 sps:$4 sm:$0xff]   ;;  %v21030_v28 = vld [vmem:[#allocation26 + $0x90] ss:$8 sps:$4 sm:$0xff]  }
0x10d1   : > { %16522 = vmatpush1.bf16.msra.mxu0 %v20970_v8  ;;  %v21025_v5 = vld [vmem:[#allocation26 + $0x1a0] ss:$8 sps:$4 sm:$0xff]   ;;  %v21028_v30 = vld [vmem:[#allocation26 + $0x194] ss:$8 sps:$4 sm:$0xff]   ;;  %v21031_v61 = vld [vmem:[#allocation26 + $0x190] ss:$8 sps:$4 sm:$0xff]  }
0x10d2   : > { %16565 = vmatpush1.bf16.msra.mxu1 %v20971_v50  ;;  %16523 = vmatprep.subr.bf16.mxu0 %v20972_v63  ;;  %v21032_v16 = vld [vmem:[#allocation26 + $0x84] ss:$8 sps:$4 sm:$0xff]   ;;  %v21036_v59 = vld [vmem:[#allocation26 + $0x80] ss:$8 sps:$4 sm:$0xff]   ;;  %v16634_v15 = vld [vmem:[%s25293_s22 + $0xf8] sm:$0xff]  ;;  %vm16721_vm5 = vcmask 130048  }
0x10d3   : > { %16566 = vmatprep.subr.bf16.mxu1 %v20974_v6  ;;  %v21034_v22 = vld [vmem:[#allocation26 + $0x184] ss:$8 sps:$4 sm:$0xff]   ;;  %v21037_v4 = vld [vmem:[#allocation26 + $0x180] ss:$8 sps:$4 sm:$0xff]   ;;  %v16618_v36 = vld [vmem:[%s25293_s22 + $0x78] sm:$0xff]  ;;  %vm16739_vm6 = vcmask 7168  }
0x10d4   : > { %v16633_v38 = vld [vmem:[%s25293_s22 + $0xf0] sm:$0xff]  ;;  %v16632_v49 = vld [vmem:[%s25293_s22 + $0xe8] sm:$0xff]  ;;  %v16631_v29 = vld [vmem:[%s25293_s22 + $0xe0] sm:$0xff] }
0x10d5   : > { %16524 = vmatpush1.bf16.msra.mxu0 %v20976_v40  ;;  %v16617_v1 = vld [vmem:[%s25293_s22 + $0x70] sm:$0xff]  ;;  %v16616_v57 = vld [vmem:[%s25293_s22 + $0x68] sm:$0xff]  ;;  %v16615_v41 = vld [vmem:[%s25293_s22 + $0x60] sm:$0xff] }
0x10d6   : > { %16567 = vmatpush1.bf16.msra.mxu1 %v20977_v12  ;;  %16525 = vmatprep.subr.bf16.mxu0 %v20978_v20  ;;  %v16630_v46 = vld [vmem:[%s25293_s22 + $0xd8] sm:$0xff]  ;;  %v16629_v7 = vld [vmem:[%s25293_s22 + $0xd0] sm:$0xff]  ;;  %v16628_v10 = vld [vmem:[%s25293_s22 + $0xc8] sm:$0xff] }
0x10d7   : > { %16568 = vmatprep.subr.bf16.mxu1 %v20980_v14  ;;  %v16614_v35 = vld [vmem:[%s25293_s22 + $0x58] sm:$0xff]  ;;  %v16613_v60 = vld [vmem:[%s25293_s22 + $0x50] sm:$0xff]  ;;  %v16612_v26 = vld [vmem:[%s25293_s22 + $0x48] sm:$0xff] }
0x10d8   : > { %v16627_v62 = vld [vmem:[%s25293_s22 + $0xc0] sm:$0xff]  ;;  %v16626_v8 = vld [vmem:[%s25293_s22 + $0xb8] sm:$0xff]  ;;  %v16625_v63 = vld [vmem:[%s25293_s22 + $0xb0] sm:$0xff] }
0x10d9   : > { %16526 = vmatpush1.bf16.msra.mxu0 %v20982_v0  ;;  %v16611_v37 = vld [vmem:[%s25293_s22 + $0x40] sm:$0xff]  ;;  %v16610_v50 = vld [vmem:[%s25293_s22 + $0x38] sm:$0xff]  ;;  %v16609_v6 = vld [vmem:[%s25293_s22 + $0x30] sm:$0xff] }
0x10da   : > { %16569 = vmatpush1.bf16.msra.mxu1 %v20983_v47  ;;  %16527 = vmatprep.subr.bf16.mxu0 %v20984_v44  ;;  %v16624_v40 = vld [vmem:[%s25293_s22 + $0xa8] sm:$0xff]  ;;  %v16623_v20 = vld [vmem:[%s25293_s22 + $0xa0] sm:$0xff]  ;;  %v16622_v0 = vld [vmem:[%s25293_s22 + $0x98] sm:$0xff] }
0x10db   : > { %16570 = vmatprep.subr.bf16.mxu1 %v20986_v17  ;;  %v16608_v12 = vld [vmem:[%s25293_s22 + $0x28] sm:$0xff]  ;;  %v16607_v14 = vld [vmem:[%s25293_s22 + $0x20] sm:$0xff]  ;;  %v16606_v47 = vld [vmem:[%s25293_s22 + $0x18] sm:$0xff] }
0x10dc   : > { %v16621_v44 = vld [vmem:[%s25293_s22 + $0x90] sm:$0xff] }
0x10dd   : > { %16528 = vmatpush1.bf16.msra.mxu0 %v20988_v51  ;;  %v16605_v17 = vld [vmem:[%s25293_s22 + $0x10] sm:$0xff]  ;;  %v16620_v51 = vld [vmem:[%s25293_s22 + $0x88] sm:$0xff] }
0x10de   : > { %16571 = vmatpush1.bf16.msra.mxu1 %v20989_v19  ;;  %16529 = vmatprep.subr.bf16.mxu0 %v20990_v56  ;;  %v16604_v19 = vld [vmem:[%s25293_s22 + $0x8] sm:$0xff]  ;;  %v16619_v56 = vld [vmem:[%s25293_s22 + $0x80] sm:$0xff] }
0x10df   : > { %16572 = vmatprep.subr.bf16.mxu1 %v20992_v48  ;;  %v16603_v48 = vld [vmem:[%s25293_s22] sm:$0xff] }
0x10e1   : > { %16530 = vmatpush2.bf16.msra.mxu0 %v20994_v43  ;;  %v16181_v43 = vld [vmem:[#allocation27] sm:$0x3] }
0x10e2   : > { %16573 = vmatpush2.bf16.msra.mxu1 %v20995_v42  ;;  %16531 = vmatprep.subr.bf16.mxu0 %v20996_v32  ;;  %v25294_v42 = vld [vmem:[#allocation47_spill] sm:$0xff] }
0x10e3   : > { %16574 = vmatprep.subr.bf16.mxu1 %v20998_v18  ;;  %v16186_v32 = vrot.slane %v16181_v43, %v25294_v42 }
0x10e5   : > { %16532 = vmatpush2.bf16.msra.mxu0 %v21000_v3 }
0x10e6   : > { %16575 = vmatpush2.bf16.msra.mxu1 %v21001_v58  ;;  %16533 = vmatprep.subr.bf16.mxu0 %v21002_v53  ;;  %v25295_v58 = vld [vmem:[#allocation48_spill] sm:$0xff] }
0x10e7   : > { %16576 = vmatprep.subr.bf16.mxu1 %v21004_v54  ;;  %v16190_v53 = vrot.slane %v16181_v43, %v25295_v58 }
0x10e9   : > { %16534 = vmatpush2.bf16.msra.mxu0 %v21006_v25 }
0x10ea   : > { %16577 = vmatpush2.bf16.msra.mxu1 %v21007_v13  ;;  %16535 = vmatprep.subr.bf16.mxu0 %v21008_v23 }
0x10eb   : > { %16578 = vmatprep.subr.bf16.mxu1 %v21010_v34 }
0x10ed   : > { %16536 = vmatpush2.bf16.msra.mxu0 %v21012_v27 }
0x10ee   : > { %16579 = vmatpush2.bf16.msra.mxu1 %v21013_v39  ;;  %16537 = vmatprep.subr.bf16.mxu0 %v21014_v55 }
0x10ef   : > { %16580 = vmatprep.subr.bf16.mxu1 %v21016_v24 }
0x10f1   : > { %16538 = vmatpush2.bf16.msra.mxu0 %v21018_v21 }
0x10f2   : > { %16581 = vmatpush2.bf16.msra.mxu1 %v21019_v11  ;;  %16539 = vmatprep.subr.bf16.mxu0 %v21020_v33 }
0x10f3   : > { %16582 = vmatprep.subr.bf16.mxu1 %v21022_v31 }
0x10f5   : > { %16540 = vmatpush2.bf16.msra.mxu0 %v21024_v52 }
0x10f6   : > { %16583 = vmatpush2.bf16.msra.mxu1 %v21025_v5  ;;  %16541 = vmatprep.subr.bf16.mxu0 %v21026_v45 }
0x10f7   : > { %16584 = vmatprep.subr.bf16.mxu1 %v21028_v30 }
0x10f9   : > { %16542 = vmatpush2.bf16.msra.mxu0 %v21030_v28 }
0x10fa   : > { %16585 = vmatpush2.bf16.msra.mxu1 %v21031_v61  ;;  %16543 = vmatprep.subr.bf16.mxu0 %v21032_v16  ;;  %v18814_v16 = vld [vmem:[#allocation28] ss:$0 sm:$0xff] }
0x10fb   : > { %16586 = vmatprep.subr.bf16.mxu1 %v21034_v22 }
0x10fd   : > { %16544 = vmatpush2.bf16.msra.mxu0 %v21036_v59 }
0x10fe   : > { %16587 = vmatpush2.bf16.msra.mxu1 %v21037_v4  ;;  %18894 = vmatprep.subr.mxu0 %v16634_v15  ;;  %v18815_v15 = vld [vmem:[#allocation29] ss:$0 sm:$0xff] }
0x1100   : > { %16546 = vmatmul.mubr.bf16.vlgmr.msra.gmra.mxu0 %v16113_v2 }
0x1101   : > { %16589 = vmatmul.mubr.bf16.vlgmr.msra.gmra.mxu1 %v16115_v9  ;;  %18895 = vmatpush3.msra.mxu0 %v16618_v36 }
0x1102   : > { %18896 = vmatprep.subr.mxu0 %v16633_v38  ;;  %v18816_v38 = vld [vmem:[#allocation3] ss:$0 sm:$0xff] }
0x1103   : > { %18897 = vmatpush3.msra.mxu0 %v16617_v1 }
0x1104   : > { %18898 = vmatprep.subr.mxu0 %v16632_v49 }
0x1105   : > { %18899 = vmatpush3.msra.mxu0 %v16616_v57 }
0x1106   : > { %18900 = vmatprep.subr.mxu0 %v16631_v29 }
0x1107   : > { %18901 = vmatpush3.msra.mxu0 %v16615_v41 }
0x1108   : > { %18902 = vmatprep.subr.mxu0 %v16630_v46 }
0x1109   : > { %18903 = vmatpush3.msra.mxu0 %v16614_v35 }
0x110a   : > { %18904 = vmatprep.subr.mxu0 %v16629_v7 }
0x110b   : > { %18905 = vmatpush3.msra.mxu0 %v16613_v60 }
0x110c   : > { %18906 = vmatprep.subr.mxu0 %v16628_v10 }
0x110d   : > { %18907 = vmatpush3.msra.mxu0 %v16612_v26 }
0x110e   : > { %18908 = vmatprep.subr.mxu0 %v16627_v62 }
0x110f   : > { %18909 = vmatpush3.msra.mxu0 %v16611_v37 }
0x1110   : > { %18910 = vmatprep.subr.mxu0 %v16626_v8 }
0x1111   : > { %18911 = vmatpush3.msra.mxu0 %v16610_v50 }
0x1112   : > { %18912 = vmatprep.subr.mxu0 %v16625_v63 }
0x1113   : > { %18913 = vmatpush3.msra.mxu0 %v16609_v6 }
0x1114   : > { %18914 = vmatprep.subr.mxu0 %v16624_v40 }
0x1115   : > { %18915 = vmatpush3.msra.mxu0 %v16608_v12 }
0x1116   : > { %18916 = vmatprep.subr.mxu0 %v16623_v20 }
0x1117   : > { %18917 = vmatpush3.msra.mxu0 %v16607_v14 }
0x1118   : > { %18918 = vmatprep.subr.mxu0 %v16622_v0 }
0x1119   : > { %18919 = vmatpush3.msra.mxu0 %v16606_v47 }
0x111a   : > { %18920 = vmatprep.subr.mxu0 %v16621_v44 }
0x111b   : > { %18921 = vmatpush3.msra.mxu0 %v16605_v17 }
0x111c   : > { %18922 = vmatprep.subr.mxu0 %v16620_v51 }
0x111d   : > { %18923 = vmatpush3.msra.mxu0 %v16604_v19 }
0x111e   : > { %18924 = vmatprep.subr.mxu0 %v16619_v56 }
0x111f   : > { %18925 = vmatpush3.msra.mxu0 %v16603_v48 }
0x11c0   : > { %v16547_v18 = vpop.f32.mrf.mxu0 }
0x11c1   : > { %v16590_v3 = vpop.f32.mrf.mxu1  ;;  %v16548_v13 = vadd.f32 %v16547_v18, %v16186_v32 }
0x11c2   : > { %v16549_v54 = vpop.f32.mrf.mxu0 }
0x11c3   : > { %v16592_v25 = vpop.f32.mrf.mxu1  ;;  %v16550_v27 = vadd.f32 %v16549_v54, %v16190_v53  ;;  %v16591_v11 = vadd.f32 %v16590_v3, %v16548_v13 }
0x11c4   : > { %v16551_v23 = vpop.f32.mrf.mxu0 }
0x11c5   : > { %v16594_v34 = vpop.f32.mrf.mxu1  ;;  %v16552_v39 = vadd.f32 %v16551_v23, %v16186_v32  ;;  %v16593_v31 = vadd.f32 %v16592_v25, %v16550_v27 }
0x11c6   : > { %v16553_v55 = vpop.f32.mrf.mxu0 }
0x11c7   : > { %v16595_v24 = vadd.f32 %v16594_v34, %v16552_v39  ;;  %v16554_v21 = vadd.f32 %v16553_v55, %v16190_v53  ;;  %v16596_v33 = vpop.f32.mrf.mxu1 }
0x11c9   : > { %v16597_v52 = vadd.f32 %v16596_v33, %v16554_v21  ;;  %v16599_v5 = vsub.f32 %v16591_v11, %v16595_v24 }
0x11cb   : > { %v16600_v45 = vsub.f32 %v16593_v31, %v16597_v52  ;;  %v16601_v28 = vand.u32 2147483647, %v16599_v5 }
0x11cd   : > { %v16602_v30 = vand.u32 2147483647, %v16600_v45 }
0x11cf   : > { %16706 = vmatprep.mubr.f32.mxu0 %v16602_v30 }
0x11d0   : > { %16707 = vmatmul.mubr.f32.vlgmr.msra.gmra.mxu0 %v16601_v28 }
0x1290   : > { %v18926_v61 = vpop.f32.mrf.mxu0 }
0x1292   : > { %v18927_v22 = vpop.f32.mrf.mxu0 }
0x1293   : > { %v18928_v59 = vadd.f32 %v18927_v22, %v18926_v61 }
0x1295   : > { %v16709_v4 = vadd.f32 %v18928_v59, %v18814_v16 }
0x1297   : > { %v16712_v2 = vmax.f32 %v16709_v4, 0.0 }
0x1299   : > { %v16720_v9 = vmul.f32 %v18815_v15, %v16712_v2 }
0x129b   : > { %v16722_v36 = vsel %vm16721_vm5, %v16720_v9, 0.0 }
0x129c   : > { %16723 = vadd.xlane.f32.xlu0 %v16722_v36 }
0x1325   : > { %v16724_v1 = vpop.xlane.xlu0 %16723 }
0x1326   : > { %v16732_v49 = vadd.f32 %v18816_v38, %v16724_v1 }
0x1328   : > { %v18817_v57 = vmul.f32 -1.442695, %v16732_v49 }
0x132a   : > { %21038 = vpow2.f32 %v18817_v57 }
0x1337   : > { %v21039_v29 = vpop.eup %21038 }
0x1338   : > { %v16736_v41 = vadd.f32 1.0, %v21039_v29 }
0x133a   : > { %21040 = vrcp.f32 %v16736_v41 }
0x1347   : > { %v21041_v46 = vpop.eup %21040 }
0x1348   : > { %16740 = vst.msk [vmem:[%s25296_s2] sm:$0xff] %vm16739_vm6, %v21041_v46 }
0x1349 PF: > { %s25297_s2 = sld [smem:[#allocation44_spill]] }
0x134a   : > { %s25298_s27 = sld [smem:[#allocation40_spill]] }
0x134b   : > { %s25299_s28 = sld [smem:[#allocation41_spill]] }
0x134c   : > { %s25300_s6 = sld [smem:[#allocation45_spill]] }
0x134f   : > { %p38_p11 = scmp.ge.s32.totalorder %s25297_s2, 5  }
0x1351   :  { %40 = sbr.rel (!%p38_p11) target bundleno = 26 (0x1a), region = 320 }
0x1356   :  { %16752 = vsyncpa [#allocation5], 1 }
0x1357   :  { %16754 = vsyncpa [#allocation5 + $0x1], 1 }
0x1358   :  { %16755 = vsyncpa [#allocation7], 1 }
0x1359   :  { %16756 = vsyncpa [#allocation10], 1 }
0x135a   :  { %16757 = vsyncpa [#allocation13], 1 }
0x135b   :  { %16758 = vsyncpa [#allocation30], 1 }

</bundles_post_ra>
